<compile_context>
chip_gen: v6e
topology: v6e:2x2x1
jax: 0.10.0
libtpu: 0.0.40
codegen_flags: <defaults>
</compile_context>

<pallas_src>
import functools

import jax
import jax.numpy as jnp
from jax.experimental import pallas as pl
from jax.experimental.pallas import tpu as pltpu

jax.config.update("jax_default_matmul_precision", "highest")

# ------------------------- configuration (module-consistent, small) ---------
N_NODES = 8        # nasbench201 graph nodes
NFEAT = 8          # node feature dim
GCN_H = 32         # gcn_layer_size
NN_EMB = 16        # nn_emb_dim
HW_EMB = 16        # hw_emb_dim
FEAT_H = 32        # feat_layer_size
FEAT_DEPTH = 5
NUM_DEVICES = 10   # len(train_device_list.split(','))

TB = 16            # graphs per grid step -> M = TB*N_NODES = 128 MXU rows
B = 32             # total graphs per call (multiple of TB)
TN = TB * N_NODES  # 128
SLAB_LANES = 32

assert GCN_H == SLAB_LANES == FEAT_H
assert NN_EMB + HW_EMB == GCN_H
assert B % TB == 0


# ------------------------------- Pallas kernel ------------------------------
def _predictor_kernel(feat_ref,       # VMEM (TN, NFEAT)   node features (TB graphs)
                      adj_ref,        # VMEM (TN, TN)      block-diag adjacency tile
                      adj_last_ref,   # VMEM (TB, TN)      last-node adjacency rows
                      dev_ref,        # VMEM (TB, FEAT_H)  dev_emb @ fw0_dev, gathered
                      slab_ref,       # VMEM (rows, 32)    packed params (resident)
                      out_ref,        # VMEM (TB, FEAT_H)  sigmoid(z); lane 0 is real
                      *, layout):
    def W(name, rows):                # static, 8-aligned row slice of the slab
        o = layout[name]
        return slab_ref[o:o + rows, :]

    def bias(name):
        o = layout[name]
        return slab_ref[o:o + 1, :]

    x = feat_ref[...]                 # (TN, NFEAT)
    A = adj_ref[...]                  # (TN, TN)

    # ---- GCN layers 1..3: relu(A @ (x @ W) + b), each a clean 2D MXU dot ----
    # (the transpose(2,1)/transpose(1,2) pairs in the PyTorch forward cancel)
    for wn, bn, din in (("gw1", "gb1", NFEAT),
                        ("gw2", "gb2", GCN_H),
                        ("gw3", "gb3", GCN_H)):
        sup = jnp.dot(x, W(wn, din), preferred_element_type=jnp.float32)   # (TN, H)
        x = jnp.maximum(
            jnp.dot(A, sup, preferred_element_type=jnp.float32) + bias(bn), 0.0)

    # ---- GCN layer 4: only each graph's last node is consumed downstream ----
    sup4 = jnp.dot(x, W("gw4", GCN_H), preferred_element_type=jnp.float32)  # (TN, H)
    g = jnp.maximum(
        jnp.dot(adj_last_ref[...], sup4, preferred_element_type=jnp.float32)
        + bias("gb4"), 0.0)                                                 # (TB, H)

    # ---- fc3 / fc4 (+ReLU) ---------------------------------------------------
    g = jnp.maximum(jnp.dot(g, W("w3", GCN_H),
                            preferred_element_type=jnp.float32) + bias("b3"), 0.0)
    g = jnp.maximum(jnp.dot(g, W("w4", GCN_H),
                            preferred_element_type=jnp.float32) + bias("b4"), 0.0)

    # ---- fused fc5 + feat_int_net layer 0 (device branch pre-projected) -----
    # h0 = relu(g @ (w5 @ fw0_g) + dev_emb @ fw0_d + (b5 @ fw0_g + fb0))
    h = jnp.maximum(
        jnp.dot(g, W("w05", GCN_H), preferred_element_type=jnp.float32)
        + dev_ref[...] + bias("b05"), 0.0)

    # ---- feat_int_net layers 1..3 (+ReLU), layer 4 (no ReLU) ----------------
    for wn, bn in (("fw1", "fb1"), ("fw2", "fb2"), ("fw3", "fb3")):
        h = jnp.maximum(jnp.dot(h, W(wn, FEAT_H),
                                preferred_element_type=jnp.float32) + bias(bn), 0.0)
    z = jnp.dot(h, W("fw4", FEAT_H),
                preferred_element_type=jnp.float32) + bias("fb4")           # (TB, 32)

    # ---- numerically stable sigmoid over the lane-dense tile -----------------
    e = jnp.exp(-jnp.abs(z))
    r = pl.reciprocal(1.0 + e, approx=False)
    out_ref[...] = jnp.where(z >= 0.0, r, 1.0 - r)


# ------------------------------- param packing -------------------------------
def pack_params(p):
    """Fold fc5 and the device-embedding projection host-side; pack one slab."""
    fw0_g = p["fw0"][:NN_EMB]                 # (NN_EMB, FEAT_H)
    fw0_d = p["fw0"][NN_EMB:]                 # (HW_EMB, FEAT_H)
    w05 = p["w5"] @ fw0_g                     # (GCN_H, FEAT_H)
    b05 = p["b5"] @ fw0_g + p["fb0"]          # (1, FEAT_H)
    emb_proj = p["dev_emb"] @ fw0_d           # (NUM_DEVICES, FEAT_H)

    def pad(a, rows):
        r, c = a.shape
        out = jnp.zeros((rows, SLAB_LANES), jnp.float32)
        return out.at[:r, :c].set(a.astype(jnp.float32))

    entries = [                               # (name, array, padded row count)
        ("gw1", p["gw1"], NFEAT),
        ("gw2", p["gw2"], GCN_H), ("gw3", p["gw3"], GCN_H), ("gw4", p["gw4"], GCN_H),
        ("w3", p["w3"], GCN_H), ("w4", p["w4"], GCN_H),
        ("w05", w05, GCN_H),
        ("fw1", p["fw1"], FEAT_H), ("fw2", p["fw2"], FEAT_H), ("fw3", p["fw3"], FEAT_H),
        ("fw4", p["fw4"], FEAT_H),            # (32,1) zero-padded to 32 lanes
        # 1-row biases padded to 8 rows so every slab offset is sublane-aligned
        ("gb1", p["gb1"], 8), ("gb2", p["gb2"], 8), ("gb3", p["gb3"], 8), ("gb4", p["gb4"], 8),
        ("b3", p["b3"], 8), ("b4", p["b4"], 8), ("b05", b05, 8),
        ("fb1", p["fb1"], 8), ("fb2", p["fb2"], 8), ("fb3", p["fb3"], 8), ("fb4", p["fb4"], 8),
    ]

    layout, blocks, off = {}, [], 0
    for name, arr, rows in entries:
        layout[name] = off
        blocks.append(pad(arr, rows))
        off += rows
    slab = jnp.concatenate(blocks, axis=0)    # (rows, 32) f32, single resident DMA
    return slab, layout, emb_proj.astype(jnp.float32)


# ------------------------------- wrapper -------------------------------------
def make_predictor(layout, slab_shape):
    kernel = functools.partial(_predictor_kernel, layout=layout)
    num_tiles = B // TB

    grid_spec = pltpu.PrefetchScalarGridSpec(
        num_scalar_prefetch=0,
        grid=(num_tiles,),
        in_specs=[
            pl.BlockSpec((TN, NFEAT), lambda i: (i, 0)),    # node features
            pl.BlockSpec((TN, TN), lambda i: (i, i)),       # diagonal adjacency tile
            pl.BlockSpec((TB, TN), lambda i: (i, 0)),       # last-node adjacency rows
            pl.BlockSpec((TB, FEAT_H), lambda i: (i, 0)),   # projected device embeddings
            pl.BlockSpec(slab_shape, lambda i: (0, 0)),     # weight slab: VMEM-resident
        ],
        out_specs=pl.BlockSpec((TB, FEAT_H), lambda i: (i, 0)),
    )

    call = pl.pallas_call(
        kernel,
        out_shape=jax.ShapeDtypeStruct((B, FEAT_H), jnp.float32),
        grid_spec=grid_spec,
        compiler_params=pltpu.CompilerParams(
            dimension_semantics=("parallel",)),             # v7x: shard steps over 2 TCs
    )

    @jax.jit
    def run(device_input, feat, adj, slab, emb_proj):
        feat2d = feat.reshape(B * N_NODES, NFEAT).astype(jnp.float32)
        adjf = adj.astype(jnp.float32)

        # Block-diagonal adjacency; only the diagonal (TN, TN) tiles are read.
        eye_b = jnp.eye(B, dtype=jnp.float32)
        block_adj = (eye_b[:, None, :, None] * adjf[:, :, None, :]).reshape(
            B * N_NODES, B * N_NODES)

        # Per-graph last-node adjacency row placed at the graph's in-tile offset.
        adj_last = adjf[:, N_NODES - 1, :]                                  # (B, N)
        onehot = jax.nn.one_hot(jnp.arange(B) % TB, TB, dtype=jnp.float32)  # (B, TB)
        adj_last_blk = (onehot[:, :, None] * adj_last[:, None, :]).reshape(B, TN)

        # Embedding lookup folded through feat_int_net layer-0's device half.
        dev_proj = jnp.take(emb_proj, device_input[:, 0].astype(jnp.int32), axis=0)

        out = call(feat2d, block_adj, adj_last_blk, dev_proj, slab)         # (B, 32)
        return out[:, 0:1]                                                  # (B, 1)

    return run


# ------------------------------- param init ----------------------------------
def init_params(key):
    ks = list(jax.random.split(key, 32))
    k = iter(ks)
    p = {}

    # embedding table (nn.Embedding default: N(0,1))
    p["dev_emb"] = jax.random.normal(next(k), (NUM_DEVICES, HW_EMB), jnp.float32)

    # GraphConvolution weights: init.uniform_(-0.05, 0.05); small uniform biases.
    dims = [(NFEAT, GCN_H), (GCN_H, GCN_H), (GCN_H, GCN_H), (GCN_H, GCN_H)]
    for i, (din, dout) in enumerate(dims, start=1):
        p[f"gw{i}"] = jax.random.uniform(next(k), (din, dout), jnp.float32, -0.05, 0.05)
        p[f"gb{i}"] = jax.random.uniform(next(k), (1, dout), jnp.float32, -0.05, 0.05)

    # fc3, fc4, fc5 (PyTorch Linear default init ~ uniform(+-1/sqrt(fan_in)))
    def linear(kw, kb, din, dout):
        bound = 1.0 / jnp.sqrt(float(din))
        Wm = jax.random.uniform(kw, (din, dout), jnp.float32, -bound, bound)
        bm = jax.random.uniform(kb, (1, dout), jnp.float32, -bound, bound)
        return Wm, bm

    p["w3"], p["b3"] = linear(next(k), next(k), GCN_H, GCN_H)
    p["w4"], p["b4"] = linear(next(k), next(k), GCN_H, GCN_H)
    p["w5"], p["b5"] = linear(next(k), next(k), GCN_H, NN_EMB)

    # feat_int_net: W ~ N(0, sqrt(2/(m+n))), b ~ N(0, sqrt(1/m))
    n_in = NN_EMB + HW_EMB
    for i in range(FEAT_DEPTH):
        n = n_in if i == 0 else FEAT_H
        m = 1 if i == FEAT_DEPTH - 1 else FEAT_H
        w_std = jnp.sqrt(2.0 / (m + n))
        b_std = jnp.sqrt(1.0 / m)
        p[f"fw{i}"] = w_std * jax.random.normal(next(k), (n, m), jnp.float32)
        p[f"fb{i}"] = b_std * jax.random.normal(next(k), (1, m), jnp.float32)
    return p


# ------------------------------- pure-JAX reference --------------------------
def reference_forward(feat, adj, device_input, p):
    dev = p["dev_emb"][device_input[:, 0]]                      # (B, HW_EMB)
    x = feat
    for i in (1, 2, 3, 4):
        sup = jnp.einsum("bni,io->bno", x, p[f"gw{i}"])
        x = jax.nn.relu(jnp.einsum("bij,bjo->bio", adj, sup) + p[f"gb{i}"])
    g = x[:, -1, :]
    g = jax.nn.relu(g @ p["w3"] + p["b3"])
    g = jax.nn.relu(g @ p["w4"] + p["b4"])
    g = g @ p["w5"] + p["b5"]
    h = jnp.concatenate([g, dev], axis=-1)
    for i in range(FEAT_DEPTH):
        h = h @ p[f"fw{i}"] + p[f"fb{i}"]
        if i != FEAT_DEPTH - 1:
            h = jax.nn.relu(h)
    return jax.nn.sigmoid(h)


# --------------------------------- main ---------------------------------------
if __name__ == "__main__":
    key = jax.random.PRNGKey(0)
    k_feat, k_adj, k_dev, k_params = jax.random.split(key, 4)

    feat = jax.random.normal(k_feat, (B, N_NODES, NFEAT), jnp.float32)
    adj = jax.random.uniform(k_adj, (B, N_NODES, N_NODES), jnp.float32)
    # row-normalize adjacency (typical GCN preprocessing), guarded against 0-sum rows
    adj = adj / jnp.maximum(jnp.sum(adj, axis=-1, keepdims=True), 1e-6)
    device_input = jax.random.randint(k_dev, (B, 1), 0, NUM_DEVICES)

    params = init_params(k_params)
    slab, layout, emb_proj = pack_params(params)      # one-time host-side fold + pack

    predictor = make_predictor(layout, slab.shape)
    out = predictor(device_input, feat, adj, slab, emb_proj)
    out = jax.block_until_ready(out)

    ref = reference_forward(feat, adj, device_input, params)

    assert out.shape == (B, 1)
    assert bool(jnp.all(jnp.isfinite(out)))
    assert bool(jnp.all((out >= 0.0) & (out <= 1.0)))           # sigmoid range
    assert bool(jnp.allclose(out, ref, atol=2e-3, rtol=2e-3))   # matches unfused reference
    print("KERNEL_OK")
</pallas_src>

<mosaic_0001>
module attributes {stable_mosaic.version = 11 : i64} {
  func.func @_predictor_kernel(%arg0: i32, %arg1: memref<128x8xf32, #tpu.memory_space<vmem>>, %arg2: memref<128x128xf32, #tpu.memory_space<vmem>>, %arg3: memref<16x128xf32, #tpu.memory_space<vmem>>, %arg4: memref<16x32xf32, #tpu.memory_space<vmem>>, %arg5: memref<416x32xf32, #tpu.memory_space<vmem>>, %arg6: memref<16x32xf32, #tpu.memory_space<vmem>>) attributes {dimension_semantics = [#tpu.dimension_semantics<parallel>], iteration_bounds = array<i64: 2>, scalar_prefetch = 0 : i64, scratch_operands = 0 : i64, tpu.core_type = #tpu.core_type<tc>, window_params = [{transform_indices = @transform_0, window_bounds = array<i64: 128, 8>}, {transform_indices = @transform_1, window_bounds = array<i64: 128, 128>}, {transform_indices = @transform_2, window_bounds = array<i64: 16, 128>}, {transform_indices = @transform_3, window_bounds = array<i64: 16, 32>}, {pipeline_mode = #tpu.pipeline_mode<synchronous>, transform_indices = @transform_4, window_bounds = array<i64: 416, 32>}, {transform_indices = @transform_5, window_bounds = array<i64: 16, 32>}]} {
    %c0 = arith.constant 0 : index
    %c0_0 = arith.constant 0 : index
    %0 = vector.load %arg1[%c0, %c0_0] : memref<128x8xf32, #tpu.memory_space<vmem>>, vector<128x8xf32>
    %c0_1 = arith.constant 0 : index
    %c0_2 = arith.constant 0 : index
    %1 = vector.load %arg2[%c0_1, %c0_2] : memref<128x128xf32, #tpu.memory_space<vmem>>, vector<128x128xf32>
    %c0_3 = arith.constant 0 : index
    %c0_4 = arith.constant 0 : index
    %2 = vector.load %arg5[%c0_3, %c0_4] : memref<416x32xf32, #tpu.memory_space<vmem>>, vector<8x32xf32>
    %cst = arith.constant dense<0.000000e+00> : vector<128x32xf32>
    %3 = tpu.matmul %0, %2, %cst {dimension_numbers = #tpu.dot_dimension_numbers<[1], [0], [0], [1], [0, 0, 1, 1], [], []>, precision = #tpu.contract_precision<fp32>} : vector<128x8xf32>, vector<8x32xf32>, vector<128x32xf32> -> vector<128x32xf32>
    %cst_5 = arith.constant dense<0.000000e+00> : vector<128x32xf32>
    %4 = tpu.matmul %1, %3, %cst_5 {dimension_numbers = #tpu.dot_dimension_numbers<[1], [0], [0], [1], [0, 0, 1, 1], [], []>, precision = #tpu.contract_precision<fp32>} : vector<128x128xf32>, vector<128x32xf32>, vector<128x32xf32> -> vector<128x32xf32>
    %c328 = arith.constant 328 : index
    %c0_6 = arith.constant 0 : index
    %5 = vector.load %arg5[%c328, %c0_6] : memref<416x32xf32, #tpu.memory_space<vmem>>, vector<1x32xf32>
    %6 = vector.broadcast %5 : vector<1x32xf32> to vector<128x32xf32>
    %7 = arith.addf %4, %6 : vector<128x32xf32>
    %cst_7 = arith.constant 0.000000e+00 : f32
    %8 = vector.broadcast %cst_7 : f32 to vector<128x32xf32>
    %9 = arith.maximumf %7, %8 : vector<128x32xf32>
    %c8 = arith.constant 8 : index
    %c0_8 = arith.constant 0 : index
    %10 = vector.load %arg5[%c8, %c0_8] : memref<416x32xf32, #tpu.memory_space<vmem>>, vector<32x32xf32>
    %cst_9 = arith.constant dense<0.000000e+00> : vector<128x32xf32>
    %11 = tpu.matmul %9, %10, %cst_9 {dimension_numbers = #tpu.dot_dimension_numbers<[1], [0], [0], [1], [0, 0, 1, 1], [], []>, precision = #tpu.contract_precision<fp32>} : vector<128x32xf32>, vector<32x32xf32>, vector<128x32xf32> -> vector<128x32xf32>
    %cst_10 = arith.constant dense<0.000000e+00> : vector<128x32xf32>
    %12 = tpu.matmul %1, %11, %cst_10 {dimension_numbers = #tpu.dot_dimension_numbers<[1], [0], [0], [1], [0, 0, 1, 1], [], []>, precision = #tpu.contract_precision<fp32>} : vector<128x128xf32>, vector<128x32xf32>, vector<128x32xf32> -> vector<128x32xf32>
    %c336 = arith.constant 336 : index
    %c0_11 = arith.constant 0 : index
    %13 = vector.load %arg5[%c336, %c0_11] : memref<416x32xf32, #tpu.memory_space<vmem>>, vector<1x32xf32>
    %14 = vector.broadcast %13 : vector<1x32xf32> to vector<128x32xf32>
    %15 = arith.addf %12, %14 : vector<128x32xf32>
    %cst_12 = arith.constant 0.000000e+00 : f32
    %16 = vector.broadcast %cst_12 : f32 to vector<128x32xf32>
    %17 = arith.maximumf %15, %16 : vector<128x32xf32>
    %c40 = arith.constant 40 : index
    %c0_13 = arith.constant 0 : index
    %18 = vector.load %arg5[%c40, %c0_13] : memref<416x32xf32, #tpu.memory_space<vmem>>, vector<32x32xf32>
    %cst_14 = arith.constant dense<0.000000e+00> : vector<128x32xf32>
    %19 = tpu.matmul %17, %18, %cst_14 {dimension_numbers = #tpu.dot_dimension_numbers<[1], [0], [0], [1], [0, 0, 1, 1], [], []>, precision = #tpu.contract_precision<fp32>} : vector<128x32xf32>, vector<32x32xf32>, vector<128x32xf32> -> vector<128x32xf32>
    %cst_15 = arith.constant dense<0.000000e+00> : vector<128x32xf32>
    %20 = tpu.matmul %1, %19, %cst_15 {dimension_numbers = #tpu.dot_dimension_numbers<[1], [0], [0], [1], [0, 0, 1, 1], [], []>, precision = #tpu.contract_precision<fp32>} : vector<128x128xf32>, vector<128x32xf32>, vector<128x32xf32> -> vector<128x32xf32>
    %c344 = arith.constant 344 : index
    %c0_16 = arith.constant 0 : index
    %21 = vector.load %arg5[%c344, %c0_16] : memref<416x32xf32, #tpu.memory_space<vmem>>, vector<1x32xf32>
    %22 = vector.broadcast %21 : vector<1x32xf32> to vector<128x32xf32>
    %23 = arith.addf %20, %22 : vector<128x32xf32>
    %cst_17 = arith.constant 0.000000e+00 : f32
    %24 = vector.broadcast %cst_17 : f32 to vector<128x32xf32>
    %25 = arith.maximumf %23, %24 : vector<128x32xf32>
    %c72 = arith.constant 72 : index
    %c0_18 = arith.constant 0 : index
    %26 = vector.load %arg5[%c72, %c0_18] : memref<416x32xf32, #tpu.memory_space<vmem>>, vector<32x32xf32>
    %cst_19 = arith.constant dense<0.000000e+00> : vector<128x32xf32>
    %27 = tpu.matmul %25, %26, %cst_19 {dimension_numbers = #tpu.dot_dimension_numbers<[1], [0], [0], [1], [0, 0, 1, 1], [], []>, precision = #tpu.contract_precision<fp32>} : vector<128x32xf32>, vector<32x32xf32>, vector<128x32xf32> -> vector<128x32xf32>
    %c0_20 = arith.constant 0 : index
    %c0_21 = arith.constant 0 : index
    %28 = vector.load %arg3[%c0_20, %c0_21] : memref<16x128xf32, #tpu.memory_space<vmem>>, vector<16x128xf32>
    %cst_22 = arith.constant dense<0.000000e+00> : vector<16x32xf32>
    %29 = tpu.matmul %28, %27, %cst_22 {dimension_numbers = #tpu.dot_dimension_numbers<[1], [0], [0], [1], [0, 0, 1, 1], [], []>, precision = #tpu.contract_precision<fp32>} : vector<16x128xf32>, vector<128x32xf32>, vector<16x32xf32> -> vector<16x32xf32>
    %c352 = arith.constant 352 : index
    %c0_23 = arith.constant 0 : index
    %30 = vector.load %arg5[%c352, %c0_23] : memref<416x32xf32, #tpu.memory_space<vmem>>, vector<1x32xf32>
    %31 = vector.broadcast %30 : vector<1x32xf32> to vector<16x32xf32>
    %32 = arith.addf %29, %31 : vector<16x32xf32>
    %cst_24 = arith.constant 0.000000e+00 : f32
    %33 = vector.broadcast %cst_24 : f32 to vector<16x32xf32>
    %34 = arith.maximumf %32, %33 : vector<16x32xf32>
    %c104 = arith.constant 104 : index
    %c0_25 = arith.constant 0 : index
    %35 = vector.load %arg5[%c104, %c0_25] : memref<416x32xf32, #tpu.memory_space<vmem>>, vector<32x32xf32>
    %cst_26 = arith.constant dense<0.000000e+00> : vector<16x32xf32>
    %36 = tpu.matmul %34, %35, %cst_26 {dimension_numbers = #tpu.dot_dimension_numbers<[1], [0], [0], [1], [0, 0, 1, 1], [], []>, precision = #tpu.contract_precision<fp32>} : vector<16x32xf32>, vector<32x32xf32>, vector<16x32xf32> -> vector<16x32xf32>
    %c360 = arith.constant 360 : index
    %c0_27 = arith.constant 0 : index
    %37 = vector.load %arg5[%c360, %c0_27] : memref<416x32xf32, #tpu.memory_space<vmem>>, vector<1x32xf32>
    %38 = vector.broadcast %37 : vector<1x32xf32> to vector<16x32xf32>
    %39 = arith.addf %36, %38 : vector<16x32xf32>
    %cst_28 = arith.constant 0.000000e+00 : f32
    %40 = vector.broadcast %cst_28 : f32 to vector<16x32xf32>
    %41 = arith.maximumf %39, %40 : vector<16x32xf32>
    %c136 = arith.constant 136 : index
    %c0_29 = arith.constant 0 : index
    %42 = vector.load %arg5[%c136, %c0_29] : memref<416x32xf32, #tpu.memory_space<vmem>>, vector<32x32xf32>
    %cst_30 = arith.constant dense<0.000000e+00> : vector<16x32xf32>
    %43 = tpu.matmul %41, %42, %cst_30 {dimension_numbers = #tpu.dot_dimension_numbers<[1], [0], [0], [1], [0, 0, 1, 1], [], []>, precision = #tpu.contract_precision<fp32>} : vector<16x32xf32>, vector<32x32xf32>, vector<16x32xf32> -> vector<16x32xf32>
    %c368 = arith.constant 368 : index
    %c0_31 = arith.constant 0 : index
    %44 = vector.load %arg5[%c368, %c0_31] : memref<416x32xf32, #tpu.memory_space<vmem>>, vector<1x32xf32>
    %45 = vector.broadcast %44 : vector<1x32xf32> to vector<16x32xf32>
    %46 = arith.addf %43, %45 : vector<16x32xf32>
    %cst_32 = arith.constant 0.000000e+00 : f32
    %47 = vector.broadcast %cst_32 : f32 to vector<16x32xf32>
    %48 = arith.maximumf %46, %47 : vector<16x32xf32>
    %c168 = arith.constant 168 : index
    %c0_33 = arith.constant 0 : index
    %49 = vector.load %arg5[%c168, %c0_33] : memref<416x32xf32, #tpu.memory_space<vmem>>, vector<32x32xf32>
    %cst_34 = arith.constant dense<0.000000e+00> : vector<16x32xf32>
    %50 = tpu.matmul %48, %49, %cst_34 {dimension_numbers = #tpu.dot_dimension_numbers<[1], [0], [0], [1], [0, 0, 1, 1], [], []>, precision = #tpu.contract_precision<fp32>} : vector<16x32xf32>, vector<32x32xf32>, vector<16x32xf32> -> vector<16x32xf32>
    %c0_35 = arith.constant 0 : index
    %c0_36 = arith.constant 0 : index
    %51 = vector.load %arg4[%c0_35, %c0_36] : memref<16x32xf32, #tpu.memory_space<vmem>>, vector<16x32xf32>
    %52 = arith.addf %50, %51 : vector<16x32xf32>
    %c376 = arith.constant 376 : index
    %c0_37 = arith.constant 0 : index
    %53 = vector.load %arg5[%c376, %c0_37] : memref<416x32xf32, #tpu.memory_space<vmem>>, vector<1x32xf32>
    %54 = vector.broadcast %53 : vector<1x32xf32> to vector<16x32xf32>
    %55 = arith.addf %52, %54 : vector<16x32xf32>
    %cst_38 = arith.constant 0.000000e+00 : f32
    %56 = vector.broadcast %cst_38 : f32 to vector<16x32xf32>
    %57 = arith.maximumf %55, %56 : vector<16x32xf32>
    %c200 = arith.constant 200 : index
    %c0_39 = arith.constant 0 : index
    %58 = vector.load %arg5[%c200, %c0_39] : memref<416x32xf32, #tpu.memory_space<vmem>>, vector<32x32xf32>
    %cst_40 = arith.constant dense<0.000000e+00> : vector<16x32xf32>
    %59 = tpu.matmul %57, %58, %cst_40 {dimension_numbers = #tpu.dot_dimension_numbers<[1], [0], [0], [1], [0, 0, 1, 1], [], []>, precision = #tpu.contract_precision<fp32>} : vector<16x32xf32>, vector<32x32xf32>, vector<16x32xf32> -> vector<16x32xf32>
    %c384 = arith.constant 384 : index
    %c0_41 = arith.constant 0 : index
    %60 = vector.load %arg5[%c384, %c0_41] : memref<416x32xf32, #tpu.memory_space<vmem>>, vector<1x32xf32>
    %61 = vector.broadcast %60 : vector<1x32xf32> to vector<16x32xf32>
    %62 = arith.addf %59, %61 : vector<16x32xf32>
    %cst_42 = arith.constant 0.000000e+00 : f32
    %63 = vector.broadcast %cst_42 : f32 to vector<16x32xf32>
    %64 = arith.maximumf %62, %63 : vector<16x32xf32>
    %c232 = arith.constant 232 : index
    %c0_43 = arith.constant 0 : index
    %65 = vector.load %arg5[%c232, %c0_43] : memref<416x32xf32, #tpu.memory_space<vmem>>, vector<32x32xf32>
    %cst_44 = arith.constant dense<0.000000e+00> : vector<16x32xf32>
    %66 = tpu.matmul %64, %65, %cst_44 {dimension_numbers = #tpu.dot_dimension_numbers<[1], [0], [0], [1], [0, 0, 1, 1], [], []>, precision = #tpu.contract_precision<fp32>} : vector<16x32xf32>, vector<32x32xf32>, vector<16x32xf32> -> vector<16x32xf32>
    %c392 = arith.constant 392 : index
    %c0_45 = arith.constant 0 : index
    %67 = vector.load %arg5[%c392, %c0_45] : memref<416x32xf32, #tpu.memory_space<vmem>>, vector<1x32xf32>
    %68 = vector.broadcast %67 : vector<1x32xf32> to vector<16x32xf32>
    %69 = arith.addf %66, %68 : vector<16x32xf32>
    %cst_46 = arith.constant 0.000000e+00 : f32
    %70 = vector.broadcast %cst_46 : f32 to vector<16x32xf32>
    %71 = arith.maximumf %69, %70 : vector<16x32xf32>
    %c264 = arith.constant 264 : index
    %c0_47 = arith.constant 0 : index
    %72 = vector.load %arg5[%c264, %c0_47] : memref<416x32xf32, #tpu.memory_space<vmem>>, vector<32x32xf32>
    %cst_48 = arith.constant dense<0.000000e+00> : vector<16x32xf32>
    %73 = tpu.matmul %71, %72, %cst_48 {dimension_numbers = #tpu.dot_dimension_numbers<[1], [0], [0], [1], [0, 0, 1, 1], [], []>, precision = #tpu.contract_precision<fp32>} : vector<16x32xf32>, vector<32x32xf32>, vector<16x32xf32> -> vector<16x32xf32>
    %c400 = arith.constant 400 : index
    %c0_49 = arith.constant 0 : index
    %74 = vector.load %arg5[%c400, %c0_49] : memref<416x32xf32, #tpu.memory_space<vmem>>, vector<1x32xf32>
    %75 = vector.broadcast %74 : vector<1x32xf32> to vector<16x32xf32>
    %76 = arith.addf %73, %75 : vector<16x32xf32>
    %cst_50 = arith.constant 0.000000e+00 : f32
    %77 = vector.broadcast %cst_50 : f32 to vector<16x32xf32>
    %78 = arith.maximumf %76, %77 : vector<16x32xf32>
    %c296 = arith.constant 296 : index
    %c0_51 = arith.constant 0 : index
    %79 = vector.load %arg5[%c296, %c0_51] : memref<416x32xf32, #tpu.memory_space<vmem>>, vector<32x32xf32>
    %cst_52 = arith.constant dense<0.000000e+00> : vector<16x32xf32>
    %80 = tpu.matmul %78, %79, %cst_52 {dimension_numbers = #tpu.dot_dimension_numbers<[1], [0], [0], [1], [0, 0, 1, 1], [], []>, precision = #tpu.contract_precision<fp32>} : vector<16x32xf32>, vector<32x32xf32>, vector<16x32xf32> -> vector<16x32xf32>
    %c408 = arith.constant 408 : index
    %c0_53 = arith.constant 0 : index
    %81 = vector.load %arg5[%c408, %c0_53] : memref<416x32xf32, #tpu.memory_space<vmem>>, vector<1x32xf32>
    %82 = vector.broadcast %81 : vector<1x32xf32> to vector<16x32xf32>
    %83 = arith.addf %80, %82 : vector<16x32xf32>
    %84 = math.absf %83 : vector<16x32xf32>
    %cst_54 = arith.constant 0.000000e+00 : f32
    %85 = vector.broadcast %cst_54 : f32 to vector<16x32xf32>
    %86 = arith.subf %85, %84 : vector<16x32xf32>
    %87 = math.exp %86 : vector<16x32xf32>
    %cst_55 = arith.constant 1.000000e+00 : f32
    %88 = vector.broadcast %cst_55 : f32 to vector<16x32xf32>
    %89 = arith.addf %88, %87 : vector<16x32xf32>
    %90 = tpu.reciprocal %89 : vector<16x32xf32> -> vector<16x32xf32>
    %cst_56 = arith.constant 0.000000e+00 : f32
    %91 = vector.broadcast %cst_56 : f32 to vector<16x32xf32>
    %92 = arith.cmpf oge, %83, %91 : vector<16x32xf32>
    %cst_57 = arith.constant 1.000000e+00 : f32
    %93 = vector.broadcast %cst_57 : f32 to vector<16x32xf32>
    %94 = arith.subf %93, %90 : vector<16x32xf32>
    %95 = arith.select %92, %90, %94 : vector<16x32xi1>, vector<16x32xf32>
    %c0_58 = arith.constant 0 : index
    %c0_59 = arith.constant 0 : index
    %96 = vector.load %arg6[%c0_58, %c0_59] : memref<16x32xf32, #tpu.memory_space<vmem>>, vector<16x32xf32>
    tpu.vector_store %arg6[%c0_58, %c0_59], %95 {strides = array<i32>} : memref<16x32xf32, #tpu.memory_space<vmem>>, vector<16x32xf32>,
    return
  }
  func.func @transform_0(%arg0: i32) -> (i32, i32) {
    %c0_i32 = arith.constant 0 : i32
    %c0_i32_0 = arith.constant 0 : i32
    return %arg0, %c0_i32 : i32, i32
  }
  func.func @transform_1(%arg0: i32) -> (i32, i32) {
    %c0_i32 = arith.constant 0 : i32
    return %arg0, %arg0 : i32, i32
  }
  func.func @transform_2(%arg0: i32) -> (i32, i32) {
    %c0_i32 = arith.constant 0 : i32
    %c0_i32_0 = arith.constant 0 : i32
    return %arg0, %c0_i32 : i32, i32
  }
  func.func @transform_3(%arg0: i32) -> (i32, i32) {
    %c0_i32 = arith.constant 0 : i32
    %c0_i32_0 = arith.constant 0 : i32
    return %arg0, %c0_i32 : i32, i32
  }
  func.func @transform_4(%arg0: i32) -> (i32, i32) {
    %c0_i32 = arith.constant 0 : i32
    %c0_i32_0 = arith.constant 0 : i32
    %c0_i32_1 = arith.constant 0 : i32
    return %c0_i32, %c0_i32_0 : i32, i32
  }
  func.func @transform_5(%arg0: i32) -> (i32, i32) {
    %c0_i32 = arith.constant 0 : i32
    %c0_i32_0 = arith.constant 0 : i32
    return %arg0, %c0_i32 : i32, i32
  }
}

</mosaic_0001>

<bundles_post_ra>
// kernel: run.1
= control target key start
LH: loop header
LB: loop body
LE: loop exit
PB: predicated region body
PF: predicated region fallthrough
CT: control target
= control target key end

     0   :  { %s17592_s18 = smov 0   ;;  %s17594_s19 = smov 0   ;;  %s22523_s0 = inlined_call_operand.vmem [shape: f32[256,8], index: 0, kind: input, shape index: {}]   ;;  %s22524_s1 = inlined_call_operand.vmem [shape: f32[256,256], index: 1, kind: input, shape index: {}]   ;;  %s22525_s2 = inlined_call_operand.vmem [shape: f32[32,128], index: 2, kind: input, shape index: {}]   ;;  %s22526_s3 = inlined_call_operand.vmem [shape: f32[32,32], index: 3, kind: input, shape index: {}]   ;;  %s22527_s4 = inlined_call_operand.vmem [shape: f32[416,32], index: 4, kind: input, shape index: {}]   ;;  %s22528_s5 = inlined_call_operand.vmem [shape: f32[32,32], index: 5, kind: output, shape index: {}]  }
   0x1   :  { %s17596_s20 = smov 0  }
   0x2 LB: > { %s13664_s21 = sadd.s32 4294967295, %s17560_s20   ;;  %s17609_s22 = sadd.s32 1, %s17560_s20   ;;  %s17560_s20 = sphi %s17596_s20, %s23322_s20   ;;  %s17556_s19 = sphi %s17594_s19, %s23321_s19   ;;  %s17552_s18 = sphi %s17592_s18, %s23320_s18  }
   0x3   : > { %s45_s23 = ssub.s32 %s17560_s20, %s17609_s22  ;;  %s50_s24 = sadd.s32 1, %s17556_s19 }
   0x4   : > { %s47_s25 = sor.u32 %s45_s23, %s45_s23  ;;  %p57_p0 = scmp.ne.s32.totalorder %s17556_s19, %s17552_s18 }
   0x5   : > { %p48_p1 = scmp.eq.s32.totalorder %s47_s25, 0  ;;  %p58_p2 = scmp.eq.s32.totalorder %s17560_s20, 0 }
   0x6   : > { %p13667_p4 = scmp.ge.s32.totalorder %s17560_s20, 2 }
   0x7   : > { %s17618_s26 = scalar_select %p48_p1, %s17556_s19, %s50_s24  }
   0x8   : > { %p59_p3 = por %p58_p2, %p57_p0  ;;  %185 = sbr.rel (%p13667_p4) target bundleno = 27 (0x1b), region = 20 }
   0xd   : > { %197 = sbr.rel (!%p59_p3) target bundleno = 27 (0x1b), region = 28  ;;  %s199_s27 = sand.u32 (%p59_p3), 1, %s17556_s19  }
   0xe   : > { %s13695_s28 = sshll.u32 (%p59_p3), %s17560_s20, 5  ;;  %s13668_s29 = sshll.u32 (%p59_p3), %s199_s27, 7 }
   0xf   : > { %s204_s30 = sadd.s32 (%p59_p3), %s17560_s20, %s13695_s28  ;;  %s201_s10 = scalar_lea.vmem (%p59_p3), [#allocation2], %s13668_s29 }
  0x10   : > { %s13671_s6 = sshll.u32 (%p59_p3), %s204_s30, 3 }
  0x11   : > { %s17627_s9 = scalar_lea.vmem (%p59_p3), %s22524_s1, %s13671_s6 }
  0x12   : > { %v265_v0 = vld [vmem:[%s17627_s9] sm:$0xff]  ;;  %v267_v1 = vld [vmem:[%s17627_s9 + $0x10] sm:$0xff] }
  0x13   : > { %v269_v2 = vld [vmem:[%s17627_s9 + $0x20] sm:$0xff]  ;;  %266 = vst [vmem:[%s201_s10] sm:$0xff] %v265_v0  ;;  %268 = vst [vmem:[%s201_s10 + $0x8] sm:$0xff] %v267_v1  ;;  %v271_v3 = vld [vmem:[%s17627_s9 + $0x30] sm:$0xff] }
  0x14   : > { %270 = vst [vmem:[%s201_s10 + $0x10] sm:$0xff] %v269_v2  ;;  %v273_v4 = vld [vmem:[%s17627_s9 + $0x40] sm:$0xff]  ;;  %v275_v5 = vld [vmem:[%s17627_s9 + $0x50] sm:$0xff]  ;;  %272 = vst [vmem:[%s201_s10 + $0x18] sm:$0xff] %v271_v3 }
  0x15   : > { %274 = vst [vmem:[%s201_s10 + $0x20] sm:$0xff] %v273_v4  ;;  %276 = vst [vmem:[%s201_s10 + $0x28] sm:$0xff] %v275_v5  ;;  %v277_v6 = vld [vmem:[%s17627_s9 + $0x60] sm:$0xff]  ;;  %v279_v7 = vld [vmem:[%s17627_s9 + $0x70] sm:$0xff] }
  0x16   : > { %v281_v8 = vld [vmem:[%s17627_s9 + $0x80] sm:$0xff]  ;;  %278 = vst [vmem:[%s201_s10 + $0x30] sm:$0xff] %v277_v6  ;;  %280 = vst [vmem:[%s201_s10 + $0x38] sm:$0xff] %v279_v7  ;;  %v283_v9 = vld [vmem:[%s17627_s9 + $0x90] sm:$0xff] }
  0x17   : > { %282 = vst [vmem:[%s201_s10 + $0x40] sm:$0xff] %v281_v8  ;;  %v285_v10 = vld [vmem:[%s17627_s9 + $0xa0] sm:$0xff]  ;;  %v287_v11 = vld [vmem:[%s17627_s9 + $0xb0] sm:$0xff]  ;;  %284 = vst [vmem:[%s201_s10 + $0x48] sm:$0xff] %v283_v9 }
  0x18   : > { %286 = vst [vmem:[%s201_s10 + $0x50] sm:$0xff] %v285_v10  ;;  %288 = vst [vmem:[%s201_s10 + $0x58] sm:$0xff] %v287_v11  ;;  %v289_v12 = vld [vmem:[%s17627_s9 + $0xc0] sm:$0xff]  ;;  %v291_v13 = vld [vmem:[%s17627_s9 + $0xd0] sm:$0xff] }
  0x19   : > { %v293_v14 = vld [vmem:[%s17627_s9 + $0xe0] sm:$0xff]  ;;  %290 = vst [vmem:[%s201_s10 + $0x60] sm:$0xff] %v289_v12  ;;  %292 = vst [vmem:[%s201_s10 + $0x68] sm:$0xff] %v291_v13  ;;  %v295_v15 = vld [vmem:[%s17627_s9 + $0xf0] sm:$0xff] }
  0x1a   : > { %294 = vst [vmem:[%s201_s10 + $0x70] sm:$0xff] %v293_v14  ;;  %296 = vst [vmem:[%s201_s10 + $0x78] sm:$0xff] %v295_v15 }
  0x1b PF: > { %p13672_p5 = scmp.ge.s32.totalorder %s17560_s20, 1  ;;  %p319_p6 = scmp.lt.s32.totalorder %s17560_s20, 3 }
  0x1d   : > { %p320_p7 = pnand %p13672_p5, %p319_p6 }
  0x1f   : > { %323 = sbr.rel (%p320_p7) target bundleno = 4232 (0x1088), region = 74 }
  0x24   : > { %v425_v16 = vld [vmem:[%s22527_s4] sm:$0xff]  ;;  %s13674_s13 = sshll.u32 %s13664_s21, 4  ;;  %vm426_vm0 = vcmask 64512   ;;  %s326_s23 = sand.u32 1, %s17552_s18   ;;  %vm2877_vm1 = vcmask 261120  }
  0x25   : > { %v17652_v17 = vand.u32 4294901760, %v425_v16  ;;  %p369_p8 = scmp.lt.s32.totalorder %s13674_s13, 31  ;;  %s13673_s24 = sshll.u32 %s326_s23, 7 }
  0x26   : > { %s17925_s25 = scalar_lea.vmem [#allocation2], %s13673_s24  ;;  %s13676_s11 = sshll.u32 %s13664_s21, 1 }
  0x27   : > { %15094 = vmatprep.subr.mxu0 %v17652_v17  ;;  %v17656_v18 = vsub.f32 %v425_v16, %v17652_v17  ;;  %s23324_s13 = smov (!%p369_p8, %s13674_s13), 31  ;;  %p376_p9 = scmp.lt.s32.totalorder %s13676_s11, 3 }
  0x28   : > { %15095 = vmatpush3.msra.mxu0 %v17652_v17  ;;  %s13675_s14 = sshll.u32 %s23324_s13, 3 }
  0x29   : > { %v17660_v19 = vand.u32 4294901760, %v17656_v18  ;;  %15146 = vmatprep.subr.mxu0 %v17656_v18  ;;  %s17666_s17 = scalar_lea.vmem %s22523_s0, %s13675_s14  ;;  %s23326_s11 = smov (!%p376_p9, %s13676_s11), 3 }
  0x2a   : > { %v393_v21 = vld [vmem:[%s17666_s17] sm:$0xff]  ;;  %v394_v22 = vld [vmem:[%s17666_s17 + $0x8] sm:$0xff]  ;;  %v395_v23 = vld [vmem:[%s17666_s17 + $0x10] sm:$0xff]  ;;  %s21353_s12 = sshll.u32 %s23326_s11, 3 }
  0x2b   : > { %v735_v20 = vsub.f32 %v17656_v18, %v17660_v19  ;;  %v428_v24 = vsel %vm426_vm0, %v393_v21, 0  ;;  %v431_v25 = vsel %vm426_vm0, %v394_v22, 0  ;;  %v434_v26 = vsel %vm426_vm0, %v395_v23, 0  ;;  %v396_v27 = vld [vmem:[%s17666_s17 + $0x18] sm:$0xff]  ;;  %v397_v28 = vld [vmem:[%s17666_s17 + $0x20] sm:$0xff]  ;;  %v398_v29 = vld [vmem:[%s17666_s17 + $0x28] sm:$0xff]  ;;  %s21359_s15 = scalar_lea.vmem %s22525_s2, %s21353_s12  ;;  %s385_s14 = scalar_lea.vmem %s22526_s3, %s21353_s12 }
  0x2c   : > { %v17679_v31 = vand.u32 4294901760, %v428_v24  ;;  %v17681_v32 = vand.u32 4294901760, %v431_v25  ;;  %v17683_v33 = vand.u32 4294901760, %v434_v26  ;;  %v399_v34 = vld [vmem:[%s17666_s17 + $0x30] sm:$0xff]  ;;  %v400_v35 = vld [vmem:[%s17666_s17 + $0x38] sm:$0xff]  ;;  %v437_v36 = vsel %vm426_vm0, %v396_v27, 0  ;;  %s391_s8 = scalar_lea.vmem %s22528_s5, %s21353_s12 }
  0x2d   : > { %v736_v30 = vand.u32 4294901760, %v735_v20  ;;  %v440_v37 = vsel %vm426_vm0, %v397_v28, 0  ;;  %v443_v38 = vsel %vm426_vm0, %v398_v29, 0  ;;  %v446_v39 = vsel %vm426_vm0, %v399_v34, 0  ;;  %v401_v0 = vld [vmem:[%s17666_s17 + $0x40] sm:$0xff]  ;;  %v402_v1 = vld [vmem:[%s17666_s17 + $0x48] sm:$0xff] }
  0x2e   : > { %v17692_v40 = vsub.f32 %v428_v24, %v17679_v31  ;;  %15122 = vmatprep.mubr.f32.mxu1 %v17679_v31  ;;  %v17696_v41 = vsub.f32 %v431_v25, %v17681_v32  ;;  %v17699_v42 = vsub.f32 %v434_v26, %v17683_v33  ;;  %v17701_v43 = vand.u32 4294901760, %v437_v36  ;;  %v403_v2 = vld [vmem:[%s17666_s17 + $0x50] sm:$0xff]  ;;  %v404_v11 = vld [vmem:[%s17666_s17 + $0x58] sm:$0xff]  ;;  %v405_v15 = vld [vmem:[%s17666_s17 + $0x60] sm:$0xff] }
  0x2f   : > { %15120 = vmatprep.subr.mxu1 %v736_v30  ;;  %v17703_v44 = vand.u32 4294901760, %v440_v37  ;;  %v17705_v45 = vand.u32 4294901760, %v443_v38  ;;  %v17707_v46 = vand.u32 4294901760, %v446_v39  ;;  %v449_v47 = vsel %vm426_vm0, %v400_v35, 0  ;;  %v406_v16 = vld [vmem:[%s17666_s17 + $0x68] sm:$0xff]  ;;  %v407_v28 = vld [vmem:[%s17666_s17 + $0x70] sm:$0xff] }
  0x30   : > { %15121 = vmatpush3.msra.mxu1 %v736_v30  ;;  %v543_v48 = vand.u32 4294901760, %v17692_v40  ;;  %v553_v49 = vand.u32 4294901760, %v17696_v41  ;;  %v563_v50 = vand.u32 4294901760, %v17699_v42  ;;  %v17716_v51 = vsub.f32 %v437_v36, %v17701_v43  ;;  %v408_v29 = vld [vmem:[%s17666_s17 + $0x78] sm:$0xff] }
  0x31   : > { %15123 = vmatmul.mubr.f32.vlgmr.msra.gmra.mxu1 %v17681_v32  ;;  %15172 = vmatprep.subr.mxu1 %v17652_v17  ;;  %v17721_v52 = vsub.f32 %v440_v37, %v17703_v44  ;;  %v17724_v53 = vsub.f32 %v443_v38, %v17705_v45  ;;  %v17727_v54 = vsub.f32 %v446_v39, %v17707_v46  ;;  %v17729_v55 = vand.u32 4294901760, %v449_v47 }
  0x32   : > { %15125 = vmatprep.mubr.f32.mxu1 %v17683_v33  ;;  %15173 = vmatpush3.msra.mxu1 %v17652_v17  ;;  %v544_v56 = vsub.f32 %v17692_v40, %v543_v48  ;;  %v554_v57 = vsub.f32 %v17696_v41, %v553_v49  ;;  %v564_v58 = vsub.f32 %v17699_v42, %v563_v50  ;;  %v573_v59 = vand.u32 4294901760, %v17716_v51 }
  0x33   : > { %15224 = vmatprep.subr.mxu1 %v17652_v17  ;;  %v583_v60 = vand.u32 4294901760, %v17721_v52  ;;  %v593_v61 = vand.u32 4294901760, %v17724_v53  ;;  %v603_v62 = vand.u32 4294901760, %v17727_v54  ;;  %v17746_v63 = vsub.f32 %v449_v47, %v17729_v55 }
  0x34   : > { %v545_v3 = vand.u32 4294901760, %v544_v56  ;;  %v555_v4 = vand.u32 4294901760, %v554_v57  ;;  %v565_v5 = vand.u32 4294901760, %v564_v58  ;;  %v574_v6 = vsub.f32 %v17716_v51, %v573_v59 }
  0x35   : > { %15126 = vmatmul.mubr.f32.gmra.mxu1 %v17701_v43  ;;  %v584_v7 = vsub.f32 %v17721_v52, %v583_v60  ;;  %v594_v8 = vsub.f32 %v17724_v53, %v593_v61  ;;  %v604_v9 = vsub.f32 %v17727_v54, %v603_v62  ;;  %v613_v10 = vand.u32 4294901760, %v17746_v63 }
  0x36   : > { %15128 = vmatprep.mubr.f32.mxu1 %v17703_v44  ;;  %15096 = vmatprep.mubr.f32.mxu0 %v545_v3  ;;  %v452_v12 = vsel %vm426_vm0, %v401_v0, 0  ;;  %v455_v13 = vsel %vm426_vm0, %v402_v1, 0  ;;  %v458_v14 = vsel %vm426_vm0, %v403_v2, 0  ;;  %v575_v20 = vand.u32 4294901760, %v574_v6 }
  0x37   : > { %15097 = vmatmul.mubr.f32.vlgmr.msra.gmra.mxu0 %v555_v4  ;;  %v585_v21 = vand.u32 4294901760, %v584_v7  ;;  %v595_v22 = vand.u32 4294901760, %v594_v8  ;;  %v605_v23 = vand.u32 4294901760, %v604_v9  ;;  %v17773_v24 = vand.u32 4294901760, %v452_v12 }
  0x38   : > { %15147 = vmatpush3.msra.mxu0 %v17656_v18  ;;  %15099 = vmatprep.mubr.f32.mxu0 %v565_v5  ;;  %v17775_v25 = vand.u32 4294901760, %v455_v13  ;;  %v17777_v26 = vand.u32 4294901760, %v458_v14  ;;  %v461_v27 = vsel %vm426_vm0, %v404_v11, 0  ;;  %v614_v30 = vsub.f32 %v17746_v63, %v613_v10 }
  0x39   : > { %15129 = vmatmul.mubr.f32.gmra.mxu1 %v17705_v45  ;;  %v17786_v34 = vand.u32 4294901760, %v461_v27  ;;  %v464_v18 = vsel %vm426_vm0, %v405_v15, 0  ;;  %v467_v35 = vsel %vm426_vm0, %v406_v16, 0  ;;  %15198 = vmatprep.subr.mxu0 %v17660_v19  ;;  %v17793_v36 = vsub.f32 %v452_v12, %v17773_v24 }
  0x3a   : > { %15131 = vmatprep.mubr.f32.mxu1 %v17707_v46  ;;  %v17796_v37 = vsub.f32 %v455_v13, %v17775_v25  ;;  %v17799_v38 = vsub.f32 %v458_v14, %v17777_v26  ;;  %v17801_v39 = vand.u32 4294901760, %v464_v18  ;;  %v17806_v56 = vand.u32 4294901760, %v467_v35 }
  0x3b   : > { %15100 = vmatmul.mubr.f32.gmra.mxu0 %v575_v20  ;;  %v17804_v47 = vsub.f32 %v461_v27, %v17786_v34  ;;  %v470_v57 = vsel %vm426_vm0, %v407_v28, 0  ;;  %v473_v58 = vsel %vm426_vm0, %v408_v29, 0  ;;  %v623_v0 = vand.u32 4294901760, %v17793_v36 }
  0x3c   : > { %15102 = vmatprep.mubr.f32.mxu0 %v585_v21  ;;  %v633_v1 = vand.u32 4294901760, %v17796_v37  ;;  %v643_v2 = vand.u32 4294901760, %v17799_v38  ;;  %v17814_v3 = vsub.f32 %v464_v18, %v17801_v39  ;;  %v17817_v4 = vand.u32 4294901760, %v470_v57 }
  0x3d   : > { %15132 = vmatmul.mubr.f32.gmra.mxu1 %v17729_v55  ;;  %v615_v5 = vand.u32 4294901760, %v614_v30  ;;  %v624_v6 = vsub.f32 %v17793_v36, %v623_v0  ;;  %v653_v8 = vand.u32 4294901760, %v17804_v47  ;;  %v17828_v9 = vsub.f32 %v467_v35, %v17806_v56 }
  0x3e   : > { %15134 = vmatprep.mubr.f32.mxu1 %v17773_v24  ;;  %v634_v7 = vsub.f32 %v17796_v37, %v633_v1  ;;  %v17830_v11 = vand.u32 4294901760, %v473_v58  ;;  %v644_v13 = vsub.f32 %v17799_v38, %v643_v2  ;;  %v663_v14 = vand.u32 4294901760, %v17814_v3 }
  0x3f   : > { %15103 = vmatmul.mubr.f32.gmra.mxu0 %v595_v22  ;;  %v625_v12 = vand.u32 4294901760, %v624_v6  ;;  %v17837_v15 = vsub.f32 %v470_v57, %v17817_v4  ;;  %v654_v20 = vsub.f32 %v17804_v47, %v653_v8  ;;  %v673_v21 = vand.u32 4294901760, %v17828_v9 }
  0x40   : > { %15105 = vmatprep.mubr.f32.mxu0 %v605_v23  ;;  %v635_v16 = vand.u32 4294901760, %v634_v7  ;;  %v692_v22 = vsub.f32 %v473_v58, %v17830_v11  ;;  %v645_v23 = vand.u32 4294901760, %v644_v13  ;;  %v664_v27 = vsub.f32 %v17814_v3, %v663_v14 }
  0x41   : > { %15135 = vmatmul.mubr.f32.gmra.mxu1 %v17775_v25  ;;  %v683_v28 = vand.u32 4294901760, %v17837_v15  ;;  %v655_v29 = vand.u32 4294901760, %v654_v20  ;;  %v674_v30 = vsub.f32 %v17828_v9, %v673_v21 }
  0x42   : > { %15137 = vmatprep.mubr.f32.mxu1 %v17777_v26  ;;  %v693_v18 = vand.u32 4294901760, %v692_v22  ;;  %v665_v35 = vand.u32 4294901760, %v664_v27 }
  0x43   : > { %15106 = vmatmul.mubr.f32.gmra.mxu0 %v615_v5  ;;  %v684_v57 = vsub.f32 %v17837_v15, %v683_v28  ;;  %v675_v58 = vand.u32 4294901760, %v674_v30 }
  0x44   : > { %15108 = vmatprep.mubr.f32.mxu0 %v625_v12  ;;  %v694_v5 = vsub.f32 %v692_v22, %v693_v18 }
  0x45   : > { %15138 = vmatmul.mubr.f32.gmra.mxu1 %v17786_v34  ;;  %v685_v6 = vand.u32 4294901760, %v684_v57 }
  0x46   : > { %15140 = vmatprep.mubr.f32.mxu1 %v17801_v39  ;;  %v695_v7 = vand.u32 4294901760, %v694_v5 }
  0x47   : > { %15109 = vmatmul.mubr.f32.gmra.mxu0 %v635_v16 }
  0x48   : > { %15111 = vmatprep.mubr.f32.mxu0 %v645_v23 }
  0x49   : > { %15141 = vmatmul.mubr.f32.gmra.mxu1 %v17806_v56 }
  0x4a   : > { %15143 = vmatprep.mubr.f32.mxu1 %v17817_v4 }
  0x4b   : > { %15112 = vmatmul.mubr.f32.gmra.mxu0 %v655_v29 }
  0x4c   : > { %15114 = vmatprep.mubr.f32.mxu0 %v665_v35 }
  0x4d   : > { %15144 = vmatmul.mubr.f32.gmra.mxu1 %v17830_v11 }
  0x4e   : > { %15174 = vmatprep.mubr.f32.mxu1 %v543_v48 }
  0x4f   : > { %15115 = vmatmul.mubr.f32.gmra.mxu0 %v675_v58 }
  0x50   : > { %15117 = vmatprep.mubr.f32.mxu0 %v685_v6 }
  0x51   : > { %15175 = vmatmul.mubr.f32.vlgmr.msra.gmra.mxu1 %v553_v49 }
  0x52   : > { %15177 = vmatprep.mubr.f32.mxu1 %v563_v50  ;;  %15225 = vmatpush3.msra.mxu1 %v17652_v17  ;;  %v409_v17 = vld [vmem:[%s17925_s25] sm:$0xff] }
  0x53   : > { %15118 = vmatmul.mubr.f32.gmra.mxu0 %v695_v7 }
  0x54   : > { %15148 = vmatprep.mubr.f32.mxu0 %v17692_v40 }
  0x55   : > { %15178 = vmatmul.mubr.f32.gmra.mxu1 %v573_v59 }
  0x56   : > { %15180 = vmatprep.mubr.f32.mxu1 %v583_v60 }
  0x57   : > { %15149 = vmatmul.mubr.f32.vlgmr.msra.gmra.mxu0 %v17696_v41 }
  0x58   : > { %15199 = vmatpush3.msra.mxu0 %v17660_v19  ;;  %15151 = vmatprep.mubr.f32.mxu0 %v17699_v42 }
  0x59   : > { %15181 = vmatmul.mubr.f32.gmra.mxu1 %v593_v61 }
  0x5a   : > { %15183 = vmatprep.mubr.f32.mxu1 %v603_v62 }
  0x5b   : > { %15152 = vmatmul.mubr.f32.gmra.mxu0 %v17716_v51 }
  0x5c   : > { %15154 = vmatprep.mubr.f32.mxu0 %v17721_v52 }
  0x5d   : > { %15184 = vmatmul.mubr.f32.gmra.mxu1 %v613_v10 }
  0x5e   : > { %15186 = vmatprep.mubr.f32.mxu1 %v623_v0 }
  0x5f   : > { %15155 = vmatmul.mubr.f32.gmra.mxu0 %v17724_v53 }
  0x60   : > { %15157 = vmatprep.mubr.f32.mxu0 %v17727_v54 }
  0x61   : > { %15187 = vmatmul.mubr.f32.gmra.mxu1 %v633_v1 }
  0x62   : > { %15189 = vmatprep.mubr.f32.mxu1 %v643_v2 }
  0x63   : > { %15158 = vmatmul.mubr.f32.gmra.mxu0 %v17746_v63 }
  0x64   : > { %15160 = vmatprep.mubr.f32.mxu0 %v17793_v36 }
  0x65   : > { %15190 = vmatmul.mubr.f32.gmra.mxu1 %v653_v8 }
  0x66   : > { %15192 = vmatprep.mubr.f32.mxu1 %v663_v14 }
  0x67   : > { %15161 = vmatmul.mubr.f32.gmra.mxu0 %v17796_v37 }
  0x68   : > { %15163 = vmatprep.mubr.f32.mxu0 %v17799_v38 }
  0x69   : > { %15193 = vmatmul.mubr.f32.gmra.mxu1 %v673_v21 }
  0x6a   : > { %15195 = vmatprep.mubr.f32.mxu1 %v683_v28 }
  0x6b   : > { %15164 = vmatmul.mubr.f32.gmra.mxu0 %v17804_v47 }
  0x6c   : > { %15166 = vmatprep.mubr.f32.mxu0 %v17814_v3 }
  0x6d   : > { %15196 = vmatmul.mubr.f32.gmra.mxu1 %v693_v18 }
  0x6e   : > { %15226 = vmatprep.mubr.f32.mxu1 %v17679_v31 }
  0x6f   : > { %15167 = vmatmul.mubr.f32.gmra.mxu0 %v17828_v9 }
  0x70   : > { %15169 = vmatprep.mubr.f32.mxu0 %v17837_v15 }
  0x71   : > { %15227 = vmatmul.mubr.f32.vlgmr.msra.gmra.mxu1 %v17681_v32 }
  0x72   : > { %15229 = vmatprep.mubr.f32.mxu1 %v17683_v33 }
  0x73   : > { %15170 = vmatmul.mubr.f32.gmra.mxu0 %v692_v22 }
  0x74   : > { %15200 = vmatprep.mubr.f32.mxu0 %v17679_v31  ;;  %v17928_v31 = vand.u32 4294901760, %v409_v17 }
  0x75   : > { %15230 = vmatmul.mubr.f32.gmra.mxu1 %v17701_v43 }
  0x76   : > { %15232 = vmatprep.mubr.f32.mxu1 %v17703_v44  ;;  %22782 = vst [vmem:[#allocation3_spill] sm:$0xff] %v17928_v31 }
  0x77   : > { %15201 = vmatmul.mubr.f32.vlgmr.msra.gmra.mxu0 %v17681_v32 }
  0x78   : > { %15203 = vmatprep.mubr.f32.mxu0 %v17683_v33  ;;  %v17933_v33 = vsub.f32 %v409_v17, %v17928_v31 }
  0x79   : > { %15233 = vmatmul.mubr.f32.gmra.mxu1 %v17705_v45 }
  0x7a   : > { %15235 = vmatprep.mubr.f32.mxu1 %v17707_v46  ;;  %22783 = vst [vmem:[#allocation4_spill] sm:$0xff] %v17933_v33  ;;  %v17937_v41 = vand.u32 4294901760, %v17933_v33 }
  0x7b   : > { %15204 = vmatmul.mubr.f32.gmra.mxu0 %v17701_v43 }
  0x7c   : > { %15206 = vmatprep.mubr.f32.mxu0 %v17703_v44  ;;  %22784 = vst [vmem:[#allocation5_spill] sm:$0xff] %v17937_v41  ;;  %v1655_v43 = vsub.f32 %v17933_v33, %v17937_v41 }
  0x7d   : > { %15236 = vmatmul.mubr.f32.gmra.mxu1 %v17729_v55 }
  0x7e   : > { %15238 = vmatprep.mubr.f32.mxu1 %v17773_v24 }
  0x7f   : > { %15207 = vmatmul.mubr.f32.gmra.mxu0 %v17705_v45 }
  0x80   : > { %15209 = vmatprep.mubr.f32.mxu0 %v17707_v46  ;;  %v17943_v46 = vand.u32 4294901760, %v1655_v43 }
  0x81   : > { %15239 = vmatmul.mubr.f32.gmra.mxu1 %v17775_v25 }
  0x82   : > { %15241 = vmatprep.mubr.f32.mxu1 %v17777_v26  ;;  %22785 = vst [vmem:[#allocation6_spill] sm:$0xff] %v17943_v46 }
  0x83   : > { %15210 = vmatmul.mubr.f32.gmra.mxu0 %v17729_v55 }
  0x84   : > { %15212 = vmatprep.mubr.f32.mxu0 %v17773_v24 }
  0x85   : > { %15242 = vmatmul.mubr.f32.gmra.mxu1 %v17786_v34 }
  0x86   : > { %15244 = vmatprep.mubr.f32.mxu1 %v17801_v39 }
  0x87   : > { %15213 = vmatmul.mubr.f32.gmra.mxu0 %v17775_v25 }
  0x88   : > { %15215 = vmatprep.mubr.f32.mxu0 %v17777_v26 }
  0x89   : > { %15245 = vmatmul.mubr.f32.gmra.mxu1 %v17806_v56 }
  0x8a   : > { %15247 = vmatprep.mubr.f32.mxu1 %v17817_v4 }
  0x8b   : > { %15216 = vmatmul.mubr.f32.gmra.mxu0 %v17786_v34 }
  0x8c   : > { %15218 = vmatprep.mubr.f32.mxu0 %v17801_v39 }
  0x8d   : > { %15248 = vmatmul.mubr.f32.gmra.mxu1 %v17830_v11 }
  0x8e   : > { %15338 = vmatprep.mubr.f32.mxu1 %v17928_v31 }
  0x8f   : > { %15219 = vmatmul.mubr.f32.gmra.mxu0 %v17806_v56 }
  0x90   : > { %15221 = vmatprep.mubr.f32.mxu0 %v17817_v4 }
  0x93   : > { %15222 = vmatmul.mubr.f32.gmra.mxu0 %v17830_v11 }
  0x94   : > { %15282 = vmatprep.mubr.f32.mxu0 %v17943_v46 }
  0xf1   : > { %v15124_v19 = vpop.f32.mrf.mxu1 }
  0xf3   : > { %v17930_v32 = vpop.f32.mrf.mxu1 }
  0xf5   : > { %v15127_v40 = vpop.f32.mrf.mxu1 }
  0xf7   : > { %v17939_v42 = vpop.f32.mrf.mxu1  ;;  %v15098_v44 = vpop.f32.mrf.mxu0 }
  0xf8   : > { %v780_v45 = vadd.f32 %v15124_v19, %v15098_v44 }
  0xf9   : > { %v17945_v48 = vpop.f32.mrf.mxu0  ;;  %v15130_v49 = vpop.f32.mrf.mxu1 }
  0xfb   : > { %v15101_v50 = vpop.f32.mrf.mxu0  ;;  %v17948_v51 = vpop.f32.mrf.mxu1 }
  0xfc   : > { %v792_v52 = vadd.f32 %v15127_v40, %v15101_v50 }
  0xfd   : > { %v17950_v53 = vpop.f32.mrf.mxu0  ;;  %v15133_v54 = vpop.f32.mrf.mxu1 }
  0xff   : > { %v15104_v55 = vpop.f32.mrf.mxu0  ;;  %v17952_v59 = vpop.f32.mrf.mxu1 }
 0x100   : > { %v804_v60 = vadd.f32 %v15130_v49, %v15104_v55 }
 0x101   : > { %v17954_v61 = vpop.f32.mrf.mxu0  ;;  %v15136_v62 = vpop.f32.mrf.mxu1 }
 0x103   : > { %v15107_v63 = vpop.f32.mrf.mxu0  ;;  %v17956_v10 = vpop.f32.mrf.mxu1 }
 0x104   : > { %v17958_v24 = vadd.f32 %v15133_v54, %v15107_v63 }
 0x105   : > { %v17960_v25 = vpop.f32.mrf.mxu0  ;;  %v15139_v26 = vpop.f32.mrf.mxu1 }
 0x107   : > { %v15110_v34 = vpop.f32.mrf.mxu0  ;;  %v17962_v36 = vpop.f32.mrf.mxu1 }
 0x108   : > { %v17964_v37 = vadd.f32 %v15136_v62, %v15110_v34 }
 0x109   : > { %v17966_v38 = vpop.f32.mrf.mxu0  ;;  %v15142_v39 = vpop.f32.mrf.mxu1 }
 0x10b   : > { %v15113_v47 = vpop.f32.mrf.mxu0  ;;  %v17968_v56 = vpop.f32.mrf.mxu1 }
 0x10c   : > { %v17970_v0 = vadd.f32 %v15139_v26, %v15113_v47 }
 0x10d   : > { %v17972_v1 = vpop.f32.mrf.mxu0  ;;  %v17974_v2 = vpop.f32.mrf.mxu1 }
 0x10f   : > { %v15116_v3 = vpop.f32.mrf.mxu0  ;;  %v17976_v4 = vpop.f32.mrf.mxu1 }
 0x110   : > { %v17978_v8 = vadd.f32 %v15142_v39, %v15116_v3 }
 0x111   : > { %v17980_v9 = vpop.f32.mrf.mxu0  ;;  %v15176_v11 = vpop.f32.mrf.mxu1 }
 0x113   : > { %v17982_v12 = vpop.f32.mrf.mxu0  ;;  %v17984_v13 = vpop.f32.mrf.mxu1 }
 0x114   : > { %22786 = vst [vmem:[#allocation7_spill] sm:$0xff] %v17984_v13 }
 0x115   : > { %v17986_v14 = vpop.f32.mrf.mxu0  ;;  %v15179_v15 = vpop.f32.mrf.mxu1 }
 0x117   : > { %v15150_v16 = vpop.f32.mrf.mxu0  ;;  %v17988_v20 = vpop.f32.mrf.mxu1 }
 0x118   : > { %22787 = vst [vmem:[#allocation8_spill] sm:$0xff] %v17988_v20  ;;  %v945_v21 = vadd.f32 %v15150_v16, %v780_v45 }
 0x119   : > { %v17990_v22 = vpop.f32.mrf.mxu0  ;;  %v15182_v23 = vpop.f32.mrf.mxu1 }
 0x11a   : > { %22788 = vst [vmem:[#allocation9_spill] sm:$0xff] %v17990_v22  ;;  %v17992_v27 = vadd.f32 %v15176_v11, %v945_v21  ;;  %v846_v22 = vadd.f32 %v17968_v56, %v17980_v9 }
 0x11b   : > { %v15153_v28 = vpop.f32.mrf.mxu0  ;;  %v17994_v29 = vpop.f32.mrf.mxu1 }
 0x11c   : > { %22789 = vst [vmem:[#allocation10_spill] sm:$0xff] %v17992_v27  ;;  %22790 = vst [vmem:[#allocation11_spill] sm:$0xff] %v17994_v29  ;;  %v959_v30 = vadd.f32 %v15153_v28, %v792_v52 }
 0x11d   : > { %v17996_v18 = vpop.f32.mrf.mxu0  ;;  %v17998_v35 = vpop.f32.mrf.mxu1 }
 0x11e   : > { %v18000_v57 = vadd.f32 %v15179_v15, %v959_v30 }
 0x11f   : > { %v15156_v58 = vpop.f32.mrf.mxu0  ;;  %v18002_v5 = vpop.f32.mrf.mxu1 }
 0x120   : > { %22791 = vst [vmem:[#allocation12_spill] sm:$0xff] %v18000_v57  ;;  %v973_v6 = vadd.f32 %v15156_v58, %v804_v60 }
 0x121   : > { %v18004_v7 = vpop.f32.mrf.mxu0  ;;  %v18006_v17 = vpop.f32.mrf.mxu1 }
 0x122   : > { %v18008_v19 = vadd.f32 %v15182_v23, %v973_v6 }
 0x123   : > { %v18010_v40 = vpop.f32.mrf.mxu0  ;;  %v18012_v43 = vpop.f32.mrf.mxu1 }
 0x124   : > { %22792 = vst [vmem:[#allocation13_spill] sm:$0xff] %v18008_v19 }
 0x125   : > { %v18014_v44 = vpop.f32.mrf.mxu0  ;;  %v15191_v45 = vpop.f32.mrf.mxu1 }
 0x127   : > { %v15162_v49 = vpop.f32.mrf.mxu0  ;;  %v1196_v50 = vpop.f32.mrf.mxu1 }
 0x129   : > { %v993_v52 = vpop.f32.mrf.mxu0  ;;  %v15194_v54 = vpop.f32.mrf.mxu1 }
 0x12b   : > { %v15165_v55 = vpop.f32.mrf.mxu0  ;;  %v1212_v62 = vpop.f32.mrf.mxu1 }
 0x12d   : > { %v1007_v60 = vpop.f32.mrf.mxu0  ;;  %v15197_v63 = vpop.f32.mrf.mxu1 }
 0x12f   : > { %v15168_v26 = vpop.f32.mrf.mxu0  ;;  %v1228_v34 = vpop.f32.mrf.mxu1 }
 0x131   : > { %v1021_v39 = vpop.f32.mrf.mxu0  ;;  %v18016_v47 = vpop.f32.mrf.mxu1 }
 0x132   : > { %22793 = vst [vmem:[#allocation14_spill] sm:$0xff] %v18016_v47 }
 0x133   : > { %v15171_v3 = vpop.f32.mrf.mxu0  ;;  %v18018_v11 = vpop.f32.mrf.mxu1 }
 0x134   : > { %22794 = vst [vmem:[#allocation15_spill] sm:$0xff] %v18018_v11 }
 0x135   : > { %v1035_v15 = vpop.f32.mrf.mxu0  ;;  %v18020_v16 = vpop.f32.mrf.mxu1 }
 0x136   : > { %22795 = vst [vmem:[#allocation16_spill] sm:$0xff] %v18020_v16 }
 0x137   : > { %v18022_v21 = vpop.f32.mrf.mxu0  ;;  %v18024_v23 = vpop.f32.mrf.mxu1 }
 0x138   : > { %22796 = vst [vmem:[#allocation17_spill] sm:$0xff] %v18022_v21  ;;  %22797 = vst [vmem:[#allocation18_spill] sm:$0xff] %v18024_v23 }
 0x139   : > { %v18026_v28 = vpop.f32.mrf.mxu0  ;;  %v18028_v30 = vpop.f32.mrf.mxu1 }
 0x13a   : > { %22798 = vst [vmem:[#allocation19_spill] sm:$0xff] %v18026_v28  ;;  %22799 = vst [vmem:[#allocation20_spill] sm:$0xff] %v18028_v30  ;;  %v1015_v30 = vadd.f32 %v15165_v55, %v17970_v0 }
 0x13b   : > { %v18030_v58 = vpop.f32.mrf.mxu0  ;;  %v18032_v6 = vpop.f32.mrf.mxu1 }
 0x13c   : > { %22800 = vst [vmem:[#allocation21_spill] sm:$0xff] %v18030_v58  ;;  %22801 = vst [vmem:[#allocation22_spill] sm:$0xff] %v18032_v6  ;;  %v1029_v58 = vadd.f32 %v15168_v26, %v17978_v8  ;;  %v1205_v9 = vadd.f32 %v15191_v45, %v1015_v30 }
 0x13d   : > { %v18034_v46 = vpop.f32.mrf.mxu0  ;;  %v18036_v31 = vpop.f32.mrf.mxu1 }
 0x13e   : > { %22802 = vst [vmem:[#allocation23_spill] sm:$0xff] %v18034_v46  ;;  %22803 = vst [vmem:[#allocation24_spill] sm:$0xff] %v18036_v31  ;;  %v834_v46 = vadd.f32 %v17962_v36, %v17972_v1  ;;  %v1022_v31 = vadd.f32 %v1021_v39, %v846_v22  ;;  %v858_v36 = vadd.f32 %v17976_v4, %v17986_v14 }
 0x13f   : > { %v18038_v41 = vpop.f32.mrf.mxu0  ;;  %v18040_v33 = vpop.f32.mrf.mxu1  ;;  %v1001_v1 = vadd.f32 %v15162_v49, %v17964_v37  ;;  %v1221_v0 = vadd.f32 %v15194_v54, %v1029_v58 }
 0x140   : > { %22804 = vst [vmem:[#allocation25_spill] sm:$0xff] %v18038_v41  ;;  %22805 = vst [vmem:[#allocation26_spill] sm:$0xff] %v18040_v33  ;;  %v1008_v20 = vadd.f32 %v1007_v60, %v834_v46  ;;  %v822_v41 = vadd.f32 %v17956_v10, %v17966_v38  ;;  %v1036_v26 = vadd.f32 %v1035_v15, %v858_v36 }
 0x141   : > { %v18042_v11 = vpop.f32.mrf.mxu0  ;;  %v15240_v47 = vpop.f32.mrf.mxu1  ;;  %v810_v10 = vadd.f32 %v17952_v59, %v17960_v25  ;;  %v987_v38 = vadd.f32 %v18010_v40, %v17958_v24  ;;  %v1189_v37 = vadd.f32 %v18006_v17, %v1001_v1  ;;  %v786_v17 = vadd.f32 %v17939_v42, %v17950_v53 }
 0x142   : > { %22806 = vst [vmem:[#allocation27_spill] sm:$0xff] %v18042_v11  ;;  %v864_v11 = vadd.f32 %v17974_v2, %v17982_v12  ;;  %v994_v8 = vadd.f32 %v993_v52, %v822_v41  ;;  %v1213_v2 = vadd.f32 %v1212_v62, %v1022_v31  ;;  %v1229_v31 = vadd.f32 %v1228_v34, %v1036_v26 }
 0x143   : > { %v15211_v23 = vpop.f32.mrf.mxu0  ;;  %v18044_v21 = vpop.f32.mrf.mxu1  ;;  %v980_v49 = vadd.f32 %v18014_v44, %v810_v10  ;;  %v1173_v40 = vadd.f32 %v17998_v35, %v987_v38  ;;  %v774_v35 = vadd.f32 %v17930_v32, %v17945_v48  ;;  %v22810_v48 = vld [vmem:[#allocation13_spill] sm:$0xff] }
 0x144   : > { %22807 = vst [vmem:[#allocation28_spill] sm:$0xff] %v18044_v21  ;;  %v1043_v55 = vadd.f32 %v15171_v3, %v864_v11  ;;  %v1197_v21 = vadd.f32 %v1196_v50, %v1008_v20  ;;  %v1181_v20 = vadd.f32 %v18012_v43, %v994_v8  ;;  %v952_v3 = vadd.f32 %v17996_v18, %v786_v17 }
 0x145   : > { %v18046_v28 = vpop.f32.mrf.mxu0  ;;  %v15243_v27 = vpop.f32.mrf.mxu1 }
 0x146   : > { %v1237_v14 = vadd.f32 %v15197_v63, %v1043_v55  ;;  %v1353_v63 = vadd.f32 %v15211_v23, %v1173_v40  ;;  %v22809_v23 = vld [vmem:[#allocation11_spill] sm:$0xff] }
 0x147   : > { %v15214_v13 = vpop.f32.mrf.mxu0  ;;  %v1532_v16 = vpop.f32.mrf.mxu1  ;;  %v22811_v18 = vld [vmem:[#allocation25_spill] sm:$0xff] }
 0x148   : > { %v1341_v30 = vadd.f32 %v22811_v18, %v22810_v48  ;;  %v22831_v48 = vld [vmem:[#allocation17_spill] sm:$0xff] }
 0x149   : > { %v1358_v6 = vpop.f32.mrf.mxu0  ;;  %v15246_v33 = vpop.f32.mrf.mxu1  ;;  %v22815_v8 = vld [vmem:[#allocation27_spill] sm:$0xff] }
 0x14a   : > { %v1359_v44 = vadd.f32 %v1358_v6, %v1181_v20 }
 0x14b   : > { %v15217_v57 = vpop.f32.mrf.mxu0  ;;  %v1544_v29 = vpop.f32.mrf.mxu1  ;;  %v22808_v11 = vld [vmem:[#allocation28_spill] sm:$0xff] }
 0x14c   : > { %v1377_v46 = vadd.f32 %v15217_v57, %v1205_v9  ;;  %v1365_v57 = vadd.f32 %v15214_v13, %v1189_v37 }
 0x14d   : > { %v1370_v56 = vpop.f32.mrf.mxu0  ;;  %v15249_v50 = vpop.f32.mrf.mxu1 }
 0x14e   : > { %v1371_v22 = vadd.f32 %v1370_v56, %v1197_v21  ;;  %v1539_v52 = vadd.f32 %v15243_v27, %v1377_v46  ;;  %v1527_v34 = vadd.f32 %v15240_v47, %v1365_v57 }
 0x14f   : > { %v15220_v19 = vpop.f32.mrf.mxu0  ;;  %v1556_v39 = vpop.f32.mrf.mxu1 }
 0x150   : > { %v1389_v12 = vadd.f32 %v15220_v19, %v1221_v0  ;;  %v1533_v43 = vadd.f32 %v1532_v16, %v1371_v22  ;;  %v18079_v42 = vand.u32 4294901760, %v1539_v52  ;;  %v18106_v6 = vand.u32 4294901760, %v1527_v34  ;;  %v22814_v0 = vld [vmem:[#allocation8_spill] sm:$0xff]  ;;  %v22819_v22 = vld [vmem:[#allocation21_spill] sm:$0xff] }
 0x151   : > { %v1382_v4 = vpop.f32.mrf.mxu0  ;;  %v1133_v55 = vadd.f32 %v22814_v0, %v952_v3 }
 0x152   : > { %v1551_v45 = vadd.f32 %v15246_v33, %v1389_v12  ;;  %v1383_v41 = vadd.f32 %v1382_v4, %v1213_v2  ;;  %v798_v33 = vadd.f32 %v17948_v51, %v17954_v61  ;;  %v18091_v15 = vand.u32 4294901760, %v1533_v43  ;;  %v22816_v2 = vld [vmem:[#allocation26_spill] sm:$0xff] }
 0x153   : > { %v15223_v19 = vpop.f32.mrf.mxu0  ;;  %v18110_v36 = vsub.f32 %v1539_v52, %v18079_v42 }
 0x154   : > { %v18068_v59 = vand.u32 4294901760, %v1551_v45  ;;  %v1545_v25 = vadd.f32 %v1544_v29, %v1383_v41  ;;  %v1401_v24 = vadd.f32 %v15223_v19, %v1237_v14  ;;  %v966_v27 = vadd.f32 %v18004_v7, %v798_v33  ;;  %v22818_v14 = vld [vmem:[#allocation12_spill] sm:$0xff]  ;;  %v22823_v33 = vld [vmem:[#allocation23_spill] sm:$0xff] }
 0x155   : > { %v1394_v54 = vpop.f32.mrf.mxu0  ;;  %v1165_v29 = vadd.f32 %v18002_v5, %v980_v49  ;;  %v1521_v5 = vadd.f32 %v22808_v11, %v1359_v44  ;;  %v18129_v10 = vsub.f32 %v1533_v43, %v18091_v15  ;;  %v22820_v41 = vld [vmem:[#allocation20_spill] sm:$0xff]  ;;  %v18155_v52 = vand.u32 4294901760, %v18110_v36  ;;  %v22824_v44 = vld [vmem:[#allocation22_spill] sm:$0xff] }
 0x156   : > { %v18075_v62 = vand.u32 4294901760, %v1545_v25  ;;  %v1563_v13 = vadd.f32 %v15249_v50, %v1401_v24  ;;  %v1395_v60 = vadd.f32 %v1394_v54, %v1229_v31  ;;  %v18082_v51 = vsub.f32 %v1551_v45, %v18068_v59  ;;  %v22822_v24 = vld [vmem:[#allocation9_spill] sm:$0xff] }
 0x157   : > { %v1347_v7 = vadd.f32 %v18046_v28, %v1165_v29  ;;  %v1149_v32 = vadd.f32 %v22809_v23, %v966_v27  ;;  %v22812_v28 = vld [vmem:[#allocation24_spill] sm:$0xff]  ;;  %v18125_v12 = vand.u32 4294901760, %v1521_v5  ;;  %v1329_v45 = vadd.f32 %v22819_v22, %v22818_v14  ;;  %22821 = vst [vmem:[#allocation13_spill] sm:$0xff] %v18155_v52 }
 0x158   : > { %v18084_v53 = vand.u32 4294901760, %v1563_v13  ;;  %v1557_v61 = vadd.f32 %v1556_v39, %v1395_v60  ;;  %v18094_v47 = vsub.f32 %v1545_v25, %v18075_v62  ;;  %v1515_v58 = vadd.f32 %v22812_v28, %v1353_v63  ;;  %v410_v25 = vld [vmem:[%s17925_s25 + $0x8] sm:$0xff] }
 0x159   : > { %v18120_v9 = vand.u32 4294901760, %v18082_v51  ;;  %v1335_v26 = vadd.f32 %v22815_v8, %v1149_v32  ;;  %v1509_v46 = vadd.f32 %v22816_v2, %v1347_v7  ;;  %v1503_v49 = vadd.f32 %v22820_v41, %v1341_v30  ;;  %v22826_v63 = vld [vmem:[#allocation16_spill] sm:$0xff]  ;;  %v22830_v32 = vld [vmem:[#allocation10_spill] sm:$0xff]  ;;  %v411_v2 = vld [vmem:[%s17925_s25 + $0x10] sm:$0xff] }
 0x15a   : > { %v18097_v16 = vsub.f32 %v1563_v13, %v18084_v53  ;;  %v18099_v21 = vand.u32 4294901760, %v1557_v61  ;;  %15250 = vmatprep.subr.mxu0 %v18084_v53  ;;  %v18138_v4 = vand.u32 4294901760, %v18094_v47  ;;  %v18143_v20 = vand.u32 4294901760, %v1515_v58  ;;  %v22832_v30 = vld [vmem:[#allocation18_spill] sm:$0xff] }
 0x15b   : > { %15251 = vmatpush3.msra.mxu0 %v18084_v53  ;;  %22813 = vst [vmem:[#allocation28_spill] sm:$0xff] %v18120_v9  ;;  %v18146_v31 = vsub.f32 %v1527_v34, %v18106_v6  ;;  %v1830_v50 = vsub.f32 %v18082_v51, %v18120_v9  ;;  %v938_v17 = vadd.f32 %v22822_v24, %v774_v35  ;;  %v18161_v43 = vand.u32 4294901760, %v1509_v46  ;;  %v418_v9 = vld [vmem:[%s17925_s25 + $0x48] sm:$0xff] }
 0x15c   : > { %v18113_v1 = vsub.f32 %v1557_v61, %v18099_v21  ;;  %15252 = vmatprep.subr.mxu0 %v18099_v21  ;;  %v18117_v56 = vand.u32 4294901760, %v18097_v16  ;;  %22817 = vst [vmem:[#allocation11_spill] sm:$0xff] %v18138_v4  ;;  %v1323_v40 = vadd.f32 %v22823_v33, %v1133_v55  ;;  %v1497_v54 = vadd.f32 %v22824_v44, %v1335_v26 }
 0x15d   : > { %15253 = vmatpush3.msra.mxu0 %v18099_v21  ;;  %v18165_v13 = vsub.f32 %v1521_v5, %v18125_v12  ;;  %v1837_v27 = vsub.f32 %v18094_v47, %v18138_v4  ;;  %v18171_v29 = vand.u32 4294901760, %v18129_v10  ;;  %v1491_v34 = vadd.f32 %v22826_v63, %v1329_v45  ;;  %v22829_v5 = vld [vmem:[#allocation7_spill] sm:$0xff] }
 0x15e   : > { %15254 = vmatprep.subr.mxu0 %v18068_v59  ;;  %v1816_v38 = vsub.f32 %v18097_v16, %v18117_v56  ;;  %v18135_v37 = vand.u32 4294901760, %v18113_v1  ;;  %v18174_v39 = vand.u32 4294901760, %v1503_v49  ;;  %v18177_v61 = vand.u32 4294901760, %v410_v25  ;;  %v413_v63 = vld [vmem:[%s17925_s25 + $0x20] sm:$0xff] }
 0x15f   : > { %15255 = vmatpush3.msra.mxu0 %v18068_v59  ;;  %22825 = vst [vmem:[#allocation25_spill] sm:$0xff] %v18171_v29  ;;  %v18180_v35 = vsub.f32 %v1515_v58, %v18143_v20  ;;  %v1831_v3 = vand.u32 4294901760, %v1830_v50  ;;  %v1844_v7 = vsub.f32 %v18110_v36, %v18155_v52  ;;  %v18186_v11 = vand.u32 4294901760, %v18146_v31  ;;  %v22836_v50 = vld [vmem:[#allocation14_spill] sm:$0xff] }
 0x160   : > { %15256 = vmatprep.subr.mxu0 %v18075_v62  ;;  %v1817_v57 = vand.u32 4294901760, %v1816_v38  ;;  %v1823_v19 = vsub.f32 %v18113_v1, %v18135_v37  ;;  %22827 = vst [vmem:[#allocation24_spill] sm:$0xff] %v18177_v61  ;;  %v1117_v23 = vadd.f32 %v22829_v5, %v938_v17  ;;  %v1317_v18 = vadd.f32 %v22831_v48, %v22830_v32  ;;  %v22834_v38 = vld [vmem:[#allocation19_spill] sm:$0xff] }
 0x161   : > { %15257 = vmatpush3.msra.mxu0 %v18075_v62  ;;  %22828 = vst [vmem:[#allocation8_spill] sm:$0xff] %v18186_v11  ;;  %v1485_v28 = vadd.f32 %v22832_v30, %v1323_v40  ;;  %v18192_v58 = vand.u32 4294901760, %v1497_v54  ;;  %v18196_v0 = vsub.f32 %v1509_v46, %v18161_v43  ;;  %v1838_v55 = vand.u32 4294901760, %v1837_v27 }
 0x162   : > { %15258 = vmatprep.subr.mxu0 %v18079_v42  ;;  %15306 = vmatprep.subr.mxu1 %v1817_v57  ;;  %v1824_v60 = vand.u32 4294901760, %v1823_v19  ;;  %v1851_v8 = vsub.f32 %v18129_v10, %v18171_v29  ;;  %v18202_v26 = vand.u32 4294901760, %v18165_v13  ;;  %v1311_v14 = vadd.f32 %v22834_v38, %v1117_v23  ;;  %v412_v19 = vld [vmem:[%s17925_s25 + $0x18] sm:$0xff] }
 0x163   : > { %15259 = vmatpush3.msra.mxu0 %v18079_v42  ;;  %15307 = vmatpush3.msra.mxu1 %v1817_v57  ;;  %v18206_v22 = vand.u32 4294901760, %v1491_v34  ;;  %v18210_v46 = vsub.f32 %v1503_v49, %v18174_v39  ;;  %v1845_v45 = vand.u32 4294901760, %v1844_v7  ;;  %v1858_v41 = vsub.f32 %v18146_v31, %v18186_v11  ;;  %v416_v11 = vld [vmem:[%s17925_s25 + $0x38] sm:$0xff] }
 0x164   : > { %15260 = vmatprep.subr.mxu0 %v18091_v15  ;;  %15308 = vmatprep.subr.mxu1 %v1824_v60  ;;  %22833 = vst [vmem:[#allocation27_spill] sm:$0xff] %v18202_v26  ;;  %v18216_v57 = vand.u32 4294901760, %v18180_v35  ;;  %v1479_v24 = vadd.f32 %v22836_v50, %v1317_v18  ;;  %v18220_v17 = vand.u32 4294901760, %v1485_v28  ;;  %v18224_v49 = vsub.f32 %v410_v25, %v18177_v61 }
 0x165   : > { %15261 = vmatpush3.msra.mxu0 %v18091_v15  ;;  %15309 = vmatpush3.msra.mxu1 %v1824_v60  ;;  %v18226_v33 = vand.u32 4294901760, %v411_v2  ;;  %v18229_v40 = vsub.f32 %v1497_v54, %v18192_v58  ;;  %v1852_v44 = vand.u32 4294901760, %v1851_v8  ;;  %v1865_v60 = vsub.f32 %v18165_v13, %v18202_v26 }
 0x166   : > { %15262 = vmatprep.subr.mxu0 %v18106_v6  ;;  %15310 = vmatprep.subr.mxu1 %v1831_v3  ;;  %22835 = vst [vmem:[#allocation26_spill] sm:$0xff] %v18216_v57  ;;  %22837 = vst [vmem:[#allocation12_spill] sm:$0xff] %v18224_v49  ;;  %v18235_v27 = vand.u32 4294901760, %v18196_v0  ;;  %v18240_v25 = vand.u32 4294901760, %v412_v19  ;;  %v18243_v54 = vsub.f32 %v1491_v34, %v18206_v22  ;;  %v1859_v5 = vand.u32 4294901760, %v1858_v41 }
 0x167   : > { %15263 = vmatpush3.msra.mxu0 %v18106_v6  ;;  %15311 = vmatpush3.msra.mxu1 %v1831_v3  ;;  %22838 = vst [vmem:[#allocation21_spill] sm:$0xff] %v18226_v33  ;;  %v22840_v3 = vld [vmem:[#allocation15_spill] sm:$0xff]  ;;  %v1872_v23 = vsub.f32 %v18180_v35, %v18216_v57  ;;  %v18249_v32 = vand.u32 4294901760, %v18210_v46  ;;  %v18251_v48 = vand.u32 4294901760, %v1479_v24  ;;  %v18255_v18 = vand.u32 4294901760, %v18224_v49 }
 0x168   : > { %15264 = vmatprep.subr.mxu0 %v18125_v12  ;;  %15312 = vmatprep.subr.mxu1 %v1838_v55  ;;  %22839 = vst [vmem:[#allocation20_spill] sm:$0xff] %v18235_v27  ;;  %v1473_v7 = vadd.f32 %v22840_v3, %v1311_v14  ;;  %22841 = vst [vmem:[#allocation9_spill] sm:$0xff] %v18240_v25  ;;  %v18258_v34 = vsub.f32 %v411_v2, %v18226_v33  ;;  %v18260_v30 = vand.u32 4294901760, %v413_v63 }
 0x169   : > { %15265 = vmatpush3.msra.mxu0 %v18125_v12  ;;  %15313 = vmatpush3.msra.mxu1 %v1838_v55  ;;  %22842 = vst [vmem:[#allocation23_spill] sm:$0xff] %v18249_v32  ;;  %22843 = vst [vmem:[#allocation22_spill] sm:$0xff] %v18251_v48  ;;  %v414_v55 = vld [vmem:[%s17925_s25 + $0x28] sm:$0xff]  ;;  %v18264_v8 = vsub.f32 %v1485_v28, %v18220_v17  ;;  %v1866_v38 = vand.u32 4294901760, %v1865_v60  ;;  %v1879_v14 = vsub.f32 %v18196_v0, %v18235_v27 }
 0x16a   : > { %15266 = vmatprep.subr.mxu0 %v18143_v20  ;;  %15314 = vmatprep.subr.mxu1 %v1845_v45  ;;  %22844 = vst [vmem:[#allocation16_spill] sm:$0xff] %v18255_v18  ;;  %22845 = vst [vmem:[#allocation7_spill] sm:$0xff] %v18258_v34  ;;  %v18272_v41 = vand.u32 4294901760, %v1473_v7  ;;  %v18276_v2 = vsub.f32 %v412_v19, %v18240_v25  ;;  %v1873_v28 = vand.u32 4294901760, %v1872_v23  ;;  %v18284_v60 = vand.u32 4294901760, %v414_v55  ;;  %v415_v23 = vld [vmem:[%s17925_s25 + $0x30] sm:$0xff] }
 0x16b   : > { %15267 = vmatpush3.msra.mxu0 %v18143_v20  ;;  %15315 = vmatpush3.msra.mxu1 %v1845_v45  ;;  %22846 = vst [vmem:[#allocation10_spill] sm:$0xff] %v18260_v30  ;;  %v18270_v45 = vand.u32 4294901760, %v18229_v40  ;;  %v1886_v50 = vsub.f32 %v18210_v46, %v18249_v32  ;;  %v18287_v3 = vsub.f32 %v1479_v24, %v18251_v48  ;;  %v1880_v32 = vand.u32 4294901760, %v1879_v14 }
 0x16c   : > { %15268 = vmatprep.subr.mxu0 %v18161_v43  ;;  %15316 = vmatprep.subr.mxu1 %v1852_v44  ;;  %22848 = vst [vmem:[#allocation18_spill] sm:$0xff] %v18276_v2  ;;  %22850 = vst [vmem:[#allocation14_spill] sm:$0xff] %v18284_v60  ;;  %v1665_v19 = vsub.f32 %v18224_v49, %v18255_v18  ;;  %v18300_v24 = vand.u32 4294901760, %v18264_v8  ;;  %v18303_v57 = vsub.f32 %v413_v63, %v18260_v30  ;;  %v417_v18 = vld [vmem:[%s17925_s25 + $0x40] sm:$0xff] }
 0x16d   : > { %15269 = vmatpush3.msra.mxu0 %v18161_v43  ;;  %15317 = vmatpush3.msra.mxu1 %v1852_v44  ;;  %22847 = vst [vmem:[#allocation17_spill] sm:$0xff] %v18270_v45  ;;  %v18282_v44 = vand.u32 4294901760, %v18243_v54  ;;  %v1893_v27 = vsub.f32 %v18229_v40, %v18270_v45  ;;  %v18310_v26 = vand.u32 4294901760, %v18276_v2  ;;  %v1887_v14 = vand.u32 4294901760, %v1886_v50 }
 0x16e   : > { %15270 = vmatprep.subr.mxu0 %v18174_v39  ;;  %15318 = vmatprep.subr.mxu1 %v1859_v5  ;;  %22852 = vst [vmem:[#allocation29_spill] sm:$0xff] %v18300_v24  ;;  %22853 = vst [vmem:[#allocation30_spill] sm:$0xff] %v18303_v57  ;;  %v18317_v63 = vsub.f32 %v414_v55, %v18284_v60  ;;  %v18319_v29 = vand.u32 4294901760, %v415_v23  ;;  %v18327_v52 = vand.u32 4294901760, %v18287_v3 }
 0x16f   : > { %15271 = vmatpush3.msra.mxu0 %v18174_v39  ;;  %15319 = vmatpush3.msra.mxu1 %v1859_v5  ;;  %22849 = vst [vmem:[#allocation19_spill] sm:$0xff] %v18282_v44  ;;  %v18293_v5 = vand.u32 4294901760, %v18258_v34  ;;  %22854 = vst [vmem:[#allocation31_spill] sm:$0xff] %v18310_v26  ;;  %v1900_v45 = vsub.f32 %v18243_v54, %v18282_v44  ;;  %v1894_v50 = vand.u32 4294901760, %v1893_v27  ;;  %v18333_v44 = vand.u32 4294901760, %v18303_v57 }
 0x170   : > { %15272 = vmatprep.subr.mxu0 %v18192_v58  ;;  %15320 = vmatprep.subr.mxu1 %v1866_v38  ;;  %22855 = vst [vmem:[#allocation32_spill] sm:$0xff] %v18317_v63  ;;  %22856 = vst [vmem:[#allocation33_spill] sm:$0xff] %v18319_v29  ;;  %v1907_v55 = vsub.f32 %v18264_v8, %v18300_v24  ;;  %v18346_v24 = vand.u32 4294901760, %v18317_v63  ;;  %v18349_v4 = vsub.f32 %v415_v23, %v18319_v29 }
 0x171   : > { %15273 = vmatpush3.msra.mxu0 %v18192_v58  ;;  %15321 = vmatpush3.msra.mxu1 %v1866_v38  ;;  %22851 = vst [vmem:[#allocation15_spill] sm:$0xff] %v18293_v5  ;;  %v18306_v38 = vsub.f32 %v1473_v7, %v18272_v41  ;;  %v18322_v7 = vand.u32 4294901760, %v1665_v19  ;;  %22858 = vst [vmem:[#allocation35_spill] sm:$0xff] %v18327_v52  ;;  %v1685_v19 = vsub.f32 %v18276_v2, %v18310_v26 }
 0x172   : > { %15274 = vmatprep.subr.mxu0 %v18206_v22  ;;  %15322 = vmatprep.subr.mxu1 %v1873_v28  ;;  %22859 = vst [vmem:[#allocation36_spill] sm:$0xff] %v18333_v44  ;;  %v1901_v27 = vand.u32 4294901760, %v1900_v45  ;;  %22862 = vst [vmem:[#allocation39_spill] sm:$0xff] %v18346_v24  ;;  %v1914_v26 = vsub.f32 %v18287_v3, %v18327_v52  ;;  %v1695_v45 = vsub.f32 %v18303_v57, %v18333_v44  ;;  %v420_v44 = vld [vmem:[%s17925_s25 + $0x58] sm:$0xff] }
 0x173   : > { %15275 = vmatpush3.msra.mxu0 %v18206_v22  ;;  %15323 = vmatpush3.msra.mxu1 %v1873_v28  ;;  %22857 = vst [vmem:[#allocation34_spill] sm:$0xff] %v18322_v7  ;;  %v1675_v28 = vsub.f32 %v18258_v34, %v18293_v5  ;;  %v18341_v5 = vand.u32 4294901760, %v18306_v38  ;;  %22863 = vst [vmem:[#allocation40_spill] sm:$0xff] %v18349_v4  ;;  %v18363_v2 = vand.u32 4294901760, %v417_v18 }
 0x174   : > { %15276 = vmatprep.subr.mxu0 %v18220_v17  ;;  %15324 = vmatprep.subr.mxu1 %v1880_v32 }
 0x175   : > { %15277 = vmatpush3.msra.mxu0 %v18220_v17  ;;  %15325 = vmatpush3.msra.mxu1 %v1880_v32  ;;  %v18335_v32 = vand.u32 4294901760, %v416_v11  ;;  %22861 = vst [vmem:[#allocation38_spill] sm:$0xff] %v18341_v5  ;;  %22866 = vst [vmem:[#allocation43_spill] sm:$0xff] %v18363_v2  ;;  %v18388_v52 = vsub.f32 %v417_v18, %v18363_v2 }
 0x176   : > { %15278 = vmatprep.subr.mxu0 %v18251_v48  ;;  %15326 = vmatprep.subr.mxu1 %v1887_v14 }
 0x177   : > { %22860 = vst [vmem:[#allocation37_spill] sm:$0xff] %v18335_v32  ;;  %15279 = vmatpush3.msra.mxu0 %v18251_v48  ;;  %15327 = vmatpush3.msra.mxu1 %v1887_v14  ;;  %v18352_v14 = vand.u32 4294901760, %v1675_v28  ;;  %v1908_v48 = vand.u32 4294901760, %v1907_v55  ;;  %v18361_v23 = vsub.f32 %v416_v11, %v18335_v32  ;;  %v18366_v28 = vand.u32 4294901760, %v1685_v19  ;;  %22872 = vst [vmem:[#allocation49_spill] sm:$0xff] %v18388_v52 }
 0x178   : > { %15280 = vmatprep.subr.mxu0 %v18272_v41  ;;  %15328 = vmatprep.subr.mxu1 %v1894_v50  ;;  %v1705_v55 = vsub.f32 %v18317_v63, %v18346_v24  ;;  %v18374_v11 = vand.u32 4294901760, %v18349_v4  ;;  %v1915_v19 = vand.u32 4294901760, %v1914_v26 }
 0x179   : > { %15281 = vmatpush3.msra.mxu0 %v18272_v41  ;;  %15329 = vmatpush3.msra.mxu1 %v1894_v50  ;;  %22864 = vst [vmem:[#allocation41_spill] sm:$0xff] %v18352_v14  ;;  %22865 = vst [vmem:[#allocation42_spill] sm:$0xff] %v18361_v23  ;;  %v1921_v50 = vsub.f32 %v18306_v38, %v18341_v5  ;;  %v18385_v5 = vand.u32 4294901760, %v18361_v23 }
 0x17a   : > { %15283 = vmatmul.mubr.f32.vlgmr.msra.gmra.mxu0 %v18322_v7  ;;  %15330 = vmatprep.subr.mxu1 %v1901_v27  ;;  %22867 = vst [vmem:[#allocation44_spill] sm:$0xff] %v18366_v28  ;;  %22868 = vst [vmem:[#allocation45_spill] sm:$0xff] %v18374_v11  ;;  %v18376_v7 = vand.u32 4294901760, %v418_v9  ;;  %v18393_v26 = vand.u32 4294901760, %v1705_v55  ;;  %v18410_v55 = vand.u32 4294901760, %v420_v44 }
 0x17b   : > { %15362 = vmatprep.subr.mxu0 %v18097_v16  ;;  %15331 = vmatpush3.msra.mxu1 %v1901_v27  ;;  %v419_v27 = vld [vmem:[%s17925_s25 + $0x50] sm:$0xff]  ;;  %22871 = vst [vmem:[#allocation48_spill] sm:$0xff] %v18385_v5  ;;  %v1922_v24 = vand.u32 4294901760, %v1921_v50  ;;  %v1725_v18 = vsub.f32 %v18361_v23, %v18385_v5  ;;  %v18408_v50 = vand.u32 4294901760, %v18388_v52 }
 0x17c   : > { %15363 = vmatpush3.msra.mxu0 %v18097_v16  ;;  %15332 = vmatprep.subr.mxu1 %v1908_v48  ;;  %22869 = vst [vmem:[#allocation46_spill] sm:$0xff] %v18376_v7  ;;  %v18382_v16 = vand.u32 4294901760, %v1695_v45  ;;  %22873 = vst [vmem:[#allocation50_spill] sm:$0xff] %v18393_v26  ;;  %v18400_v45 = vand.u32 4294901760, %v419_v27 }
 0x17d   : > { %15364 = vmatprep.subr.mxu0 %v18113_v1  ;;  %15285 = vmatprep.mubr.f32.mxu0 %v18352_v14  ;;  %22876 = vst [vmem:[#allocation53_spill] sm:$0xff] %v18408_v50  ;;  %22877 = vst [vmem:[#allocation54_spill] sm:$0xff] %v18410_v55 }
 0x17e   : > { %15333 = vmatpush3.msra.mxu1 %v1908_v48  ;;  %15365 = vmatpush3.msra.mxu0 %v18113_v1  ;;  %22870 = vst [vmem:[#allocation47_spill] sm:$0xff] %v18382_v16  ;;  %v1715_v1 = vsub.f32 %v18349_v4, %v18374_v11  ;;  %v18398_v48 = vsub.f32 %v418_v9, %v18376_v7  ;;  %22875 = vst [vmem:[#allocation52_spill] sm:$0xff] %v18400_v45  ;;  %v421_v9 = vld [vmem:[%s17925_s25 + $0x60] sm:$0xff] }
 0x17f   : > { %15286 = vmatmul.mubr.f32.gmra.mxu0 %v18366_v28  ;;  %15334 = vmatprep.subr.mxu1 %v1915_v19 }
 0x180   : > { %15366 = vmatprep.subr.mxu0 %v18082_v51  ;;  %15335 = vmatpush3.msra.mxu1 %v1915_v19  ;;  %22874 = vst [vmem:[#allocation51_spill] sm:$0xff] %v18398_v48  ;;  %v18419_v19 = vand.u32 4294901760, %v18398_v48 }
 0x181   : > { %15367 = vmatpush3.msra.mxu0 %v18082_v51  ;;  %15336 = vmatprep.subr.mxu1 %v1922_v24  ;;  %v18416_v51 = vand.u32 4294901760, %v1715_v1  ;;  %v1735_v1 = vsub.f32 %v18388_v52, %v18408_v50 }
 0x182   : > { %15368 = vmatprep.subr.mxu0 %v18094_v47  ;;  %15288 = vmatprep.mubr.f32.mxu0 %v18382_v16  ;;  %22879 = vst [vmem:[#allocation56_spill] sm:$0xff] %v18419_v19  ;;  %v18422_v16 = vsub.f32 %v419_v27, %v18400_v45  ;;  %v18436_v27 = vand.u32 4294901760, %v421_v9 }
 0x183   : > { %15337 = vmatpush3.msra.mxu1 %v1922_v24  ;;  %15369 = vmatpush3.msra.mxu0 %v18094_v47  ;;  %22878 = vst [vmem:[#allocation55_spill] sm:$0xff] %v18416_v51  ;;  %v422_v24 = vld [vmem:[%s17925_s25 + $0x68] sm:$0xff]  ;;  %v18429_v47 = vand.u32 4294901760, %v1725_v18 }
 0x184   : > { %15289 = vmatmul.mubr.f32.gmra.mxu0 %v18393_v26  ;;  %15339 = vmatmul.mubr.f32.vlgmr.msra.gmra.mxu1 %v18177_v61  ;;  %22880 = vst [vmem:[#allocation57_spill] sm:$0xff] %v18422_v16  ;;  %v18434_v26 = vsub.f32 %v420_v44, %v18410_v55  ;;  %22883 = vst [vmem:[#allocation60_spill] sm:$0xff] %v18436_v27  ;;  %v18445_v18 = vand.u32 4294901760, %v18422_v16  ;;  %v18447_v28 = vand.u32 4294901760, %v422_v24  ;;  %v423_v44 = vld [vmem:[%s17925_s25 + $0x70] sm:$0xff] }
 0x185   : > { %15370 = vmatprep.subr.mxu0 %v18110_v36  ;;  %15418 = vmatprep.subr.mxu1 %v18084_v53  ;;  %22881 = vst [vmem:[#allocation58_spill] sm:$0xff] %v18429_v47  ;;  %v18474_v61 = vand.u32 4294901760, %v423_v44 }
 0x186   : > { %15371 = vmatpush3.msra.mxu0 %v18110_v36  ;;  %15419 = vmatpush3.msra.mxu1 %v18084_v53  ;;  %22882 = vst [vmem:[#allocation59_spill] sm:$0xff] %v18434_v26  ;;  %v1745_v36 = vsub.f32 %v18398_v48, %v18419_v19  ;;  %22884 = vst [vmem:[#allocation61_spill] sm:$0xff] %v18445_v18  ;;  %v18457_v14 = vand.u32 4294901760, %v18434_v26 }
 0x187   : > { %15372 = vmatprep.subr.mxu0 %v18129_v10  ;;  %15420 = vmatprep.subr.mxu1 %v18099_v21  ;;  %22885 = vst [vmem:[#allocation62_spill] sm:$0xff] %v18447_v28  ;;  %22891 = vst [vmem:[#allocation68_spill] sm:$0xff] %v18474_v61 }
 0x188   : > { %15291 = vmatprep.mubr.f32.mxu0 %v18416_v51  ;;  %15341 = vmatprep.mubr.f32.mxu1 %v18226_v33  ;;  %v18454_v51 = vand.u32 4294901760, %v1735_v1  ;;  %22887 = vst [vmem:[#allocation64_spill] sm:$0xff] %v18457_v14  ;;  %v18460_v33 = vsub.f32 %v421_v9, %v18436_v27  ;;  %v1755_v1 = vsub.f32 %v18422_v16, %v18445_v18 }
 0x189   : > { %15373 = vmatpush3.msra.mxu0 %v18129_v10  ;;  %15421 = vmatpush3.msra.mxu1 %v18099_v21  ;;  %v424_v10 = vld [vmem:[%s17925_s25 + $0x78] sm:$0xff] }
 0x18a   : > { %15292 = vmatmul.mubr.f32.gmra.mxu0 %v18429_v47  ;;  %15342 = vmatmul.mubr.f32.gmra.mxu1 %v18240_v25  ;;  %22886 = vst [vmem:[#allocation63_spill] sm:$0xff] %v18454_v51  ;;  %22888 = vst [vmem:[#allocation65_spill] sm:$0xff] %v18460_v33  ;;  %v18467_v47 = vand.u32 4294901760, %v1745_v36  ;;  %v18472_v25 = vsub.f32 %v422_v24, %v18447_v28  ;;  %v18483_v9 = vand.u32 4294901760, %v18460_v33  ;;  %v18485_v36 = vand.u32 4294901760, %v424_v10 }
 0x18b   : > { %15374 = vmatprep.subr.mxu0 %v18146_v31  ;;  %15422 = vmatprep.subr.mxu1 %v18068_v59  ;;  %v18491_v24 = vand.u32 4294901760, %v1755_v1 }
 0x18c   : > { %15375 = vmatpush3.msra.mxu0 %v18146_v31  ;;  %15423 = vmatpush3.msra.mxu1 %v18068_v59  ;;  %22889 = vst [vmem:[#allocation66_spill] sm:$0xff] %v18467_v47  ;;  %22890 = vst [vmem:[#allocation67_spill] sm:$0xff] %v18472_v25  ;;  %v1765_v31 = vsub.f32 %v18434_v26, %v18457_v14  ;;  %v1775_v1 = vsub.f32 %v18460_v33, %v18483_v9 }
 0x18d   : > { %15376 = vmatprep.subr.mxu0 %v18165_v13  ;;  %15424 = vmatprep.subr.mxu1 %v18075_v62  ;;  %22892 = vst [vmem:[#allocation69_spill] sm:$0xff] %v18483_v9  ;;  %22893 = vst [vmem:[#allocation70_spill] sm:$0xff] %v18485_v36 }
 0x18e   : > { %15294 = vmatprep.mubr.f32.mxu0 %v18454_v51  ;;  %15344 = vmatprep.mubr.f32.mxu1 %v18260_v30  ;;  %22894 = vst [vmem:[#allocation71_spill] sm:$0xff] %v18491_v24  ;;  %v18494_v51 = vand.u32 4294901760, %v18472_v25  ;;  %v18497_v30 = vsub.f32 %v423_v44, %v18474_v61 }
 0x18f   : > { %15377 = vmatpush3.msra.mxu0 %v18165_v13  ;;  %15425 = vmatpush3.msra.mxu1 %v18075_v62  ;;  %v18503_v13 = vand.u32 4294901760, %v1765_v31 }
 0x190   : > { %15295 = vmatmul.mubr.f32.gmra.mxu0 %v18467_v47  ;;  %15345 = vmatmul.mubr.f32.gmra.mxu1 %v18284_v60  ;;  %22895 = vst [vmem:[#allocation72_spill] sm:$0xff] %v18494_v51  ;;  %22896 = vst [vmem:[#allocation73_spill] sm:$0xff] %v18497_v30  ;;  %v18508_v47 = vsub.f32 %v424_v10, %v18485_v36  ;;  %v18517_v44 = vand.u32 4294901760, %v18497_v30  ;;  %v18523_v10 = vand.u32 4294901760, %v1775_v1 }
 0x191   : > { %15378 = vmatprep.subr.mxu0 %v18180_v35  ;;  %15426 = vmatprep.subr.mxu1 %v18079_v42  ;;  %22897 = vst [vmem:[#allocation74_spill] sm:$0xff] %v18503_v13 }
 0x192   : > { %15379 = vmatpush3.msra.mxu0 %v18180_v35  ;;  %15427 = vmatpush3.msra.mxu1 %v18079_v42  ;;  %22898 = vst [vmem:[#allocation75_spill] sm:$0xff] %v18508_v47  ;;  %v1785_v35 = vsub.f32 %v18472_v25, %v18494_v51  ;;  %22899 = vst [vmem:[#allocation76_spill] sm:$0xff] %v18517_v44  ;;  %v18526_v31 = vand.u32 4294901760, %v18508_v47 }
 0x193   : > { %15380 = vmatprep.subr.mxu0 %v18196_v0  ;;  %15428 = vmatprep.subr.mxu1 %v18091_v15  ;;  %22900 = vst [vmem:[#allocation77_spill] sm:$0xff] %v18523_v10 }
 0x194   : > { %15297 = vmatprep.mubr.f32.mxu0 %v18491_v24  ;;  %15347 = vmatprep.mubr.f32.mxu1 %v18319_v29  ;;  %22901 = vst [vmem:[#allocation78_spill] sm:$0xff] %v18526_v31  ;;  %v1805_v1 = vsub.f32 %v18508_v47, %v18526_v31 }
 0x195   : > { %15381 = vmatpush3.msra.mxu0 %v18196_v0  ;;  %15429 = vmatpush3.msra.mxu1 %v18091_v15  ;;  %v18532_v0 = vand.u32 4294901760, %v1785_v35 }
 0x196   : > { %15298 = vmatmul.mubr.f32.gmra.mxu0 %v18503_v13  ;;  %15348 = vmatmul.mubr.f32.gmra.mxu1 %v18335_v32  ;;  %v1795_v13 = vsub.f32 %v18497_v30, %v18517_v44  ;;  %v18552_v35 = vand.u32 4294901760, %v1805_v1  ;;  %v22913_v1 = vld [vmem:[#allocation25_spill] sm:$0xff] }
 0x197   : > { %15382 = vmatprep.subr.mxu0 %v18210_v46  ;;  %15430 = vmatprep.subr.mxu1 %v18106_v6  ;;  %22902 = vst [vmem:[#allocation79_spill] sm:$0xff] %v18532_v0 }
 0x198   : > { %15383 = vmatpush3.msra.mxu0 %v18210_v46  ;;  %15431 = vmatpush3.msra.mxu1 %v18106_v6  ;;  %v18546_v46 = vand.u32 4294901760, %v1795_v13  ;;  %22904 = vst [vmem:[#allocation81_spill] sm:$0xff] %v18552_v35  ;;  %v22912_v13 = vld [vmem:[#allocation13_spill] sm:$0xff] }
 0x199   : > { %15384 = vmatprep.subr.mxu0 %v18229_v40  ;;  %15432 = vmatprep.subr.mxu1 %v18125_v12 }
 0x19a   : > { %15300 = vmatprep.mubr.f32.mxu0 %v18523_v10  ;;  %15350 = vmatprep.mubr.f32.mxu1 %v18363_v2  ;;  %22903 = vst [vmem:[#allocation80_spill] sm:$0xff] %v18546_v46 }
 0x19b   : > { %15385 = vmatpush3.msra.mxu0 %v18229_v40  ;;  %15433 = vmatpush3.msra.mxu1 %v18125_v12  ;;  %v22905_v40 = vld [vmem:[#allocation4_spill] sm:$0xff] }
 0x19c   : > { %15301 = vmatmul.mubr.f32.gmra.mxu0 %v18532_v0  ;;  %15351 = vmatmul.mubr.f32.gmra.mxu1 %v18376_v7 }
 0x19d   : > { %15386 = vmatprep.subr.mxu0 %v18243_v54  ;;  %15434 = vmatprep.subr.mxu1 %v18143_v20 }
 0x19e   : > { %15387 = vmatpush3.msra.mxu0 %v18243_v54  ;;  %15435 = vmatpush3.msra.mxu1 %v18143_v20  ;;  %v22906_v54 = vld [vmem:[#allocation18_spill] sm:$0xff] }
 0x19f   : > { %15388 = vmatprep.subr.mxu0 %v18264_v8  ;;  %15436 = vmatprep.subr.mxu1 %v18161_v43 }
 0x1a0   : > { %15303 = vmatprep.mubr.f32.mxu0 %v18546_v46  ;;  %15353 = vmatprep.mubr.f32.mxu1 %v18400_v45 }
 0x1a1   : > { %15389 = vmatpush3.msra.mxu0 %v18264_v8  ;;  %15437 = vmatpush3.msra.mxu1 %v18161_v43  ;;  %v22907_v8 = vld [vmem:[#allocation22_spill] sm:$0xff] }
 0x1a2   : > { %15304 = vmatmul.mubr.f32.gmra.mxu0 %v18552_v35  ;;  %15354 = vmatmul.mubr.f32.gmra.mxu1 %v18410_v55 }
 0x1a3   : > { %15390 = vmatprep.subr.mxu0 %v18287_v3  ;;  %15438 = vmatprep.subr.mxu1 %v18174_v39 }
 0x1a4   : > { %15391 = vmatpush3.msra.mxu0 %v18287_v3  ;;  %15439 = vmatpush3.msra.mxu1 %v18174_v39  ;;  %v22908_v3 = vld [vmem:[#allocation28_spill] sm:$0xff] }
 0x1a5   : > { %15392 = vmatprep.subr.mxu0 %v18306_v38  ;;  %15440 = vmatprep.subr.mxu1 %v18192_v58 }
 0x1a6   : > { %15356 = vmatprep.mubr.f32.mxu1 %v18436_v27  ;;  %15393 = vmatpush3.msra.mxu0 %v18306_v38  ;;  %v22911_v38 = vld [vmem:[#allocation16_spill] sm:$0xff] }
 0x1a7   : > { %15394 = vmatprep.mubr.f32.mxu0 %v22905_v40  ;;  %15441 = vmatpush3.msra.mxu1 %v18192_v58 }
 0x1a8   : > { %15357 = vmatmul.mubr.f32.gmra.mxu1 %v18447_v28  ;;  %15395 = vmatmul.mubr.f32.vlgmr.msra.gmra.mxu0 %v18224_v49 }
 0x1a9   : > { %15442 = vmatprep.subr.mxu1 %v18206_v22  ;;  %15474 = vmatprep.subr.mxu0 %v18117_v56 }
 0x1aa   : > { %15443 = vmatpush3.msra.mxu1 %v18206_v22  ;;  %15475 = vmatpush3.msra.mxu0 %v18117_v56  ;;  %v22909_v56 = vld [vmem:[#allocation11_spill] sm:$0xff] }
 0x1ab   : > { %15444 = vmatprep.subr.mxu1 %v18220_v17  ;;  %15476 = vmatprep.subr.mxu0 %v18135_v37 }
 0x1ac   : > { %15359 = vmatprep.mubr.f32.mxu1 %v18474_v61  ;;  %15397 = vmatprep.mubr.f32.mxu0 %v18258_v34 }
 0x1ad   : > { %15445 = vmatpush3.msra.mxu1 %v18220_v17  ;;  %15477 = vmatpush3.msra.mxu0 %v18135_v37  ;;  %v22910_v37 = vld [vmem:[#allocation5_spill] sm:$0xff] }
 0x1ae   : > { %15360 = vmatmul.mubr.f32.gmra.mxu1 %v18485_v36  ;;  %15398 = vmatmul.mubr.f32.gmra.mxu0 %v22906_v54 }
 0x1af   : > { %15446 = vmatprep.subr.mxu1 %v22907_v8  ;;  %15478 = vmatprep.subr.mxu0 %v22908_v3 }
 0x1b0   : > { %15447 = vmatpush3.msra.mxu1 %v22907_v8  ;;  %15479 = vmatpush3.msra.mxu0 %v22908_v3  ;;  %v22914_v3 = vld [vmem:[#allocation15_spill] sm:$0xff] }
 0x1b1   : > { %15448 = vmatprep.subr.mxu1 %v18272_v41  ;;  %15480 = vmatprep.subr.mxu0 %v22909_v56 }
 0x1b2   : > { %15400 = vmatprep.mubr.f32.mxu0 %v18303_v57  ;;  %15449 = vmatpush3.msra.mxu1 %v18272_v41 }
 0x1b3   : > { %15450 = vmatprep.mubr.f32.mxu1 %v22910_v37  ;;  %15481 = vmatpush3.msra.mxu0 %v22909_v56  ;;  %v22915_v56 = vld [vmem:[#allocation31_spill] sm:$0xff] }
 0x1b4   : > { %15401 = vmatmul.mubr.f32.gmra.mxu0 %v18317_v63  ;;  %15451 = vmatmul.mubr.f32.vlgmr.msra.gmra.mxu1 %v22911_v38  ;;  %v22916_v38 = vld [vmem:[#allocation8_spill] sm:$0xff] }
 0x1b5   : > { %15482 = vmatprep.subr.mxu0 %v22912_v13  ;;  %15530 = vmatprep.subr.mxu1 %v18084_v53 }
 0x1b6   : > { %15483 = vmatpush3.msra.mxu0 %v22912_v13  ;;  %15531 = vmatpush3.msra.mxu1 %v18084_v53  ;;  %v22917_v53 = vld [vmem:[#allocation27_spill] sm:$0xff]  ;;  %v22918_v13 = vld [vmem:[#allocation36_spill] sm:$0xff] }
 0x1b7   : > { %15484 = vmatprep.subr.mxu0 %v22913_v1  ;;  %15532 = vmatprep.subr.mxu1 %v18099_v21 }
 0x1b8   : > { %15403 = vmatprep.mubr.f32.mxu0 %v18349_v4  ;;  %15453 = vmatprep.mubr.f32.mxu1 %v22914_v3 }
 0x1b9   : > { %15485 = vmatpush3.msra.mxu0 %v22913_v1  ;;  %15533 = vmatpush3.msra.mxu1 %v18099_v21  ;;  %v22919_v21 = vld [vmem:[#allocation39_spill] sm:$0xff]  ;;  %v22920_v1 = vld [vmem:[#allocation26_spill] sm:$0xff] }
 0x1ba   : > { %15404 = vmatmul.mubr.f32.gmra.mxu0 %v18361_v23  ;;  %15454 = vmatmul.mubr.f32.gmra.mxu1 %v22915_v56 }
 0x1bb   : > { %15486 = vmatprep.subr.mxu0 %v22916_v38  ;;  %15534 = vmatprep.subr.mxu1 %v18068_v59 }
 0x1bc   : > { %15487 = vmatpush3.msra.mxu0 %v22916_v38  ;;  %15535 = vmatpush3.msra.mxu1 %v18068_v59  ;;  %v22921_v59 = vld [vmem:[#allocation20_spill] sm:$0xff] }
 0x1bd   : > { %15488 = vmatprep.subr.mxu0 %v22917_v53  ;;  %15536 = vmatprep.subr.mxu1 %v18075_v62  ;;  %v22929_v38 = vld [vmem:[#allocation24_spill] sm:$0xff] }
 0x1be   : > { %15406 = vmatprep.mubr.f32.mxu0 %v18388_v52  ;;  %15456 = vmatprep.mubr.f32.mxu1 %v22918_v13 }
 0x1bf   : > { %15489 = vmatpush3.msra.mxu0 %v22917_v53  ;;  %15537 = vmatpush3.msra.mxu1 %v18075_v62  ;;  %v22922_v62 = vld [vmem:[#allocation23_spill] sm:$0xff]  ;;  %v22931_v53 = vld [vmem:[#allocation9_spill] sm:$0xff] }
 0x1c0   : > { %15407 = vmatmul.mubr.f32.gmra.mxu0 %v18398_v48  ;;  %15457 = vmatmul.mubr.f32.gmra.mxu1 %v22919_v21 }
 0x1c1   : > { %15490 = vmatprep.subr.mxu0 %v22920_v1  ;;  %15538 = vmatprep.subr.mxu1 %v18079_v42 }
 0x1c2   : > { %15491 = vmatpush3.msra.mxu0 %v22920_v1  ;;  %15539 = vmatpush3.msra.mxu1 %v18079_v42  ;;  %v22923_v42 = vld [vmem:[#allocation17_spill] sm:$0xff] }
 0x1c3   : > { %15492 = vmatprep.subr.mxu0 %v22921_v59  ;;  %15540 = vmatprep.subr.mxu1 %v18091_v15 }
 0x1c4   : > { %15409 = vmatprep.mubr.f32.mxu0 %v18422_v16  ;;  %15459 = vmatprep.mubr.f32.mxu1 %v18374_v11 }
 0x1c5   : > { %15493 = vmatpush3.msra.mxu0 %v22921_v59  ;;  %15541 = vmatpush3.msra.mxu1 %v18091_v15  ;;  %v22924_v15 = vld [vmem:[#allocation19_spill] sm:$0xff] }
 0x1c6   : > { %15410 = vmatmul.mubr.f32.gmra.mxu0 %v18434_v26  ;;  %15460 = vmatmul.mubr.f32.gmra.mxu1 %v18385_v5 }
 0x1c7   : > { %15494 = vmatprep.subr.mxu0 %v22922_v62  ;;  %15542 = vmatprep.subr.mxu1 %v18106_v6 }
 0x1c8   : > { %15495 = vmatpush3.msra.mxu0 %v22922_v62  ;;  %15543 = vmatpush3.msra.mxu1 %v18106_v6  ;;  %v22925_v6 = vld [vmem:[#allocation29_spill] sm:$0xff]  ;;  %v2875_v62 = vld [vmem:[%s22527_s4 + $0x18] sm:$0xff] }
 0x1c9   : > { %15496 = vmatprep.subr.mxu0 %v22923_v42  ;;  %15544 = vmatprep.subr.mxu1 %v18125_v12 }
 0x1ca   : > { %15412 = vmatprep.mubr.f32.mxu0 %v18460_v33  ;;  %15462 = vmatprep.mubr.f32.mxu1 %v18408_v50 }
 0x1cb   : > { %15497 = vmatpush3.msra.mxu0 %v22923_v42  ;;  %15545 = vmatpush3.msra.mxu1 %v18125_v12  ;;  %v22926_v12 = vld [vmem:[#allocation35_spill] sm:$0xff]  ;;  %v18728_v42 = vand.u32 4294901760, %v2875_v62 }
 0x1cc   : > { %15413 = vmatmul.mubr.f32.gmra.mxu0 %v18472_v25  ;;  %15463 = vmatmul.mubr.f32.gmra.mxu1 %v18419_v19 }
 0x1cd   : > { %15498 = vmatprep.subr.mxu0 %v22924_v15  ;;  %15546 = vmatprep.subr.mxu1 %v18143_v20  ;;  %22936 = vst [vmem:[#allocation13_spill] sm:$0xff] %v18728_v42 }
 0x1ce   : > { %15499 = vmatpush3.msra.mxu0 %v22924_v15  ;;  %15547 = vmatpush3.msra.mxu1 %v18143_v20  ;;  %v22927_v20 = vld [vmem:[#allocation38_spill] sm:$0xff]  ;;  %v2874_v15 = vld [vmem:[%s22527_s4 + $0x10] sm:$0xff] }
 0x1cf   : > { %15500 = vmatprep.subr.mxu0 %v22925_v6  ;;  %15548 = vmatprep.subr.mxu1 %v18161_v43 }
 0x1d0   : > { %15415 = vmatprep.mubr.f32.mxu0 %v18497_v30  ;;  %15465 = vmatprep.mubr.f32.mxu1 %v18445_v18 }
 0x1d1   : > { %15501 = vmatpush3.msra.mxu0 %v22925_v6  ;;  %15549 = vmatpush3.msra.mxu1 %v18161_v43  ;;  %v22928_v43 = vld [vmem:[#allocation3_spill] sm:$0xff]  ;;  %v18735_v6 = vsub.f32 %v2875_v62, %v18728_v42 }
 0x1d2   : > { %15416 = vmatmul.mubr.f32.gmra.mxu0 %v18508_v47  ;;  %15466 = vmatmul.mubr.f32.gmra.mxu1 %v18457_v14 }
 0x1d3   : > { %15502 = vmatprep.subr.mxu0 %v22926_v12  ;;  %15550 = vmatprep.subr.mxu1 %v18174_v39  ;;  %22937 = vst [vmem:[#allocation25_spill] sm:$0xff] %v18735_v6 }
 0x1d4   : > { %15503 = vmatpush3.msra.mxu0 %v22926_v12  ;;  %15551 = vmatpush3.msra.mxu1 %v18174_v39  ;;  %v22930_v39 = vld [vmem:[#allocation21_spill] sm:$0xff]  ;;  %v18737_v12 = vand.u32 4294901760, %v2874_v15 }
 0x1d5   : > { %15504 = vmatprep.subr.mxu0 %v22927_v20  ;;  %15552 = vmatprep.subr.mxu1 %v18192_v58 }
 0x1d6   : > { %15468 = vmatprep.mubr.f32.mxu1 %v18483_v9  ;;  %15505 = vmatpush3.msra.mxu0 %v22927_v20  ;;  %22938 = vst [vmem:[#allocation8_spill] sm:$0xff] %v18737_v12  ;;  %v2873_v20 = vld [vmem:[%s22527_s4 + $0x8] sm:$0xff] }
 0x1d7   : > { %15506 = vmatprep.mubr.f32.mxu0 %v22928_v43  ;;  %15553 = vmatpush3.msra.mxu1 %v18192_v58  ;;  %v22932_v58 = vld [vmem:[#allocation10_spill] sm:$0xff] }
 0x1d8   : > { %15469 = vmatmul.mubr.f32.gmra.mxu1 %v18494_v51  ;;  %15507 = vmatmul.mubr.f32.vlgmr.msra.gmra.mxu0 %v22929_v38 }
 0x1d9   : > { %15554 = vmatprep.subr.mxu1 %v18206_v22  ;;  %15471 = vmatprep.mubr.f32.mxu1 %v18517_v44 }
 0x1da   : > { %15555 = vmatpush3.msra.mxu1 %v18206_v22  ;;  %15509 = vmatprep.mubr.f32.mxu0 %v22930_v39  ;;  %v2876_v22 = vld [vmem:[%s22527_s4 + $0x20] sm:$0xff] }
 0x1db   : > { %15556 = vmatprep.subr.mxu1 %v18220_v17 }
 0x1dc   : > { %15557 = vmatpush3.msra.mxu1 %v18220_v17  ;;  %15510 = vmatmul.mubr.f32.gmra.mxu0 %v22931_v53  ;;  %v18713_v17 = vand.u32 4294901760, %v2876_v22 }
 0x1dd   : > { %15472 = vmatmul.mubr.f32.gmra.mxu1 %v18526_v31  ;;  %15558 = vmatprep.subr.mxu1 %v22907_v8 }
 0x1de   : > { %15559 = vmatpush3.msra.mxu1 %v22907_v8  ;;  %15512 = vmatprep.mubr.f32.mxu0 %v22932_v58  ;;  %22933 = vst [vmem:[#allocation22_spill] sm:$0xff] %v18713_v17 }
 0x1df   : > { %15560 = vmatprep.subr.mxu1 %v18272_v41  ;;  %15562 = vmatprep.mubr.f32.mxu1 %v22928_v43 }
 0x1e0   : > { %15561 = vmatpush3.msra.mxu1 %v18272_v41  ;;  %15513 = vmatmul.mubr.f32.gmra.mxu0 %v18284_v60  ;;  %v18718_v41 = vsub.f32 %v2876_v22, %v18713_v17  ;;  %v18744_v22 = vand.u32 4294901760, %v18735_v6 }
 0x1e1   : > { %15563 = vmatmul.mubr.f32.vlgmr.msra.gmra.mxu1 %v22929_v38  ;;  %15515 = vmatprep.mubr.f32.mxu0 %v18319_v29 }
 0x1e2   : > { %15565 = vmatprep.mubr.f32.mxu1 %v22930_v39  ;;  %15586 = vmatprep.subr.mxu0 %v18713_v17  ;;  %22934 = vst [vmem:[#allocation28_spill] sm:$0xff] %v18718_v41  ;;  %v18721_v8 = vand.u32 4294901760, %v18718_v41  ;;  %22939 = vst [vmem:[#allocation27_spill] sm:$0xff] %v18744_v22  ;;  %v3190_v62 = vsub.f32 %v18735_v6, %v18744_v22 }
 0x1e3   : > { %15587 = vmatpush3.msra.mxu0 %v18713_v17 }
 0x1e4   : > { %15516 = vmatmul.mubr.f32.gmra.mxu0 %v18335_v32  ;;  %22935 = vst [vmem:[#allocation11_spill] sm:$0xff] %v18721_v8  ;;  %v3183_v1 = vsub.f32 %v18718_v41, %v18721_v8  ;;  %15588 = vmatprep.subr.mxu0 %v18728_v42  ;;  %v3191_v51 = vand.u32 4294901760, %v3190_v62 }
 0x1e5   : > { %15566 = vmatmul.mubr.f32.gmra.mxu1 %v22931_v53  ;;  %15518 = vmatprep.mubr.f32.mxu0 %v18363_v2 }
 0x1e6   : > { %15568 = vmatprep.mubr.f32.mxu1 %v22932_v58  ;;  %v3184_v59 = vand.u32 4294901760, %v3183_v1  ;;  %15589 = vmatpush3.msra.mxu0 %v18728_v42  ;;  %v18748_v1 = vsub.f32 %v2874_v15, %v18737_v12 }
 0x1e7   : > { %15590 = vmatprep.subr.mxu0 %v18737_v12 }
 0x1e8   : > { %15519 = vmatmul.mubr.f32.gmra.mxu0 %v18376_v7  ;;  %15618 = vmatprep.subr.mxu1 %v3184_v59  ;;  %22940 = vst [vmem:[#allocation26_spill] sm:$0xff] %v18748_v1  ;;  %v18756_v31 = vand.u32 4294901760, %v18748_v1 }
 0x1e9   : > { %15569 = vmatmul.mubr.f32.gmra.mxu1 %v18284_v60  ;;  %15521 = vmatprep.mubr.f32.mxu0 %v18400_v45 }
 0x1ea   : > { %15571 = vmatprep.mubr.f32.mxu1 %v18319_v29  ;;  %15619 = vmatpush3.msra.mxu1 %v3184_v59  ;;  %v18750_v59 = vand.u32 4294901760, %v2873_v20  ;;  %22942 = vst [vmem:[#allocation23_spill] sm:$0xff] %v18756_v31  ;;  %v3197_v15 = vsub.f32 %v18748_v1, %v18756_v31 }
 0x1eb   : > { %15591 = vmatpush3.msra.mxu0 %v18737_v12  ;;  %15620 = vmatprep.subr.mxu1 %v3191_v51 }
 0x1ec   : > { %15522 = vmatmul.mubr.f32.gmra.mxu0 %v18410_v55  ;;  %22941 = vst [vmem:[#allocation20_spill] sm:$0xff] %v18750_v59  ;;  %v18759_v44 = vsub.f32 %v2873_v20, %v18750_v59  ;;  %15592 = vmatprep.subr.mxu0 %v18750_v59  ;;  %v3198_v14 = vand.u32 4294901760, %v3197_v15 }
 0x1ed   : > { %15572 = vmatmul.mubr.f32.gmra.mxu1 %v18335_v32  ;;  %15524 = vmatprep.mubr.f32.mxu0 %v18436_v27 }
 0x1ee   : > { %15574 = vmatprep.mubr.f32.mxu1 %v18363_v2  ;;  %22943 = vst [vmem:[#allocation17_spill] sm:$0xff] %v18759_v44  ;;  %15593 = vmatpush3.msra.mxu0 %v18750_v59  ;;  %v18766_v9 = vand.u32 4294901760, %v18759_v44 }
 0x1ef   : > { %15650 = vmatprep.subr.mxu0 %v18718_v41  ;;  %15621 = vmatpush3.msra.mxu1 %v3191_v51 }
 0x1f0   : > { %15525 = vmatmul.mubr.f32.gmra.mxu0 %v18447_v28  ;;  %22944 = vst [vmem:[#allocation19_spill] sm:$0xff] %v18766_v9  ;;  %v3204_v47 = vsub.f32 %v18759_v44, %v18766_v9  ;;  %15622 = vmatprep.subr.mxu1 %v3198_v14  ;;  %v13682_v44 = vld [vmem:[%s22527_s4 + $0x148] ss:$0 sm:$0xff] }
 0x1f1   : > { %15575 = vmatmul.mubr.f32.gmra.mxu1 %v18376_v7  ;;  %15527 = vmatprep.mubr.f32.mxu0 %v18474_v61 }
 0x1f2   : > { %15577 = vmatprep.mubr.f32.mxu1 %v18400_v45  ;;  %v3205_v20 = vand.u32 4294901760, %v3204_v47  ;;  %15623 = vmatpush3.msra.mxu1 %v3198_v14 }
 0x1f4   : > { %15528 = vmatmul.mubr.f32.gmra.mxu0 %v18485_v36  ;;  %15624 = vmatprep.subr.mxu1 %v3205_v20 }
 0x1f5   : > { %15578 = vmatmul.mubr.f32.gmra.mxu1 %v18410_v55 }
 0x1f6   : > { %15580 = vmatprep.mubr.f32.mxu1 %v18436_v27  ;;  %15625 = vmatpush3.msra.mxu1 %v3205_v20 }
 0x1f7   : > { %15682 = vmatprep.subr.mxu1 %v18713_v17 }
 0x1f9   : > { %15581 = vmatmul.mubr.f32.gmra.mxu1 %v18447_v28 }
 0x1fa   : > { %15583 = vmatprep.mubr.f32.mxu1 %v18474_v61 }
 0x1fd   : > { %15584 = vmatmul.mubr.f32.gmra.mxu1 %v18485_v36 }
 0x23a   : > { %v15284_v62 = vpop.f32.mrf.mxu0 }
 0x23b   : > { %v1669_v1 = vadd.f32 %v15284_v62, %v13682_v44 }
 0x23c   : > { %v1658_v18 = vpop.f32.mrf.mxu0 }
 0x23d   : > { %v1659_v17 = vadd.f32 %v13682_v44, %v1658_v18 }
 0x23f   : > { %v15287_v30 = vpop.f32.mrf.mxu0 }
 0x240   : > { %v1689_v59 = vadd.f32 %v15287_v30, %v13682_v44 }
 0x241   : > { %v1678_v19 = vpop.f32.mrf.mxu0 }
 0x244   : > { %v15290_v25 = vpop.f32.mrf.mxu0  ;;  %v15340_v50 = vpop.f32.mrf.mxu1 }
 0x246   : > { %v1698_v33 = vpop.f32.mrf.mxu0  ;;  %v1959_v5 = vpop.f32.mrf.mxu1 }
 0x24a   : > { %v15293_v15 = vpop.f32.mrf.mxu0  ;;  %v18772_v26 = vpop.f32.mrf.mxu1 }
 0x24b   : > { %v1978_v62 = vadd.f32 %v18772_v26, %v1689_v59 }
 0x24c   : > { %v18774_v11 = vpop.f32.mrf.mxu0  ;;  %v18776_v51 = vpop.f32.mrf.mxu1 }
 0x250   : > { %v15296_v14 = vpop.f32.mrf.mxu0  ;;  %v18778_v47 = vpop.f32.mrf.mxu1 }
 0x252   : > { %v18780_v20 = vpop.f32.mrf.mxu0  ;;  %v18782_v16 = vpop.f32.mrf.mxu1 }
 0x256   : > { %v15299_v21 = vpop.f32.mrf.mxu0  ;;  %v18784_v48 = vpop.f32.mrf.mxu1 }
 0x258   : > { %v18786_v13 = vpop.f32.mrf.mxu0  ;;  %v18788_v52 = vpop.f32.mrf.mxu1 }
 0x25c   : > { %v15302_v56 = vpop.f32.mrf.mxu0  ;;  %v18790_v23 = vpop.f32.mrf.mxu1 }
 0x25d   : > { %v1789_v30 = vadd.f32 %v15302_v56, %v13682_v44 }
 0x25e   : > { %v18792_v3 = vpop.f32.mrf.mxu0  ;;  %v18794_v4 = vpop.f32.mrf.mxu1 }
 0x262   : > { %v15305_v63 = vpop.f32.mrf.mxu0  ;;  %v18796_v37 = vpop.f32.mrf.mxu1 }
 0x264   : > { %v18798_v57 = vpop.f32.mrf.mxu0  ;;  %v18800_v54 = vpop.f32.mrf.mxu1 }
 0x268   : > { %v18802_v36 = vpop.f32.mrf.mxu1  ;;  %v18804_v34 = vpop.f32.mrf.mxu0 }
 0x26a   : > { %v18806_v61 = vpop.f32.mrf.mxu1  ;;  %v18808_v49 = vpop.f32.mrf.mxu0 }
 0x26e   : > { %v18810_v28 = vpop.f32.mrf.mxu1  ;;  %v18812_v40 = vpop.f32.mrf.mxu0 }
 0x270   : > { %v18814_v27 = vpop.f32.mrf.mxu1  ;;  %v18816_v55 = vpop.f32.mrf.mxu0 }
 0x274   : > { %v18818_v35 = vpop.f32.mrf.mxu0  ;;  %v18820_v45 = vpop.f32.mrf.mxu1 }
 0x276   : > { %v18822_v46 = vpop.f32.mrf.mxu0  ;;  %v18824_v7 = vpop.f32.mrf.mxu1 }
 0x27a   : > { %v18826_v0 = vpop.f32.mrf.mxu0  ;;  %v18828_v2 = vpop.f32.mrf.mxu1 }
 0x27c   : > { %v18830_v10 = vpop.f32.mrf.mxu0  ;;  %v18832_v32 = vpop.f32.mrf.mxu1 }
 0x280   : > { %v18834_v29 = vpop.f32.mrf.mxu0  ;;  %v18836_v24 = vpop.f32.mrf.mxu1 }
 0x282   : > { %v18838_v60 = vpop.f32.mrf.mxu0  ;;  %v18840_v58 = vpop.f32.mrf.mxu1 }
 0x283   : > { %22945 = vst [vmem:[#allocation29_spill] sm:$0xff] %v18840_v58 }
 0x286   : > { %v18842_v53 = vpop.f32.mrf.mxu0  ;;  %v18844_v39 = vpop.f32.mrf.mxu1 }
 0x287   : > { %22946 = vst [vmem:[#allocation35_spill] sm:$0xff] %v18842_v53  ;;  %22947 = vst [vmem:[#allocation38_spill] sm:$0xff] %v18844_v39  ;;  %v1749_v39 = vadd.f32 %v15296_v14, %v13682_v44  ;;  %v1769_v53 = vadd.f32 %v15299_v21, %v13682_v44 }
 0x288   : > { %v18846_v38 = vpop.f32.mrf.mxu0  ;;  %v18848_v43 = vpop.f32.mrf.mxu1 }
 0x289   : > { %22948 = vst [vmem:[#allocation82_spill] sm:$0xff] %v18846_v38  ;;  %22949 = vst [vmem:[#allocation83_spill] sm:$0xff] %v18848_v43  ;;  %v1729_v43 = vadd.f32 %v15293_v15, %v13682_v44  ;;  %v1960_v38 = vadd.f32 %v1959_v5, %v1659_v17  ;;  %v2014_v21 = vadd.f32 %v18790_v23, %v1749_v39 }
 0x28b   : > { %v2002_v5 = vadd.f32 %v18784_v48, %v1729_v43 }
 0x28c   : > { %v18850_v9 = vpop.f32.mrf.mxu0  ;;  %v18852_v31 = vpop.f32.mrf.mxu1 }
 0x28d   : > { %22950 = vst [vmem:[#allocation84_spill] sm:$0xff] %v18850_v9  ;;  %22951 = vst [vmem:[#allocation85_spill] sm:$0xff] %v18852_v31  ;;  %v1709_v31 = vadd.f32 %v15290_v25, %v13682_v44  ;;  %v1679_v9 = vadd.f32 %v13682_v44, %v1678_v19  ;;  %v1739_v25 = vadd.f32 %v13682_v44, %v18780_v20 }
 0x28e   : > { %v18854_v22 = vpop.f32.mrf.mxu0  ;;  %v18856_v8 = vpop.f32.mrf.mxu1  ;;  %v1759_v19 = vadd.f32 %v13682_v44, %v18786_v13  ;;  %v2154_v13 = vadd.f32 %v18808_v49, %v1960_v38  ;;  %v2203_v49 = vadd.f32 %v18826_v0, %v2002_v5  ;;  %v22959_v0 = vld [vmem:[#allocation38_spill] sm:$0xff] }
 0x28f   : > { %22952 = vst [vmem:[#allocation86_spill] sm:$0xff] %v18854_v22  ;;  %22953 = vst [vmem:[#allocation87_spill] sm:$0xff] %v18856_v8  ;;  %v1966_v22 = vadd.f32 %v15340_v50, %v1669_v1  ;;  %v1699_v8 = vadd.f32 %v13682_v44, %v1698_v33  ;;  %v1990_v18 = vadd.f32 %v18778_v47, %v1709_v31 }
 0x290   : > { %v1809_v33 = vadd.f32 %v15305_v63, %v13682_v44  ;;  %v2008_v17 = vadd.f32 %v18794_v4, %v1739_v25  ;;  %v2026_v31 = vadd.f32 %v18796_v37, %v1769_v53  ;;  %v1799_v1 = vadd.f32 %v13682_v44, %v18798_v57  ;;  %v22957_v53 = vld [vmem:[#allocation29_spill] sm:$0xff]  ;;  %v22961_v59 = vld [vmem:[#allocation83_spill] sm:$0xff] }
 0x291   : > { %v1984_v50 = vadd.f32 %v18782_v16, %v1699_v8  ;;  %v2020_v63 = vadd.f32 %v18800_v54, %v1759_v19  ;;  %v2038_v16 = vadd.f32 %v18802_v36, %v1789_v30  ;;  %v2161_v48 = vadd.f32 %v18804_v34, %v1966_v22  ;;  %v22960_v22 = vld [vmem:[#allocation82_spill] sm:$0xff] }
 0x292   : > { %v18861_v6 = vpop.f32.mrf.mxu0  ;;  %v18863_v41 = vpop.f32.mrf.mxu1  ;;  %v2050_v23 = vadd.f32 %v18810_v28, %v1809_v33  ;;  %v2175_v4 = vadd.f32 %v18812_v40, %v1978_v62  ;;  %v2044_v37 = vadd.f32 %v18814_v27, %v1799_v1 }
 0x293   : > { %22954 = vst [vmem:[#allocation88_spill] sm:$0xff] %v18861_v6  ;;  %22955 = vst [vmem:[#allocation89_spill] sm:$0xff] %v18863_v41  ;;  %v1719_v6 = vadd.f32 %v13682_v44, %v18774_v11  ;;  %v1972_v41 = vadd.f32 %v18776_v51, %v1679_v9  ;;  %v1779_v11 = vadd.f32 %v13682_v44, %v18792_v3 }
 0x294   : > { %v18865_v12 = vpop.f32.mrf.mxu0  ;;  %v18867_v42 = vpop.f32.mrf.mxu1  ;;  %v2189_v44 = vadd.f32 %v18818_v35, %v1990_v18  ;;  %v2356_v36 = vadd.f32 %v18820_v45, %v2161_v48  ;;  %v2182_v34 = vadd.f32 %v18822_v46, %v1984_v50  ;;  %v2372_v28 = vadd.f32 %v18828_v2, %v2175_v4  ;;  %v22962_v14 = vld [vmem:[#allocation84_spill] sm:$0xff] }
 0x295   : > { %22956 = vst [vmem:[#allocation90_spill] sm:$0xff] %v18865_v12  ;;  %v1996_v26 = vadd.f32 %v18788_v52, %v1719_v6  ;;  %v2032_v52 = vadd.f32 %v18806_v61, %v1779_v11  ;;  %v2168_v57 = vadd.f32 %v18816_v55, %v1972_v41  ;;  %v2348_v61 = vadd.f32 %v18824_v7, %v2154_v13  ;;  %v22958_v7 = vld [vmem:[#allocation35_spill] sm:$0xff] }
 0x296   : > { %v2217_v55 = vadd.f32 %v18834_v29, %v2014_v21  ;;  %v2388_v35 = vadd.f32 %v18836_v24, %v2189_v44  ;;  %v2210_v46 = vadd.f32 %v18838_v60, %v2008_v17  ;;  %v2380_v41 = vadd.f32 %v22957_v53, %v2182_v34  ;;  %v22964_v20 = vld [vmem:[#allocation86_spill] sm:$0xff]  ;;  %v22965_v62 = vld [vmem:[#allocation87_spill] sm:$0xff] }
 0x297   : > { %v2196_v40 = vadd.f32 %v18830_v10, %v1996_v26  ;;  %v2364_v27 = vadd.f32 %v18832_v32, %v2168_v57  ;;  %v2231_v8 = vadd.f32 %v22958_v7, %v2026_v31  ;;  %v2404_v6 = vadd.f32 %v22959_v0, %v2203_v49 }
 0x298   : > { %v18872_v58 = vpop.f32.mrf.mxu1  ;;  %v15508_v12 = vpop.f32.mrf.mxu0  ;;  %v2224_v10 = vadd.f32 %v22960_v22, %v2020_v63  ;;  %v2245_v24 = vadd.f32 %v22962_v14, %v2038_v16  ;;  %v2238_v60 = vadd.f32 %v22964_v20, %v2032_v52  ;;  %v2412_v30 = vadd.f32 %v22965_v62, %v2210_v46  ;;  %v22970_v20 = vld [vmem:[#allocation13_spill] sm:$0xff] }
 0x299   : > { %v2593_v39 = vadd.f32 %v15508_v12, %v2356_v36  ;;  %v2396_v15 = vadd.f32 %v22961_v59, %v2196_v40  ;;  %v22963_v12 = vld [vmem:[#allocation85_spill] sm:$0xff] }
 0x29a   : > { %v2443_v9 = vpop.f32.mrf.mxu1  ;;  %v2586_v56 = vpop.f32.mrf.mxu0  ;;  %v2420_v47 = vadd.f32 %v22963_v12, %v2217_v55  ;;  %v22966_v25 = vld [vmem:[#allocation88_spill] sm:$0xff]  ;;  %v22967_v11 = vld [vmem:[#allocation89_spill] sm:$0xff]  ;;  %v2428_v31 = vadd.f32 %v18867_v42, %v2224_v10  ;;  %v18919_v1 = vadd.f32 %v18872_v58, %v2245_v24 }
 0x29b   : > { %v2587_v32 = vadd.f32 %v2586_v56, %v2348_v61  ;;  %v2259_v50 = vadd.f32 %v22966_v25, %v2050_v23  ;;  %v2436_v21 = vadd.f32 %v22967_v11, %v2231_v8  ;;  %v22971_v11 = vld [vmem:[#allocation8_spill] sm:$0xff] }
 0x29c   : > { %v15511_v3 = vpop.f32.mrf.mxu0  ;;  %v22968_v56 = vld [vmem:[#allocation90_spill] sm:$0xff] }
 0x29d   : > { %v15473_v43 = vpop.f32.mrf.mxu1  ;;  %v2605_v33 = vadd.f32 %v15511_v3, %v2372_v28  ;;  %v2252_v17 = vadd.f32 %v22968_v56, %v2044_v37  ;;  %v18922_v3 = vadd.f32 %v2443_v9, %v2238_v60 }
 0x29e   : > { %v2598_v54 = vpop.f32.mrf.mxu0  ;;  %v18924_v4 = vadd.f32 %v15473_v43, %v2259_v50 }
 0x29f   : > { %v2459_v38 = vpop.f32.mrf.mxu1  ;;  %v2599_v16 = vadd.f32 %v2598_v54, %v2364_v27 }
 0x2a0   : > { %v15514_v45 = vpop.f32.mrf.mxu0  ;;  %v18926_v57 = vadd.f32 %v2459_v38, %v2252_v17 }
 0x2a1   : > { %v15564_v2 = vpop.f32.mrf.mxu1  ;;  %v2617_v42 = vadd.f32 %v15514_v45, %v2388_v35 }
 0x2a2   : > { %v2770_v51 = vadd.f32 %v15564_v2, %v2593_v39  ;;  %v2610_v29 = vpop.f32.mrf.mxu0 }
 0x2a3   : > { %v2763_v18 = vpop.f32.mrf.mxu1  ;;  %v2611_v49 = vadd.f32 %v2610_v29, %v2380_v41 }
 0x2a4   : > { %v2858_v5 = vmax.f32 %v2770_v51, 0.0  ;;  %v2764_v19 = vadd.f32 %v2763_v18, %v2587_v32  ;;  %v15517_v26 = vpop.f32.mrf.mxu0  ;;  %v22969_v51 = vld [vmem:[#allocation22_spill] sm:$0xff] }
 0x2a5   : > { %v15567_v63 = vpop.f32.mrf.mxu1  ;;  %v2629_v9 = vadd.f32 %v15517_v26, %v2404_v6 }
 0x2a6   : > { %v2882_v48 = vsel %vm2877_vm1, %v2858_v5, 0  ;;  %v2857_v52 = vmax.f32 %v2764_v19, 0.0  ;;  %v2782_v13 = vadd.f32 %v15567_v63, %v2605_v33  ;;  %v2622_v23 = vpop.f32.mrf.mxu0 }
 0x2a7   : > { %v18928_v44 = vand.u32 4294901760, %v2882_v48  ;;  %v2775_v37 = vpop.f32.mrf.mxu1  ;;  %v2623_v38 = vadd.f32 %v2622_v23, %v2396_v15 }
 0x2a8   : > { %v2879_v58 = vsel %vm2877_vm1, %v2857_v52, 0  ;;  %v2860_v36 = vmax.f32 %v2782_v13, 0.0  ;;  %v2776_v34 = vadd.f32 %v2775_v37, %v2599_v16  ;;  %v15520_v54 = vpop.f32.mrf.mxu0  ;;  %v22972_v37 = vld [vmem:[#allocation20_spill] sm:$0xff] }
 0x2a9   : > { %v18932_v61 = vsub.f32 %v2882_v48, %v18928_v44  ;;  %v18934_v28 = vand.u32 4294901760, %v2879_v58  ;;  %v15570_v43 = vpop.f32.mrf.mxu1  ;;  %v2641_v53 = vadd.f32 %v15520_v54, %v2420_v47 }
 0x2aa   : > { %v2888_v40 = vsel %vm2877_vm1, %v2860_v36, 0  ;;  %v2859_v27 = vmax.f32 %v2776_v34, 0.0  ;;  %v2794_v55 = vadd.f32 %v15570_v43, %v2617_v42  ;;  %v2634_v39 = vpop.f32.mrf.mxu0 }
 0x2ab   : > { %v3007_v35 = vand.u32 4294901760, %v18932_v61  ;;  %v18939_v45 = vsub.f32 %v2879_v58, %v18934_v28  ;;  %v18941_v46 = vand.u32 4294901760, %v2888_v40  ;;  %v2787_v7 = vpop.f32.mrf.mxu1  ;;  %15626 = vmatprep.mubr.f32.mxu1 %v18934_v28  ;;  %v2635_v0 = vadd.f32 %v2634_v39, %v2412_v30 }
 0x2ac   : > { %v2885_v41 = vsel %vm2877_vm1, %v2859_v27, 0  ;;  %v2862_v8 = vmax.f32 %v2794_v55, 0.0  ;;  %v2788_v6 = vadd.f32 %v2787_v7, %v2611_v49  ;;  %15627 = vmatmul.mubr.f32.vlgmr.msra.gmra.mxu1 %v18928_v44  ;;  %v15523_v2 = vpop.f32.mrf.mxu0 }
 0x2ad   : > { %v3008_v22 = vsub.f32 %v18932_v61, %v3007_v35  ;;  %v18950_v10 = vsub.f32 %v2888_v40, %v18941_v46  ;;  %v18952_v59 = vand.u32 4294901760, %v2885_v41  ;;  %v2653_v15 = vadd.f32 %v15523_v2, %v2436_v21  ;;  %v15573_v32 = vpop.f32.mrf.mxu1  ;;  %15683 = vmatpush3.msra.mxu1 %v22969_v51 }
 0x2ae   : > { %v2894_v29 = vsel %vm2877_vm1, %v2862_v8, 0  ;;  %v2861_v14 = vmax.f32 %v2788_v6, 0.0  ;;  %v2806_v24 = vadd.f32 %v15573_v32, %v2629_v9  ;;  %v2646_v12 = vpop.f32.mrf.mxu0  ;;  %v2997_v47 = vand.u32 4294901760, %v18939_v45  ;;  %15684 = vmatprep.subr.mxu1 %v22970_v20  ;;  %v22973_v8 = vld [vmem:[#allocation28_spill] sm:$0xff] }
 0x2af   : > { %v3009_v60 = vand.u32 4294901760, %v3008_v22  ;;  %v18959_v62 = vsub.f32 %v2885_v41, %v18952_v59  ;;  %v18961_v30 = vand.u32 4294901760, %v2894_v29  ;;  %v2647_v18 = vadd.f32 %v2646_v12, %v2428_v31  ;;  %v2799_v25 = vpop.f32.mrf.mxu1  ;;  %15629 = vmatprep.mubr.f32.mxu1 %v18952_v59  ;;  %15685 = vmatpush3.msra.mxu1 %v22970_v20 }
 0x2b0   : > { %v2891_v50 = vsel %vm2877_vm1, %v2861_v14, 0  ;;  %v2864_v33 = vmax.f32 %v2806_v24, 0.0  ;;  %v2800_v5 = vadd.f32 %v2799_v25, %v2623_v38  ;;  %15630 = vmatmul.mubr.f32.gmra.mxu1 %v18941_v46  ;;  %v15526_v19 = vpop.f32.mrf.mxu0  ;;  %v2998_v26 = vsub.f32 %v18939_v45, %v2997_v47  ;;  %15686 = vmatprep.subr.mxu1 %v22971_v11 }
 0x2b1   : > { %v18972_v21 = vsub.f32 %v2894_v29, %v18961_v30  ;;  %v18974_v56 = vand.u32 4294901760, %v2891_v50  ;;  %v2665_v17 = vadd.f32 %v15526_v19, %v18919_v1  ;;  %v15576_v31 = vpop.f32.mrf.mxu1  ;;  %v3017_v63 = vand.u32 4294901760, %v18959_v62  ;;  %15687 = vmatpush3.msra.mxu1 %v22971_v11 }
 0x2b2   : > { %v2900_v16 = vsel %vm2877_vm1, %v2864_v33, 0  ;;  %v2863_v48 = vmax.f32 %v2800_v5, 0.0  ;;  %v2818_v52 = vadd.f32 %v15576_v31, %v2641_v53  ;;  %v2658_v13 = vpop.f32.mrf.mxu0  ;;  %v2999_v23 = vand.u32 4294901760, %v2998_v26  ;;  %15688 = vmatprep.subr.mxu1 %v22972_v37 }
 0x2b3   : > { %v18982_v42 = vsub.f32 %v2891_v50, %v18974_v56  ;;  %v18984_v58 = vand.u32 4294901760, %v2900_v16  ;;  %v2659_v1 = vadd.f32 %v2658_v13, %v18922_v3  ;;  %v2811_v36 = vpop.f32.mrf.mxu1  ;;  %15632 = vmatprep.mubr.f32.mxu1 %v18974_v56  ;;  %v3018_v34 = vsub.f32 %v18959_v62, %v3017_v63  ;;  %15689 = vmatpush3.msra.mxu1 %v22972_v37 }
 0x2b4   : > { %v2897_v54 = vsel %vm2877_vm1, %v2863_v48, 0  ;;  %v2866_v49 = vmax.f32 %v2818_v52, 0.0  ;;  %v2812_v9 = vadd.f32 %v2811_v36, %v2635_v0  ;;  %15594 = vmatprep.mubr.f32.mxu0 %v2999_v23  ;;  %15633 = vmatmul.mubr.f32.gmra.mxu1 %v18961_v30  ;;  %v15529_v43 = vpop.f32.mrf.mxu0  ;;  %v3027_v40 = vand.u32 4294901760, %v18950_v10 }
 0x2b5   : > { %v18996_v3 = vsub.f32 %v2900_v16, %v18984_v58  ;;  %v18998_v38 = vand.u32 4294901760, %v2897_v54  ;;  %15595 = vmatmul.mubr.f32.vlgmr.msra.gmra.mxu0 %v3009_v60  ;;  %v2677_v27 = vadd.f32 %v15529_v43, %v18924_v4  ;;  %v15579_v55 = vpop.f32.mrf.mxu1  ;;  %v3019_v39 = vand.u32 4294901760, %v3018_v34  ;;  %15746 = vmatprep.subr.mxu1 %v22969_v51  ;;  %v22974_v60 = vld [vmem:[#allocation25_spill] sm:$0xff]  ;;  %v22975_v16 = vld [vmem:[#allocation26_spill] sm:$0xff] }
 0x2b6   : > { %v2906_v53 = vsel %vm2877_vm1, %v2866_v49, 0  ;;  %v2865_v7 = vmax.f32 %v2812_v9, 0.0  ;;  %v2830_v41 = vadd.f32 %v15579_v55, %v2653_v15  ;;  %15651 = vmatpush3.msra.mxu0 %v22973_v8  ;;  %v2670_v0 = vpop.f32.mrf.mxu0  ;;  %v3028_v6 = vsub.f32 %v18950_v10, %v3027_v40  ;;  %v22976_v9 = vld [vmem:[#allocation17_spill] sm:$0xff] }
 0x2b7   : > { %v19008_v2 = vsub.f32 %v2897_v54, %v18998_v38  ;;  %v19010_v22 = vand.u32 4294901760, %v2906_v53  ;;  %v2671_v4 = vadd.f32 %v2670_v0, %v18926_v57  ;;  %v2823_v32 = vpop.f32.mrf.mxu1  ;;  %15597 = vmatprep.mubr.f32.mxu0 %v3019_v39  ;;  %15635 = vmatprep.mubr.f32.mxu1 %v18998_v38  ;;  %v3037_v15 = vand.u32 4294901760, %v18982_v42 }
 0x2b8   : > { %v2903_v29 = vsel %vm2877_vm1, %v2865_v7, 0  ;;  %v2868_v14 = vmax.f32 %v2830_v41, 0.0  ;;  %v2824_v24 = vadd.f32 %v2823_v32, %v2647_v18  ;;  %v3029_v12 = vand.u32 4294901760, %v3028_v6  ;;  %15636 = vmatmul.mubr.f32.gmra.mxu1 %v18984_v58  ;;  %15652 = vmatprep.subr.mxu0 %v22974_v60  ;;  %v22977_v6 = vld [vmem:[#allocation11_spill] sm:$0xff] }
 0x2b9   : > { %v19019_v25 = vsub.f32 %v2906_v53, %v19010_v22  ;;  %v19021_v50 = vand.u32 4294901760, %v2903_v29  ;;  %v15582_v57 = vpop.f32.mrf.mxu1  ;;  %v3038_v33 = vsub.f32 %v18982_v42, %v3037_v15  ;;  %v3047_v5 = vand.u32 4294901760, %v18972_v21  ;;  %15653 = vmatpush3.msra.mxu0 %v22974_v60 }
 0x2ba   : > { %v2912_v18 = vsel %vm2877_vm1, %v2868_v14, 0  ;;  %v2867_v19 = vmax.f32 %v2824_v24, 0.0  ;;  %15598 = vmatmul.mubr.f32.gmra.mxu0 %v3029_v12  ;;  %v2842_v26 = vadd.f32 %v15582_v57, %v2665_v17  ;;  %v3057_v31 = vand.u32 4294901760, %v19008_v2  ;;  %15654 = vmatprep.subr.mxu0 %v22975_v16 }
 0x2bb   : > { %v19032_v48 = vsub.f32 %v2903_v29, %v19021_v50  ;;  %v19034_v52 = vand.u32 4294901760, %v2912_v18  ;;  %v2835_v13 = vpop.f32.mrf.mxu1  ;;  %v3039_v23 = vand.u32 4294901760, %v3038_v33  ;;  %15638 = vmatprep.mubr.f32.mxu1 %v19021_v50  ;;  %v3048_v36 = vsub.f32 %v18972_v21, %v3047_v5  ;;  %15655 = vmatpush3.msra.mxu0 %v22975_v16 }
 0x2bc   : > { %v2909_v17 = vsel %vm2877_vm1, %v2867_v19, 0  ;;  %v2870_v34 = vmax.f32 %v2842_v26, 0.0  ;;  %v2836_v54 = vadd.f32 %v2835_v13, %v2659_v1  ;;  %15639 = vmatmul.mubr.f32.gmra.mxu1 %v19010_v22  ;;  %v3058_v49 = vsub.f32 %v19008_v2, %v3057_v31  ;;  %15656 = vmatprep.subr.mxu0 %v22976_v9 }
 0x2bd   : > { %v19048_v43 = vsub.f32 %v2912_v18, %v19034_v52  ;;  %v19050_v55 = vand.u32 4294901760, %v2909_v17  ;;  %15600 = vmatprep.mubr.f32.mxu0 %v3039_v23  ;;  %v3049_v39 = vand.u32 4294901760, %v3048_v36  ;;  %v15585_v53 = vpop.f32.mrf.mxu1  ;;  %v3067_v7 = vand.u32 4294901760, %v18996_v3  ;;  %15657 = vmatpush3.msra.mxu0 %v22976_v9 }
 0x2be   : > { %v2918_v1 = vsel %vm2877_vm1, %v2870_v34, 0  ;;  %v2869_v41 = vmax.f32 %v2836_v54, 0.0  ;;  %v2854_v8 = vadd.f32 %v15585_v53, %v2677_v27  ;;  %v3059_v0 = vand.u32 4294901760, %v3058_v49  ;;  %15714 = vmatprep.subr.mxu0 %v22977_v6 }
 0x2bf   : > { %v19057_v32 = vsub.f32 %v2909_v17, %v19050_v55  ;;  %v19059_v29 = vand.u32 4294901760, %v2918_v1  ;;  %15601 = vmatmul.mubr.f32.gmra.mxu0 %v3049_v39  ;;  %v2847_v14 = vpop.f32.mrf.mxu1  ;;  %15641 = vmatprep.mubr.f32.mxu1 %v19050_v55  ;;  %v3068_v24 = vsub.f32 %v18996_v3, %v3067_v7  ;;  %v3077_v12 = vand.u32 4294901760, %v19032_v48 }
 0x2c0   : > { %v2915_v27 = vsel %vm2877_vm1, %v2869_v41, 0  ;;  %v2872_v60 = vmax.f32 %v2854_v8, 0.0  ;;  %v2848_v57 = vadd.f32 %v2847_v14, %v2671_v4  ;;  %15603 = vmatprep.mubr.f32.mxu0 %v3059_v0  ;;  %15642 = vmatmul.mubr.f32.gmra.mxu1 %v19034_v52  ;;  %v3087_v33 = vand.u32 4294901760, %v19019_v25 }
 0x2c1   : > { %v19070_v18 = vsub.f32 %v2918_v1, %v19059_v29  ;;  %v19072_v19 = vand.u32 4294901760, %v2915_v27  ;;  %v3069_v26 = vand.u32 4294901760, %v3068_v24  ;;  %v3078_v16 = vsub.f32 %v19032_v48, %v3077_v12 }
 0x2c2   : > { %v2924_v13 = vsel %vm2877_vm1, %v2872_v60, 0  ;;  %v2871_v23 = vmax.f32 %v2848_v57, 0.0  ;;  %v3088_v4 = vsub.f32 %v19019_v25, %v3087_v33  ;;  %v3097_v36 = vand.u32 4294901760, %v19057_v32 }
 0x2c3   : > { %v19083_v17 = vsub.f32 %v2915_v27, %v19072_v19  ;;  %v19085_v34 = vand.u32 4294901760, %v2924_v13  ;;  %15604 = vmatmul.mubr.f32.gmra.mxu0 %v3069_v26  ;;  %v3079_v54 = vand.u32 4294901760, %v3078_v16  ;;  %15644 = vmatprep.mubr.f32.mxu1 %v19072_v19  ;;  %v3107_v49 = vand.u32 4294901760, %v19048_v43 }
 0x2c4   : > { %v2921_v9 = vsel %vm2877_vm1, %v2871_v23, 0  ;;  %v3089_v39 = vand.u32 4294901760, %v3088_v4  ;;  %15645 = vmatmul.mubr.f32.gmra.mxu1 %v19059_v29  ;;  %v3098_v53 = vsub.f32 %v19057_v32, %v3097_v36  ;;  %v3127_v1 = vand.u32 4294901760, %v19070_v18 }
 0x2c5   : > { %v19096_v41 = vsub.f32 %v2924_v13, %v19085_v34  ;;  %v19098_v8 = vand.u32 4294901760, %v2921_v9  ;;  %15606 = vmatprep.mubr.f32.mxu0 %v3079_v54  ;;  %v3108_v0 = vsub.f32 %v19048_v43, %v3107_v49  ;;  %v3117_v14 = vand.u32 4294901760, %v19083_v17 }
 0x2c6   : > { %v3099_v24 = vand.u32 4294901760, %v3098_v53  ;;  %v3128_v57 = vsub.f32 %v19070_v18, %v3127_v1 }
 0x2c7   : > { %v19105_v27 = vsub.f32 %v2921_v9, %v19098_v8  ;;  %15607 = vmatmul.mubr.f32.gmra.mxu0 %v3089_v39  ;;  %15647 = vmatprep.mubr.f32.mxu1 %v19098_v8  ;;  %v3118_v60 = vsub.f32 %v19083_v17, %v3117_v14  ;;  %v3109_v26 = vand.u32 4294901760, %v3108_v0  ;;  %v3147_v23 = vand.u32 4294901760, %v19096_v41 }
 0x2c8   : > { %15609 = vmatprep.mubr.f32.mxu0 %v3099_v24  ;;  %15648 = vmatmul.mubr.f32.gmra.mxu1 %v19085_v34  ;;  %v3129_v54 = vand.u32 4294901760, %v3128_v57 }
 0x2c9   : > { %15690 = vmatprep.mubr.f32.mxu1 %v2997_v47  ;;  %v3119_v16 = vand.u32 4294901760, %v3118_v60  ;;  %v3137_v13 = vand.u32 4294901760, %v19105_v27  ;;  %v3148_v39 = vsub.f32 %v19096_v41, %v3147_v23 }
 0x2cb   : > { %15610 = vmatmul.mubr.f32.gmra.mxu0 %v3109_v26  ;;  %v3138_v4 = vsub.f32 %v19105_v27, %v3137_v13  ;;  %v3149_v47 = vand.u32 4294901760, %v3148_v39 }
 0x2cc   : > { %15612 = vmatprep.mubr.f32.mxu0 %v3119_v16  ;;  %15691 = vmatmul.mubr.f32.vlgmr.msra.gmra.mxu1 %v3007_v35  ;;  %v22978_v35 = vld [vmem:[#allocation27_spill] sm:$0xff] }
 0x2cd   : > { %15693 = vmatprep.mubr.f32.mxu1 %v3017_v63  ;;  %v3139_v9 = vand.u32 4294901760, %v3138_v4  ;;  %15747 = vmatpush3.msra.mxu1 %v22969_v51 }
 0x2ce   : > { %15748 = vmatprep.subr.mxu1 %v22970_v20 }
 0x2cf   : > { %15613 = vmatmul.mubr.f32.gmra.mxu0 %v3129_v54  ;;  %15749 = vmatpush3.msra.mxu1 %v22970_v20 }
 0x2d0   : > { %15615 = vmatprep.mubr.f32.mxu0 %v3139_v9  ;;  %15694 = vmatmul.mubr.f32.gmra.mxu1 %v3027_v40 }
 0x2d1   : > { %15696 = vmatprep.mubr.f32.mxu1 %v3037_v15  ;;  %15750 = vmatprep.subr.mxu1 %v22971_v11 }
 0x2d2   : > { %15751 = vmatpush3.msra.mxu1 %v22971_v11 }
 0x2d3   : > { %15616 = vmatmul.mubr.f32.gmra.mxu0 %v3149_v47  ;;  %15752 = vmatprep.subr.mxu1 %v22972_v37 }
 0x2d4   : > { %15658 = vmatprep.mubr.f32.mxu0 %v18939_v45  ;;  %15697 = vmatmul.mubr.f32.gmra.mxu1 %v3047_v5  ;;  %v22979_v45 = vld [vmem:[#allocation23_spill] sm:$0xff] }
 0x2d5   : > { %15699 = vmatprep.mubr.f32.mxu1 %v3057_v31  ;;  %15753 = vmatpush3.msra.mxu1 %v22972_v37 }
 0x2d7   : > { %15659 = vmatmul.mubr.f32.vlgmr.msra.gmra.mxu0 %v18932_v61  ;;  %v22980_v61 = vld [vmem:[#allocation19_spill] sm:$0xff] }
 0x2d8   : > { %15661 = vmatprep.mubr.f32.mxu0 %v18959_v62  ;;  %15715 = vmatpush3.msra.mxu0 %v22977_v6 }
 0x2d9   : > { %15700 = vmatmul.mubr.f32.gmra.mxu1 %v3067_v7  ;;  %15716 = vmatprep.subr.mxu0 %v22978_v35 }
 0x2da   : > { %15702 = vmatprep.mubr.f32.mxu1 %v3077_v12  ;;  %15717 = vmatpush3.msra.mxu0 %v22978_v35 }
 0x2db   : > { %15662 = vmatmul.mubr.f32.gmra.mxu0 %v18950_v10  ;;  %15718 = vmatprep.subr.mxu0 %v22979_v45 }
 0x2dc   : > { %15664 = vmatprep.mubr.f32.mxu0 %v18982_v42  ;;  %15719 = vmatpush3.msra.mxu0 %v22979_v45 }
 0x2dd   : > { %15703 = vmatmul.mubr.f32.gmra.mxu1 %v3087_v33  ;;  %15720 = vmatprep.subr.mxu0 %v22980_v61 }
 0x2de   : > { %15705 = vmatprep.mubr.f32.mxu1 %v3097_v36  ;;  %15721 = vmatpush3.msra.mxu0 %v22980_v61 }
 0x2df   : > { %15665 = vmatmul.mubr.f32.gmra.mxu0 %v18972_v21 }
 0x2e0   : > { %15667 = vmatprep.mubr.f32.mxu0 %v19008_v2 }
 0x2e1   : > { %15706 = vmatmul.mubr.f32.gmra.mxu1 %v3107_v49 }
 0x2e2   : > { %15708 = vmatprep.mubr.f32.mxu1 %v3117_v14 }
 0x2e3   : > { %15668 = vmatmul.mubr.f32.gmra.mxu0 %v18996_v3 }
 0x2e4   : > { %15670 = vmatprep.mubr.f32.mxu0 %v19032_v48 }
 0x2e5   : > { %15709 = vmatmul.mubr.f32.gmra.mxu1 %v3127_v1 }
 0x2e6   : > { %15711 = vmatprep.mubr.f32.mxu1 %v3137_v13 }
 0x2e7   : > { %15671 = vmatmul.mubr.f32.gmra.mxu0 %v19019_v25 }
 0x2e8   : > { %15673 = vmatprep.mubr.f32.mxu0 %v19057_v32 }
 0x2e9   : > { %15712 = vmatmul.mubr.f32.gmra.mxu1 %v3147_v23 }
 0x2ea   : > { %15754 = vmatprep.mubr.f32.mxu1 %v18934_v28 }
 0x2eb   : > { %15674 = vmatmul.mubr.f32.gmra.mxu0 %v19048_v43 }
 0x2ec   : > { %15676 = vmatprep.mubr.f32.mxu0 %v19083_v17 }
 0x2ed   : > { %15755 = vmatmul.mubr.f32.vlgmr.msra.gmra.mxu1 %v18928_v44 }
 0x2ee   : > { %15757 = vmatprep.mubr.f32.mxu1 %v18952_v59 }
 0x2ef   : > { %15677 = vmatmul.mubr.f32.gmra.mxu0 %v19070_v18 }
 0x2f0   : > { %15679 = vmatprep.mubr.f32.mxu0 %v19105_v27 }
 0x2f1   : > { %15758 = vmatmul.mubr.f32.gmra.mxu1 %v18941_v46 }
 0x2f2   : > { %15760 = vmatprep.mubr.f32.mxu1 %v18974_v56 }
 0x2f3   : > { %15680 = vmatmul.mubr.f32.gmra.mxu0 %v19096_v41 }
 0x2f4   : > { %15722 = vmatprep.mubr.f32.mxu0 %v18934_v28  ;;  %v22982_v28 = vld [vmem:[#allocation6_spill] sm:$0xff] }
 0x2f5   : > { %15761 = vmatmul.mubr.f32.gmra.mxu1 %v18961_v30 }
 0x2f6   : > { %15763 = vmatprep.mubr.f32.mxu1 %v18998_v38 }
 0x2f7   : > { %15723 = vmatmul.mubr.f32.vlgmr.msra.gmra.mxu0 %v18928_v44  ;;  %v22981_v44 = vld [vmem:[#allocation3_spill] sm:$0xff] }
 0x2f8   : > { %15725 = vmatprep.mubr.f32.mxu0 %v18952_v59 }
 0x2f9   : > { %15764 = vmatmul.mubr.f32.gmra.mxu1 %v18984_v58 }
 0x2fa   : > { %15766 = vmatprep.mubr.f32.mxu1 %v19021_v50 }
 0x2fb   : > { %15726 = vmatmul.mubr.f32.gmra.mxu0 %v18941_v46 }
 0x2fc   : > { %15728 = vmatprep.mubr.f32.mxu0 %v18974_v56 }
 0x2fd   : > { %15767 = vmatmul.mubr.f32.gmra.mxu1 %v19010_v22 }
 0x2fe   : > { %15769 = vmatprep.mubr.f32.mxu1 %v19050_v55 }
 0x2ff   : > { %15729 = vmatmul.mubr.f32.gmra.mxu0 %v18961_v30 }
 0x300   : > { %15731 = vmatprep.mubr.f32.mxu0 %v18998_v38 }
 0x301   : > { %15770 = vmatmul.mubr.f32.gmra.mxu1 %v19034_v52 }
 0x302   : > { %15772 = vmatprep.mubr.f32.mxu1 %v19072_v19 }
 0x303   : > { %15732 = vmatmul.mubr.f32.gmra.mxu0 %v18984_v58 }
 0x304   : > { %15734 = vmatprep.mubr.f32.mxu0 %v19021_v50 }
 0x305   : > { %15773 = vmatmul.mubr.f32.gmra.mxu1 %v19059_v29 }
 0x306   : > { %15775 = vmatprep.mubr.f32.mxu1 %v19098_v8 }
 0x307   : > { %15735 = vmatmul.mubr.f32.gmra.mxu0 %v19010_v22 }
 0x308   : > { %15737 = vmatprep.mubr.f32.mxu0 %v19050_v55 }
 0x309   : > { %15776 = vmatmul.mubr.f32.gmra.mxu1 %v19085_v34 }
 0x30a   : > { %15866 = vmatprep.mubr.f32.mxu1 %v22981_v44 }
 0x30b   : > { %15738 = vmatmul.mubr.f32.gmra.mxu0 %v19034_v52 }
 0x30c   : > { %15740 = vmatprep.mubr.f32.mxu0 %v19072_v19 }
 0x30f   : > { %15741 = vmatmul.mubr.f32.gmra.mxu0 %v19059_v29 }
 0x310   : > { %15743 = vmatprep.mubr.f32.mxu0 %v19098_v8 }
 0x313   : > { %15744 = vmatmul.mubr.f32.gmra.mxu0 %v19085_v34 }
 0x314   : > { %15810 = vmatprep.mubr.f32.mxu0 %v22982_v28 }
 0x36c   : > { %v15628_v46 = vpop.f32.mrf.mxu1 }
 0x36e   : > { %v19207_v10 = vpop.f32.mrf.mxu1 }
 0x370   : > { %v15631_v59 = vpop.f32.mrf.mxu1 }
 0x372   : > { %v19209_v51 = vpop.f32.mrf.mxu1 }
 0x374   : > { %v15634_v20 = vpop.f32.mrf.mxu1 }
 0x375   : > { %v15596_v62 = vpop.f32.mrf.mxu0 }
 0x376   : > { %v3249_v30 = vadd.f32 %v15628_v46, %v15596_v62  ;;  %v19211_v11 = vpop.f32.mrf.mxu1 }
 0x377   : > { %v19213_v21 = vpop.f32.mrf.mxu0 }
 0x378   : > { %v15637_v56 = vpop.f32.mrf.mxu1 }
 0x37a   : > { %v15599_v63 = vpop.f32.mrf.mxu0  ;;  %v19215_v37 = vpop.f32.mrf.mxu1 }
 0x37b   : > { %v3261_v42 = vadd.f32 %v15631_v59, %v15599_v63 }
 0x37c   : > { %v19217_v58 = vpop.f32.mrf.mxu0  ;;  %v15640_v40 = vpop.f32.mrf.mxu1 }
 0x37e   : > { %v19219_v3 = vpop.f32.mrf.mxu1 }
 0x37f   : > { %v15602_v38 = vpop.f32.mrf.mxu0 }
 0x380   : > { %v3273_v2 = vadd.f32 %v15634_v20, %v15602_v38  ;;  %v15643_v22 = vpop.f32.mrf.mxu1 }
 0x381   : > { %v19221_v15 = vpop.f32.mrf.mxu0 }
 0x382   : > { %v19223_v25 = vpop.f32.mrf.mxu1 }
 0x383   : > { %v15605_v50 = vpop.f32.mrf.mxu0 }
 0x384   : > { %v19225_v5 = vadd.f32 %v15637_v56, %v15605_v50  ;;  %v15646_v31 = vpop.f32.mrf.mxu1 }
 0x385   : > { %v19227_v48 = vpop.f32.mrf.mxu0 }
 0x386   : > { %v19229_v52 = vpop.f32.mrf.mxu1 }
 0x387   : > { %v15608_v43 = vpop.f32.mrf.mxu0 }
 0x388   : > { %v19231_v55 = vadd.f32 %v15640_v40, %v15608_v43  ;;  %v19233_v7 = vpop.f32.mrf.mxu1 }
 0x389   : > { %v19235_v6 = vpop.f32.mrf.mxu0 }
 0x38a   : > { %v19237_v32 = vpop.f32.mrf.mxu1 }
 0x38b   : > { %v15611_v29 = vpop.f32.mrf.mxu0 }
 0x38c   : > { %v19239_v12 = vadd.f32 %v15643_v22, %v15611_v29  ;;  %v15692_v33 = vpop.f32.mrf.mxu1 }
 0x38d   : > { %v19241_v18 = vpop.f32.mrf.mxu0 }
 0x38e   : > { %v19243_v19 = vpop.f32.mrf.mxu1 }
 0x38f   : > { %22983 = vst [vmem:[#allocation29_spill] sm:$0xff] %v19243_v19  ;;  %v15614_v36 = vpop.f32.mrf.mxu0 }
 0x390   : > { %v19245_v17 = vadd.f32 %v15646_v31, %v15614_v36  ;;  %v15695_v34 = vpop.f32.mrf.mxu1 }
 0x391   : > { %v3121_v49 = vpop.f32.mrf.mxu0 }
 0x392   : > { %v19247_v53 = vpop.f32.mrf.mxu1 }
 0x393   : > { %22984 = vst [vmem:[#allocation35_spill] sm:$0xff] %v19247_v53  ;;  %v19249_v1 = vpop.f32.mrf.mxu0 }
 0x394   : > { %v15698_v41 = vpop.f32.mrf.mxu1 }
 0x395   : > { %v19251_v8 = vpop.f32.mrf.mxu0 }
 0x396   : > { %v19253_v0 = vpop.f32.mrf.mxu1 }
 0x397   : > { %22985 = vst [vmem:[#allocation38_spill] sm:$0xff] %v19253_v0  ;;  %v15660_v14 = vpop.f32.mrf.mxu0  ;;  %v3291_v0 = vadd.f32 %v19219_v3, %v19235_v6  ;;  %v3279_v3 = vadd.f32 %v19215_v37, %v19227_v48 }
 0x398   : > { %v3420_v24 = vadd.f32 %v15660_v14, %v3249_v30 }
 0x399   : > { %v19255_v27 = vpop.f32.mrf.mxu0  ;;  %v19257_v60 = vpop.f32.mrf.mxu1 }
 0x39a   : > { %22986 = vst [vmem:[#allocation82_spill] sm:$0xff] %v19255_v27  ;;  %v19259_v57 = vadd.f32 %v15692_v33, %v3420_v24  ;;  %v3303_v27 = vadd.f32 %v19223_v25, %v19241_v18 }
 0x39b   : > { %v15663_v26 = vpop.f32.mrf.mxu0  ;;  %v19261_v16 = vpop.f32.mrf.mxu1 }
 0x39c   : > { %22987 = vst [vmem:[#allocation83_spill] sm:$0xff] %v19259_v57  ;;  %v3434_v13 = vadd.f32 %v15663_v26, %v3261_v42 }
 0x39d   : > { %v19263_v23 = vpop.f32.mrf.mxu0  ;;  %v19265_v4 = vpop.f32.mrf.mxu1 }
 0x39e   : > { %v19267_v54 = vadd.f32 %v15695_v34, %v3434_v13 }
 0x39f   : > { %v15666_v9 = vpop.f32.mrf.mxu0  ;;  %v19269_v39 = vpop.f32.mrf.mxu1 }
 0x3a0   : > { %22988 = vst [vmem:[#allocation84_spill] sm:$0xff] %v19267_v54  ;;  %v3448_v47 = vadd.f32 %v15666_v9, %v3273_v2 }
 0x3a1   : > { %v19271_v35 = vpop.f32.mrf.mxu0  ;;  %v15707_v45 = vpop.f32.mrf.mxu1 }
 0x3a2   : > { %v19273_v61 = vadd.f32 %v15698_v41, %v3448_v47 }
 0x3a3   : > { %v15669_v46 = vpop.f32.mrf.mxu0  ;;  %v3674_v59 = vpop.f32.mrf.mxu1 }
 0x3a4   : > { %22989 = vst [vmem:[#allocation85_spill] sm:$0xff] %v19273_v61  ;;  %v3462_v6 = vadd.f32 %v15669_v46, %v19225_v5 }
 0x3a5   : > { %v19275_v20 = vpop.f32.mrf.mxu0  ;;  %v15710_v62 = vpop.f32.mrf.mxu1 }
 0x3a6   : > { %v3651_v46 = vadd.f32 %v19257_v60, %v3462_v6 }
 0x3a7   : > { %v15672_v30 = vpop.f32.mrf.mxu0  ;;  %v3690_v56 = vpop.f32.mrf.mxu1 }
 0x3a8   : > { %v3476_v25 = vadd.f32 %v15672_v30, %v19231_v55 }
 0x3a9   : > { %v3468_v63 = vpop.f32.mrf.mxu0  ;;  %v15713_v42 = vpop.f32.mrf.mxu1 }
 0x3ab   : > { %v15675_v40 = vpop.f32.mrf.mxu0  ;;  %v19277_v38 = vpop.f32.mrf.mxu1 }
 0x3ad   : > { %v3482_v22 = vpop.f32.mrf.mxu0  ;;  %v19279_v50 = vpop.f32.mrf.mxu1 }
 0x3ae   : > { %22990 = vst [vmem:[#allocation86_spill] sm:$0xff] %v19279_v50  ;;  %v3483_v53 = vadd.f32 %v3482_v22, %v3303_v27 }
 0x3af   : > { %v15678_v2 = vpop.f32.mrf.mxu0  ;;  %v19281_v31 = vpop.f32.mrf.mxu1 }
 0x3b0   : > { %22991 = vst [vmem:[#allocation87_spill] sm:$0xff] %v19281_v31 }
 0x3b1   : > { %v3496_v43 = vpop.f32.mrf.mxu0  ;;  %v19283_v29 = vpop.f32.mrf.mxu1 }
 0x3b2   : > { %22992 = vst [vmem:[#allocation88_spill] sm:$0xff] %v19283_v29 }
 0x3b3   : > { %v15681_v33 = vpop.f32.mrf.mxu0  ;;  %v19285_v36 = vpop.f32.mrf.mxu1 }
 0x3b4   : > { %22993 = vst [vmem:[#allocation89_spill] sm:$0xff] %v19285_v36 }
 0x3b5   : > { %v3510_v34 = vpop.f32.mrf.mxu0  ;;  %v19287_v41 = vpop.f32.mrf.mxu1 }
 0x3b6   : > { %22994 = vst [vmem:[#allocation90_spill] sm:$0xff] %v19287_v41  ;;  %v3490_v41 = vadd.f32 %v15675_v40, %v19239_v12 }
 0x3b7   : > { %v19289_v14 = vpop.f32.mrf.mxu0  ;;  %v19291_v24 = vpop.f32.mrf.mxu1 }
 0x3b8   : > { %22995 = vst [vmem:[#allocation22_spill] sm:$0xff] %v19289_v14  ;;  %22996 = vst [vmem:[#allocation13_spill] sm:$0xff] %v19291_v24  ;;  %v3683_v12 = vadd.f32 %v15707_v45, %v3490_v41 }
 0x3b9   : > { %v19293_v26 = vpop.f32.mrf.mxu0  ;;  %v19295_v13 = vpop.f32.mrf.mxu1 }
 0x3ba   : > { %22997 = vst [vmem:[#allocation8_spill] sm:$0xff] %v19293_v26  ;;  %22998 = vst [vmem:[#allocation20_spill] sm:$0xff] %v19295_v13 }
 0x3bb   : > { %v19297_v9 = vpop.f32.mrf.mxu0  ;;  %v19299_v47 = vpop.f32.mrf.mxu1 }
 0x3bc   : > { %22999 = vst [vmem:[#allocation28_spill] sm:$0xff] %v19297_v9  ;;  %23000 = vst [vmem:[#allocation25_spill] sm:$0xff] %v19299_v47  ;;  %v3504_v9 = vadd.f32 %v15678_v2, %v19245_v17  ;;  %v3469_v17 = vadd.f32 %v3468_v63, %v3291_v0  ;;  %v3455_v0 = vadd.f32 %v19275_v20, %v3279_v3 }
 0x3bd   : > { %v19301_v28 = vpop.f32.mrf.mxu0  ;;  %v19303_v44 = vpop.f32.mrf.mxu1 }
 0x3be   : > { %23001 = vst [vmem:[#allocation26_spill] sm:$0xff] %v19301_v28  ;;  %v3315_v28 = vadd.f32 %v19229_v52, %v3121_v49  ;;  %v3699_v49 = vadd.f32 %v15710_v62, %v3504_v9  ;;  %v3659_v63 = vadd.f32 %v19269_v39, %v3469_v17 }
 0x3bf   : > { %v19305_v31 = vpop.f32.mrf.mxu0  ;;  %v19307_v50 = vpop.f32.mrf.mxu1 }
 0x3c0   : > { %23002 = vst [vmem:[#allocation17_spill] sm:$0xff] %v19305_v31  ;;  %23003 = vst [vmem:[#allocation11_spill] sm:$0xff] %v19307_v50  ;;  %v3497_v13 = vadd.f32 %v3496_v43, %v3315_v28  ;;  %v3327_v31 = vadd.f32 %v19237_v32, %v19251_v8  ;;  %v3667_v32 = vadd.f32 %v19265_v4, %v3476_v25 }
 0x3c1   : > { %v19309_v36 = vpop.f32.mrf.mxu0  ;;  %v15771_v14 = vpop.f32.mrf.mxu1  ;;  %v3255_v4 = vadd.f32 %v19209_v51, %v19217_v58 }
 0x3c2   : > { %23004 = vst [vmem:[#allocation27_spill] sm:$0xff] %v19309_v36  ;;  %v3333_v36 = vadd.f32 %v19233_v7, %v19249_v1  ;;  %v3511_v40 = vadd.f32 %v3510_v34, %v3327_v31  ;;  %v3675_v7 = vadd.f32 %v3674_v59, %v3483_v53  ;;  %v3691_v28 = vadd.f32 %v3690_v56, %v3497_v13 }
 0x3c3   : > { %v15733_v19 = vpop.f32.mrf.mxu0  ;;  %v4022_v26 = vpop.f32.mrf.mxu1  ;;  %v3427_v34 = vadd.f32 %v19263_v23, %v3255_v4  ;;  %v23008_v23 = vld [vmem:[#allocation38_spill] sm:$0xff] }
 0x3c4   : > { %v3518_v18 = vadd.f32 %v15681_v33, %v3333_v36  ;;  %v3707_v59 = vadd.f32 %v19277_v38, %v3511_v40  ;;  %v3840_v43 = vadd.f32 %v15733_v19, %v3651_v46  ;;  %v3243_v36 = vadd.f32 %v19207_v10, %v19213_v21  ;;  %v23018_v46 = vld [vmem:[#allocation13_spill] sm:$0xff] }
 0x3c5   : > { %v19311_v57 = vpop.f32.mrf.mxu0  ;;  %v15774_v54 = vpop.f32.mrf.mxu1  ;;  %v23017_v4 = vld [vmem:[#allocation26_spill] sm:$0xff] }
 0x3c6   : > { %v3715_v62 = vadd.f32 %v15713_v42, %v3518_v18 }
 0x3c7   : > { %v15736_v29 = vpop.f32.mrf.mxu0  ;;  %v4034_v2 = vpop.f32.mrf.mxu1  ;;  %v23007_v10 = vld [vmem:[#allocation17_spill] sm:$0xff] }
 0x3c8   : > { %v3852_v30 = vadd.f32 %v15736_v29, %v3667_v32  ;;  %v3643_v29 = vadd.f32 %v19261_v16, %v3455_v0 }
 0x3c9   : > { %v3845_v24 = vpop.f32.mrf.mxu0  ;;  %v15777_v53 = vpop.f32.mrf.mxu1  ;;  %v23011_v40 = vld [vmem:[#allocation27_spill] sm:$0xff] }
 0x3ca   : > { %v3846_v20 = vadd.f32 %v3845_v24, %v3659_v63  ;;  %v4017_v33 = vadd.f32 %v19303_v44, %v3852_v30  ;;  %v3834_v19 = vadd.f32 %v19311_v57, %v3643_v29  ;;  %v23009_v57 = vld [vmem:[#allocation20_spill] sm:$0xff] }
 0x3cb   : > { %v15739_v47 = vpop.f32.mrf.mxu0  ;;  %v4046_v51 = vpop.f32.mrf.mxu1  ;;  %v4005_v9 = vadd.f32 %v23009_v57, %v3840_v43  ;;  %v23019_v43 = vld [vmem:[#allocation88_spill] sm:$0xff] }
 0x3cc   : > { %v3864_v50 = vadd.f32 %v15739_v47, %v3683_v12  ;;  %v19371_v47 = vand.u32 4294901760, %v4017_v33 }
 0x3cd   : > { %v3857_v52 = vpop.f32.mrf.mxu0  ;;  %v19408_v30 = vand.u32 4294901760, %v4005_v9 }
 0x3ce   : > { %v3858_v8 = vadd.f32 %v3857_v52, %v3675_v7  ;;  %v4029_v56 = vadd.f32 %v15771_v14, %v3864_v50  ;;  %v23012_v7 = vld [vmem:[#allocation25_spill] sm:$0xff]  ;;  %v19411_v63 = vsub.f32 %v4017_v33, %v19371_v47 }
 0x3cf   : > { %v15742_v61 = vpop.f32.mrf.mxu0 }
 0x3d0   : > { %v3876_v1 = vadd.f32 %v15742_v61, %v3699_v49  ;;  %v4023_v39 = vadd.f32 %v4022_v26, %v3858_v8  ;;  %v19344_v58 = vand.u32 4294901760, %v4029_v56  ;;  %v23006_v26 = vld [vmem:[#allocation85_spill] sm:$0xff]  ;;  %v23010_v49 = vld [vmem:[#allocation35_spill] sm:$0xff]  ;;  %v23013_v8 = vld [vmem:[#allocation84_spill] sm:$0xff] }
 0x3d1   : > { %v3869_v55 = vpop.f32.mrf.mxu0  ;;  %v3828_v21 = vadd.f32 %v23007_v10, %v23006_v26  ;;  %v3611_v17 = vadd.f32 %v23010_v49, %v3427_v34  ;;  %v19448_v34 = vand.u32 4294901760, %v19411_v63  ;;  %v23022_v26 = vld [vmem:[#allocation29_spill] sm:$0xff] }
 0x3d2   : > { %v4041_v27 = vadd.f32 %v15774_v54, %v3876_v1  ;;  %v3870_v45 = vadd.f32 %v3869_v55, %v3691_v28  ;;  %v3267_v54 = vadd.f32 %v19211_v11, %v19221_v15  ;;  %v19356_v41 = vand.u32 4294901760, %v4023_v39 }
 0x3d3   : > { %v15745_v61 = vpop.f32.mrf.mxu0  ;;  %v19375_v25 = vsub.f32 %v4029_v56, %v19344_v58  ;;  %v3999_v1 = vadd.f32 %v23012_v7, %v3834_v19  ;;  %v23020_v19 = vld [vmem:[#allocation83_spill] sm:$0xff] }
 0x3d4   : > { %v19332_v37 = vand.u32 4294901760, %v4041_v27  ;;  %v4035_v5 = vadd.f32 %v4034_v2, %v3870_v45  ;;  %v3888_v48 = vadd.f32 %v15745_v61, %v3715_v62  ;;  %v3441_v50 = vadd.f32 %v19271_v35, %v3267_v54  ;;  %v23005_v35 = vld [vmem:[#allocation11_spill] sm:$0xff]  ;;  %v23015_v62 = vld [vmem:[#allocation90_spill] sm:$0xff] }
 0x3d5   : > { %v3881_v42 = vpop.f32.mrf.mxu0  ;;  %v4011_v16 = vadd.f32 %v23005_v35, %v3846_v20  ;;  %v19394_v3 = vsub.f32 %v4023_v39, %v19356_v41  ;;  %v3993_v0 = vadd.f32 %v23015_v62, %v3828_v21  ;;  %v19420_v56 = vand.u32 4294901760, %v19375_v25  ;;  %v23021_v35 = vld [vmem:[#allocation22_spill] sm:$0xff]  ;;  %v23023_v21 = vld [vmem:[#allocation89_spill] sm:$0xff] }
 0x3d6   : > { %v19339_v22 = vand.u32 4294901760, %v4035_v5  ;;  %v4053_v31 = vadd.f32 %v15777_v53, %v3888_v48  ;;  %v3882_v38 = vadd.f32 %v3881_v42, %v3707_v59  ;;  %v19347_v11 = vsub.f32 %v4041_v27, %v19332_v37  ;;  %v23014_v27 = vld [vmem:[#allocation28_spill] sm:$0xff] }
 0x3d7   : > { %v3627_v13 = vadd.f32 %v23008_v23, %v3441_v50  ;;  %v19390_v28 = vand.u32 4294901760, %v4011_v16  ;;  %v3816_v45 = vadd.f32 %v23014_v27, %v23013_v8  ;;  %v3810_v54 = vadd.f32 %v23017_v4, %v3611_v17 }
 0x3d8   : > { %v19349_v15 = vand.u32 4294901760, %v4053_v31  ;;  %v4047_v60 = vadd.f32 %v4046_v51, %v3882_v38  ;;  %v19359_v44 = vsub.f32 %v4035_v5, %v19339_v22  ;;  %v19385_v12 = vand.u32 4294901760, %v19347_v11  ;;  %v23016_v5 = vld [vmem:[#allocation82_spill] sm:$0xff] }
 0x3d9   : > { %v3822_v2 = vadd.f32 %v23011_v40, %v3627_v13  ;;  %v3413_v48 = vadd.f32 %v23016_v5, %v3243_v36  ;;  %v19425_v42 = vand.u32 4294901760, %v3999_v1  ;;  %v19429_v39 = vsub.f32 %v4011_v16, %v19390_v28  ;;  %v23024_v40 = vld [vmem:[#allocation8_spill] sm:$0xff] }
 0x3da   : > { %v19362_v14 = vsub.f32 %v4053_v31, %v19349_v15  ;;  %v19364_v24 = vand.u32 4294901760, %v4047_v60  ;;  %15778 = vmatprep.subr.mxu0 %v19349_v15  ;;  %v19403_v55 = vand.u32 4294901760, %v19359_v44  ;;  %v4320_v59 = vsub.f32 %v19347_v11, %v19385_v12 }
 0x3db   : > { %15779 = vmatpush3.msra.mxu0 %v19349_v15  ;;  %v3987_v20 = vadd.f32 %v23018_v46, %v3822_v2  ;;  %v19435_v50 = vand.u32 4294901760, %v19394_v3  ;;  %v3981_v29 = vadd.f32 %v23019_v43, %v3816_v45  ;;  %v19438_v33 = vand.u32 4294901760, %v3993_v0  ;;  %v23025_v45 = vld [vmem:[#allocation86_spill] sm:$0xff] }
 0x3dc   : > { %v19378_v52 = vsub.f32 %v4047_v60, %v19364_v24  ;;  %15780 = vmatprep.subr.mxu0 %v19364_v24  ;;  %v19382_v18 = vand.u32 4294901760, %v19362_v14  ;;  %v4327_v38 = vsub.f32 %v19359_v44, %v19403_v55  ;;  %v19442_v51 = vsub.f32 %v4005_v9, %v19408_v30 }
 0x3dd   : > { %15781 = vmatpush3.msra.mxu0 %v19364_v24  ;;  %v4321_v60 = vand.u32 4294901760, %v4320_v59  ;;  %v4334_v36 = vsub.f32 %v19375_v25, %v19420_v56  ;;  %v3804_v16 = vadd.f32 %v23021_v35, %v23020_v19  ;;  %v3595_v10 = vadd.f32 %v23022_v26, %v3413_v48  ;;  %v23026_v48 = vld [vmem:[#allocation87_spill] sm:$0xff] }
 0x3de   : > { %15782 = vmatprep.subr.mxu0 %v19332_v37  ;;  %v4306_v6 = vsub.f32 %v19362_v14, %v19382_v18  ;;  %v19400_v32 = vand.u32 4294901760, %v19378_v52  ;;  %v3975_v23 = vadd.f32 %v23023_v21, %v3810_v54  ;;  %v19454_v13 = vand.u32 4294901760, %v3987_v20 }
 0x3df   : > { %15783 = vmatpush3.msra.mxu0 %v19332_v37  ;;  %v19458_v57 = vsub.f32 %v3999_v1, %v19425_v42  ;;  %v4328_v9 = vand.u32 4294901760, %v4327_v38  ;;  %v4341_v49 = vsub.f32 %v19394_v3, %v19435_v50  ;;  %v19464_v17 = vand.u32 4294901760, %v19429_v39 }
 0x3e0   : > { %15784 = vmatprep.subr.mxu0 %v19339_v22  ;;  %v4307_v53 = vand.u32 4294901760, %v4306_v6  ;;  %v4313_v61 = vsub.f32 %v19378_v52, %v19400_v32  ;;  %v3798_v2 = vadd.f32 %v23024_v40, %v3595_v10  ;;  %v19467_v7 = vand.u32 4294901760, %v3981_v29 }
 0x3e1   : > { %15785 = vmatpush3.msra.mxu0 %v19339_v22  ;;  %v19471_v1 = vsub.f32 %v3993_v0, %v19438_v33  ;;  %v4335_v6 = vand.u32 4294901760, %v4334_v36  ;;  %v4348_v8 = vsub.f32 %v19411_v63, %v19448_v34  ;;  %v19477_v27 = vand.u32 4294901760, %v19442_v51 }
 0x3e2   : > { %15786 = vmatprep.subr.mxu0 %v19344_v58  ;;  %15834 = vmatprep.subr.mxu1 %v4307_v53  ;;  %v4314_v31 = vand.u32 4294901760, %v4313_v61  ;;  %v3969_v62 = vadd.f32 %v23025_v45, %v3804_v16  ;;  %v19484_v0 = vsub.f32 %v3987_v20, %v19454_v13  ;;  %v4342_v61 = vand.u32 4294901760, %v4341_v49 }
 0x3e3   : > { %15787 = vmatpush3.msra.mxu0 %v19344_v58  ;;  %15835 = vmatpush3.msra.mxu1 %v4307_v53  ;;  %v19480_v53 = vand.u32 4294901760, %v3975_v23  ;;  %v4355_v59 = vsub.f32 %v19429_v39, %v19464_v17  ;;  %v19490_v5 = vand.u32 4294901760, %v19458_v57  ;;  %v3963_v4 = vadd.f32 %v23026_v48, %v3798_v2  ;;  %v23027_v48 = vld [vmem:[#allocation34_spill] sm:$0xff] }
 0x3e4   : > { %15788 = vmatprep.subr.mxu0 %v19356_v41  ;;  %15836 = vmatprep.subr.mxu1 %v4314_v31  ;;  %v19495_v54 = vsub.f32 %v3981_v29, %v19467_v7  ;;  %v4349_v46 = vand.u32 4294901760, %v4348_v8  ;;  %v4362_v20 = vsub.f32 %v19442_v51, %v19477_v27  ;;  %v19503_v38 = vand.u32 4294901760, %v3969_v62 }
 0x3e5   : > { %15789 = vmatpush3.msra.mxu0 %v19356_v41  ;;  %15837 = vmatpush3.msra.mxu1 %v4314_v31  ;;  %v19501_v31 = vand.u32 4294901760, %v19471_v1  ;;  %v19507_v43 = vsub.f32 %v3975_v23, %v19480_v53  ;;  %v4356_v29 = vand.u32 4294901760, %v4355_v59  ;;  %v19513_v36 = vand.u32 4294901760, %v19484_v0 }
 0x3e6   : > { %15790 = vmatprep.subr.mxu0 %v19371_v47  ;;  %15838 = vmatprep.subr.mxu1 %v4321_v60  ;;  %v19515_v19 = vand.u32 4294901760, %v3963_v4  ;;  %v4363_v35 = vand.u32 4294901760, %v4362_v20  ;;  %v19522_v26 = vand.u32 4294901760, %v19495_v54  ;;  %v19525_v10 = vsub.f32 %v3969_v62, %v19503_v38  ;;  %v23028_v20 = vld [vmem:[#allocation41_spill] sm:$0xff] }
 0x3e7   : > { %15791 = vmatpush3.msra.mxu0 %v19371_v47  ;;  %15839 = vmatpush3.msra.mxu1 %v4321_v60  ;;  %v4369_v60 = vsub.f32 %v19458_v57, %v19490_v5  ;;  %v4376_v16 = vsub.f32 %v19471_v1, %v19501_v31  ;;  %v4383_v23 = vsub.f32 %v19484_v0, %v19513_v36 }
 0x3e8   : > { %15792 = vmatprep.subr.mxu0 %v19390_v28  ;;  %15840 = vmatprep.subr.mxu1 %v4328_v9  ;;  %v19535_v49 = vsub.f32 %v3963_v4, %v19515_v19  ;;  %v4390_v2 = vsub.f32 %v19495_v54, %v19522_v26 }
 0x3e9   : > { %15793 = vmatpush3.msra.mxu0 %v19390_v28  ;;  %15841 = vmatpush3.msra.mxu1 %v4328_v9  ;;  %v4370_v21 = vand.u32 4294901760, %v4369_v60  ;;  %v19532_v9 = vand.u32 4294901760, %v19507_v43  ;;  %v4377_v40 = vand.u32 4294901760, %v4376_v16  ;;  %v4384_v8 = vand.u32 4294901760, %v4383_v23  ;;  %v23029_v60 = vld [vmem:[#allocation44_spill] sm:$0xff]  ;;  %v23031_v16 = vld [vmem:[#allocation50_spill] sm:$0xff] }
 0x3ea   : > { %15794 = vmatprep.subr.mxu0 %v19408_v30  ;;  %15842 = vmatprep.subr.mxu1 %v4335_v6  ;;  %v19550_v62 = vand.u32 4294901760, %v19535_v49  ;;  %v23036_v23 = vld [vmem:[#allocation9_spill] sm:$0xff] }
 0x3eb   : > { %15795 = vmatpush3.msra.mxu0 %v19408_v30  ;;  %15843 = vmatpush3.msra.mxu1 %v4335_v6  ;;  %v19543_v6 = vand.u32 4294901760, %v19525_v10  ;;  %v4397_v45 = vsub.f32 %v19507_v43, %v19532_v9 }
 0x3ec   : > { %15796 = vmatprep.subr.mxu0 %v19425_v42  ;;  %15844 = vmatprep.subr.mxu1 %v4342_v61 }
 0x3ed   : > { %15797 = vmatpush3.msra.mxu0 %v19425_v42  ;;  %15845 = vmatpush3.msra.mxu1 %v4342_v61  ;;  %v4391_v61 = vand.u32 4294901760, %v4390_v2  ;;  %v4404_v59 = vsub.f32 %v19525_v10, %v19543_v6  ;;  %v4398_v4 = vand.u32 4294901760, %v4397_v45  ;;  %v23040_v2 = vld [vmem:[#allocation14_spill] sm:$0xff]  ;;  %v23044_v45 = vld [vmem:[#allocation37_spill] sm:$0xff] }
 0x3ee   : > { %15798 = vmatprep.subr.mxu0 %v19438_v33  ;;  %15846 = vmatprep.subr.mxu1 %v4349_v46 }
 0x3ef   : > { %15799 = vmatpush3.msra.mxu0 %v19438_v33  ;;  %15847 = vmatpush3.msra.mxu1 %v4349_v46  ;;  %v4411_v46 = vsub.f32 %v19535_v49, %v19550_v62 }
 0x3f0   : > { %15800 = vmatprep.subr.mxu0 %v19454_v13  ;;  %15848 = vmatprep.subr.mxu1 %v4356_v29 }
 0x3f1   : > { %15801 = vmatpush3.msra.mxu0 %v19454_v13  ;;  %15849 = vmatpush3.msra.mxu1 %v4356_v29  ;;  %v4405_v29 = vand.u32 4294901760, %v4404_v59  ;;  %v23048_v59 = vld [vmem:[#allocation46_spill] sm:$0xff] }
 0x3f2   : > { %15802 = vmatprep.subr.mxu0 %v19467_v7  ;;  %15850 = vmatprep.subr.mxu1 %v4363_v35 }
 0x3f3   : > { %15803 = vmatpush3.msra.mxu0 %v19467_v7  ;;  %15851 = vmatpush3.msra.mxu1 %v4363_v35  ;;  %v4412_v35 = vand.u32 4294901760, %v4411_v46  ;;  %v23052_v46 = vld [vmem:[#allocation54_spill] sm:$0xff] }
 0x3f4   : > { %15804 = vmatprep.subr.mxu0 %v19480_v53  ;;  %15852 = vmatprep.subr.mxu1 %v4370_v21 }
 0x3f5   : > { %15805 = vmatpush3.msra.mxu0 %v19480_v53  ;;  %15853 = vmatpush3.msra.mxu1 %v4370_v21  ;;  %v23034_v21 = vld [vmem:[#allocation21_spill] sm:$0xff] }
 0x3f6   : > { %15806 = vmatprep.subr.mxu0 %v19503_v38  ;;  %15854 = vmatprep.subr.mxu1 %v4377_v40 }
 0x3f7   : > { %15807 = vmatpush3.msra.mxu0 %v19503_v38  ;;  %15855 = vmatpush3.msra.mxu1 %v4377_v40  ;;  %v23039_v40 = vld [vmem:[#allocation66_spill] sm:$0xff] }
 0x3f8   : > { %15808 = vmatprep.subr.mxu0 %v19515_v19  ;;  %15856 = vmatprep.subr.mxu1 %v4384_v8 }
 0x3f9   : > { %15809 = vmatpush3.msra.mxu0 %v19515_v19  ;;  %15857 = vmatpush3.msra.mxu1 %v4384_v8  ;;  %v23043_v8 = vld [vmem:[#allocation74_spill] sm:$0xff] }
 0x3fa   : > { %15811 = vmatmul.mubr.f32.vlgmr.msra.gmra.mxu0 %v23027_v48  ;;  %15858 = vmatprep.subr.mxu1 %v4391_v61 }
 0x3fb   : > { %15890 = vmatprep.subr.mxu0 %v19362_v14  ;;  %15859 = vmatpush3.msra.mxu1 %v4391_v61  ;;  %v23047_v61 = vld [vmem:[#allocation79_spill] sm:$0xff] }
 0x3fc   : > { %15891 = vmatpush3.msra.mxu0 %v19362_v14  ;;  %15860 = vmatprep.subr.mxu1 %v4398_v4  ;;  %v23030_v14 = vld [vmem:[#allocation47_spill] sm:$0xff] }
 0x3fd   : > { %15892 = vmatprep.subr.mxu0 %v19378_v52  ;;  %15813 = vmatprep.mubr.f32.mxu0 %v23028_v20 }
 0x3fe   : > { %15861 = vmatpush3.msra.mxu1 %v4398_v4  ;;  %15893 = vmatpush3.msra.mxu0 %v19378_v52  ;;  %v23032_v52 = vld [vmem:[#allocation24_spill] sm:$0xff]  ;;  %v23051_v4 = vld [vmem:[#allocation81_spill] sm:$0xff] }
 0x3ff   : > { %15814 = vmatmul.mubr.f32.gmra.mxu0 %v23029_v60  ;;  %15862 = vmatprep.subr.mxu1 %v4405_v29 }
 0x400   : > { %15894 = vmatprep.subr.mxu0 %v19347_v11  ;;  %15863 = vmatpush3.msra.mxu1 %v4405_v29  ;;  %v23055_v29 = vld [vmem:[#allocation62_spill] sm:$0xff] }
 0x401   : > { %15895 = vmatpush3.msra.mxu0 %v19347_v11  ;;  %15864 = vmatprep.subr.mxu1 %v4412_v35  ;;  %v23033_v11 = vld [vmem:[#allocation55_spill] sm:$0xff] }
 0x402   : > { %15896 = vmatprep.subr.mxu0 %v19359_v44  ;;  %15816 = vmatprep.mubr.f32.mxu0 %v23030_v14 }
 0x403   : > { %15865 = vmatpush3.msra.mxu1 %v4412_v35  ;;  %15897 = vmatpush3.msra.mxu0 %v19359_v44  ;;  %v23035_v44 = vld [vmem:[#allocation58_spill] sm:$0xff]  ;;  %v23056_v35 = vld [vmem:[#allocation12_spill] sm:$0xff] }
 0x404   : > { %15817 = vmatmul.mubr.f32.gmra.mxu0 %v23031_v16  ;;  %15867 = vmatmul.mubr.f32.vlgmr.msra.gmra.mxu1 %v23032_v52 }
 0x405   : > { %15898 = vmatprep.subr.mxu0 %v19375_v25  ;;  %15946 = vmatprep.subr.mxu1 %v19349_v15 }
 0x406   : > { %15899 = vmatpush3.msra.mxu0 %v19375_v25  ;;  %15947 = vmatpush3.msra.mxu1 %v19349_v15  ;;  %v23037_v25 = vld [vmem:[#allocation63_spill] sm:$0xff] }
 0x407   : > { %15900 = vmatprep.subr.mxu0 %v19394_v3  ;;  %15948 = vmatprep.subr.mxu1 %v19364_v24 }
 0x408   : > { %15819 = vmatprep.mubr.f32.mxu0 %v23033_v11  ;;  %15869 = vmatprep.mubr.f32.mxu1 %v23034_v21 }
 0x409   : > { %15901 = vmatpush3.msra.mxu0 %v19394_v3  ;;  %15949 = vmatpush3.msra.mxu1 %v19364_v24  ;;  %v23038_v3 = vld [vmem:[#allocation10_spill] sm:$0xff] }
 0x40a   : > { %15820 = vmatmul.mubr.f32.gmra.mxu0 %v23035_v44  ;;  %15870 = vmatmul.mubr.f32.gmra.mxu1 %v23036_v23 }
 0x40b   : > { %15902 = vmatprep.subr.mxu0 %v19411_v63  ;;  %15950 = vmatprep.subr.mxu1 %v19332_v37 }
 0x40c   : > { %15903 = vmatpush3.msra.mxu0 %v19411_v63  ;;  %15951 = vmatpush3.msra.mxu1 %v19332_v37  ;;  %v23041_v63 = vld [vmem:[#allocation71_spill] sm:$0xff] }
 0x40d   : > { %15904 = vmatprep.subr.mxu0 %v19429_v39  ;;  %15952 = vmatprep.subr.mxu1 %v19339_v22 }
 0x40e   : > { %15822 = vmatprep.mubr.f32.mxu0 %v23037_v25  ;;  %15872 = vmatprep.mubr.f32.mxu1 %v23038_v3 }
 0x40f   : > { %15905 = vmatpush3.msra.mxu0 %v19429_v39  ;;  %15953 = vmatpush3.msra.mxu1 %v19339_v22  ;;  %v23042_v39 = vld [vmem:[#allocation33_spill] sm:$0xff] }
 0x410   : > { %15823 = vmatmul.mubr.f32.gmra.mxu0 %v23039_v40  ;;  %15873 = vmatmul.mubr.f32.gmra.mxu1 %v23040_v2 }
 0x411   : > { %15906 = vmatprep.subr.mxu0 %v19442_v51  ;;  %15954 = vmatprep.subr.mxu1 %v19344_v58 }
 0x412   : > { %15907 = vmatpush3.msra.mxu0 %v19442_v51  ;;  %15955 = vmatpush3.msra.mxu1 %v19344_v58  ;;  %v23045_v51 = vld [vmem:[#allocation77_spill] sm:$0xff] }
 0x413   : > { %15908 = vmatprep.subr.mxu0 %v19458_v57  ;;  %15956 = vmatprep.subr.mxu1 %v19356_v41 }
 0x414   : > { %15825 = vmatprep.mubr.f32.mxu0 %v23041_v63  ;;  %15875 = vmatprep.mubr.f32.mxu1 %v23042_v39 }
 0x415   : > { %15909 = vmatpush3.msra.mxu0 %v19458_v57  ;;  %15957 = vmatpush3.msra.mxu1 %v19356_v41  ;;  %v23046_v57 = vld [vmem:[#allocation43_spill] sm:$0xff] }
 0x416   : > { %15826 = vmatmul.mubr.f32.gmra.mxu0 %v23043_v8  ;;  %15876 = vmatmul.mubr.f32.gmra.mxu1 %v23044_v45 }
 0x417   : > { %15910 = vmatprep.subr.mxu0 %v19471_v1  ;;  %15958 = vmatprep.subr.mxu1 %v19371_v47 }
 0x418   : > { %15911 = vmatpush3.msra.mxu0 %v19471_v1  ;;  %15959 = vmatpush3.msra.mxu1 %v19371_v47  ;;  %v23049_v1 = vld [vmem:[#allocation80_spill] sm:$0xff] }
 0x419   : > { %15912 = vmatprep.subr.mxu0 %v19484_v0  ;;  %15960 = vmatprep.subr.mxu1 %v19390_v28 }
 0x41a   : > { %15828 = vmatprep.mubr.f32.mxu0 %v23045_v51  ;;  %15878 = vmatprep.mubr.f32.mxu1 %v23046_v57 }
 0x41b   : > { %15913 = vmatpush3.msra.mxu0 %v19484_v0  ;;  %15961 = vmatpush3.msra.mxu1 %v19390_v28  ;;  %v23050_v0 = vld [vmem:[#allocation52_spill] sm:$0xff] }
 0x41c   : > { %15829 = vmatmul.mubr.f32.gmra.mxu0 %v23047_v61  ;;  %15879 = vmatmul.mubr.f32.gmra.mxu1 %v23048_v59 }
 0x41d   : > { %15914 = vmatprep.subr.mxu0 %v19495_v54  ;;  %15962 = vmatprep.subr.mxu1 %v19408_v30 }
 0x41e   : > { %15915 = vmatpush3.msra.mxu0 %v19495_v54  ;;  %15963 = vmatpush3.msra.mxu1 %v19408_v30  ;;  %v23053_v54 = vld [vmem:[#allocation60_spill] sm:$0xff] }
 0x41f   : > { %15916 = vmatprep.subr.mxu0 %v19507_v43  ;;  %15964 = vmatprep.subr.mxu1 %v19425_v42 }
 0x420   : > { %15831 = vmatprep.mubr.f32.mxu0 %v23049_v1  ;;  %15881 = vmatprep.mubr.f32.mxu1 %v23050_v0 }
 0x421   : > { %15917 = vmatpush3.msra.mxu0 %v19507_v43  ;;  %15965 = vmatpush3.msra.mxu1 %v19425_v42  ;;  %v23054_v43 = vld [vmem:[#allocation4_spill] sm:$0xff] }
 0x422   : > { %15832 = vmatmul.mubr.f32.gmra.mxu0 %v23051_v4  ;;  %15882 = vmatmul.mubr.f32.gmra.mxu1 %v23052_v46 }
 0x423   : > { %15918 = vmatprep.subr.mxu0 %v19525_v10  ;;  %15966 = vmatprep.subr.mxu1 %v19438_v33 }
 0x424   : > { %15919 = vmatpush3.msra.mxu0 %v19525_v10  ;;  %15967 = vmatpush3.msra.mxu1 %v19438_v33  ;;  %v23057_v10 = vld [vmem:[#allocation68_spill] sm:$0xff] }
 0x425   : > { %15920 = vmatprep.subr.mxu0 %v19535_v49  ;;  %15968 = vmatprep.subr.mxu1 %v19454_v13 }
 0x426   : > { %15884 = vmatprep.mubr.f32.mxu1 %v23053_v54  ;;  %15921 = vmatpush3.msra.mxu0 %v19535_v49  ;;  %v23058_v49 = vld [vmem:[#allocation7_spill] sm:$0xff] }
 0x427   : > { %15922 = vmatprep.mubr.f32.mxu0 %v23054_v43  ;;  %15969 = vmatpush3.msra.mxu1 %v19454_v13  ;;  %v23060_v43 = vld [vmem:[#allocation18_spill] sm:$0xff] }
 0x428   : > { %15885 = vmatmul.mubr.f32.gmra.mxu1 %v23055_v29  ;;  %15923 = vmatmul.mubr.f32.vlgmr.msra.gmra.mxu0 %v23056_v35  ;;  %v23059_v35 = vld [vmem:[#allocation70_spill] sm:$0xff] }
 0x429   : > { %15970 = vmatprep.subr.mxu1 %v19467_v7  ;;  %16002 = vmatprep.subr.mxu0 %v19382_v18 }
 0x42a   : > { %15971 = vmatpush3.msra.mxu1 %v19467_v7  ;;  %16003 = vmatpush3.msra.mxu0 %v19382_v18  ;;  %v23061_v18 = vld [vmem:[#allocation30_spill] sm:$0xff] }
 0x42b   : > { %15972 = vmatprep.subr.mxu1 %v19480_v53  ;;  %16004 = vmatprep.subr.mxu0 %v19400_v32 }
 0x42c   : > { %15887 = vmatprep.mubr.f32.mxu1 %v23057_v10  ;;  %15925 = vmatprep.mubr.f32.mxu0 %v23058_v49  ;;  %v23064_v49 = vld [vmem:[#allocation16_spill] sm:$0xff] }
 0x42d   : > { %15973 = vmatpush3.msra.mxu1 %v19480_v53  ;;  %16005 = vmatpush3.msra.mxu0 %v19400_v32  ;;  %v23062_v32 = vld [vmem:[#allocation5_spill] sm:$0xff] }
 0x42e   : > { %15888 = vmatmul.mubr.f32.gmra.mxu1 %v23059_v35  ;;  %15926 = vmatmul.mubr.f32.gmra.mxu0 %v23060_v43  ;;  %v23063_v43 = vld [vmem:[#allocation32_spill] sm:$0xff] }
 0x42f   : > { %15974 = vmatprep.subr.mxu1 %v19503_v38  ;;  %16006 = vmatprep.subr.mxu0 %v19385_v12 }
 0x430   : > { %15975 = vmatpush3.msra.mxu1 %v19503_v38  ;;  %16007 = vmatpush3.msra.mxu0 %v19385_v12  ;;  %v23065_v12 = vld [vmem:[#allocation40_spill] sm:$0xff] }
 0x431   : > { %15976 = vmatprep.subr.mxu1 %v19515_v19  ;;  %16008 = vmatprep.subr.mxu0 %v19403_v55 }
 0x432   : > { %15928 = vmatprep.mubr.f32.mxu0 %v23061_v18  ;;  %15977 = vmatpush3.msra.mxu1 %v19515_v19 }
 0x433   : > { %15978 = vmatprep.mubr.f32.mxu1 %v23062_v32  ;;  %16009 = vmatpush3.msra.mxu0 %v19403_v55  ;;  %v23066_v32 = vld [vmem:[#allocation15_spill] sm:$0xff]  ;;  %v23067_v55 = vld [vmem:[#allocation42_spill] sm:$0xff] }
 0x434   : > { %15929 = vmatmul.mubr.f32.gmra.mxu0 %v23063_v43  ;;  %15979 = vmatmul.mubr.f32.vlgmr.msra.gmra.mxu1 %v23064_v49  ;;  %v23068_v49 = vld [vmem:[#allocation31_spill] sm:$0xff] }
 0x435   : > { %16010 = vmatprep.subr.mxu0 %v19420_v56  ;;  %16058 = vmatprep.subr.mxu1 %v19349_v15 }
 0x436   : > { %16011 = vmatpush3.msra.mxu0 %v19420_v56  ;;  %16059 = vmatpush3.msra.mxu1 %v19349_v15  ;;  %v23069_v15 = vld [vmem:[#allocation49_spill] sm:$0xff]  ;;  %v23070_v56 = vld [vmem:[#allocation36_spill] sm:$0xff] }
 0x437   : > { %16012 = vmatprep.subr.mxu0 %v19435_v50  ;;  %16060 = vmatprep.subr.mxu1 %v19364_v24 }
 0x438   : > { %15931 = vmatprep.mubr.f32.mxu0 %v23065_v12  ;;  %15981 = vmatprep.mubr.f32.mxu1 %v23066_v32 }
 0x439   : > { %16013 = vmatpush3.msra.mxu0 %v19435_v50  ;;  %16061 = vmatpush3.msra.mxu1 %v19364_v24  ;;  %v23071_v24 = vld [vmem:[#allocation51_spill] sm:$0xff] }
 0x43a   : > { %15932 = vmatmul.mubr.f32.gmra.mxu0 %v23067_v55  ;;  %15982 = vmatmul.mubr.f32.gmra.mxu1 %v23068_v49  ;;  %v23072_v50 = vld [vmem:[#allocation39_spill] sm:$0xff] }
 0x43b   : > { %16014 = vmatprep.subr.mxu0 %v19448_v34  ;;  %16062 = vmatprep.subr.mxu1 %v19332_v37 }
 0x43c   : > { %16015 = vmatpush3.msra.mxu0 %v19448_v34  ;;  %16063 = vmatpush3.msra.mxu1 %v19332_v37  ;;  %v23073_v37 = vld [vmem:[#allocation57_spill] sm:$0xff] }
 0x43d   : > { %16016 = vmatprep.subr.mxu0 %v19464_v17  ;;  %16064 = vmatprep.subr.mxu1 %v19339_v22  ;;  %v23074_v34 = vld [vmem:[#allocation45_spill] sm:$0xff] }
 0x43e   : > { %15934 = vmatprep.mubr.f32.mxu0 %v23069_v15  ;;  %15984 = vmatprep.mubr.f32.mxu1 %v23070_v56 }
 0x43f   : > { %16017 = vmatpush3.msra.mxu0 %v19464_v17  ;;  %16065 = vmatpush3.msra.mxu1 %v19339_v22  ;;  %v23075_v22 = vld [vmem:[#allocation59_spill] sm:$0xff]  ;;  %v23076_v17 = vld [vmem:[#allocation48_spill] sm:$0xff] }
 0x440   : > { %15935 = vmatmul.mubr.f32.gmra.mxu0 %v23071_v24  ;;  %15985 = vmatmul.mubr.f32.gmra.mxu1 %v23072_v50 }
 0x441   : > { %16018 = vmatprep.subr.mxu0 %v19477_v27  ;;  %16066 = vmatprep.subr.mxu1 %v19344_v58 }
 0x442   : > { %16019 = vmatpush3.msra.mxu0 %v19477_v27  ;;  %16067 = vmatpush3.msra.mxu1 %v19344_v58  ;;  %v23077_v58 = vld [vmem:[#allocation65_spill] sm:$0xff] }
 0x443   : > { %16020 = vmatprep.subr.mxu0 %v19490_v5  ;;  %16068 = vmatprep.subr.mxu1 %v19356_v41  ;;  %v23078_v27 = vld [vmem:[#allocation53_spill] sm:$0xff] }
 0x444   : > { %15937 = vmatprep.mubr.f32.mxu0 %v23073_v37  ;;  %15987 = vmatprep.mubr.f32.mxu1 %v23074_v34 }
 0x445   : > { %16021 = vmatpush3.msra.mxu0 %v19490_v5  ;;  %16069 = vmatpush3.msra.mxu1 %v19356_v41  ;;  %v23079_v41 = vld [vmem:[#allocation67_spill] sm:$0xff]  ;;  %v23080_v5 = vld [vmem:[#allocation56_spill] sm:$0xff] }
 0x446   : > { %15938 = vmatmul.mubr.f32.gmra.mxu0 %v23075_v22  ;;  %15988 = vmatmul.mubr.f32.gmra.mxu1 %v23076_v17 }
 0x447   : > { %16022 = vmatprep.subr.mxu0 %v19501_v31  ;;  %16070 = vmatprep.subr.mxu1 %v19371_v47 }
 0x448   : > { %16023 = vmatpush3.msra.mxu0 %v19501_v31  ;;  %16071 = vmatpush3.msra.mxu1 %v19371_v47  ;;  %v23081_v47 = vld [vmem:[#allocation73_spill] sm:$0xff] }
 0x449   : > { %16024 = vmatprep.subr.mxu0 %v19513_v36  ;;  %16072 = vmatprep.subr.mxu1 %v19390_v28  ;;  %v23082_v31 = vld [vmem:[#allocation61_spill] sm:$0xff] }
 0x44a   : > { %15940 = vmatprep.mubr.f32.mxu0 %v23077_v58  ;;  %15990 = vmatprep.mubr.f32.mxu1 %v23078_v27 }
 0x44b   : > { %16025 = vmatpush3.msra.mxu0 %v19513_v36  ;;  %16073 = vmatpush3.msra.mxu1 %v19390_v28  ;;  %v23083_v28 = vld [vmem:[#allocation75_spill] sm:$0xff]  ;;  %v23084_v36 = vld [vmem:[#allocation64_spill] sm:$0xff] }
 0x44c   : > { %15941 = vmatmul.mubr.f32.gmra.mxu0 %v23079_v41  ;;  %15991 = vmatmul.mubr.f32.gmra.mxu1 %v23080_v5 }
 0x44d   : > { %16026 = vmatprep.subr.mxu0 %v19522_v26  ;;  %16074 = vmatprep.subr.mxu1 %v19408_v30 }
 0x44e   : > { %16027 = vmatpush3.msra.mxu0 %v19522_v26  ;;  %16075 = vmatpush3.msra.mxu1 %v19408_v30  ;;  %v23085_v30 = vld [vmem:[#allocation69_spill] sm:$0xff]  ;;  %v23087_v26 = vld [vmem:[#allocation72_spill] sm:$0xff] }
 0x44f   : > { %16028 = vmatprep.subr.mxu0 %v19532_v9  ;;  %16076 = vmatprep.subr.mxu1 %v19425_v42 }
 0x450   : > { %15943 = vmatprep.mubr.f32.mxu0 %v23081_v47  ;;  %15993 = vmatprep.mubr.f32.mxu1 %v23082_v31 }
 0x451   : > { %16029 = vmatpush3.msra.mxu0 %v19532_v9  ;;  %16077 = vmatpush3.msra.mxu1 %v19425_v42  ;;  %v23086_v42 = vld [vmem:[#allocation3_spill] sm:$0xff]  ;;  %v23088_v9 = vld [vmem:[#allocation76_spill] sm:$0xff] }
 0x452   : > { %15944 = vmatmul.mubr.f32.gmra.mxu0 %v23083_v28  ;;  %15994 = vmatmul.mubr.f32.gmra.mxu1 %v23084_v36 }
 0x453   : > { %16030 = vmatprep.subr.mxu0 %v19543_v6  ;;  %16078 = vmatprep.subr.mxu1 %v19438_v33 }
 0x454   : > { %16031 = vmatpush3.msra.mxu0 %v19543_v6  ;;  %16079 = vmatpush3.msra.mxu1 %v19438_v33  ;;  %v23089_v33 = vld [vmem:[#allocation78_spill] sm:$0xff] }
 0x455   : > { %16032 = vmatprep.subr.mxu0 %v19550_v62  ;;  %16080 = vmatprep.subr.mxu1 %v19454_v13 }
 0x456   : > { %15996 = vmatprep.mubr.f32.mxu1 %v23085_v30  ;;  %16033 = vmatpush3.msra.mxu0 %v19550_v62  ;;  %v5365_v62 = vld [vmem:[%s22527_s4 + $0x38] sm:$0xff] }
 0x457   : > { %16034 = vmatprep.mubr.f32.mxu0 %v23086_v42  ;;  %16081 = vmatpush3.msra.mxu1 %v19454_v13  ;;  %v5366_v13 = vld [vmem:[%s22527_s4 + $0x40] sm:$0xff] }
 0x458   : > { %15997 = vmatmul.mubr.f32.gmra.mxu1 %v23087_v26  ;;  %16035 = vmatmul.mubr.f32.vlgmr.msra.gmra.mxu0 %v23032_v52 }
 0x459   : > { %16082 = vmatprep.subr.mxu1 %v19467_v7  ;;  %15999 = vmatprep.mubr.f32.mxu1 %v23088_v9 }
 0x45a   : > { %16083 = vmatpush3.msra.mxu1 %v19467_v7  ;;  %16037 = vmatprep.mubr.f32.mxu0 %v23034_v21  ;;  %v19783_v7 = vand.u32 4294901760, %v5366_v13 }
 0x45b   : > { %16084 = vmatprep.subr.mxu1 %v19480_v53 }
 0x45c   : > { %16085 = vmatpush3.msra.mxu1 %v19480_v53  ;;  %16038 = vmatmul.mubr.f32.gmra.mxu0 %v23036_v23  ;;  %23090 = vst [vmem:[#allocation23_spill] sm:$0xff] %v19783_v7  ;;  %v19788_v53 = vsub.f32 %v5366_v13, %v19783_v7  ;;  %v5364_v13 = vld [vmem:[%s22527_s4 + $0x30] sm:$0xff] }
 0x45d   : > { %16000 = vmatmul.mubr.f32.gmra.mxu1 %v23089_v33  ;;  %16086 = vmatprep.subr.mxu1 %v19503_v38  ;;  %v19798_v33 = vand.u32 4294901760, %v5365_v62  ;;  %v19807_v26 = vand.u32 4294901760, %v5364_v13 }
 0x45e   : > { %16087 = vmatpush3.msra.mxu1 %v19503_v38  ;;  %16040 = vmatprep.mubr.f32.mxu0 %v23038_v3  ;;  %23091 = vst [vmem:[#allocation19_spill] sm:$0xff] %v19788_v53  ;;  %v19791_v38 = vand.u32 4294901760, %v19788_v53 }
 0x45f   : > { %16088 = vmatprep.subr.mxu1 %v19515_v19  ;;  %16090 = vmatprep.mubr.f32.mxu1 %v23086_v42  ;;  %23093 = vst [vmem:[#allocation85_spill] sm:$0xff] %v19798_v33  ;;  %v19805_v9 = vsub.f32 %v5365_v62, %v19798_v33  ;;  %23095 = vst [vmem:[#allocation38_spill] sm:$0xff] %v19807_v26  ;;  %v19818_v30 = vsub.f32 %v5364_v13, %v19807_v26 }
 0x460   : > { %16089 = vmatpush3.msra.mxu1 %v19515_v19  ;;  %16041 = vmatmul.mubr.f32.gmra.mxu0 %v23040_v2  ;;  %23092 = vst [vmem:[#allocation11_spill] sm:$0xff] %v19791_v38  ;;  %v5672_v19 = vsub.f32 %v19788_v53, %v19791_v38 }
 0x461   : > { %16091 = vmatmul.mubr.f32.vlgmr.msra.gmra.mxu1 %v23032_v52  ;;  %16043 = vmatprep.mubr.f32.mxu0 %v23042_v39  ;;  %23094 = vst [vmem:[#allocation17_spill] sm:$0xff] %v19805_v9  ;;  %23097 = vst [vmem:[#allocation35_spill] sm:$0xff] %v19818_v30  ;;  %v19826_v28 = vand.u32 4294901760, %v19818_v30 }
 0x462   : > { %16093 = vmatprep.mubr.f32.mxu1 %v23034_v21  ;;  %16114 = vmatprep.subr.mxu0 %v19783_v7  ;;  %v5673_v6 = vand.u32 4294901760, %v5672_v19  ;;  %v5363_v19 = vld [vmem:[%s22527_s4 + $0x28] sm:$0xff] }
 0x463   : > { %16115 = vmatpush3.msra.mxu0 %v19783_v7  ;;  %v19820_v36 = vand.u32 4294901760, %v5363_v19  ;;  %23099 = vst [vmem:[#allocation25_spill] sm:$0xff] %v19826_v28  ;;  %v5686_v13 = vsub.f32 %v19818_v30, %v19826_v28 }
 0x464   : > { %16044 = vmatmul.mubr.f32.gmra.mxu0 %v23044_v45  ;;  %16146 = vmatprep.subr.mxu1 %v5673_v6 }
 0x465   : > { %16094 = vmatmul.mubr.f32.gmra.mxu1 %v23036_v23  ;;  %16046 = vmatprep.mubr.f32.mxu0 %v23046_v57  ;;  %23098 = vst [vmem:[#allocation27_spill] sm:$0xff] %v19820_v36  ;;  %v19829_v31 = vsub.f32 %v5363_v19, %v19820_v36  ;;  %v5687_v41 = vand.u32 4294901760, %v5686_v13 }
 0x466   : > { %16096 = vmatprep.mubr.f32.mxu1 %v23038_v3  ;;  %16147 = vmatpush3.msra.mxu1 %v5673_v6  ;;  %v19814_v6 = vand.u32 4294901760, %v19805_v9 }
 0x467   : > { %16116 = vmatprep.subr.mxu0 %v19798_v33  ;;  %23100 = vst [vmem:[#allocation84_spill] sm:$0xff] %v19829_v31  ;;  %v19836_v5 = vand.u32 4294901760, %v19829_v31 }
 0x468   : > { %16047 = vmatmul.mubr.f32.gmra.mxu0 %v23048_v59  ;;  %23096 = vst [vmem:[#allocation20_spill] sm:$0xff] %v19814_v6  ;;  %v5679_v62 = vsub.f32 %v19805_v9, %v19814_v6 }
 0x469   : > { %16097 = vmatmul.mubr.f32.gmra.mxu1 %v23040_v2  ;;  %16049 = vmatprep.mubr.f32.mxu0 %v23050_v0  ;;  %23101 = vst [vmem:[#allocation28_spill] sm:$0xff] %v19836_v5  ;;  %v5693_v27 = vsub.f32 %v19829_v31, %v19836_v5  ;;  %v13683_v31 = vld [vmem:[%s22527_s4 + $0x150] ss:$0 sm:$0xff] }
 0x46a   : > { %16099 = vmatprep.mubr.f32.mxu1 %v23042_v39  ;;  %16117 = vmatpush3.msra.mxu0 %v19798_v33  ;;  %v5680_v47 = vand.u32 4294901760, %v5679_v62 }
 0x46b   : > { %16118 = vmatprep.subr.mxu0 %v19807_v26  ;;  %v5694_v19 = vand.u32 4294901760, %v5693_v27 }
 0x46c   : > { %16050 = vmatmul.mubr.f32.gmra.mxu0 %v23052_v46  ;;  %16148 = vmatprep.subr.mxu1 %v5680_v47 }
 0x46d   : > { %16100 = vmatmul.mubr.f32.gmra.mxu1 %v23044_v45  ;;  %16052 = vmatprep.mubr.f32.mxu0 %v23053_v54 }
 0x46e   : > { %16102 = vmatprep.mubr.f32.mxu1 %v23046_v57  ;;  %16119 = vmatpush3.msra.mxu0 %v19807_v26 }
 0x46f   : > { %16120 = vmatprep.subr.mxu0 %v19820_v36  ;;  %16149 = vmatpush3.msra.mxu1 %v5680_v47 }
 0x470   : > { %16053 = vmatmul.mubr.f32.gmra.mxu0 %v23055_v29  ;;  %16150 = vmatprep.subr.mxu1 %v5687_v41 }
 0x471   : > { %16103 = vmatmul.mubr.f32.gmra.mxu1 %v23048_v59  ;;  %16055 = vmatprep.mubr.f32.mxu0 %v23057_v10 }
 0x472   : > { %16105 = vmatprep.mubr.f32.mxu1 %v23050_v0  ;;  %16121 = vmatpush3.msra.mxu0 %v19820_v36 }
 0x473   : > { %16178 = vmatprep.subr.mxu0 %v19788_v53  ;;  %16151 = vmatpush3.msra.mxu1 %v5687_v41 }
 0x474   : > { %16056 = vmatmul.mubr.f32.gmra.mxu0 %v23059_v35  ;;  %16152 = vmatprep.subr.mxu1 %v5694_v19 }
 0x475   : > { %16106 = vmatmul.mubr.f32.gmra.mxu1 %v23052_v46 }
 0x476   : > { %16108 = vmatprep.mubr.f32.mxu1 %v23053_v54  ;;  %16153 = vmatpush3.msra.mxu1 %v5694_v19 }
 0x477   : > { %16210 = vmatprep.subr.mxu1 %v19783_v7 }
 0x479   : > { %16109 = vmatmul.mubr.f32.gmra.mxu1 %v23055_v29 }
 0x47a   : > { %16111 = vmatprep.mubr.f32.mxu1 %v23057_v10 }
 0x47d   : > { %16112 = vmatmul.mubr.f32.gmra.mxu1 %v23059_v35 }
 0x4ba   : > { %v15812_v62 = vpop.f32.mrf.mxu0 }
 0x4bb   : > { %v4159_v30 = vadd.f32 %v15812_v62, %v13683_v31 }
 0x4bc   : > { %v4148_v58 = vpop.f32.mrf.mxu0 }
 0x4bd   : > { %v4149_v7 = vadd.f32 %v13683_v31, %v4148_v58 }
 0x4bf   : > { %v15815_v17 = vpop.f32.mrf.mxu0 }
 0x4c0   : > { %v4179_v36 = vadd.f32 %v15815_v17, %v13683_v31 }
 0x4c1   : > { %v4168_v22 = vpop.f32.mrf.mxu0 }
 0x4c4   : > { %v15818_v34 = vpop.f32.mrf.mxu0  ;;  %v15868_v37 = vpop.f32.mrf.mxu1 }
 0x4c6   : > { %v4188_v50 = vpop.f32.mrf.mxu0  ;;  %v4449_v24 = vpop.f32.mrf.mxu1 }
 0x4ca   : > { %v15821_v13 = vpop.f32.mrf.mxu0  ;;  %v19842_v56 = vpop.f32.mrf.mxu1 }
 0x4cb   : > { %v4468_v62 = vadd.f32 %v19842_v56, %v4179_v36 }
 0x4cc   : > { %v19844_v15 = vpop.f32.mrf.mxu0  ;;  %v19846_v47 = vpop.f32.mrf.mxu1 }
 0x4d0   : > { %v15824_v27 = vpop.f32.mrf.mxu0  ;;  %v19848_v41 = vpop.f32.mrf.mxu1 }
 0x4d2   : > { %v19850_v19 = vpop.f32.mrf.mxu0  ;;  %v19852_v49 = vpop.f32.mrf.mxu1 }
 0x4d6   : > { %v15827_v55 = vpop.f32.mrf.mxu0  ;;  %v19854_v32 = vpop.f32.mrf.mxu1 }
 0x4d8   : > { %v19856_v12 = vpop.f32.mrf.mxu0  ;;  %v19858_v43 = vpop.f32.mrf.mxu1 }
 0x4dc   : > { %v15830_v18 = vpop.f32.mrf.mxu0  ;;  %v19860_v35 = vpop.f32.mrf.mxu1 }
 0x4dd   : > { %v4279_v17 = vadd.f32 %v15830_v18, %v13683_v31 }
 0x4de   : > { %v19862_v10 = vpop.f32.mrf.mxu0  ;;  %v19864_v29 = vpop.f32.mrf.mxu1 }
 0x4e2   : > { %v15833_v54 = vpop.f32.mrf.mxu0  ;;  %v19866_v46 = vpop.f32.mrf.mxu1 }
 0x4e4   : > { %v19868_v4 = vpop.f32.mrf.mxu0  ;;  %v19870_v0 = vpop.f32.mrf.mxu1 }
 0x4e8   : > { %v19872_v1 = vpop.f32.mrf.mxu1  ;;  %v19874_v59 = vpop.f32.mrf.mxu0 }
 0x4ea   : > { %v19876_v61 = vpop.f32.mrf.mxu1  ;;  %v19878_v57 = vpop.f32.mrf.mxu0 }
 0x4ee   : > { %v19880_v51 = vpop.f32.mrf.mxu1  ;;  %v19882_v45 = vpop.f32.mrf.mxu0 }
 0x4f0   : > { %v19884_v8 = vpop.f32.mrf.mxu1  ;;  %v19886_v39 = vpop.f32.mrf.mxu0 }
 0x4f4   : > { %v19888_v63 = vpop.f32.mrf.mxu0  ;;  %v19890_v2 = vpop.f32.mrf.mxu1 }
 0x4f6   : > { %v19892_v40 = vpop.f32.mrf.mxu0  ;;  %v19894_v3 = vpop.f32.mrf.mxu1 }
 0x4fa   : > { %v19896_v25 = vpop.f32.mrf.mxu0  ;;  %v19898_v23 = vpop.f32.mrf.mxu1 }
 0x4fc   : > { %v19900_v44 = vpop.f32.mrf.mxu0  ;;  %v19902_v21 = vpop.f32.mrf.mxu1 }
 0x500   : > { %v19904_v11 = vpop.f32.mrf.mxu0  ;;  %v19906_v52 = vpop.f32.mrf.mxu1 }
 0x502   : > { %v19908_v16 = vpop.f32.mrf.mxu0  ;;  %v19910_v14 = vpop.f32.mrf.mxu1 }
 0x503   : > { %23102 = vst [vmem:[#allocation90_spill] sm:$0xff] %v19910_v14 }
 0x506   : > { %v19912_v60 = vpop.f32.mrf.mxu0  ;;  %v19914_v20 = vpop.f32.mrf.mxu1 }
 0x507   : > { %23103 = vst [vmem:[#allocation82_spill] sm:$0xff] %v19912_v60  ;;  %23104 = vst [vmem:[#allocation26_spill] sm:$0xff] %v19914_v20  ;;  %v4239_v20 = vadd.f32 %v15824_v27, %v13683_v31  ;;  %v4259_v60 = vadd.f32 %v15827_v55, %v13683_v31  ;;  %v4249_v55 = vadd.f32 %v13683_v31, %v19856_v12 }
 0x508   : > { %v19916_v48 = vpop.f32.mrf.mxu0  ;;  %v19918_v42 = vpop.f32.mrf.mxu1 }
 0x509   : > { %23105 = vst [vmem:[#allocation13_spill] sm:$0xff] %v19916_v48  ;;  %23106 = vst [vmem:[#allocation88_spill] sm:$0xff] %v19918_v42  ;;  %v4219_v42 = vadd.f32 %v15821_v13, %v13683_v31  ;;  %v4450_v48 = vadd.f32 %v4449_v24, %v4149_v7 }
 0x50b   : > { %v4492_v24 = vadd.f32 %v19854_v32, %v4219_v42 }
 0x50c   : > { %v19920_v5 = vpop.f32.mrf.mxu0  ;;  %v19922_v28 = vpop.f32.mrf.mxu1 }
 0x50d   : > { %23107 = vst [vmem:[#allocation83_spill] sm:$0xff] %v19920_v5  ;;  %23108 = vst [vmem:[#allocation22_spill] sm:$0xff] %v19922_v28  ;;  %v4199_v28 = vadd.f32 %v15818_v34, %v13683_v31  ;;  %v4169_v5 = vadd.f32 %v13683_v31, %v4168_v22  ;;  %v4229_v34 = vadd.f32 %v13683_v31, %v19850_v19 }
 0x50e   : > { %v19924_v6 = vpop.f32.mrf.mxu0  ;;  %v19926_v38 = vpop.f32.mrf.mxu1 }
 0x50f   : > { %23109 = vst [vmem:[#allocation29_spill] sm:$0xff] %v19924_v6  ;;  %23110 = vst [vmem:[#allocation89_spill] sm:$0xff] %v19926_v38  ;;  %v4456_v6 = vadd.f32 %v15868_v37, %v4159_v30  ;;  %v4189_v38 = vadd.f32 %v13683_v31, %v4188_v50  ;;  %v4480_v58 = vadd.f32 %v19848_v41, %v4199_v28 }
 0x510   : > { %v4299_v50 = vadd.f32 %v15833_v54, %v13683_v31  ;;  %v4498_v36 = vadd.f32 %v19864_v29, %v4229_v34  ;;  %v4516_v28 = vadd.f32 %v19866_v46, %v4259_v60  ;;  %v4289_v30 = vadd.f32 %v13683_v31, %v19868_v4 }
 0x511   : > { %v4474_v37 = vadd.f32 %v19852_v49, %v4189_v38  ;;  %v4510_v54 = vadd.f32 %v19870_v0, %v4249_v55  ;;  %v4528_v49 = vadd.f32 %v19872_v1, %v4279_v17  ;;  %v4651_v32 = vadd.f32 %v19874_v59, %v4456_v6  ;;  %v23117_v38 = vld [vmem:[#allocation13_spill] sm:$0xff]  ;;  %v23118_v6 = vld [vmem:[#allocation88_spill] sm:$0xff] }
 0x512   : > { %v19931_v9 = vpop.f32.mrf.mxu0  ;;  %v19933_v53 = vpop.f32.mrf.mxu1  ;;  %v4540_v42 = vadd.f32 %v19880_v51, %v4299_v50  ;;  %v4534_v29 = vadd.f32 %v19884_v8, %v4289_v30  ;;  %v4679_v0 = vadd.f32 %v19888_v63, %v4480_v58 }
 0x513   : > { %23111 = vst [vmem:[#allocation8_spill] sm:$0xff] %v19931_v9  ;;  %23112 = vst [vmem:[#allocation86_spill] sm:$0xff] %v19933_v53  ;;  %v4209_v9 = vadd.f32 %v13683_v31, %v19844_v15  ;;  %v4462_v53 = vadd.f32 %v19846_v47, %v4169_v5  ;;  %v4269_v15 = vadd.f32 %v13683_v31, %v19862_v10  ;;  %v23114_v31 = vld [vmem:[#allocation90_spill] sm:$0xff] }
 0x514   : > { %v19935_v26 = vpop.f32.mrf.mxu0  ;;  %v19937_v33 = vpop.f32.mrf.mxu1  ;;  %v4504_v5 = vadd.f32 %v19860_v35, %v4239_v20  ;;  %v4644_v10 = vadd.f32 %v19878_v57, %v4450_v48  ;;  %v4665_v20 = vadd.f32 %v19882_v45, %v4468_v62  ;;  %v4846_v1 = vadd.f32 %v19890_v2, %v4651_v32  ;;  %v23119_v27 = vld [vmem:[#allocation83_spill] sm:$0xff] }
 0x515   : > { %23113 = vst [vmem:[#allocation87_spill] sm:$0xff] %v19935_v26  ;;  %v4486_v56 = vadd.f32 %v19858_v43, %v4209_v9  ;;  %v4522_v43 = vadd.f32 %v19876_v61, %v4269_v15  ;;  %v4658_v4 = vadd.f32 %v19886_v39, %v4462_v53  ;;  %v4672_v59 = vadd.f32 %v19892_v40, %v4474_v37 }
 0x516   : > { %v4838_v61 = vadd.f32 %v19894_v3, %v4644_v10  ;;  %v4693_v48 = vadd.f32 %v19896_v25, %v4492_v24  ;;  %v4862_v51 = vadd.f32 %v19898_v23, %v4665_v20  ;;  %v4707_v39 = vadd.f32 %v19904_v11, %v4504_v5  ;;  %v23115_v3 = vld [vmem:[#allocation82_spill] sm:$0xff]  ;;  %v23121_v19 = vld [vmem:[#allocation29_spill] sm:$0xff] }
 0x517   : > { %v4686_v45 = vadd.f32 %v19900_v44, %v4486_v56  ;;  %v4854_v8 = vadd.f32 %v19902_v21, %v4658_v4  ;;  %v4878_v63 = vadd.f32 %v19906_v52, %v4679_v0  ;;  %v4700_v40 = vadd.f32 %v19908_v16, %v4498_v36  ;;  %v23116_v25 = vld [vmem:[#allocation26_spill] sm:$0xff]  ;;  %v23122_v62 = vld [vmem:[#allocation89_spill] sm:$0xff] }
 0x518   : > { %v19942_v14 = vpop.f32.mrf.mxu1  ;;  %v16036_v26 = vpop.f32.mrf.mxu0  ;;  %v4870_v9 = vadd.f32 %v23114_v31, %v4672_v59  ;;  %v4721_v7 = vadd.f32 %v23115_v3, %v4516_v28  ;;  %v4894_v53 = vadd.f32 %v23116_v25, %v4693_v48  ;;  %v4714_v44 = vadd.f32 %v23117_v38, %v4510_v54 }
 0x519   : > { %v5083_v35 = vadd.f32 %v16036_v26, %v4846_v1  ;;  %v4886_v13 = vadd.f32 %v23118_v6, %v4686_v45  ;;  %v4735_v52 = vadd.f32 %v23119_v27, %v4528_v49  ;;  %v23120_v26 = vld [vmem:[#allocation22_spill] sm:$0xff]  ;;  %v4728_v16 = vadd.f32 %v23121_v19, %v4522_v43  ;;  %v23127_v19 = vld [vmem:[#allocation85_spill] sm:$0xff] }
 0x51a   : > { %v4933_v22 = vpop.f32.mrf.mxu1  ;;  %v5076_v18 = vpop.f32.mrf.mxu0  ;;  %v4910_v41 = vadd.f32 %v23120_v26, %v4707_v39  ;;  %v4902_v17 = vadd.f32 %v23122_v62, %v4700_v40  ;;  %v23123_v34 = vld [vmem:[#allocation8_spill] sm:$0xff]  ;;  %v23124_v15 = vld [vmem:[#allocation86_spill] sm:$0xff]  ;;  %v4918_v28 = vadd.f32 %v19937_v33, %v4714_v44 }
 0x51b   : > { %v5077_v21 = vadd.f32 %v5076_v18, %v4838_v61  ;;  %v4749_v37 = vadd.f32 %v23123_v34, %v4540_v42  ;;  %v4926_v5 = vadd.f32 %v23124_v15, %v4721_v7  ;;  %v19989_v30 = vadd.f32 %v19942_v14, %v4735_v52  ;;  %v23128_v15 = vld [vmem:[#allocation38_spill] sm:$0xff] }
 0x51c   : > { %v16039_v12 = vpop.f32.mrf.mxu0  ;;  %v23125_v18 = vld [vmem:[#allocation87_spill] sm:$0xff] }
 0x51d   : > { %v16001_v60 = vpop.f32.mrf.mxu1  ;;  %v5095_v50 = vadd.f32 %v16039_v12, %v4862_v51  ;;  %v4742_v36 = vadd.f32 %v23125_v18, %v4534_v29  ;;  %v19992_v12 = vadd.f32 %v4933_v22, %v4728_v16 }
 0x51e   : > { %v5088_v46 = vpop.f32.mrf.mxu0  ;;  %v19994_v20 = vadd.f32 %v16001_v60, %v4749_v37 }
 0x51f   : > { %v4949_v57 = vpop.f32.mrf.mxu1  ;;  %v5089_v49 = vadd.f32 %v5088_v46, %v4854_v8 }
 0x520   : > { %v16042_v2 = vpop.f32.mrf.mxu0  ;;  %v19996_v4 = vadd.f32 %v4949_v57, %v4742_v36 }
 0x521   : > { %v16092_v23 = vpop.f32.mrf.mxu1  ;;  %v5107_v33 = vadd.f32 %v16042_v2, %v4878_v63 }
 0x522   : > { %v5260_v47 = vadd.f32 %v16092_v23, %v5083_v35  ;;  %v5100_v11 = vpop.f32.mrf.mxu0 }
 0x523   : > { %v5253_v58 = vpop.f32.mrf.mxu1  ;;  %v5101_v48 = vadd.f32 %v5100_v11, %v4870_v9 }
 0x524   : > { %v5348_v24 = vmax.f32 %v5260_v47, 0.0  ;;  %v5254_v55 = vadd.f32 %v5253_v58, %v5077_v21  ;;  %v16045_v56 = vpop.f32.mrf.mxu0  ;;  %v23126_v47 = vld [vmem:[#allocation23_spill] sm:$0xff] }
 0x525   : > { %v16095_v54 = vpop.f32.mrf.mxu1  ;;  %v5119_v22 = vadd.f32 %v16045_v56, %v4894_v53 }
 0x526   : > { %v5371_v32 = vsel %vm2877_vm1, %v5348_v24, 0  ;;  %v5347_v43 = vmax.f32 %v5254_v55, 0.0  ;;  %v5272_v10 = vadd.f32 %v16095_v54, %v5095_v50  ;;  %v5112_v42 = vpop.f32.mrf.mxu0 }
 0x527   : > { %v19998_v0 = vand.u32 4294901760, %v5371_v32  ;;  %v5265_v29 = vpop.f32.mrf.mxu1  ;;  %v5113_v57 = vadd.f32 %v5112_v42, %v4886_v13 }
 0x528   : > { %v5368_v14 = vsel %vm2877_vm1, %v5347_v43, 0  ;;  %v5350_v1 = vmax.f32 %v5272_v10, 0.0  ;;  %v5266_v59 = vadd.f32 %v5265_v29, %v5089_v49  ;;  %v16048_v46 = vpop.f32.mrf.mxu0  ;;  %v23129_v29 = vld [vmem:[#allocation27_spill] sm:$0xff] }
 0x529   : > { %v20002_v61 = vsub.f32 %v5371_v32, %v19998_v0  ;;  %v20004_v51 = vand.u32 4294901760, %v5368_v14  ;;  %v16098_v60 = vpop.f32.mrf.mxu1  ;;  %v5131_v31 = vadd.f32 %v16048_v46, %v4910_v41 }
 0x52a   : > { %v5377_v45 = vsel %vm2877_vm1, %v5350_v1, 0  ;;  %v5349_v8 = vmax.f32 %v5266_v59, 0.0  ;;  %v5284_v39 = vadd.f32 %v16098_v60, %v5107_v33  ;;  %v5124_v35 = vpop.f32.mrf.mxu0 }
 0x52b   : > { %v5496_v63 = vand.u32 4294901760, %v20002_v61  ;;  %v20009_v2 = vsub.f32 %v5368_v14, %v20004_v51  ;;  %v20011_v40 = vand.u32 4294901760, %v5377_v45  ;;  %v5277_v3 = vpop.f32.mrf.mxu1  ;;  %16154 = vmatprep.mubr.f32.mxu1 %v20004_v51  ;;  %v5125_v25 = vadd.f32 %v5124_v35, %v4902_v17 }
 0x52c   : > { %v5374_v9 = vsel %vm2877_vm1, %v5349_v8, 0  ;;  %v5352_v7 = vmax.f32 %v5284_v39, 0.0  ;;  %v5278_v53 = vadd.f32 %v5277_v3, %v5101_v48  ;;  %16155 = vmatmul.mubr.f32.vlgmr.msra.gmra.mxu1 %v19998_v0  ;;  %v16051_v23 = vpop.f32.mrf.mxu0 }
 0x52d   : > { %v20019_v38 = vsub.f32 %v20002_v61, %v5496_v63  ;;  %v20022_v44 = vsub.f32 %v5377_v45, %v20011_v40  ;;  %v20024_v6 = vand.u32 4294901760, %v5374_v9  ;;  %v5143_v13 = vadd.f32 %v16051_v23, %v4926_v5  ;;  %v16101_v21 = vpop.f32.mrf.mxu1  ;;  %16211 = vmatpush3.msra.mxu1 %v23126_v47 }
 0x52e   : > { %v5383_v11 = vsel %vm2877_vm1, %v5352_v7, 0  ;;  %v5351_v27 = vmax.f32 %v5278_v53, 0.0  ;;  %v5296_v52 = vadd.f32 %v16101_v21, %v5119_v22  ;;  %v5136_v26 = vpop.f32.mrf.mxu0  ;;  %v5486_v41 = vand.u32 4294901760, %v20009_v2  ;;  %16212 = vmatprep.subr.mxu1 %v23127_v19 }
 0x52f   : > { %v5498_v16 = vand.u32 4294901760, %v20019_v38  ;;  %v5516_v62 = vand.u32 4294901760, %v20022_v44  ;;  %v20033_v17 = vsub.f32 %v5374_v9, %v20024_v6  ;;  %v20035_v58 = vand.u32 4294901760, %v5383_v11  ;;  %v5289_v34 = vpop.f32.mrf.mxu1  ;;  %16157 = vmatprep.mubr.f32.mxu1 %v20024_v6  ;;  %16213 = vmatpush3.msra.mxu1 %v23127_v19 }
 0x530   : > { %v5380_v37 = vsel %vm2877_vm1, %v5351_v27, 0  ;;  %v5354_v50 = vmax.f32 %v5296_v52, 0.0  ;;  %v5137_v24 = vadd.f32 %v5136_v26, %v4918_v28  ;;  %v5290_v55 = vadd.f32 %v5289_v34, %v5113_v57  ;;  %16158 = vmatmul.mubr.f32.gmra.mxu1 %v20011_v40  ;;  %v16054_v56 = vpop.f32.mrf.mxu0  ;;  %16214 = vmatprep.subr.mxu1 %v23128_v15  ;;  %v23130_v27 = vld [vmem:[#allocation19_spill] sm:$0xff] }
 0x531   : > { %v20043_v5 = vsub.f32 %v5383_v11, %v20035_v58  ;;  %v20045_v18 = vand.u32 4294901760, %v5380_v37  ;;  %v5155_v36 = vadd.f32 %v16054_v56, %v19989_v30  ;;  %v16104_v54 = vpop.f32.mrf.mxu1  ;;  %v5487_v49 = vsub.f32 %v20009_v2, %v5486_v41  ;;  %16215 = vmatpush3.msra.mxu1 %v23128_v15 }
 0x532   : > { %v5389_v28 = vsel %vm2877_vm1, %v5354_v50, 0  ;;  %v5353_v32 = vmax.f32 %v5290_v55, 0.0  ;;  %v5308_v43 = vadd.f32 %v16104_v54, %v5131_v31  ;;  %v5148_v10 = vpop.f32.mrf.mxu0  ;;  %v5506_v42 = vand.u32 4294901760, %v20033_v17  ;;  %16216 = vmatprep.subr.mxu1 %v23129_v29  ;;  %v23131_v55 = vld [vmem:[#allocation17_spill] sm:$0xff] }
 0x533   : > { %v5536_v33 = vand.u32 4294901760, %v20043_v5  ;;  %v20057_v30 = vsub.f32 %v5380_v37, %v20045_v18  ;;  %v20059_v14 = vand.u32 4294901760, %v5389_v28  ;;  %v5149_v1 = vadd.f32 %v5148_v10, %v19992_v12  ;;  %v5301_v59 = vpop.f32.mrf.mxu1  ;;  %16160 = vmatprep.mubr.f32.mxu1 %v20045_v18  ;;  %16217 = vmatpush3.msra.mxu1 %v23129_v29 }
 0x534   : > { %v5386_v46 = vsel %vm2877_vm1, %v5353_v32, 0  ;;  %v5356_v48 = vmax.f32 %v5308_v43, 0.0  ;;  %v5302_v22 = vadd.f32 %v5301_v59, %v5125_v25  ;;  %v5488_v60 = vand.u32 4294901760, %v5487_v49  ;;  %16161 = vmatmul.mubr.f32.gmra.mxu1 %v20035_v58  ;;  %v16057_v45 = vpop.f32.mrf.mxu0  ;;  %16274 = vmatprep.subr.mxu1 %v23126_v47 }
 0x535   : > { %v20068_v57 = vsub.f32 %v5389_v28, %v20059_v14  ;;  %v20070_v8 = vand.u32 4294901760, %v5386_v46  ;;  %v5167_v12 = vadd.f32 %v16057_v45, %v19994_v20  ;;  %v16107_v39 = vpop.f32.mrf.mxu1  ;;  %v5507_v35 = vsub.f32 %v20033_v17, %v5506_v42 }
 0x536   : > { %v5395_v31 = vsel %vm2877_vm1, %v5356_v48, 0  ;;  %v5355_v3 = vmax.f32 %v5302_v22, 0.0  ;;  %16122 = vmatprep.mubr.f32.mxu0 %v5488_v60  ;;  %v5320_v9 = vadd.f32 %v16107_v39, %v5143_v13  ;;  %v5160_v7 = vpop.f32.mrf.mxu0  ;;  %v5517_v25 = vsub.f32 %v20022_v44, %v5516_v62  ;;  %v23132_v60 = vld [vmem:[#allocation35_spill] sm:$0xff] }
 0x537   : > { %v5556_v53 = vand.u32 4294901760, %v20068_v57  ;;  %v20082_v23 = vsub.f32 %v5386_v46, %v20070_v8  ;;  %v20084_v20 = vand.u32 4294901760, %v5395_v31  ;;  %16123 = vmatmul.mubr.f32.vlgmr.msra.gmra.mxu0 %v5498_v16  ;;  %v5161_v38 = vadd.f32 %v5160_v7, %v19996_v4  ;;  %v5313_v21 = vpop.f32.mrf.mxu1  ;;  %16163 = vmatprep.mubr.f32.mxu1 %v20070_v8 }
 0x538   : > { %v5392_v13 = vsel %vm2877_vm1, %v5355_v3, 0  ;;  %v5358_v11 = vmax.f32 %v5320_v9, 0.0  ;;  %16179 = vmatpush3.msra.mxu0 %v23130_v27  ;;  %v5314_v52 = vadd.f32 %v5313_v21, %v5137_v24  ;;  %v5508_v26 = vand.u32 4294901760, %v5507_v35  ;;  %16164 = vmatmul.mubr.f32.gmra.mxu1 %v20059_v14  ;;  %v23133_v21 = vld [vmem:[#allocation84_spill] sm:$0xff] }
 0x539   : > { %v20092_v34 = vsub.f32 %v5395_v31, %v20084_v20  ;;  %v20094_v37 = vand.u32 4294901760, %v5392_v13  ;;  %v5518_v16 = vand.u32 4294901760, %v5517_v25  ;;  %v16110_v50 = vpop.f32.mrf.mxu1  ;;  %v5526_v4 = vand.u32 4294901760, %v20057_v30  ;;  %16180 = vmatprep.subr.mxu0 %v23131_v55 }
 0x53a   : > { %v5401_v56 = vsel %vm2877_vm1, %v5358_v11, 0  ;;  %v5357_v54 = vmax.f32 %v5314_v52, 0.0  ;;  %16125 = vmatprep.mubr.f32.mxu0 %v5508_v26  ;;  %v5332_v49 = vadd.f32 %v16110_v50, %v5155_v36  ;;  %v5537_v24 = vsub.f32 %v20043_v5, %v5536_v33  ;;  %16181 = vmatpush3.msra.mxu0 %v23131_v55 }
 0x53b   : > { %v5576_v28 = vand.u32 4294901760, %v20092_v34  ;;  %v20105_v32 = vsub.f32 %v5392_v13, %v20094_v37  ;;  %v20107_v43 = vand.u32 4294901760, %v5401_v56  ;;  %16126 = vmatmul.mubr.f32.gmra.mxu0 %v5518_v16  ;;  %v5325_v10 = vpop.f32.mrf.mxu1  ;;  %v5527_v59 = vsub.f32 %v20057_v30, %v5526_v4  ;;  %16166 = vmatprep.mubr.f32.mxu1 %v20094_v37 }
 0x53c   : > { %v5398_v36 = vsel %vm2877_vm1, %v5357_v54, 0  ;;  %v5360_v46 = vmax.f32 %v5332_v49, 0.0  ;;  %v5326_v48 = vadd.f32 %v5325_v10, %v5149_v1  ;;  %v5538_v22 = vand.u32 4294901760, %v5537_v24  ;;  %16167 = vmatmul.mubr.f32.gmra.mxu1 %v20084_v20  ;;  %16182 = vmatprep.subr.mxu0 %v23132_v60 }
 0x53d   : > { %v20117_v45 = vsub.f32 %v5401_v56, %v20107_v43  ;;  %v20119_v39 = vand.u32 4294901760, %v5398_v36  ;;  %v5528_v35 = vand.u32 4294901760, %v5527_v59  ;;  %v16113_v31 = vpop.f32.mrf.mxu1  ;;  %v5546_v3 = vand.u32 4294901760, %v20082_v23  ;;  %16183 = vmatpush3.msra.mxu0 %v23132_v60 }
 0x53e   : > { %v5407_v9 = vsel %vm2877_vm1, %v5360_v46, 0  ;;  %v5359_v7 = vmax.f32 %v5326_v48, 0.0  ;;  %v5344_v1 = vadd.f32 %v16113_v31, %v5167_v12  ;;  %v5557_v25 = vsub.f32 %v20068_v57, %v5556_v53  ;;  %16184 = vmatprep.subr.mxu0 %v23133_v21  ;;  %v23134_v46 = vld [vmem:[#allocation11_spill] sm:$0xff] }
 0x53f   : > { %v5596_v13 = vand.u32 4294901760, %v20117_v45  ;;  %v20130_v11 = vsub.f32 %v5398_v36, %v20119_v39  ;;  %v20132_v27 = vand.u32 4294901760, %v5407_v9  ;;  %16128 = vmatprep.mubr.f32.mxu0 %v5528_v35  ;;  %v5337_v52 = vpop.f32.mrf.mxu1  ;;  %v5547_v26 = vsub.f32 %v20082_v23, %v5546_v3  ;;  %16169 = vmatprep.mubr.f32.mxu1 %v20119_v39 }
 0x540   : > { %v5404_v12 = vsel %vm2877_vm1, %v5359_v7, 0  ;;  %16129 = vmatmul.mubr.f32.gmra.mxu0 %v5538_v22  ;;  %v5362_v16 = vmax.f32 %v5344_v1, 0.0  ;;  %v5338_v50 = vadd.f32 %v5337_v52, %v5161_v38  ;;  %v5558_v55 = vand.u32 4294901760, %v5557_v25  ;;  %16170 = vmatmul.mubr.f32.gmra.mxu1 %v20107_v43 }
 0x541   : > { %v20141_v56 = vsub.f32 %v5407_v9, %v20132_v27  ;;  %v20143_v54 = vand.u32 4294901760, %v5404_v12  ;;  %v5548_v49 = vand.u32 4294901760, %v5547_v26  ;;  %v5566_v24 = vand.u32 4294901760, %v20105_v32  ;;  %16185 = vmatpush3.msra.mxu0 %v23133_v21 }
 0x542   : > { %v5413_v10 = vsel %vm2877_vm1, %v5362_v16, 0  ;;  %v5361_v59 = vmax.f32 %v5338_v50, 0.0  ;;  %v5577_v38 = vsub.f32 %v20092_v34, %v5576_v28  ;;  %v5586_v36 = vand.u32 4294901760, %v20130_v11  ;;  %16242 = vmatprep.subr.mxu0 %v23134_v46 }
 0x543   : > { %v20154_v48 = vsub.f32 %v5404_v12, %v20143_v54  ;;  %v20156_v22 = vand.u32 4294901760, %v5413_v10  ;;  %16131 = vmatprep.mubr.f32.mxu0 %v5548_v49  ;;  %v5567_v60 = vsub.f32 %v20105_v32, %v5566_v24  ;;  %16172 = vmatprep.mubr.f32.mxu1 %v20143_v54  ;;  %v5616_v9 = vand.u32 4294901760, %v20141_v56 }
 0x544   : > { %v5410_v35 = vsel %vm2877_vm1, %v5361_v59, 0  ;;  %16132 = vmatmul.mubr.f32.gmra.mxu0 %v5558_v55  ;;  %16173 = vmatmul.mubr.f32.gmra.mxu1 %v20132_v27  ;;  %v5587_v31 = vsub.f32 %v20130_v11, %v5586_v36  ;;  %v5578_v52 = vand.u32 4294901760, %v5577_v38  ;;  %v5597_v12 = vsub.f32 %v20117_v45, %v5596_v13 }
 0x545   : > { %v20168_v7 = vand.u32 4294901760, %v5410_v35  ;;  %v5568_v1 = vand.u32 4294901760, %v5567_v60  ;;  %v5606_v25 = vand.u32 4294901760, %v20154_v48  ;;  %v20172_v21 = vsub.f32 %v5413_v10, %v20156_v22 }
 0x546   : > { %v5588_v26 = vand.u32 4294901760, %v5587_v31  ;;  %v5598_v59 = vand.u32 4294901760, %v5597_v12  ;;  %v5617_v38 = vsub.f32 %v20141_v56, %v5616_v9 }
 0x547   : > { %v20178_v16 = vsub.f32 %v5410_v35, %v20168_v7  ;;  %16134 = vmatprep.mubr.f32.mxu0 %v5568_v1  ;;  %16175 = vmatprep.mubr.f32.mxu1 %v20168_v7  ;;  %v5607_v50 = vsub.f32 %v20154_v48, %v5606_v25  ;;  %v5636_v10 = vand.u32 4294901760, %v20172_v21 }
 0x548   : > { %16135 = vmatmul.mubr.f32.gmra.mxu0 %v5578_v52  ;;  %16176 = vmatmul.mubr.f32.gmra.mxu1 %v20156_v22  ;;  %v5618_v35 = vand.u32 4294901760, %v5617_v38 }
 0x549   : > { %16137 = vmatprep.mubr.f32.mxu0 %v5588_v26  ;;  %16218 = vmatprep.mubr.f32.mxu1 %v5486_v41  ;;  %v5608_v55 = vand.u32 4294901760, %v5607_v50  ;;  %v5626_v49 = vand.u32 4294901760, %v20178_v16  ;;  %v5637_v31 = vsub.f32 %v20172_v21, %v5636_v10 }
 0x54b   : > { %v5627_v60 = vsub.f32 %v20178_v16, %v5626_v49 }
 0x54c   : > { %16138 = vmatmul.mubr.f32.gmra.mxu0 %v5598_v59  ;;  %16219 = vmatmul.mubr.f32.vlgmr.msra.gmra.mxu1 %v5496_v63  ;;  %v5638_v63 = vand.u32 4294901760, %v5637_v31 }
 0x54d   : > { %16140 = vmatprep.mubr.f32.mxu0 %v5608_v55  ;;  %16221 = vmatprep.mubr.f32.mxu1 %v5506_v42  ;;  %v5628_v41 = vand.u32 4294901760, %v5627_v60 }
 0x54e   : > { %16275 = vmatpush3.msra.mxu1 %v23126_v47 }
 0x54f   : > { %16276 = vmatprep.subr.mxu1 %v23127_v19 }
 0x550   : > { %16141 = vmatmul.mubr.f32.gmra.mxu0 %v5618_v35  ;;  %16222 = vmatmul.mubr.f32.gmra.mxu1 %v5516_v62 }
 0x551   : > { %16143 = vmatprep.mubr.f32.mxu0 %v5628_v41  ;;  %16224 = vmatprep.mubr.f32.mxu1 %v5526_v4 }
 0x552   : > { %16277 = vmatpush3.msra.mxu1 %v23127_v19 }
 0x553   : > { %16278 = vmatprep.subr.mxu1 %v23128_v15 }
 0x554   : > { %16144 = vmatmul.mubr.f32.gmra.mxu0 %v5638_v63  ;;  %16225 = vmatmul.mubr.f32.gmra.mxu1 %v5536_v33 }
 0x555   : > { %16186 = vmatprep.mubr.f32.mxu0 %v20009_v2  ;;  %16227 = vmatprep.mubr.f32.mxu1 %v5546_v3  ;;  %v23135_v2 = vld [vmem:[#allocation20_spill] sm:$0xff] }
 0x556   : > { %16279 = vmatpush3.msra.mxu1 %v23128_v15 }
 0x557   : > { %16280 = vmatprep.subr.mxu1 %v23129_v29 }
 0x558   : > { %16187 = vmatmul.mubr.f32.vlgmr.msra.gmra.mxu0 %v20002_v61  ;;  %16228 = vmatmul.mubr.f32.gmra.mxu1 %v5556_v53  ;;  %v23136_v61 = vld [vmem:[#allocation25_spill] sm:$0xff] }
 0x559   : > { %16189 = vmatprep.mubr.f32.mxu0 %v20033_v17  ;;  %16243 = vmatpush3.msra.mxu0 %v23134_v46 }
 0x55a   : > { %16230 = vmatprep.mubr.f32.mxu1 %v5566_v24  ;;  %16244 = vmatprep.subr.mxu0 %v23135_v2 }
 0x55b   : > { %16245 = vmatpush3.msra.mxu0 %v23135_v2  ;;  %16281 = vmatpush3.msra.mxu1 %v23129_v29 }
 0x55c   : > { %16190 = vmatmul.mubr.f32.gmra.mxu0 %v20022_v44  ;;  %16231 = vmatmul.mubr.f32.gmra.mxu1 %v5576_v28  ;;  %v23137_v44 = vld [vmem:[#allocation28_spill] sm:$0xff] }
 0x55d   : > { %16192 = vmatprep.mubr.f32.mxu0 %v20057_v30  ;;  %16233 = vmatprep.mubr.f32.mxu1 %v5586_v36 }
 0x55e   : > { %16246 = vmatprep.subr.mxu0 %v23136_v61 }
 0x55f   : > { %16247 = vmatpush3.msra.mxu0 %v23136_v61 }
 0x560   : > { %16193 = vmatmul.mubr.f32.gmra.mxu0 %v20043_v5  ;;  %16234 = vmatmul.mubr.f32.gmra.mxu1 %v5596_v13 }
 0x561   : > { %16195 = vmatprep.mubr.f32.mxu0 %v20082_v23  ;;  %16236 = vmatprep.mubr.f32.mxu1 %v5606_v25 }
 0x562   : > { %16248 = vmatprep.subr.mxu0 %v23137_v44 }
 0x563   : > { %16249 = vmatpush3.msra.mxu0 %v23137_v44 }
 0x564   : > { %16196 = vmatmul.mubr.f32.gmra.mxu0 %v20068_v57  ;;  %16237 = vmatmul.mubr.f32.gmra.mxu1 %v5616_v9 }
 0x565   : > { %16198 = vmatprep.mubr.f32.mxu0 %v20105_v32  ;;  %16239 = vmatprep.mubr.f32.mxu1 %v5626_v49 }
 0x568   : > { %16199 = vmatmul.mubr.f32.gmra.mxu0 %v20092_v34  ;;  %16240 = vmatmul.mubr.f32.gmra.mxu1 %v5636_v10 }
 0x569   : > { %16201 = vmatprep.mubr.f32.mxu0 %v20130_v11  ;;  %16282 = vmatprep.mubr.f32.mxu1 %v20004_v51 }
 0x56c   : > { %16202 = vmatmul.mubr.f32.gmra.mxu0 %v20117_v45  ;;  %16283 = vmatmul.mubr.f32.vlgmr.msra.gmra.mxu1 %v19998_v0 }
 0x56d   : > { %16204 = vmatprep.mubr.f32.mxu0 %v20154_v48  ;;  %16285 = vmatprep.mubr.f32.mxu1 %v20024_v6 }
 0x570   : > { %16205 = vmatmul.mubr.f32.gmra.mxu0 %v20141_v56  ;;  %16286 = vmatmul.mubr.f32.gmra.mxu1 %v20011_v40 }
 0x571   : > { %16207 = vmatprep.mubr.f32.mxu0 %v20178_v16  ;;  %16288 = vmatprep.mubr.f32.mxu1 %v20045_v18 }
 0x574   : > { %16208 = vmatmul.mubr.f32.gmra.mxu0 %v20172_v21  ;;  %16289 = vmatmul.mubr.f32.gmra.mxu1 %v20035_v58 }
 0x575   : > { %16250 = vmatprep.mubr.f32.mxu0 %v20004_v51  ;;  %16291 = vmatprep.mubr.f32.mxu1 %v20070_v8  ;;  %v23139_v51 = vld [vmem:[#allocation6_spill] sm:$0xff] }
 0x578   : > { %16251 = vmatmul.mubr.f32.vlgmr.msra.gmra.mxu0 %v19998_v0  ;;  %16292 = vmatmul.mubr.f32.gmra.mxu1 %v20059_v14  ;;  %v23138_v0 = vld [vmem:[#allocation3_spill] sm:$0xff] }
 0x579   : > { %16253 = vmatprep.mubr.f32.mxu0 %v20024_v6  ;;  %16294 = vmatprep.mubr.f32.mxu1 %v20094_v37 }
 0x57c   : > { %16254 = vmatmul.mubr.f32.gmra.mxu0 %v20011_v40  ;;  %16295 = vmatmul.mubr.f32.gmra.mxu1 %v20084_v20 }
 0x57d   : > { %16256 = vmatprep.mubr.f32.mxu0 %v20045_v18  ;;  %16297 = vmatprep.mubr.f32.mxu1 %v20119_v39 }
 0x580   : > { %16257 = vmatmul.mubr.f32.gmra.mxu0 %v20035_v58  ;;  %16298 = vmatmul.mubr.f32.gmra.mxu1 %v20107_v43 }
 0x581   : > { %16259 = vmatprep.mubr.f32.mxu0 %v20070_v8  ;;  %16300 = vmatprep.mubr.f32.mxu1 %v20143_v54 }
 0x584   : > { %16260 = vmatmul.mubr.f32.gmra.mxu0 %v20059_v14  ;;  %16301 = vmatmul.mubr.f32.gmra.mxu1 %v20132_v27 }
 0x585   : > { %16262 = vmatprep.mubr.f32.mxu0 %v20094_v37  ;;  %16303 = vmatprep.mubr.f32.mxu1 %v20168_v7 }
 0x588   : > { %16263 = vmatmul.mubr.f32.gmra.mxu0 %v20084_v20  ;;  %16304 = vmatmul.mubr.f32.gmra.mxu1 %v20156_v22 }
 0x589   : > { %16265 = vmatprep.mubr.f32.mxu0 %v20119_v39  ;;  %16394 = vmatprep.mubr.f32.mxu1 %v23138_v0 }
 0x58c   : > { %16266 = vmatmul.mubr.f32.gmra.mxu0 %v20107_v43 }
 0x58d   : > { %16268 = vmatprep.mubr.f32.mxu0 %v20143_v54 }
 0x590   : > { %16269 = vmatmul.mubr.f32.gmra.mxu0 %v20132_v27 }
 0x591   : > { %16271 = vmatprep.mubr.f32.mxu0 %v20168_v7 }
 0x594   : > { %16272 = vmatmul.mubr.f32.gmra.mxu0 %v20156_v22 }
 0x595   : > { %16338 = vmatprep.mubr.f32.mxu0 %v23139_v51 }
 0x5ec   : > { %v16156_v40 = vpop.f32.mrf.mxu1 }
 0x5ee   : > { %v20280_v6 = vpop.f32.mrf.mxu1 }
 0x5f0   : > { %v16159_v47 = vpop.f32.mrf.mxu1 }
 0x5f2   : > { %v20282_v19 = vpop.f32.mrf.mxu1 }
 0x5f4   : > { %v16162_v62 = vpop.f32.mrf.mxu1 }
 0x5f6   : > { %v20284_v17 = vpop.f32.mrf.mxu1 }
 0x5f7   : > { %v16124_v58 = vpop.f32.mrf.mxu0 }
 0x5f8   : > { %v5738_v15 = vadd.f32 %v16156_v40, %v16124_v58  ;;  %v16165_v5 = vpop.f32.mrf.mxu1 }
 0x5f9   : > { %v20286_v18 = vpop.f32.mrf.mxu0 }
 0x5fa   : > { %v20288_v42 = vpop.f32.mrf.mxu1 }
 0x5fb   : > { %v16127_v29 = vpop.f32.mrf.mxu0 }
 0x5fc   : > { %v5750_v33 = vadd.f32 %v16159_v47, %v16127_v29  ;;  %v16168_v30 = vpop.f32.mrf.mxu1 }
 0x5fd   : > { %v20290_v14 = vpop.f32.mrf.mxu0 }
 0x5fe   : > { %v20292_v57 = vpop.f32.mrf.mxu1 }
 0x600   : > { %v16130_v8 = vpop.f32.mrf.mxu0  ;;  %v16171_v53 = vpop.f32.mrf.mxu1 }
 0x601   : > { %v5762_v23 = vadd.f32 %v16162_v62, %v16130_v8 }
 0x602   : > { %v20294_v20 = vpop.f32.mrf.mxu0  ;;  %v20296_v34 = vpop.f32.mrf.mxu1 }
 0x604   : > { %v16133_v37 = vpop.f32.mrf.mxu0  ;;  %v16174_v4 = vpop.f32.mrf.mxu1 }
 0x605   : > { %v20298_v28 = vadd.f32 %v16165_v5, %v16133_v37 }
 0x606   : > { %v20300_v32 = vpop.f32.mrf.mxu0  ;;  %v20302_v43 = vpop.f32.mrf.mxu1 }
 0x608   : > { %v16136_v45 = vpop.f32.mrf.mxu0  ;;  %v20304_v39 = vpop.f32.mrf.mxu1 }
 0x609   : > { %v20306_v3 = vadd.f32 %v16168_v30, %v16136_v45 }
 0x60a   : > { %v20308_v13 = vpop.f32.mrf.mxu0  ;;  %v20310_v11 = vpop.f32.mrf.mxu1 }
 0x60c   : > { %v16139_v27 = vpop.f32.mrf.mxu0  ;;  %v16220_v56 = vpop.f32.mrf.mxu1 }
 0x60d   : > { %v20312_v54 = vadd.f32 %v16171_v53, %v16139_v27 }
 0x60e   : > { %v20314_v24 = vpop.f32.mrf.mxu0  ;;  %v20316_v36 = vpop.f32.mrf.mxu1 }
 0x60f   : > { %23140 = vst [vmem:[#allocation90_spill] sm:$0xff] %v20316_v36 }
 0x610   : > { %v16142_v46 = vpop.f32.mrf.mxu0  ;;  %v16223_v48 = vpop.f32.mrf.mxu1 }
 0x611   : > { %v20318_v22 = vadd.f32 %v16174_v4, %v16142_v46 }
 0x612   : > { %v5610_v9 = vpop.f32.mrf.mxu0  ;;  %v20320_v7 = vpop.f32.mrf.mxu1 }
 0x613   : > { %23141 = vst [vmem:[#allocation82_spill] sm:$0xff] %v20320_v7 }
 0x614   : > { %v20322_v1 = vpop.f32.mrf.mxu0  ;;  %v16226_v25 = vpop.f32.mrf.mxu1 }
 0x616   : > { %v20324_v21 = vpop.f32.mrf.mxu0  ;;  %v20326_v52 = vpop.f32.mrf.mxu1 }
 0x617   : > { %23142 = vst [vmem:[#allocation26_spill] sm:$0xff] %v20326_v52  ;;  %v5780_v52 = vadd.f32 %v20292_v57, %v20308_v13  ;;  %v5768_v57 = vadd.f32 %v20288_v42, %v20300_v32 }
 0x618   : > { %v16188_v26 = vpop.f32.mrf.mxu0  ;;  %v20328_v12 = vpop.f32.mrf.mxu1 }
 0x619   : > { %v5909_v16 = vadd.f32 %v16188_v26, %v5738_v15 }
 0x61a   : > { %v20330_v50 = vpop.f32.mrf.mxu0  ;;  %v20332_v55 = vpop.f32.mrf.mxu1 }
 0x61b   : > { %23143 = vst [vmem:[#allocation13_spill] sm:$0xff] %v20330_v50  ;;  %v20334_v49 = vadd.f32 %v16220_v56, %v5909_v16  ;;  %v5792_v50 = vadd.f32 %v20296_v34, %v20314_v24 }
 0x61c   : > { %v16191_v10 = vpop.f32.mrf.mxu0  ;;  %v20336_v59 = vpop.f32.mrf.mxu1 }
 0x61d   : > { %23144 = vst [vmem:[#allocation88_spill] sm:$0xff] %v20334_v49  ;;  %v5923_v38 = vadd.f32 %v16191_v10, %v5750_v33 }
 0x61e   : > { %v20338_v60 = vpop.f32.mrf.mxu0  ;;  %v20340_v41 = vpop.f32.mrf.mxu1 }
 0x61f   : > { %v20342_v35 = vadd.f32 %v16223_v48, %v5923_v38 }
 0x620   : > { %v16194_v31 = vpop.f32.mrf.mxu0  ;;  %v16235_v63 = vpop.f32.mrf.mxu1 }
 0x621   : > { %23145 = vst [vmem:[#allocation83_spill] sm:$0xff] %v20342_v35  ;;  %v5937_v2 = vadd.f32 %v16194_v31, %v5762_v23 }
 0x622   : > { %v20344_v61 = vpop.f32.mrf.mxu0  ;;  %v6163_v44 = vpop.f32.mrf.mxu1 }
 0x623   : > { %v20346_v51 = vadd.f32 %v16226_v25, %v5937_v2 }
 0x624   : > { %v16197_v40 = vpop.f32.mrf.mxu0  ;;  %v16238_v47 = vpop.f32.mrf.mxu1 }
 0x625   : > { %23146 = vst [vmem:[#allocation22_spill] sm:$0xff] %v20346_v51  ;;  %v5951_v13 = vadd.f32 %v16197_v40, %v20298_v28 }
 0x626   : > { %v20348_v62 = vpop.f32.mrf.mxu0  ;;  %v6179_v58 = vpop.f32.mrf.mxu1 }
 0x627   : > { %v6140_v40 = vadd.f32 %v20328_v12, %v5951_v13 }
 0x628   : > { %v16200_v15 = vpop.f32.mrf.mxu0  ;;  %v16241_v5 = vpop.f32.mrf.mxu1 }
 0x629   : > { %v5965_v34 = vadd.f32 %v16200_v15, %v20306_v3 }
 0x62a   : > { %v5957_v29 = vpop.f32.mrf.mxu0  ;;  %v20350_v33 = vpop.f32.mrf.mxu1 }
 0x62c   : > { %v16203_v30 = vpop.f32.mrf.mxu0  ;;  %v20352_v8 = vpop.f32.mrf.mxu1 }
 0x62d   : > { %23147 = vst [vmem:[#allocation29_spill] sm:$0xff] %v20352_v8 }
 0x62e   : > { %v5971_v53 = vpop.f32.mrf.mxu0  ;;  %v20354_v23 = vpop.f32.mrf.mxu1 }
 0x62f   : > { %23148 = vst [vmem:[#allocation89_spill] sm:$0xff] %v20354_v23  ;;  %v5972_v7 = vadd.f32 %v5971_v53, %v5792_v50 }
 0x630   : > { %v16206_v37 = vpop.f32.mrf.mxu0  ;;  %v20356_v4 = vpop.f32.mrf.mxu1 }
 0x631   : > { %23149 = vst [vmem:[#allocation8_spill] sm:$0xff] %v20356_v4 }
 0x632   : > { %v5985_v45 = vpop.f32.mrf.mxu0  ;;  %v20358_v27 = vpop.f32.mrf.mxu1 }
 0x633   : > { %23150 = vst [vmem:[#allocation86_spill] sm:$0xff] %v20358_v27 }
 0x634   : > { %v16209_v56 = vpop.f32.mrf.mxu0  ;;  %v20360_v46 = vpop.f32.mrf.mxu1 }
 0x635   : > { %23151 = vst [vmem:[#allocation87_spill] sm:$0xff] %v20360_v46  ;;  %v5804_v46 = vadd.f32 %v20302_v43, %v5610_v9 }
 0x636   : > { %v5999_v48 = vpop.f32.mrf.mxu0  ;;  %v20362_v25 = vpop.f32.mrf.mxu1 }
 0x637   : > { %23152 = vst [vmem:[#allocation23_spill] sm:$0xff] %v20362_v25 }
 0x638   : > { %v20364_v26 = vpop.f32.mrf.mxu0  ;;  %v20366_v16 = vpop.f32.mrf.mxu1 }
 0x639   : > { %23153 = vst [vmem:[#allocation85_spill] sm:$0xff] %v20364_v26  ;;  %23154 = vst [vmem:[#allocation38_spill] sm:$0xff] %v20366_v16  ;;  %v5986_v16 = vadd.f32 %v5985_v45, %v5804_v46 }
 0x63a   : > { %v20368_v10 = vpop.f32.mrf.mxu0  ;;  %v20370_v38 = vpop.f32.mrf.mxu1 }
 0x63b   : > { %23155 = vst [vmem:[#allocation27_spill] sm:$0xff] %v20368_v10  ;;  %23156 = vst [vmem:[#allocation19_spill] sm:$0xff] %v20370_v38  ;;  %v6180_v50 = vadd.f32 %v6179_v58, %v5986_v16 }
 0x63c   : > { %v20372_v31 = vpop.f32.mrf.mxu0  ;;  %v20374_v2 = vpop.f32.mrf.mxu1 }
 0x63d   : > { %23157 = vst [vmem:[#allocation17_spill] sm:$0xff] %v20372_v31  ;;  %v5993_v31 = vadd.f32 %v16206_v37, %v20318_v22  ;;  %v5958_v22 = vadd.f32 %v5957_v29, %v5780_v52  ;;  %v5944_v52 = vadd.f32 %v20348_v62, %v5768_v57 }
 0x63e   : > { %v20376_v0 = vpop.f32.mrf.mxu0  ;;  %v20380_v8 = vpop.f32.mrf.mxu1 }
 0x63f   : > { %23158 = vst [vmem:[#allocation35_spill] sm:$0xff] %v20376_v0  ;;  %23160 = vst [vmem:[#allocation11_spill] sm:$0xff] %v20380_v8  ;;  %v5979_v0 = vadd.f32 %v16203_v30, %v20312_v54  ;;  %v6188_v9 = vadd.f32 %v16238_v47, %v5993_v31  ;;  %v6148_v29 = vadd.f32 %v20340_v41, %v5958_v22 }
 0x640   : > { %v20378_v23 = vpop.f32.mrf.mxu0  ;;  %v16299_v26 = vpop.f32.mrf.mxu1 }
 0x641   : > { %23159 = vst [vmem:[#allocation84_spill] sm:$0xff] %v20378_v23  ;;  %v5816_v23 = vadd.f32 %v20310_v11, %v20324_v21  ;;  %v6172_v54 = vadd.f32 %v16235_v63, %v5979_v0  ;;  %v6156_v11 = vadd.f32 %v20336_v59, %v5965_v34  ;;  %v5744_v59 = vadd.f32 %v20282_v19, %v20290_v14 }
 0x642   : > { %v20382_v27 = vpop.f32.mrf.mxu0  ;;  %v6511_v4 = vpop.f32.mrf.mxu1 }
 0x643   : > { %23161 = vst [vmem:[#allocation20_spill] sm:$0xff] %v20382_v27  ;;  %v5822_v27 = vadd.f32 %v20304_v39, %v20322_v1  ;;  %v6000_v30 = vadd.f32 %v5999_v48, %v5816_v23  ;;  %v6164_v39 = vadd.f32 %v6163_v44, %v5972_v7  ;;  %v5916_v46 = vadd.f32 %v20338_v60, %v5744_v59  ;;  %v23165_v60 = vld [vmem:[#allocation26_spill] sm:$0xff] }
 0x644   : > { %v16261_v36 = vpop.f32.mrf.mxu0  ;;  %v16302_v35 = vpop.f32.mrf.mxu1 }
 0x645   : > { %v6007_v24 = vadd.f32 %v16209_v56, %v5822_v27  ;;  %v6329_v45 = vadd.f32 %v16261_v36, %v6140_v40  ;;  %v6132_v27 = vadd.f32 %v20332_v55, %v5944_v52  ;;  %v23175_v40 = vld [vmem:[#allocation23_spill] sm:$0xff] }
 0x646   : > { %v20384_v49 = vpop.f32.mrf.mxu0  ;;  %v6523_v37 = vpop.f32.mrf.mxu1  ;;  %v23174_v59 = vld [vmem:[#allocation35_spill] sm:$0xff] }
 0x647   : > { %v6204_v63 = vadd.f32 %v16241_v5, %v6007_v24  ;;  %v6323_v36 = vadd.f32 %v20384_v49, %v6132_v27  ;;  %v23166_v49 = vld [vmem:[#allocation38_spill] sm:$0xff] }
 0x648   : > { %v16264_v10 = vpop.f32.mrf.mxu0  ;;  %v16305_v7 = vpop.f32.mrf.mxu1  ;;  %v6494_v31 = vadd.f32 %v23166_v49, %v6329_v45  ;;  %v23176_v45 = vld [vmem:[#allocation8_spill] sm:$0xff] }
 0x649   : > { %v6341_v47 = vadd.f32 %v16264_v10, %v6156_v11  ;;  %v23163_v10 = vld [vmem:[#allocation22_spill] sm:$0xff] }
 0x64a   : > { %v6334_v25 = vpop.f32.mrf.mxu0  ;;  %v6535_v19 = vpop.f32.mrf.mxu1 }
 0x64b   : > { %v6335_v62 = vadd.f32 %v6334_v25, %v6148_v29  ;;  %v6506_v56 = vadd.f32 %v20374_v2, %v6341_v47  ;;  %v20481_v47 = vand.u32 4294901760, %v6494_v31 }
 0x64c   : > { %v16267_v38 = vpop.f32.mrf.mxu0 }
 0x64d   : > { %v6353_v8 = vadd.f32 %v16267_v38, %v6172_v54  ;;  %v20444_v2 = vand.u32 4294901760, %v6506_v56 }
 0x64e   : > { %v6346_v43 = vpop.f32.mrf.mxu0 }
 0x64f   : > { %v6347_v21 = vadd.f32 %v6346_v43, %v6164_v39  ;;  %v6518_v58 = vadd.f32 %v16299_v26, %v6353_v8  ;;  %v23169_v39 = vld [vmem:[#allocation19_spill] sm:$0xff]  ;;  %v20484_v29 = vsub.f32 %v6506_v56, %v20444_v2 }
 0x650   : > { %v16270_v51 = vpop.f32.mrf.mxu0 }
 0x651   : > { %v6365_v1 = vadd.f32 %v16270_v51, %v6188_v9  ;;  %v6196_v51 = vadd.f32 %v20350_v33, %v6000_v30  ;;  %v6512_v41 = vadd.f32 %v6511_v4, %v6347_v21  ;;  %v20417_v14 = vand.u32 4294901760, %v6518_v58  ;;  %v23167_v9 = vld [vmem:[#allocation82_spill] sm:$0xff]  ;;  %v23168_v30 = vld [vmem:[#allocation20_spill] sm:$0xff]  ;;  %v23170_v21 = vld [vmem:[#allocation83_spill] sm:$0xff] }
 0x652   : > { %v6358_v3 = vpop.f32.mrf.mxu0  ;;  %v5732_v4 = vadd.f32 %v20280_v6, %v20286_v18  ;;  %v23164_v6 = vld [vmem:[#allocation84_spill] sm:$0xff]  ;;  %v6100_v22 = vadd.f32 %v23167_v9, %v5916_v46  ;;  %v20521_v46 = vand.u32 4294901760, %v20484_v29 }
 0x653   : > { %v6530_v15 = vadd.f32 %v16302_v35, %v6365_v1  ;;  %v6359_v0 = vadd.f32 %v6358_v3, %v6180_v50  ;;  %v5756_v35 = vadd.f32 %v20284_v17, %v20294_v20  ;;  %v20429_v48 = vand.u32 4294901760, %v6512_v41 }
 0x654   : > { %v16273_v44 = vpop.f32.mrf.mxu0  ;;  %v6317_v18 = vadd.f32 %v23164_v6, %v23163_v10  ;;  %v20448_v34 = vsub.f32 %v6518_v58, %v20417_v14  ;;  %v6488_v1 = vadd.f32 %v23169_v39, %v6323_v36  ;;  %v23177_v36 = vld [vmem:[#allocation88_spill] sm:$0xff]  ;;  %v23179_v10 = vld [vmem:[#allocation90_spill] sm:$0xff] }
 0x655   : > { %v20405_v42 = vand.u32 4294901760, %v6530_v15  ;;  %v6524_v28 = vadd.f32 %v6523_v37, %v6359_v0  ;;  %v6377_v32 = vadd.f32 %v16273_v44, %v6204_v63  ;;  %v5930_v8 = vadd.f32 %v20344_v61, %v5756_v35  ;;  %v23162_v61 = vld [vmem:[#allocation11_spill] sm:$0xff] }
 0x656   : > { %v6370_v5 = vpop.f32.mrf.mxu0  ;;  %v6500_v55 = vadd.f32 %v23162_v61, %v6335_v62  ;;  %v20467_v57 = vsub.f32 %v6512_v41, %v20429_v48  ;;  %v23172_v63 = vld [vmem:[#allocation87_spill] sm:$0xff]  ;;  %v20493_v58 = vand.u32 4294901760, %v20448_v34  ;;  %v6299_v35 = vadd.f32 %v23174_v59, %v6100_v22  ;;  %v23178_v61 = vld [vmem:[#allocation85_spill] sm:$0xff] }
 0x657   : > { %v20412_v53 = vand.u32 4294901760, %v6524_v28  ;;  %v6542_v23 = vadd.f32 %v16305_v7, %v6377_v32  ;;  %v6371_v33 = vadd.f32 %v6370_v5, %v6196_v51  ;;  %v20420_v17 = vsub.f32 %v6530_v15, %v20405_v42  ;;  %v23171_v15 = vld [vmem:[#allocation17_spill] sm:$0xff] }
 0x658   : > { %v6116_v38 = vadd.f32 %v23165_v60, %v5930_v8  ;;  %v20463_v50 = vand.u32 4294901760, %v6500_v55  ;;  %v6305_v0 = vadd.f32 %v23171_v15, %v23170_v21  ;;  %v6482_v52 = vadd.f32 %v23172_v63, %v6317_v18  ;;  %v23180_v18 = vld [vmem:[#allocation86_spill] sm:$0xff] }
 0x659   : > { %v20422_v20 = vand.u32 4294901760, %v6542_v23  ;;  %v6536_v12 = vadd.f32 %v6535_v19, %v6371_v33  ;;  %v20432_v25 = vsub.f32 %v6524_v28, %v20412_v53  ;;  %v20458_v54 = vand.u32 4294901760, %v20420_v17  ;;  %v23173_v28 = vld [vmem:[#allocation13_spill] sm:$0xff] }
 0x65a   : > { %v6311_v37 = vadd.f32 %v23168_v30, %v6116_v38  ;;  %v5902_v32 = vadd.f32 %v23173_v28, %v5732_v4  ;;  %v20498_v5 = vand.u32 4294901760, %v6488_v1  ;;  %v20502_v41 = vsub.f32 %v6500_v55, %v20463_v50  ;;  %v23181_v30 = vld [vmem:[#allocation27_spill] sm:$0xff] }
 0x65b   : > { %v20435_v26 = vsub.f32 %v6542_v23, %v20422_v20  ;;  %v20437_v16 = vand.u32 4294901760, %v6536_v12  ;;  %16306 = vmatprep.subr.mxu0 %v20422_v20  ;;  %v20476_v3 = vand.u32 4294901760, %v20432_v25  ;;  %v6809_v51 = vsub.f32 %v20420_v17, %v20458_v54 }
 0x65c   : > { %16307 = vmatpush3.msra.mxu0 %v20422_v20  ;;  %v6476_v62 = vadd.f32 %v23175_v40, %v6311_v37  ;;  %v20508_v8 = vand.u32 4294901760, %v20467_v57  ;;  %v6470_v27 = vadd.f32 %v23176_v45, %v6305_v0  ;;  %v20511_v56 = vand.u32 4294901760, %v6482_v52  ;;  %v23182_v0 = vld [vmem:[#allocation29_spill] sm:$0xff] }
 0x65d   : > { %v20451_v43 = vsub.f32 %v6536_v12, %v20437_v16  ;;  %16308 = vmatprep.subr.mxu0 %v20437_v16  ;;  %v20455_v24 = vand.u32 4294901760, %v20435_v26  ;;  %v6816_v33 = vsub.f32 %v20432_v25, %v20476_v3  ;;  %v20515_v19 = vsub.f32 %v6494_v31, %v20481_v47 }
 0x65e   : > { %16309 = vmatpush3.msra.mxu0 %v20437_v16  ;;  %v6810_v12 = vand.u32 4294901760, %v6809_v51  ;;  %v6823_v4 = vsub.f32 %v20448_v34, %v20493_v58  ;;  %v6293_v55 = vadd.f32 %v23178_v61, %v23177_v36  ;;  %v6084_v6 = vadd.f32 %v23179_v10, %v5902_v32  ;;  %v23183_v32 = vld [vmem:[#allocation89_spill] sm:$0xff] }
 0x65f   : > { %16310 = vmatprep.subr.mxu0 %v20405_v42  ;;  %v6795_v13 = vsub.f32 %v20435_v26, %v20455_v24  ;;  %v20473_v11 = vand.u32 4294901760, %v20451_v43  ;;  %v6464_v60 = vadd.f32 %v23180_v18, %v6299_v35  ;;  %v20527_v38 = vand.u32 4294901760, %v6476_v62 }
 0x660   : > { %16311 = vmatpush3.msra.mxu0 %v20405_v42  ;;  %v20531_v49 = vsub.f32 %v6488_v1, %v20498_v5  ;;  %v6817_v31 = vand.u32 4294901760, %v6816_v33  ;;  %v6830_v9 = vsub.f32 %v20467_v57, %v20508_v8  ;;  %v20537_v22 = vand.u32 4294901760, %v20502_v41 }
 0x661   : > { %16312 = vmatprep.subr.mxu0 %v20412_v53  ;;  %v6796_v7 = vand.u32 4294901760, %v6795_v13  ;;  %v6802_v44 = vsub.f32 %v20451_v43, %v20473_v11  ;;  %v6287_v37 = vadd.f32 %v23181_v30, %v6084_v6  ;;  %v20540_v39 = vand.u32 4294901760, %v6470_v27 }
 0x662   : > { %16313 = vmatpush3.msra.mxu0 %v20412_v53  ;;  %v20544_v1 = vsub.f32 %v6482_v52, %v20511_v56  ;;  %v6824_v13 = vand.u32 4294901760, %v6823_v4  ;;  %v6837_v21 = vsub.f32 %v20484_v29, %v20521_v46  ;;  %v20550_v15 = vand.u32 4294901760, %v20515_v19 }
 0x663   : > { %16314 = vmatprep.subr.mxu0 %v20417_v14  ;;  %16362 = vmatprep.subr.mxu1 %v6796_v7  ;;  %v6803_v23 = vand.u32 4294901760, %v6802_v44  ;;  %v6458_v63 = vadd.f32 %v23182_v0, %v6293_v55  ;;  %v20557_v52 = vsub.f32 %v6476_v62, %v20527_v38  ;;  %v6831_v44 = vand.u32 4294901760, %v6830_v9 }
 0x664   : > { %16315 = vmatpush3.msra.mxu0 %v20417_v14  ;;  %16363 = vmatpush3.msra.mxu1 %v6796_v7  ;;  %v20553_v7 = vand.u32 4294901760, %v6464_v60  ;;  %v6844_v51 = vsub.f32 %v20502_v41, %v20537_v22  ;;  %v20563_v28 = vand.u32 4294901760, %v20531_v49  ;;  %v6452_v59 = vadd.f32 %v23183_v32, %v6287_v37  ;;  %v23184_v32 = vld [vmem:[#allocation34_spill] sm:$0xff] }
 0x665   : > { %16316 = vmatprep.subr.mxu0 %v20429_v48  ;;  %16364 = vmatprep.subr.mxu1 %v6803_v23  ;;  %v20568_v35 = vsub.f32 %v6470_v27, %v20540_v39  ;;  %v6838_v40 = vand.u32 4294901760, %v6837_v21  ;;  %v6851_v62 = vsub.f32 %v20515_v19, %v20550_v15  ;;  %v20576_v33 = vand.u32 4294901760, %v6458_v63 }
 0x666   : > { %16317 = vmatpush3.msra.mxu0 %v20429_v48  ;;  %16365 = vmatpush3.msra.mxu1 %v6803_v23  ;;  %v20574_v23 = vand.u32 4294901760, %v20544_v1  ;;  %v20580_v45 = vsub.f32 %v6464_v60, %v20553_v7  ;;  %v6845_v27 = vand.u32 4294901760, %v6844_v51  ;;  %v20586_v4 = vand.u32 4294901760, %v20557_v52 }
 0x667   : > { %16318 = vmatprep.subr.mxu0 %v20444_v2  ;;  %16366 = vmatprep.subr.mxu1 %v6810_v12  ;;  %v20588_v36 = vand.u32 4294901760, %v6452_v59  ;;  %v6852_v61 = vand.u32 4294901760, %v6851_v62  ;;  %v20595_v10 = vand.u32 4294901760, %v20568_v35  ;;  %v20598_v6 = vsub.f32 %v6458_v63, %v20576_v33  ;;  %v23185_v62 = vld [vmem:[#allocation41_spill] sm:$0xff] }
 0x668   : > { %16319 = vmatpush3.msra.mxu0 %v20444_v2  ;;  %16367 = vmatpush3.msra.mxu1 %v6810_v12  ;;  %v6858_v12 = vsub.f32 %v20531_v49, %v20563_v28  ;;  %v6865_v55 = vsub.f32 %v20544_v1, %v20574_v23  ;;  %v6872_v60 = vsub.f32 %v20557_v52, %v20586_v4 }
 0x669   : > { %16320 = vmatprep.subr.mxu0 %v20463_v50  ;;  %16368 = vmatprep.subr.mxu1 %v6817_v31  ;;  %v20608_v9 = vsub.f32 %v6452_v59, %v20588_v36  ;;  %v6879_v37 = vsub.f32 %v20568_v35, %v20595_v10 }
 0x66a   : > { %16321 = vmatpush3.msra.mxu0 %v20463_v50  ;;  %16369 = vmatpush3.msra.mxu1 %v6817_v31  ;;  %v6859_v18 = vand.u32 4294901760, %v6858_v12  ;;  %v20605_v31 = vand.u32 4294901760, %v20580_v45  ;;  %v6866_v30 = vand.u32 4294901760, %v6865_v55  ;;  %v6873_v21 = vand.u32 4294901760, %v6872_v60  ;;  %v23186_v12 = vld [vmem:[#allocation44_spill] sm:$0xff]  ;;  %v23188_v55 = vld [vmem:[#allocation50_spill] sm:$0xff] }
 0x66b   : > { %16322 = vmatprep.subr.mxu0 %v20481_v47  ;;  %16370 = vmatprep.subr.mxu1 %v6824_v13  ;;  %v20623_v63 = vand.u32 4294901760, %v20608_v9  ;;  %v23193_v60 = vld [vmem:[#allocation9_spill] sm:$0xff] }
 0x66c   : > { %16323 = vmatpush3.msra.mxu0 %v20481_v47  ;;  %16371 = vmatpush3.msra.mxu1 %v6824_v13  ;;  %v20616_v13 = vand.u32 4294901760, %v20598_v6  ;;  %v6886_v0 = vsub.f32 %v20580_v45, %v20605_v31 }
 0x66d   : > { %16324 = vmatprep.subr.mxu0 %v20498_v5  ;;  %16372 = vmatprep.subr.mxu1 %v6831_v44 }
 0x66e   : > { %16325 = vmatpush3.msra.mxu0 %v20498_v5  ;;  %16373 = vmatpush3.msra.mxu1 %v6831_v44  ;;  %v6880_v44 = vand.u32 4294901760, %v6879_v37  ;;  %v6893_v51 = vsub.f32 %v20598_v6, %v20616_v13  ;;  %v6887_v59 = vand.u32 4294901760, %v6886_v0  ;;  %v23197_v37 = vld [vmem:[#allocation14_spill] sm:$0xff]  ;;  %v23201_v0 = vld [vmem:[#allocation37_spill] sm:$0xff] }
 0x66f   : > { %16326 = vmatprep.subr.mxu0 %v20511_v56  ;;  %16374 = vmatprep.subr.mxu1 %v6838_v40 }
 0x670   : > { %16327 = vmatpush3.msra.mxu0 %v20511_v56  ;;  %16375 = vmatpush3.msra.mxu1 %v6838_v40  ;;  %v6900_v40 = vsub.f32 %v20608_v9, %v20623_v63 }
 0x671   : > { %16328 = vmatprep.subr.mxu0 %v20527_v38  ;;  %16376 = vmatprep.subr.mxu1 %v6845_v27 }
 0x672   : > { %16329 = vmatpush3.msra.mxu0 %v20527_v38  ;;  %16377 = vmatpush3.msra.mxu1 %v6845_v27  ;;  %v6894_v27 = vand.u32 4294901760, %v6893_v51  ;;  %v23205_v51 = vld [vmem:[#allocation46_spill] sm:$0xff] }
 0x673   : > { %16330 = vmatprep.subr.mxu0 %v20540_v39  ;;  %16378 = vmatprep.subr.mxu1 %v6852_v61 }
 0x674   : > { %16331 = vmatpush3.msra.mxu0 %v20540_v39  ;;  %16379 = vmatpush3.msra.mxu1 %v6852_v61  ;;  %v6901_v61 = vand.u32 4294901760, %v6900_v40  ;;  %v23212_v40 = vld [vmem:[#allocation62_spill] sm:$0xff] }
 0x675   : > { %16332 = vmatprep.subr.mxu0 %v20553_v7  ;;  %16380 = vmatprep.subr.mxu1 %v6859_v18 }
 0x676   : > { %16333 = vmatpush3.msra.mxu0 %v20553_v7  ;;  %16381 = vmatpush3.msra.mxu1 %v6859_v18  ;;  %v23191_v18 = vld [vmem:[#allocation21_spill] sm:$0xff] }
 0x677   : > { %16334 = vmatprep.subr.mxu0 %v20576_v33  ;;  %16382 = vmatprep.subr.mxu1 %v6866_v30 }
 0x678   : > { %16335 = vmatpush3.msra.mxu0 %v20576_v33  ;;  %16383 = vmatpush3.msra.mxu1 %v6866_v30  ;;  %v23196_v30 = vld [vmem:[#allocation66_spill] sm:$0xff] }
 0x679   : > { %16336 = vmatprep.subr.mxu0 %v20588_v36  ;;  %16384 = vmatprep.subr.mxu1 %v6873_v21 }
 0x67a   : > { %16337 = vmatpush3.msra.mxu0 %v20588_v36  ;;  %16385 = vmatpush3.msra.mxu1 %v6873_v21  ;;  %v23200_v21 = vld [vmem:[#allocation74_spill] sm:$0xff] }
 0x67b   : > { %16339 = vmatmul.mubr.f32.vlgmr.msra.gmra.mxu0 %v23184_v32  ;;  %16386 = vmatprep.subr.mxu1 %v6880_v44  ;;  %v23208_v32 = vld [vmem:[#allocation81_spill] sm:$0xff] }
 0x67c   : > { %16418 = vmatprep.subr.mxu0 %v20435_v26  ;;  %16387 = vmatpush3.msra.mxu1 %v6880_v44  ;;  %v23204_v44 = vld [vmem:[#allocation79_spill] sm:$0xff] }
 0x67d   : > { %16419 = vmatpush3.msra.mxu0 %v20435_v26  ;;  %16388 = vmatprep.subr.mxu1 %v6887_v59  ;;  %v23187_v26 = vld [vmem:[#allocation47_spill] sm:$0xff] }
 0x67e   : > { %16420 = vmatprep.subr.mxu0 %v20451_v43  ;;  %16341 = vmatprep.mubr.f32.mxu0 %v23185_v62  ;;  %v23213_v62 = vld [vmem:[#allocation12_spill] sm:$0xff] }
 0x67f   : > { %16389 = vmatpush3.msra.mxu1 %v6887_v59  ;;  %16421 = vmatpush3.msra.mxu0 %v20451_v43  ;;  %v23189_v43 = vld [vmem:[#allocation24_spill] sm:$0xff]  ;;  %v23209_v59 = vld [vmem:[#allocation54_spill] sm:$0xff] }
 0x680   : > { %16342 = vmatmul.mubr.f32.gmra.mxu0 %v23186_v12  ;;  %16390 = vmatprep.subr.mxu1 %v6894_v27  ;;  %v23217_v12 = vld [vmem:[#allocation18_spill] sm:$0xff] }
 0x681   : > { %16422 = vmatprep.subr.mxu0 %v20420_v17  ;;  %16391 = vmatpush3.msra.mxu1 %v6894_v27  ;;  %v23216_v27 = vld [vmem:[#allocation70_spill] sm:$0xff] }
 0x682   : > { %16423 = vmatpush3.msra.mxu0 %v20420_v17  ;;  %16392 = vmatprep.subr.mxu1 %v6901_v61  ;;  %v23190_v17 = vld [vmem:[#allocation55_spill] sm:$0xff] }
 0x683   : > { %16424 = vmatprep.subr.mxu0 %v20432_v25  ;;  %16344 = vmatprep.mubr.f32.mxu0 %v23187_v26  ;;  %v23221_v26 = vld [vmem:[#allocation16_spill] sm:$0xff] }
 0x684   : > { %16393 = vmatpush3.msra.mxu1 %v6901_v61  ;;  %16425 = vmatpush3.msra.mxu0 %v20432_v25  ;;  %v23192_v25 = vld [vmem:[#allocation58_spill] sm:$0xff]  ;;  %v23220_v61 = vld [vmem:[#allocation32_spill] sm:$0xff] }
 0x685   : > { %16345 = vmatmul.mubr.f32.gmra.mxu0 %v23188_v55  ;;  %16395 = vmatmul.mubr.f32.vlgmr.msra.gmra.mxu1 %v23189_v43  ;;  %v23223_v55 = vld [vmem:[#allocation15_spill] sm:$0xff] }
 0x686   : > { %16426 = vmatprep.subr.mxu0 %v20448_v34  ;;  %16474 = vmatprep.subr.mxu1 %v20422_v20 }
 0x687   : > { %16427 = vmatpush3.msra.mxu0 %v20448_v34  ;;  %16475 = vmatpush3.msra.mxu1 %v20422_v20  ;;  %v23194_v34 = vld [vmem:[#allocation63_spill] sm:$0xff] }
 0x688   : > { %16428 = vmatprep.subr.mxu0 %v20467_v57  ;;  %16476 = vmatprep.subr.mxu1 %v20437_v16 }
 0x689   : > { %16347 = vmatprep.mubr.f32.mxu0 %v23190_v17  ;;  %16397 = vmatprep.mubr.f32.mxu1 %v23191_v18  ;;  %v23225_v17 = vld [vmem:[#allocation31_spill] sm:$0xff] }
 0x68a   : > { %16429 = vmatpush3.msra.mxu0 %v20467_v57  ;;  %16477 = vmatpush3.msra.mxu1 %v20437_v16  ;;  %v23195_v57 = vld [vmem:[#allocation10_spill] sm:$0xff] }
 0x68b   : > { %16348 = vmatmul.mubr.f32.gmra.mxu0 %v23192_v25  ;;  %16398 = vmatmul.mubr.f32.gmra.mxu1 %v23193_v60 }
 0x68c   : > { %16430 = vmatprep.subr.mxu0 %v20484_v29  ;;  %16478 = vmatprep.subr.mxu1 %v20405_v42 }
 0x68d   : > { %16431 = vmatpush3.msra.mxu0 %v20484_v29  ;;  %16479 = vmatpush3.msra.mxu1 %v20405_v42  ;;  %v23198_v29 = vld [vmem:[#allocation71_spill] sm:$0xff] }
 0x68e   : > { %16432 = vmatprep.subr.mxu0 %v20502_v41  ;;  %16480 = vmatprep.subr.mxu1 %v20412_v53 }
 0x68f   : > { %16350 = vmatprep.mubr.f32.mxu0 %v23194_v34  ;;  %16400 = vmatprep.mubr.f32.mxu1 %v23195_v57  ;;  %v7852_v34 = vld [vmem:[%s22527_s4 + $0x48] sm:$0xff] }
 0x690   : > { %16433 = vmatpush3.msra.mxu0 %v20502_v41  ;;  %16481 = vmatpush3.msra.mxu1 %v20412_v53  ;;  %v23199_v41 = vld [vmem:[#allocation33_spill] sm:$0xff] }
 0x691   : > { %16351 = vmatmul.mubr.f32.gmra.mxu0 %v23196_v30  ;;  %16401 = vmatmul.mubr.f32.gmra.mxu1 %v23197_v37 }
 0x692   : > { %16434 = vmatprep.subr.mxu0 %v20515_v19  ;;  %16482 = vmatprep.subr.mxu1 %v20417_v14 }
 0x693   : > { %16435 = vmatpush3.msra.mxu0 %v20515_v19  ;;  %16483 = vmatpush3.msra.mxu1 %v20417_v14  ;;  %v23202_v19 = vld [vmem:[#allocation77_spill] sm:$0xff] }
 0x694   : > { %16436 = vmatprep.subr.mxu0 %v20531_v49  ;;  %16484 = vmatprep.subr.mxu1 %v20429_v48 }
 0x695   : > { %16353 = vmatprep.mubr.f32.mxu0 %v23198_v29  ;;  %16403 = vmatprep.mubr.f32.mxu1 %v23199_v41 }
 0x696   : > { %16437 = vmatpush3.msra.mxu0 %v20531_v49  ;;  %16485 = vmatpush3.msra.mxu1 %v20429_v48  ;;  %v23203_v49 = vld [vmem:[#allocation43_spill] sm:$0xff] }
 0x697   : > { %16354 = vmatmul.mubr.f32.gmra.mxu0 %v23200_v21  ;;  %16404 = vmatmul.mubr.f32.gmra.mxu1 %v23201_v0 }
 0x698   : > { %16438 = vmatprep.subr.mxu0 %v20544_v1  ;;  %16486 = vmatprep.subr.mxu1 %v20444_v2 }
 0x699   : > { %16439 = vmatpush3.msra.mxu0 %v20544_v1  ;;  %16487 = vmatpush3.msra.mxu1 %v20444_v2  ;;  %v23206_v1 = vld [vmem:[#allocation80_spill] sm:$0xff] }
 0x69a   : > { %16440 = vmatprep.subr.mxu0 %v20557_v52  ;;  %16488 = vmatprep.subr.mxu1 %v20463_v50 }
 0x69b   : > { %16356 = vmatprep.mubr.f32.mxu0 %v23202_v19  ;;  %16406 = vmatprep.mubr.f32.mxu1 %v23203_v49 }
 0x69c   : > { %16441 = vmatpush3.msra.mxu0 %v20557_v52  ;;  %16489 = vmatpush3.msra.mxu1 %v20463_v50  ;;  %v23207_v52 = vld [vmem:[#allocation52_spill] sm:$0xff] }
 0x69d   : > { %16357 = vmatmul.mubr.f32.gmra.mxu0 %v23204_v44  ;;  %16407 = vmatmul.mubr.f32.gmra.mxu1 %v23205_v51 }
 0x69e   : > { %16442 = vmatprep.subr.mxu0 %v20568_v35  ;;  %16490 = vmatprep.subr.mxu1 %v20481_v47 }
 0x69f   : > { %16443 = vmatpush3.msra.mxu0 %v20568_v35  ;;  %16491 = vmatpush3.msra.mxu1 %v20481_v47  ;;  %v23210_v35 = vld [vmem:[#allocation60_spill] sm:$0xff] }
 0x6a0   : > { %16444 = vmatprep.subr.mxu0 %v20580_v45  ;;  %16492 = vmatprep.subr.mxu1 %v20498_v5 }
 0x6a1   : > { %16359 = vmatprep.mubr.f32.mxu0 %v23206_v1  ;;  %16409 = vmatprep.mubr.f32.mxu1 %v23207_v52 }
 0x6a2   : > { %16445 = vmatpush3.msra.mxu0 %v20580_v45  ;;  %16493 = vmatpush3.msra.mxu1 %v20498_v5  ;;  %v23211_v45 = vld [vmem:[#allocation4_spill] sm:$0xff] }
 0x6a3   : > { %16360 = vmatmul.mubr.f32.gmra.mxu0 %v23208_v32  ;;  %16410 = vmatmul.mubr.f32.gmra.mxu1 %v23209_v59 }
 0x6a4   : > { %16446 = vmatprep.subr.mxu0 %v20598_v6  ;;  %16494 = vmatprep.subr.mxu1 %v20511_v56 }
 0x6a5   : > { %16447 = vmatpush3.msra.mxu0 %v20598_v6  ;;  %16495 = vmatpush3.msra.mxu1 %v20511_v56  ;;  %v23214_v6 = vld [vmem:[#allocation68_spill] sm:$0xff] }
 0x6a6   : > { %16448 = vmatprep.subr.mxu0 %v20608_v9  ;;  %16496 = vmatprep.subr.mxu1 %v20527_v38 }
 0x6a7   : > { %16412 = vmatprep.mubr.f32.mxu1 %v23210_v35  ;;  %16449 = vmatpush3.msra.mxu0 %v20608_v9  ;;  %v23215_v9 = vld [vmem:[#allocation7_spill] sm:$0xff] }
 0x6a8   : > { %16450 = vmatprep.mubr.f32.mxu0 %v23211_v45  ;;  %16497 = vmatpush3.msra.mxu1 %v20527_v38 }
 0x6a9   : > { %16413 = vmatmul.mubr.f32.gmra.mxu1 %v23212_v40  ;;  %16451 = vmatmul.mubr.f32.vlgmr.msra.gmra.mxu0 %v23213_v62 }
 0x6aa   : > { %16498 = vmatprep.subr.mxu1 %v20540_v39  ;;  %16530 = vmatprep.subr.mxu0 %v20455_v24 }
 0x6ab   : > { %16499 = vmatpush3.msra.mxu1 %v20540_v39  ;;  %16531 = vmatpush3.msra.mxu0 %v20455_v24  ;;  %v23218_v24 = vld [vmem:[#allocation30_spill] sm:$0xff] }
 0x6ac   : > { %16500 = vmatprep.subr.mxu1 %v20553_v7  ;;  %16532 = vmatprep.subr.mxu0 %v20473_v11 }
 0x6ad   : > { %16415 = vmatprep.mubr.f32.mxu1 %v23214_v6  ;;  %16453 = vmatprep.mubr.f32.mxu0 %v23215_v9 }
 0x6ae   : > { %16501 = vmatpush3.msra.mxu1 %v20553_v7  ;;  %16533 = vmatpush3.msra.mxu0 %v20473_v11  ;;  %v23219_v11 = vld [vmem:[#allocation5_spill] sm:$0xff] }
 0x6af   : > { %16416 = vmatmul.mubr.f32.gmra.mxu1 %v23216_v27  ;;  %16454 = vmatmul.mubr.f32.gmra.mxu0 %v23217_v12 }
 0x6b0   : > { %16502 = vmatprep.subr.mxu1 %v20576_v33  ;;  %16534 = vmatprep.subr.mxu0 %v20458_v54 }
 0x6b1   : > { %16503 = vmatpush3.msra.mxu1 %v20576_v33  ;;  %16535 = vmatpush3.msra.mxu0 %v20458_v54  ;;  %v23222_v54 = vld [vmem:[#allocation40_spill] sm:$0xff] }
 0x6b2   : > { %16504 = vmatprep.subr.mxu1 %v20588_v36  ;;  %16536 = vmatprep.subr.mxu0 %v20476_v3 }
 0x6b3   : > { %16456 = vmatprep.mubr.f32.mxu0 %v23218_v24  ;;  %16505 = vmatpush3.msra.mxu1 %v20588_v36 }
 0x6b4   : > { %16506 = vmatprep.mubr.f32.mxu1 %v23219_v11  ;;  %16537 = vmatpush3.msra.mxu0 %v20476_v3  ;;  %v23224_v3 = vld [vmem:[#allocation42_spill] sm:$0xff] }
 0x6b5   : > { %16457 = vmatmul.mubr.f32.gmra.mxu0 %v23220_v61  ;;  %16507 = vmatmul.mubr.f32.vlgmr.msra.gmra.mxu1 %v23221_v26 }
 0x6b6   : > { %16538 = vmatprep.subr.mxu0 %v20493_v58  ;;  %16586 = vmatprep.subr.mxu1 %v20422_v20 }
 0x6b7   : > { %16539 = vmatpush3.msra.mxu0 %v20493_v58  ;;  %16587 = vmatpush3.msra.mxu1 %v20422_v20  ;;  %v23226_v20 = vld [vmem:[#allocation49_spill] sm:$0xff]  ;;  %v23227_v58 = vld [vmem:[#allocation36_spill] sm:$0xff] }
 0x6b8   : > { %16540 = vmatprep.subr.mxu0 %v20508_v8  ;;  %16588 = vmatprep.subr.mxu1 %v20437_v16 }
 0x6b9   : > { %16459 = vmatprep.mubr.f32.mxu0 %v23222_v54  ;;  %16509 = vmatprep.mubr.f32.mxu1 %v23223_v55 }
 0x6ba   : > { %16541 = vmatpush3.msra.mxu0 %v20508_v8  ;;  %16589 = vmatpush3.msra.mxu1 %v20437_v16  ;;  %v23228_v16 = vld [vmem:[#allocation51_spill] sm:$0xff] }
 0x6bb   : > { %16460 = vmatmul.mubr.f32.gmra.mxu0 %v23224_v3  ;;  %16510 = vmatmul.mubr.f32.gmra.mxu1 %v23225_v17  ;;  %v23229_v8 = vld [vmem:[#allocation39_spill] sm:$0xff] }
 0x6bc   : > { %16542 = vmatprep.subr.mxu0 %v20521_v46  ;;  %16590 = vmatprep.subr.mxu1 %v20405_v42 }
 0x6bd   : > { %16543 = vmatpush3.msra.mxu0 %v20521_v46  ;;  %16591 = vmatpush3.msra.mxu1 %v20405_v42  ;;  %v23230_v42 = vld [vmem:[#allocation57_spill] sm:$0xff] }
 0x6be   : > { %16544 = vmatprep.subr.mxu0 %v20537_v22  ;;  %16592 = vmatprep.subr.mxu1 %v20412_v53  ;;  %v23231_v46 = vld [vmem:[#allocation45_spill] sm:$0xff] }
 0x6bf   : > { %16462 = vmatprep.mubr.f32.mxu0 %v23226_v20  ;;  %16512 = vmatprep.mubr.f32.mxu1 %v23227_v58 }
 0x6c0   : > { %16545 = vmatpush3.msra.mxu0 %v20537_v22  ;;  %16593 = vmatpush3.msra.mxu1 %v20412_v53  ;;  %v23232_v53 = vld [vmem:[#allocation59_spill] sm:$0xff]  ;;  %v23233_v22 = vld [vmem:[#allocation48_spill] sm:$0xff] }
 0x6c1   : > { %16463 = vmatmul.mubr.f32.gmra.mxu0 %v23228_v16  ;;  %16513 = vmatmul.mubr.f32.gmra.mxu1 %v23229_v8 }
 0x6c2   : > { %16546 = vmatprep.subr.mxu0 %v20550_v15  ;;  %16594 = vmatprep.subr.mxu1 %v20417_v14 }
 0x6c3   : > { %16547 = vmatpush3.msra.mxu0 %v20550_v15  ;;  %16595 = vmatpush3.msra.mxu1 %v20417_v14  ;;  %v23234_v14 = vld [vmem:[#allocation65_spill] sm:$0xff] }
 0x6c4   : > { %16548 = vmatprep.subr.mxu0 %v20563_v28  ;;  %16596 = vmatprep.subr.mxu1 %v20429_v48  ;;  %v23235_v15 = vld [vmem:[#allocation53_spill] sm:$0xff] }
 0x6c5   : > { %16465 = vmatprep.mubr.f32.mxu0 %v23230_v42  ;;  %16515 = vmatprep.mubr.f32.mxu1 %v23231_v46 }
 0x6c6   : > { %16549 = vmatpush3.msra.mxu0 %v20563_v28  ;;  %16597 = vmatpush3.msra.mxu1 %v20429_v48  ;;  %v23236_v48 = vld [vmem:[#allocation67_spill] sm:$0xff]  ;;  %v23237_v28 = vld [vmem:[#allocation56_spill] sm:$0xff] }
 0x6c7   : > { %16466 = vmatmul.mubr.f32.gmra.mxu0 %v23232_v53  ;;  %16516 = vmatmul.mubr.f32.gmra.mxu1 %v23233_v22 }
 0x6c8   : > { %16550 = vmatprep.subr.mxu0 %v20574_v23  ;;  %16598 = vmatprep.subr.mxu1 %v20444_v2 }
 0x6c9   : > { %16551 = vmatpush3.msra.mxu0 %v20574_v23  ;;  %16599 = vmatpush3.msra.mxu1 %v20444_v2  ;;  %v23238_v2 = vld [vmem:[#allocation73_spill] sm:$0xff] }
 0x6ca   : > { %16552 = vmatprep.subr.mxu0 %v20586_v4  ;;  %16600 = vmatprep.subr.mxu1 %v20463_v50  ;;  %v23239_v23 = vld [vmem:[#allocation61_spill] sm:$0xff] }
 0x6cb   : > { %16468 = vmatprep.mubr.f32.mxu0 %v23234_v14  ;;  %16518 = vmatprep.mubr.f32.mxu1 %v23235_v15 }
 0x6cc   : > { %16553 = vmatpush3.msra.mxu0 %v20586_v4  ;;  %16601 = vmatpush3.msra.mxu1 %v20463_v50  ;;  %v23240_v50 = vld [vmem:[#allocation75_spill] sm:$0xff]  ;;  %v23241_v4 = vld [vmem:[#allocation64_spill] sm:$0xff] }
 0x6cd   : > { %16469 = vmatmul.mubr.f32.gmra.mxu0 %v23236_v48  ;;  %16519 = vmatmul.mubr.f32.gmra.mxu1 %v23237_v28 }
 0x6ce   : > { %16554 = vmatprep.subr.mxu0 %v20595_v10  ;;  %16602 = vmatprep.subr.mxu1 %v20481_v47 }
 0x6cf   : > { %16555 = vmatpush3.msra.mxu0 %v20595_v10  ;;  %16603 = vmatpush3.msra.mxu1 %v20481_v47  ;;  %v23242_v47 = vld [vmem:[#allocation69_spill] sm:$0xff]  ;;  %v23244_v10 = vld [vmem:[#allocation72_spill] sm:$0xff] }
 0x6d0   : > { %16556 = vmatprep.subr.mxu0 %v20605_v31  ;;  %16604 = vmatprep.subr.mxu1 %v20498_v5 }
 0x6d1   : > { %16471 = vmatprep.mubr.f32.mxu0 %v23238_v2  ;;  %16521 = vmatprep.mubr.f32.mxu1 %v23239_v23 }
 0x6d2   : > { %16557 = vmatpush3.msra.mxu0 %v20605_v31  ;;  %16605 = vmatpush3.msra.mxu1 %v20498_v5  ;;  %v23243_v5 = vld [vmem:[#allocation3_spill] sm:$0xff]  ;;  %v23245_v31 = vld [vmem:[#allocation76_spill] sm:$0xff] }
 0x6d3   : > { %16472 = vmatmul.mubr.f32.gmra.mxu0 %v23240_v50  ;;  %16522 = vmatmul.mubr.f32.gmra.mxu1 %v23241_v4 }
 0x6d4   : > { %16558 = vmatprep.subr.mxu0 %v20616_v13  ;;  %16606 = vmatprep.subr.mxu1 %v20511_v56 }
 0x6d5   : > { %16559 = vmatpush3.msra.mxu0 %v20616_v13  ;;  %16607 = vmatpush3.msra.mxu1 %v20511_v56  ;;  %v23246_v56 = vld [vmem:[#allocation78_spill] sm:$0xff] }
 0x6d6   : > { %16560 = vmatprep.subr.mxu0 %v20623_v63  ;;  %16608 = vmatprep.subr.mxu1 %v20527_v38 }
 0x6d7   : > { %16524 = vmatprep.mubr.f32.mxu1 %v23242_v47  ;;  %16561 = vmatpush3.msra.mxu0 %v20623_v63  ;;  %v7854_v63 = vld [vmem:[%s22527_s4 + $0x58] sm:$0xff] }
 0x6d8   : > { %16562 = vmatprep.mubr.f32.mxu0 %v23243_v5  ;;  %16609 = vmatpush3.msra.mxu1 %v20527_v38  ;;  %v7855_v38 = vld [vmem:[%s22527_s4 + $0x60] sm:$0xff] }
 0x6d9   : > { %16525 = vmatmul.mubr.f32.gmra.mxu1 %v23244_v10  ;;  %16563 = vmatmul.mubr.f32.vlgmr.msra.gmra.mxu0 %v23189_v43 }
 0x6da   : > { %16610 = vmatprep.subr.mxu1 %v20540_v39  ;;  %16527 = vmatprep.mubr.f32.mxu1 %v23245_v31 }
 0x6db   : > { %16611 = vmatpush3.msra.mxu1 %v20540_v39  ;;  %16565 = vmatprep.mubr.f32.mxu0 %v23191_v18  ;;  %v20856_v39 = vand.u32 4294901760, %v7855_v38 }
 0x6dc   : > { %16612 = vmatprep.subr.mxu1 %v20553_v7 }
 0x6dd   : > { %16613 = vmatpush3.msra.mxu1 %v20553_v7  ;;  %16566 = vmatmul.mubr.f32.gmra.mxu0 %v23193_v60  ;;  %23247 = vst [vmem:[#allocation25_spill] sm:$0xff] %v20856_v39  ;;  %v20861_v7 = vsub.f32 %v7855_v38, %v20856_v39 }
 0x6de   : > { %16528 = vmatmul.mubr.f32.gmra.mxu1 %v23246_v56  ;;  %16614 = vmatprep.subr.mxu1 %v20576_v33 }
 0x6df   : > { %16615 = vmatpush3.msra.mxu1 %v20576_v33  ;;  %16568 = vmatprep.mubr.f32.mxu0 %v23195_v57  ;;  %23248 = vst [vmem:[#allocation28_spill] sm:$0xff] %v20861_v7  ;;  %v20864_v33 = vand.u32 4294901760, %v20861_v7 }
 0x6e0   : > { %16616 = vmatprep.subr.mxu1 %v20588_v36  ;;  %16618 = vmatprep.mubr.f32.mxu1 %v23243_v5 }
 0x6e1   : > { %16617 = vmatpush3.msra.mxu1 %v20588_v36  ;;  %16569 = vmatmul.mubr.f32.gmra.mxu0 %v23197_v37  ;;  %23249 = vst [vmem:[#allocation6_spill] sm:$0xff] %v20864_v33  ;;  %v8161_v36 = vsub.f32 %v20861_v7, %v20864_v33 }
 0x6e2   : > { %16619 = vmatmul.mubr.f32.vlgmr.msra.gmra.mxu1 %v23189_v43  ;;  %16571 = vmatprep.mubr.f32.mxu0 %v23199_v41  ;;  %v20871_v43 = vand.u32 4294901760, %v7854_v63 }
 0x6e3   : > { %16621 = vmatprep.mubr.f32.mxu1 %v23191_v18  ;;  %16642 = vmatprep.subr.mxu0 %v20856_v39  ;;  %v8162_v13 = vand.u32 4294901760, %v8161_v36  ;;  %v7853_v18 = vld [vmem:[%s22527_s4 + $0x50] sm:$0xff] }
 0x6e4   : > { %16643 = vmatpush3.msra.mxu0 %v20856_v39  ;;  %23250 = vst [vmem:[#allocation11_spill] sm:$0xff] %v20871_v43  ;;  %v20878_v25 = vsub.f32 %v7854_v63, %v20871_v43 }
 0x6e5   : > { %16572 = vmatmul.mubr.f32.gmra.mxu0 %v23201_v0  ;;  %16674 = vmatprep.subr.mxu1 %v8162_v13 }
 0x6e6   : > { %16622 = vmatmul.mubr.f32.gmra.mxu1 %v23193_v60  ;;  %16574 = vmatprep.mubr.f32.mxu0 %v23203_v49  ;;  %23251 = vst [vmem:[#allocation22_spill] sm:$0xff] %v20878_v25  ;;  %v20880_v60 = vand.u32 4294901760, %v7853_v18 }
 0x6e7   : > { %16624 = vmatprep.mubr.f32.mxu1 %v23195_v57  ;;  %16675 = vmatpush3.msra.mxu1 %v8162_v13  ;;  %v20887_v57 = vand.u32 4294901760, %v20878_v25 }
 0x6e8   : > { %16644 = vmatprep.subr.mxu0 %v20871_v43  ;;  %23252 = vst [vmem:[#allocation84_spill] sm:$0xff] %v20880_v60  ;;  %v20891_v30 = vsub.f32 %v7853_v18, %v20880_v60 }
 0x6e9   : > { %16575 = vmatmul.mubr.f32.gmra.mxu0 %v23205_v51  ;;  %23253 = vst [vmem:[#allocation26_spill] sm:$0xff] %v20887_v57  ;;  %v8168_v29 = vsub.f32 %v20878_v25, %v20887_v57 }
 0x6ea   : > { %16625 = vmatmul.mubr.f32.gmra.mxu1 %v23197_v37  ;;  %16577 = vmatprep.mubr.f32.mxu0 %v23207_v52  ;;  %23254 = vst [vmem:[#allocation38_spill] sm:$0xff] %v20891_v30  ;;  %v20893_v37 = vand.u32 4294901760, %v7852_v34 }
 0x6eb   : > { %16627 = vmatprep.mubr.f32.mxu1 %v23199_v41  ;;  %16645 = vmatpush3.msra.mxu0 %v20871_v43  ;;  %v20899_v41 = vand.u32 4294901760, %v20891_v30 }
 0x6ec   : > { %16646 = vmatprep.subr.mxu0 %v20880_v60  ;;  %23255 = vst [vmem:[#allocation82_spill] sm:$0xff] %v20893_v37  ;;  %v20902_v21 = vsub.f32 %v7852_v34, %v20893_v37 }
 0x6ed   : > { %16578 = vmatmul.mubr.f32.gmra.mxu0 %v23209_v59  ;;  %23256 = vst [vmem:[#allocation20_spill] sm:$0xff] %v20899_v41  ;;  %v8175_v19 = vsub.f32 %v20891_v30, %v20899_v41 }
 0x6ee   : > { %16628 = vmatmul.mubr.f32.gmra.mxu1 %v23201_v0  ;;  %16580 = vmatprep.mubr.f32.mxu0 %v23210_v35  ;;  %23257 = vst [vmem:[#allocation19_spill] sm:$0xff] %v20902_v21  ;;  %v8169_v0 = vand.u32 4294901760, %v8168_v29 }
 0x6ef   : > { %16630 = vmatprep.mubr.f32.mxu1 %v23203_v49  ;;  %16647 = vmatpush3.msra.mxu0 %v20880_v60  ;;  %v20909_v49 = vand.u32 4294901760, %v20902_v21  ;;  %v8176_v44 = vand.u32 4294901760, %v8175_v19 }
 0x6f0   : > { %16648 = vmatprep.subr.mxu0 %v20893_v37  ;;  %16676 = vmatprep.subr.mxu1 %v8169_v0 }
 0x6f1   : > { %16581 = vmatmul.mubr.f32.gmra.mxu0 %v23212_v40  ;;  %23258 = vst [vmem:[#allocation83_spill] sm:$0xff] %v20909_v49  ;;  %16677 = vmatpush3.msra.mxu1 %v8169_v0 }
 0x6f2   : > { %16631 = vmatmul.mubr.f32.gmra.mxu1 %v23205_v51  ;;  %16583 = vmatprep.mubr.f32.mxu0 %v23214_v6  ;;  %v8182_v51 = vsub.f32 %v20902_v21, %v20909_v49  ;;  %v13684_v21 = vld [vmem:[%s22527_s4 + $0x158] ss:$0 sm:$0xff] }
 0x6f3   : > { %16633 = vmatprep.mubr.f32.mxu1 %v23207_v52  ;;  %16649 = vmatpush3.msra.mxu0 %v20893_v37 }
 0x6f4   : > { %16706 = vmatprep.subr.mxu0 %v20861_v7  ;;  %16678 = vmatprep.subr.mxu1 %v8176_v44  ;;  %v8183_v1 = vand.u32 4294901760, %v8182_v51 }
 0x6f5   : > { %16584 = vmatmul.mubr.f32.gmra.mxu0 %v23216_v27  ;;  %16679 = vmatpush3.msra.mxu1 %v8176_v44 }
 0x6f6   : > { %16634 = vmatmul.mubr.f32.gmra.mxu1 %v23209_v59  ;;  %16680 = vmatprep.subr.mxu1 %v8183_v1 }
 0x6f7   : > { %16636 = vmatprep.mubr.f32.mxu1 %v23210_v35  ;;  %16681 = vmatpush3.msra.mxu1 %v8183_v1 }
 0x6f8   : > { %16738 = vmatprep.subr.mxu1 %v20856_v39 }
 0x6fa   : > { %16637 = vmatmul.mubr.f32.gmra.mxu1 %v23212_v40 }
 0x6fb   : > { %16639 = vmatprep.mubr.f32.mxu1 %v23214_v6 }
 0x6fe   : > { %16640 = vmatmul.mubr.f32.gmra.mxu1 %v23216_v27 }
 0x73b   : > { %v16340_v52 = vpop.f32.mrf.mxu0 }
 0x73c   : > { %v6648_v30 = vadd.f32 %v16340_v52, %v13684_v21 }
 0x73d   : > { %v6637_v32 = vpop.f32.mrf.mxu0 }
 0x73e   : > { %v6638_v39 = vadd.f32 %v13684_v21, %v6637_v32 }
 0x740   : > { %v16343_v59 = vpop.f32.mrf.mxu0 }
 0x741   : > { %v6668_v37 = vadd.f32 %v16343_v59, %v13684_v21 }
 0x742   : > { %v6657_v35 = vpop.f32.mrf.mxu0 }
 0x745   : > { %v16346_v45 = vpop.f32.mrf.mxu0  ;;  %v16396_v40 = vpop.f32.mrf.mxu1 }
 0x747   : > { %v6677_v62 = vpop.f32.mrf.mxu0  ;;  %v6938_v6 = vpop.f32.mrf.mxu1 }
 0x74b   : > { %v16349_v9 = vpop.f32.mrf.mxu0  ;;  %v20915_v27 = vpop.f32.mrf.mxu1 }
 0x74c   : > { %v6957_v52 = vadd.f32 %v20915_v27, %v6668_v37 }
 0x74d   : > { %v20917_v12 = vpop.f32.mrf.mxu0  ;;  %v20919_v24 = vpop.f32.mrf.mxu1 }
 0x751   : > { %v16352_v11 = vpop.f32.mrf.mxu0  ;;  %v20921_v61 = vpop.f32.mrf.mxu1 }
 0x753   : > { %v20923_v26 = vpop.f32.mrf.mxu0  ;;  %v20925_v54 = vpop.f32.mrf.mxu1 }
 0x757   : > { %v16355_v55 = vpop.f32.mrf.mxu0  ;;  %v20927_v3 = vpop.f32.mrf.mxu1 }
 0x759   : > { %v20929_v17 = vpop.f32.mrf.mxu0  ;;  %v20931_v20 = vpop.f32.mrf.mxu1 }
 0x75d   : > { %v16358_v58 = vpop.f32.mrf.mxu0  ;;  %v20933_v16 = vpop.f32.mrf.mxu1 }
 0x75e   : > { %v6768_v59 = vadd.f32 %v16358_v58, %v13684_v21 }
 0x75f   : > { %v20935_v8 = vpop.f32.mrf.mxu0  ;;  %v20937_v42 = vpop.f32.mrf.mxu1 }
 0x763   : > { %v16361_v46 = vpop.f32.mrf.mxu0  ;;  %v20939_v53 = vpop.f32.mrf.mxu1 }
 0x765   : > { %v20941_v22 = vpop.f32.mrf.mxu0  ;;  %v20943_v14 = vpop.f32.mrf.mxu1 }
 0x769   : > { %v20945_v15 = vpop.f32.mrf.mxu1  ;;  %v20947_v48 = vpop.f32.mrf.mxu0 }
 0x76b   : > { %v20949_v28 = vpop.f32.mrf.mxu1  ;;  %v20951_v2 = vpop.f32.mrf.mxu0 }
 0x76f   : > { %v20953_v23 = vpop.f32.mrf.mxu1  ;;  %v20955_v50 = vpop.f32.mrf.mxu0 }
 0x771   : > { %v20957_v4 = vpop.f32.mrf.mxu1  ;;  %v20959_v47 = vpop.f32.mrf.mxu0 }
 0x775   : > { %v20961_v5 = vpop.f32.mrf.mxu0  ;;  %v20963_v10 = vpop.f32.mrf.mxu1 }
 0x777   : > { %v20965_v31 = vpop.f32.mrf.mxu0  ;;  %v20967_v56 = vpop.f32.mrf.mxu1 }
 0x77b   : > { %v20969_v38 = vpop.f32.mrf.mxu0  ;;  %v20971_v36 = vpop.f32.mrf.mxu1 }
 0x77d   : > { %v20973_v13 = vpop.f32.mrf.mxu0  ;;  %v20975_v63 = vpop.f32.mrf.mxu1 }
 0x781   : > { %v20977_v18 = vpop.f32.mrf.mxu0  ;;  %v20979_v34 = vpop.f32.mrf.mxu1 }
 0x783   : > { %v20981_v29 = vpop.f32.mrf.mxu0  ;;  %v20983_v0 = vpop.f32.mrf.mxu1 }
 0x784   : > { %23259 = vst [vmem:[#allocation17_spill] sm:$0xff] %v20983_v0 }
 0x787   : > { %v20985_v19 = vpop.f32.mrf.mxu0  ;;  %v20987_v44 = vpop.f32.mrf.mxu1 }
 0x788   : > { %23260 = vst [vmem:[#allocation87_spill] sm:$0xff] %v20985_v19  ;;  %23261 = vst [vmem:[#allocation13_spill] sm:$0xff] %v20987_v44  ;;  %v6728_v44 = vadd.f32 %v16352_v11, %v13684_v21  ;;  %v6748_v19 = vadd.f32 %v16355_v55, %v13684_v21  ;;  %v7154_v55 = vadd.f32 %v20955_v50, %v6957_v52 }
 0x789   : > { %v20989_v51 = vpop.f32.mrf.mxu0  ;;  %v20991_v1 = vpop.f32.mrf.mxu1 }
 0x78a   : > { %23262 = vst [vmem:[#allocation35_spill] sm:$0xff] %v20989_v51  ;;  %23263 = vst [vmem:[#allocation23_spill] sm:$0xff] %v20991_v1  ;;  %v6708_v1 = vadd.f32 %v16349_v9, %v13684_v21  ;;  %v6939_v51 = vadd.f32 %v6938_v6, %v6638_v39  ;;  %v6993_v9 = vadd.f32 %v20933_v16, %v6728_v44 }
 0x78c   : > { %v6981_v39 = vadd.f32 %v20927_v3, %v6708_v1 }
 0x78d   : > { %v20993_v49 = vpop.f32.mrf.mxu0  ;;  %v20995_v41 = vpop.f32.mrf.mxu1 }
 0x78e   : > { %23264 = vst [vmem:[#allocation8_spill] sm:$0xff] %v20993_v49  ;;  %23265 = vst [vmem:[#allocation88_spill] sm:$0xff] %v20995_v41  ;;  %v6688_v41 = vadd.f32 %v16346_v45, %v13684_v21  ;;  %v6658_v49 = vadd.f32 %v13684_v21, %v6657_v35  ;;  %v6718_v35 = vadd.f32 %v13684_v21, %v20923_v26 }
 0x78f   : > { %v20997_v57 = vpop.f32.mrf.mxu0  ;;  %v20999_v33 = vpop.f32.mrf.mxu1  ;;  %v6788_v45 = vadd.f32 %v16361_v46, %v13684_v21  ;;  %v7133_v26 = vadd.f32 %v20951_v2, %v6939_v51  ;;  %v7351_v46 = vadd.f32 %v20971_v36, %v7154_v55 }
 0x790   : > { %23266 = vst [vmem:[#allocation85_spill] sm:$0xff] %v20997_v57  ;;  %23267 = vst [vmem:[#allocation90_spill] sm:$0xff] %v20999_v33  ;;  %v6945_v57 = vadd.f32 %v16396_v40, %v6648_v30  ;;  %v6678_v33 = vadd.f32 %v13684_v21, %v6677_v62  ;;  %v6969_v32 = vadd.f32 %v20921_v61, %v6688_v41 }
 0x791   : > { %v6738_v40 = vadd.f32 %v13684_v21, %v20929_v17  ;;  %v6758_v62 = vadd.f32 %v13684_v21, %v20935_v8  ;;  %v6987_v27 = vadd.f32 %v20937_v42, %v6718_v35  ;;  %v7005_v41 = vadd.f32 %v20939_v53, %v6748_v19  ;;  %v23275_v36 = vld [vmem:[#allocation23_spill] sm:$0xff] }
 0x792   : > { %v6963_v30 = vadd.f32 %v20925_v54, %v6678_v33  ;;  %v7140_v11 = vadd.f32 %v20947_v48, %v6945_v57  ;;  %v7029_v54 = vadd.f32 %v20953_v23, %v6788_v45  ;;  %v7327_v8 = vadd.f32 %v20967_v56, %v7133_v26  ;;  %v23271_v23 = vld [vmem:[#allocation17_spill] sm:$0xff]  ;;  %v23274_v56 = vld [vmem:[#allocation35_spill] sm:$0xff] }
 0x793   : > { %v21004_v25 = vpop.f32.mrf.mxu0  ;;  %v21006_v7 = vpop.f32.mrf.mxu1  ;;  %v6999_v33 = vadd.f32 %v20943_v14, %v6738_v40  ;;  %v7182_v42 = vadd.f32 %v20969_v38, %v6981_v39  ;;  %v7189_v2 = vadd.f32 %v20981_v29, %v6987_v27 }
 0x794   : > { %23268 = vst [vmem:[#allocation86_spill] sm:$0xff] %v21004_v25  ;;  %23269 = vst [vmem:[#allocation27_spill] sm:$0xff] %v21006_v7  ;;  %v6698_v25 = vadd.f32 %v13684_v21, %v20917_v12  ;;  %v6951_v7 = vadd.f32 %v20919_v24, %v6658_v49  ;;  %v6778_v12 = vadd.f32 %v13684_v21, %v20941_v22 }
 0x795   : > { %v21008_v60 = vpop.f32.mrf.mxu0  ;;  %v21010_v43 = vpop.f32.mrf.mxu1  ;;  %v7017_v24 = vadd.f32 %v20945_v15, %v6768_v59  ;;  %v7335_v58 = vadd.f32 %v20963_v10, %v7140_v11  ;;  %v7161_v57 = vadd.f32 %v20965_v31, %v6963_v30  ;;  %v7203_v38 = vadd.f32 %v23274_v56, %v6999_v33  ;;  %v23276_v44 = vld [vmem:[#allocation8_spill] sm:$0xff] }
 0x796   : > { %23270 = vst [vmem:[#allocation29_spill] sm:$0xff] %v21008_v60  ;;  %v6975_v37 = vadd.f32 %v20931_v20, %v6698_v25  ;;  %v7011_v25 = vadd.f32 %v20949_v28, %v6758_v62  ;;  %v7023_v3 = vadd.f32 %v20957_v4, %v6778_v12  ;;  %v7147_v21 = vadd.f32 %v20959_v47, %v6951_v7  ;;  %v23272_v4 = vld [vmem:[#allocation87_spill] sm:$0xff] }
 0x797   : > { %v7168_v20 = vadd.f32 %v20961_v5, %v6969_v32  ;;  %v7196_v7 = vadd.f32 %v20977_v18, %v6993_v9  ;;  %v7359_v50 = vadd.f32 %v23271_v23, %v7161_v57  ;;  %v7210_v47 = vadd.f32 %v23272_v4, %v7005_v41  ;;  %v23273_v5 = vld [vmem:[#allocation13_spill] sm:$0xff]  ;;  %v23279_v52 = vld [vmem:[#allocation90_spill] sm:$0xff] }
 0x798   : > { %v7175_v53 = vadd.f32 %v20973_v13, %v6975_v37  ;;  %v7343_v14 = vadd.f32 %v20975_v63, %v7147_v21  ;;  %v7383_v10 = vadd.f32 %v23273_v5, %v7182_v42  ;;  %v23278_v1 = vld [vmem:[#allocation85_spill] sm:$0xff]  ;;  %v7391_v59 = vadd.f32 %v23279_v52, %v7189_v2 }
 0x799   : > { %v21015_v0 = vpop.f32.mrf.mxu1  ;;  %v16564_v60 = vpop.f32.mrf.mxu0  ;;  %v7367_v15 = vadd.f32 %v20979_v34, %v7168_v20  ;;  %v7224_v34 = vadd.f32 %v23276_v44, %v7017_v24  ;;  %v7217_v29 = vadd.f32 %v23278_v1, %v7011_v25  ;;  %v7407_v41 = vadd.f32 %v21010_v43, %v7203_v38  ;;  %v23284_v1 = vld [vmem:[#allocation11_spill] sm:$0xff] }
 0x79a   : > { %v7572_v48 = vadd.f32 %v16564_v60, %v7335_v58  ;;  %v7375_v13 = vadd.f32 %v23275_v36, %v7175_v53  ;;  %v23277_v60 = vld [vmem:[#allocation88_spill] sm:$0xff] }
 0x79b   : > { %v7422_v49 = vpop.f32.mrf.mxu1  ;;  %v7565_v6 = vpop.f32.mrf.mxu0  ;;  %v7399_v51 = vadd.f32 %v23277_v60, %v7196_v7  ;;  %v23280_v35 = vld [vmem:[#allocation86_spill] sm:$0xff]  ;;  %v23281_v62 = vld [vmem:[#allocation27_spill] sm:$0xff]  ;;  %v21062_v12 = vadd.f32 %v21015_v0, %v7224_v34 }
 0x79c   : > { %v7566_v63 = vadd.f32 %v7565_v6, %v7327_v8  ;;  %v7238_v30 = vadd.f32 %v23280_v35, %v7029_v54  ;;  %v7415_v9 = vadd.f32 %v23281_v62, %v7210_v47  ;;  %v23285_v62 = vld [vmem:[#allocation84_spill] sm:$0xff] }
 0x79d   : > { %v16567_v61 = vpop.f32.mrf.mxu0  ;;  %v23282_v6 = vld [vmem:[#allocation29_spill] sm:$0xff] }
 0x79e   : > { %v16529_v17 = vpop.f32.mrf.mxu1  ;;  %v7584_v45 = vadd.f32 %v16567_v61, %v7351_v46  ;;  %v7231_v27 = vadd.f32 %v23282_v6, %v7023_v3  ;;  %v21065_v61 = vadd.f32 %v7422_v49, %v7217_v29 }
 0x79f   : > { %v7577_v16 = vpop.f32.mrf.mxu0  ;;  %v21067_v55 = vadd.f32 %v16529_v17, %v7238_v30 }
 0x7a0   : > { %v7438_v22 = vpop.f32.mrf.mxu1  ;;  %v7578_v24 = vadd.f32 %v7577_v16, %v7343_v14 }
 0x7a1   : > { %v16570_v28 = vpop.f32.mrf.mxu0  ;;  %v21069_v21 = vadd.f32 %v7438_v22, %v7231_v27 }
 0x7a2   : > { %v16620_v31 = vpop.f32.mrf.mxu1  ;;  %v7596_v43 = vadd.f32 %v16570_v28, %v7367_v15 }
 0x7a3   : > { %v7749_v19 = vadd.f32 %v16620_v31, %v7572_v48  ;;  %v7589_v18 = vpop.f32.mrf.mxu0 }
 0x7a4   : > { %v7742_v32 = vpop.f32.mrf.mxu1  ;;  %v7590_v42 = vadd.f32 %v7589_v18, %v7359_v50 }
 0x7a5   : > { %v7837_v39 = vmax.f32 %v7749_v19, 0.0  ;;  %v7743_v40 = vadd.f32 %v7742_v32, %v7566_v63  ;;  %v16573_v37 = vpop.f32.mrf.mxu0  ;;  %v23283_v19 = vld [vmem:[#allocation25_spill] sm:$0xff] }
 0x7a6   : > { %v16623_v33 = vpop.f32.mrf.mxu1  ;;  %v7608_v49 = vadd.f32 %v16573_v37, %v7383_v10 }
 0x7a7   : > { %v7860_v11 = vsel %vm2877_vm1, %v7837_v39, 0  ;;  %v7836_v25 = vmax.f32 %v7743_v40, 0.0  ;;  %v7761_v26 = vadd.f32 %v16623_v33, %v7584_v45  ;;  %v7601_v54 = vpop.f32.mrf.mxu0 }
 0x7a8   : > { %v21071_v20 = vand.u32 4294901760, %v7860_v11  ;;  %v7754_v3 = vpop.f32.mrf.mxu1  ;;  %v7602_v22 = vadd.f32 %v7601_v54, %v7375_v13 }
 0x7a9   : > { %v7857_v0 = vsel %vm2877_vm1, %v7836_v25, 0  ;;  %v7839_v58 = vmax.f32 %v7761_v26, 0.0  ;;  %v7755_v57 = vadd.f32 %v7754_v3, %v7578_v24  ;;  %v16576_v16 = vpop.f32.mrf.mxu0  ;;  %v23286_v3 = vld [vmem:[#allocation82_spill] sm:$0xff] }
 0x7aa   : > { %v21075_v8 = vsub.f32 %v7860_v11, %v21071_v20  ;;  %v21077_v46 = vand.u32 4294901760, %v7857_v0  ;;  %v16626_v17 = vpop.f32.mrf.mxu1  ;;  %v7620_v23 = vadd.f32 %v16576_v16, %v7399_v51 }
 0x7ab   : > { %v7866_v53 = vsel %vm2877_vm1, %v7839_v58, 0  ;;  %v7838_v14 = vmax.f32 %v7755_v57, 0.0  ;;  %v7773_v7 = vadd.f32 %v16626_v17, %v7596_v43  ;;  %v7613_v48 = vpop.f32.mrf.mxu0 }
 0x7ac   : > { %v7985_v15 = vand.u32 4294901760, %v21075_v8  ;;  %v21082_v28 = vsub.f32 %v7857_v0, %v21077_v46  ;;  %v21084_v2 = vand.u32 4294901760, %v7866_v53  ;;  %v7766_v4 = vpop.f32.mrf.mxu1  ;;  %16682 = vmatprep.mubr.f32.mxu1 %v21077_v46  ;;  %v7614_v5 = vadd.f32 %v7613_v48, %v7391_v59 }
 0x7ad   : > { %v7863_v50 = vsel %vm2877_vm1, %v7838_v14, 0  ;;  %v7841_v47 = vmax.f32 %v7773_v7, 0.0  ;;  %v7767_v10 = vadd.f32 %v7766_v4, %v7590_v42  ;;  %16683 = vmatmul.mubr.f32.vlgmr.msra.gmra.mxu1 %v21071_v20  ;;  %v16579_v31 = vpop.f32.mrf.mxu0 }
 0x7ae   : > { %v21092_v56 = vsub.f32 %v21075_v8, %v7985_v15  ;;  %v21095_v38 = vsub.f32 %v7866_v53, %v21084_v2  ;;  %v21097_v36 = vand.u32 4294901760, %v7863_v50  ;;  %v7632_v13 = vadd.f32 %v16579_v31, %v7415_v9  ;;  %v16629_v63 = vpop.f32.mrf.mxu1  ;;  %16739 = vmatpush3.msra.mxu1 %v23283_v19 }
 0x7af   : > { %v7872_v18 = vsel %vm2877_vm1, %v7841_v47, 0  ;;  %v7840_v44 = vmax.f32 %v7767_v10, 0.0  ;;  %v7785_v34 = vadd.f32 %v16629_v63, %v7608_v49  ;;  %v7625_v60 = vpop.f32.mrf.mxu0  ;;  %v7975_v51 = vand.u32 4294901760, %v21082_v28  ;;  %16740 = vmatprep.subr.mxu1 %v23284_v1 }
 0x7b0   : > { %v7987_v29 = vand.u32 4294901760, %v21092_v56  ;;  %v8005_v52 = vand.u32 4294901760, %v21095_v38  ;;  %v21106_v59 = vsub.f32 %v7863_v50, %v21097_v36  ;;  %v21108_v32 = vand.u32 4294901760, %v7872_v18  ;;  %v7778_v35 = vpop.f32.mrf.mxu1  ;;  %16685 = vmatprep.mubr.f32.mxu1 %v21097_v36  ;;  %16741 = vmatpush3.msra.mxu1 %v23284_v1 }
 0x7b1   : > { %v7869_v30 = vsel %vm2877_vm1, %v7840_v44, 0  ;;  %v7843_v45 = vmax.f32 %v7785_v34, 0.0  ;;  %v7626_v39 = vadd.f32 %v7625_v60, %v7407_v41  ;;  %v7779_v40 = vadd.f32 %v7778_v35, %v7602_v22  ;;  %16686 = vmatmul.mubr.f32.gmra.mxu1 %v21084_v2  ;;  %v16582_v37 = vpop.f32.mrf.mxu0  ;;  %16742 = vmatprep.subr.mxu1 %v23285_v62  ;;  %v23287_v44 = vld [vmem:[#allocation28_spill] sm:$0xff] }
 0x7b2   : > { %v21116_v9 = vsub.f32 %v7872_v18, %v21108_v32  ;;  %v21118_v6 = vand.u32 4294901760, %v7869_v30  ;;  %v7644_v27 = vadd.f32 %v16582_v37, %v21062_v12  ;;  %v16632_v33 = vpop.f32.mrf.mxu1  ;;  %v7976_v24 = vsub.f32 %v21082_v28, %v7975_v51  ;;  %16743 = vmatpush3.msra.mxu1 %v23285_v62 }
 0x7b3   : > { %v7878_v41 = vsel %vm2877_vm1, %v7843_v45, 0  ;;  %v7842_v11 = vmax.f32 %v7779_v40, 0.0  ;;  %v7797_v25 = vadd.f32 %v16632_v33, %v7620_v23  ;;  %v7637_v26 = vpop.f32.mrf.mxu0  ;;  %v7995_v54 = vand.u32 4294901760, %v21106_v59  ;;  %16744 = vmatprep.subr.mxu1 %v23286_v3  ;;  %v23288_v40 = vld [vmem:[#allocation22_spill] sm:$0xff] }
 0x7b4   : > { %v8025_v43 = vand.u32 4294901760, %v21116_v9  ;;  %v21130_v12 = vsub.f32 %v7869_v30, %v21118_v6  ;;  %v21132_v0 = vand.u32 4294901760, %v7878_v41  ;;  %v7638_v58 = vadd.f32 %v7637_v26, %v21065_v61  ;;  %v7790_v57 = vpop.f32.mrf.mxu1  ;;  %16688 = vmatprep.mubr.f32.mxu1 %v21118_v6  ;;  %16745 = vmatpush3.msra.mxu1 %v23286_v3 }
 0x7b5   : > { %v7875_v16 = vsel %vm2877_vm1, %v7842_v11, 0  ;;  %v7845_v42 = vmax.f32 %v7797_v25, 0.0  ;;  %v7791_v49 = vadd.f32 %v7790_v57, %v7614_v5  ;;  %v7977_v17 = vand.u32 4294901760, %v7976_v24  ;;  %16689 = vmatmul.mubr.f32.gmra.mxu1 %v21108_v32  ;;  %v16585_v53 = vpop.f32.mrf.mxu0  ;;  %16802 = vmatprep.subr.mxu1 %v23283_v19 }
 0x7b6   : > { %v21141_v22 = vsub.f32 %v7878_v41, %v21132_v0  ;;  %v21143_v14 = vand.u32 4294901760, %v7875_v16  ;;  %v7656_v61 = vadd.f32 %v16585_v53, %v21067_v55  ;;  %v16635_v7 = vpop.f32.mrf.mxu1  ;;  %v7996_v48 = vsub.f32 %v21106_v59, %v7995_v54 }
 0x7b7   : > { %v7884_v23 = vsel %vm2877_vm1, %v7845_v42, 0  ;;  %v7844_v4 = vmax.f32 %v7791_v49, 0.0  ;;  %16650 = vmatprep.mubr.f32.mxu0 %v7977_v17  ;;  %v7809_v50 = vadd.f32 %v16635_v7, %v7632_v13  ;;  %v7649_v47 = vpop.f32.mrf.mxu0  ;;  %v8006_v5 = vsub.f32 %v21095_v38, %v8005_v52  ;;  %v23289_v17 = vld [vmem:[#allocation38_spill] sm:$0xff] }
 0x7b8   : > { %v8045_v10 = vand.u32 4294901760, %v21141_v22  ;;  %v21155_v31 = vsub.f32 %v7875_v16, %v21143_v14  ;;  %v21157_v55 = vand.u32 4294901760, %v7884_v23  ;;  %16651 = vmatmul.mubr.f32.vlgmr.msra.gmra.mxu0 %v7987_v29  ;;  %v7650_v56 = vadd.f32 %v7649_v47, %v21069_v21  ;;  %v7802_v63 = vpop.f32.mrf.mxu1  ;;  %16691 = vmatprep.mubr.f32.mxu1 %v21143_v14 }
 0x7b9   : > { %v7881_v13 = vsel %vm2877_vm1, %v7844_v4, 0  ;;  %v7847_v18 = vmax.f32 %v7809_v50, 0.0  ;;  %16707 = vmatpush3.msra.mxu0 %v23287_v44  ;;  %v7803_v34 = vadd.f32 %v7802_v63, %v7626_v39  ;;  %v7997_v60 = vand.u32 4294901760, %v7996_v48  ;;  %16692 = vmatmul.mubr.f32.gmra.mxu1 %v21132_v0  ;;  %v23290_v63 = vld [vmem:[#allocation19_spill] sm:$0xff] }
 0x7ba   : > { %v21165_v35 = vsub.f32 %v7884_v23, %v21157_v55  ;;  %v21167_v30 = vand.u32 4294901760, %v7881_v13  ;;  %v8007_v29 = vand.u32 4294901760, %v8006_v5  ;;  %v16638_v45 = vpop.f32.mrf.mxu1  ;;  %v8015_v21 = vand.u32 4294901760, %v21130_v12  ;;  %16708 = vmatprep.subr.mxu0 %v23288_v40 }
 0x7bb   : > { %v7890_v37 = vsel %vm2877_vm1, %v7847_v18, 0  ;;  %v7846_v33 = vmax.f32 %v7803_v34, 0.0  ;;  %16653 = vmatprep.mubr.f32.mxu0 %v7997_v60  ;;  %v7821_v24 = vadd.f32 %v16638_v45, %v7644_v27  ;;  %v8026_v39 = vsub.f32 %v21116_v9, %v8025_v43  ;;  %16709 = vmatpush3.msra.mxu0 %v23288_v40 }
 0x7bc   : > { %v8065_v41 = vand.u32 4294901760, %v21165_v35  ;;  %v21178_v11 = vsub.f32 %v7881_v13, %v21167_v30  ;;  %v21180_v25 = vand.u32 4294901760, %v7890_v37  ;;  %16654 = vmatmul.mubr.f32.gmra.mxu0 %v8007_v29  ;;  %v7814_v26 = vpop.f32.mrf.mxu1  ;;  %v8016_v57 = vsub.f32 %v21130_v12, %v8015_v21  ;;  %16694 = vmatprep.mubr.f32.mxu1 %v21167_v30 }
 0x7bd   : > { %v7887_v27 = vsel %vm2877_vm1, %v7846_v33, 0  ;;  %v7849_v16 = vmax.f32 %v7821_v24, 0.0  ;;  %v7815_v42 = vadd.f32 %v7814_v26, %v7638_v58  ;;  %v8027_v49 = vand.u32 4294901760, %v8026_v39  ;;  %16695 = vmatmul.mubr.f32.gmra.mxu1 %v21157_v55  ;;  %16710 = vmatprep.subr.mxu0 %v23289_v17 }
 0x7be   : > { %v21190_v53 = vsub.f32 %v7890_v37, %v21180_v25  ;;  %v21192_v7 = vand.u32 4294901760, %v7887_v27  ;;  %v8017_v48 = vand.u32 4294901760, %v8016_v57  ;;  %v16641_v23 = vpop.f32.mrf.mxu1  ;;  %v8035_v4 = vand.u32 4294901760, %v21155_v31  ;;  %16711 = vmatpush3.msra.mxu0 %v23289_v17 }
 0x7bf   : > { %v7896_v50 = vsel %vm2877_vm1, %v7849_v16, 0  ;;  %v7848_v47 = vmax.f32 %v7815_v42, 0.0  ;;  %v7833_v58 = vadd.f32 %v16641_v23, %v7656_v61  ;;  %v8046_v5 = vsub.f32 %v21141_v22, %v8045_v10  ;;  %16712 = vmatprep.subr.mxu0 %v23290_v63  ;;  %v23291_v16 = vld [vmem:[#allocation6_spill] sm:$0xff] }
 0x7c0   : > { %v8085_v13 = vand.u32 4294901760, %v21190_v53  ;;  %v21203_v18 = vsub.f32 %v7887_v27, %v21192_v7  ;;  %v21205_v44 = vand.u32 4294901760, %v7896_v50  ;;  %16656 = vmatprep.mubr.f32.mxu0 %v8017_v48  ;;  %v7826_v34 = vpop.f32.mrf.mxu1  ;;  %v8036_v60 = vsub.f32 %v21155_v31, %v8035_v4  ;;  %16697 = vmatprep.mubr.f32.mxu1 %v21192_v7 }
 0x7c1   : > { %v7893_v61 = vsel %vm2877_vm1, %v7848_v47, 0  ;;  %16657 = vmatmul.mubr.f32.gmra.mxu0 %v8027_v49  ;;  %v7851_v29 = vmax.f32 %v7833_v58, 0.0  ;;  %v7827_v45 = vadd.f32 %v7826_v34, %v7650_v56  ;;  %v8047_v40 = vand.u32 4294901760, %v8046_v5  ;;  %16698 = vmatmul.mubr.f32.gmra.mxu1 %v21180_v25 }
 0x7c2   : > { %v21214_v37 = vsub.f32 %v7896_v50, %v21205_v44  ;;  %v21216_v33 = vand.u32 4294901760, %v7893_v61  ;;  %v8037_v24 = vand.u32 4294901760, %v8036_v60  ;;  %v8055_v39 = vand.u32 4294901760, %v21178_v11  ;;  %16713 = vmatpush3.msra.mxu0 %v23290_v63 }
 0x7c3   : > { %v7902_v26 = vsel %vm2877_vm1, %v7851_v29, 0  ;;  %v7850_v57 = vmax.f32 %v7827_v45, 0.0  ;;  %v8066_v56 = vsub.f32 %v21165_v35, %v8065_v41  ;;  %v8075_v27 = vand.u32 4294901760, %v21203_v18  ;;  %16770 = vmatprep.subr.mxu0 %v23291_v16 }
 0x7c4   : > { %v21227_v42 = vsub.f32 %v7893_v61, %v21216_v33  ;;  %v21229_v49 = vand.u32 4294901760, %v7902_v26  ;;  %16659 = vmatprep.mubr.f32.mxu0 %v8037_v24  ;;  %v8056_v17 = vsub.f32 %v21178_v11, %v8055_v39  ;;  %16700 = vmatprep.mubr.f32.mxu1 %v21216_v33  ;;  %v8105_v50 = vand.u32 4294901760, %v21214_v37 }
 0x7c5   : > { %v7899_v48 = vsel %vm2877_vm1, %v7850_v57, 0  ;;  %16660 = vmatmul.mubr.f32.gmra.mxu0 %v8047_v40  ;;  %16701 = vmatmul.mubr.f32.gmra.mxu1 %v21205_v44  ;;  %v8076_v23 = vsub.f32 %v21203_v18, %v8075_v27  ;;  %v8067_v34 = vand.u32 4294901760, %v8066_v56  ;;  %v8086_v61 = vsub.f32 %v21190_v53, %v8085_v13 }
 0x7c6   : > { %v21241_v47 = vand.u32 4294901760, %v7899_v48  ;;  %v8057_v58 = vand.u32 4294901760, %v8056_v17  ;;  %v8095_v5 = vand.u32 4294901760, %v21227_v42  ;;  %v21245_v63 = vsub.f32 %v7902_v26, %v21229_v49 }
 0x7c7   : > { %v8077_v60 = vand.u32 4294901760, %v8076_v23  ;;  %v8087_v57 = vand.u32 4294901760, %v8086_v61  ;;  %v8106_v56 = vsub.f32 %v21214_v37, %v8105_v50 }
 0x7c8   : > { %v21251_v29 = vsub.f32 %v7899_v48, %v21241_v47  ;;  %16662 = vmatprep.mubr.f32.mxu0 %v8057_v58  ;;  %16703 = vmatprep.mubr.f32.mxu1 %v21241_v47  ;;  %v8096_v45 = vsub.f32 %v21227_v42, %v8095_v5  ;;  %v8125_v26 = vand.u32 4294901760, %v21245_v63 }
 0x7c9   : > { %16663 = vmatmul.mubr.f32.gmra.mxu0 %v8067_v34  ;;  %16704 = vmatmul.mubr.f32.gmra.mxu1 %v21229_v49  ;;  %v8107_v48 = vand.u32 4294901760, %v8106_v56 }
 0x7ca   : > { %16665 = vmatprep.mubr.f32.mxu0 %v8077_v60  ;;  %16746 = vmatprep.mubr.f32.mxu1 %v7975_v51  ;;  %v8097_v40 = vand.u32 4294901760, %v8096_v45  ;;  %v8115_v24 = vand.u32 4294901760, %v21251_v29  ;;  %v8126_v23 = vsub.f32 %v21245_v63, %v8125_v26 }
 0x7cc   : > { %v8116_v17 = vsub.f32 %v21251_v29, %v8115_v24 }
 0x7cd   : > { %16666 = vmatmul.mubr.f32.gmra.mxu0 %v8087_v57  ;;  %16747 = vmatmul.mubr.f32.vlgmr.msra.gmra.mxu1 %v7985_v15  ;;  %v8127_v15 = vand.u32 4294901760, %v8126_v23 }
 0x7ce   : > { %16668 = vmatprep.mubr.f32.mxu0 %v8097_v40  ;;  %16749 = vmatprep.mubr.f32.mxu1 %v7995_v54  ;;  %v8117_v51 = vand.u32 4294901760, %v8116_v17 }
 0x7cf   : > { %16803 = vmatpush3.msra.mxu1 %v23283_v19  ;;  %v9034_v19 = vld [vmem:[%s21359_s15] sm:$0xff] }
 0x7d0   : > { %16804 = vmatprep.subr.mxu1 %v23284_v1 }
 0x7d1   : > { %16669 = vmatmul.mubr.f32.gmra.mxu0 %v8107_v48  ;;  %16750 = vmatmul.mubr.f32.gmra.mxu1 %v8005_v52 }
 0x7d2   : > { %16671 = vmatprep.mubr.f32.mxu0 %v8117_v51  ;;  %16752 = vmatprep.mubr.f32.mxu1 %v8015_v21 }
 0x7d3   : > { %16805 = vmatpush3.msra.mxu1 %v23284_v1  ;;  %v21362_v1 = vand.u32 4294901760, %v9034_v19 }
 0x7d4   : > { %16806 = vmatprep.subr.mxu1 %v23285_v62 }
 0x7d5   : > { %16672 = vmatmul.mubr.f32.gmra.mxu0 %v8127_v15  ;;  %16753 = vmatmul.mubr.f32.gmra.mxu1 %v8025_v43  ;;  %23295 = vst [vmem:[#allocation89_spill] sm:$0xff] %v21362_v1 }
 0x7d6   : > { %16714 = vmatprep.mubr.f32.mxu0 %v21082_v28  ;;  %16755 = vmatprep.mubr.f32.mxu1 %v8035_v4  ;;  %v23292_v28 = vld [vmem:[#allocation26_spill] sm:$0xff] }
 0x7d7   : > { %16807 = vmatpush3.msra.mxu1 %v23285_v62 }
 0x7d8   : > { %16808 = vmatprep.subr.mxu1 %v23286_v3 }
 0x7d9   : > { %16715 = vmatmul.mubr.f32.vlgmr.msra.gmra.mxu0 %v21075_v8  ;;  %16756 = vmatmul.mubr.f32.gmra.mxu1 %v8045_v10  ;;  %v23293_v8 = vld [vmem:[#allocation20_spill] sm:$0xff] }
 0x7da   : > { %16717 = vmatprep.mubr.f32.mxu0 %v21106_v59  ;;  %16771 = vmatpush3.msra.mxu0 %v23291_v16  ;;  %v21365_v59 = vsub.f32 %v9034_v19, %v21362_v1 }
 0x7db   : > { %16758 = vmatprep.mubr.f32.mxu1 %v8055_v39  ;;  %16772 = vmatprep.subr.mxu0 %v23292_v28 }
 0x7dc   : > { %16773 = vmatpush3.msra.mxu0 %v23292_v28  ;;  %16809 = vmatpush3.msra.mxu1 %v23286_v3  ;;  %23296 = vst [vmem:[#allocation34_spill] sm:$0xff] %v21365_v59 }
 0x7dd   : > { %16718 = vmatmul.mubr.f32.gmra.mxu0 %v21095_v38  ;;  %16759 = vmatmul.mubr.f32.gmra.mxu1 %v8065_v41  ;;  %v23294_v38 = vld [vmem:[#allocation83_spill] sm:$0xff] }
 0x7de   : > { %16720 = vmatprep.mubr.f32.mxu0 %v21130_v12  ;;  %16761 = vmatprep.mubr.f32.mxu1 %v8075_v27 }
 0x7df   : > { %16774 = vmatprep.subr.mxu0 %v23293_v8 }
 0x7e0   : > { %16775 = vmatpush3.msra.mxu0 %v23293_v8 }
 0x7e1   : > { %16721 = vmatmul.mubr.f32.gmra.mxu0 %v21116_v9  ;;  %16762 = vmatmul.mubr.f32.gmra.mxu1 %v8085_v13  ;;  %v22777_v9 = vand.u32 4294901760, %v21365_v59 }
 0x7e2   : > { %16723 = vmatprep.mubr.f32.mxu0 %v21155_v31  ;;  %16764 = vmatprep.mubr.f32.mxu1 %v8095_v5 }
 0x7e3   : > { %16776 = vmatprep.subr.mxu0 %v23294_v38  ;;  %v9125_v43 = vsub.f32 %v21365_v59, %v22777_v9 }
 0x7e4   : > { %16777 = vmatpush3.msra.mxu0 %v23294_v38 }
 0x7e5   : > { %16724 = vmatmul.mubr.f32.gmra.mxu0 %v21141_v22  ;;  %16765 = vmatmul.mubr.f32.gmra.mxu1 %v8105_v50 }
 0x7e6   : > { %16726 = vmatprep.mubr.f32.mxu0 %v21178_v11  ;;  %16767 = vmatprep.mubr.f32.mxu1 %v8115_v24 }
 0x7e9   : > { %16727 = vmatmul.mubr.f32.gmra.mxu0 %v21165_v35  ;;  %16768 = vmatmul.mubr.f32.gmra.mxu1 %v8125_v26 }
 0x7ea   : > { %16729 = vmatprep.mubr.f32.mxu0 %v21203_v18  ;;  %16810 = vmatprep.mubr.f32.mxu1 %v21077_v46 }
 0x7ed   : > { %16730 = vmatmul.mubr.f32.gmra.mxu0 %v21190_v53  ;;  %16811 = vmatmul.mubr.f32.vlgmr.msra.gmra.mxu1 %v21071_v20 }
 0x7ee   : > { %16732 = vmatprep.mubr.f32.mxu0 %v21227_v42  ;;  %16813 = vmatprep.mubr.f32.mxu1 %v21097_v36 }
 0x7f1   : > { %16733 = vmatmul.mubr.f32.gmra.mxu0 %v21214_v37  ;;  %16814 = vmatmul.mubr.f32.gmra.mxu1 %v21084_v2 }
 0x7f2   : > { %16735 = vmatprep.mubr.f32.mxu0 %v21251_v29  ;;  %16816 = vmatprep.mubr.f32.mxu1 %v21118_v6 }
 0x7f5   : > { %16736 = vmatmul.mubr.f32.gmra.mxu0 %v21245_v63  ;;  %16817 = vmatmul.mubr.f32.gmra.mxu1 %v21108_v32 }
 0x7f6   : > { %16778 = vmatprep.mubr.f32.mxu0 %v21077_v46  ;;  %16819 = vmatprep.mubr.f32.mxu1 %v21143_v14 }
 0x7f9   : > { %16779 = vmatmul.mubr.f32.vlgmr.msra.gmra.mxu0 %v21071_v20  ;;  %16820 = vmatmul.mubr.f32.gmra.mxu1 %v21132_v0 }
 0x7fa   : > { %16781 = vmatprep.mubr.f32.mxu0 %v21097_v36  ;;  %16822 = vmatprep.mubr.f32.mxu1 %v21167_v30 }
 0x7fd   : > { %16782 = vmatmul.mubr.f32.gmra.mxu0 %v21084_v2  ;;  %16823 = vmatmul.mubr.f32.gmra.mxu1 %v21157_v55 }
 0x7fe   : > { %16784 = vmatprep.mubr.f32.mxu0 %v21118_v6  ;;  %16825 = vmatprep.mubr.f32.mxu1 %v21192_v7 }
 0x801   : > { %16785 = vmatmul.mubr.f32.gmra.mxu0 %v21108_v32  ;;  %16826 = vmatmul.mubr.f32.gmra.mxu1 %v21180_v25 }
 0x802   : > { %16787 = vmatprep.mubr.f32.mxu0 %v21143_v14  ;;  %16828 = vmatprep.mubr.f32.mxu1 %v21216_v33  ;;  %v9126_v14 = vand.u32 4294901760, %v9125_v43 }
 0x805   : > { %16788 = vmatmul.mubr.f32.gmra.mxu0 %v21132_v0  ;;  %16829 = vmatmul.mubr.f32.gmra.mxu1 %v21205_v44 }
 0x806   : > { %16790 = vmatprep.mubr.f32.mxu0 %v21167_v30  ;;  %16831 = vmatprep.mubr.f32.mxu1 %v21241_v47 }
 0x809   : > { %16791 = vmatmul.mubr.f32.gmra.mxu0 %v21157_v55  ;;  %16832 = vmatmul.mubr.f32.gmra.mxu1 %v21229_v49 }
 0x80a   : > { %16793 = vmatprep.mubr.f32.mxu0 %v21192_v7  ;;  %16901 = vmatprep.mubr.f32.mxu1 %v21362_v1 }
 0x80d   : > { %16794 = vmatmul.mubr.f32.gmra.mxu0 %v21180_v25 }
 0x80e   : > { %16796 = vmatprep.mubr.f32.mxu0 %v21216_v33 }
 0x811   : > { %16797 = vmatmul.mubr.f32.gmra.mxu0 %v21205_v44 }
 0x812   : > { %16799 = vmatprep.mubr.f32.mxu0 %v21241_v47 }
 0x815   : > { %16800 = vmatmul.mubr.f32.gmra.mxu0 %v21229_v49 }
 0x816   : > { %16866 = vmatprep.mubr.f32.mxu0 %v9126_v14 }
 0x86d   : > { %v16684_v20 = vpop.f32.mrf.mxu1 }
 0x86f   : > { %v8220_v46 = vpop.f32.mrf.mxu1 }
 0x871   : > { %v16687_v2 = vpop.f32.mrf.mxu1 }
 0x873   : > { %v8232_v36 = vpop.f32.mrf.mxu1 }
 0x875   : > { %v16690_v52 = vpop.f32.mrf.mxu1 }
 0x877   : > { %v8244_v32 = vpop.f32.mrf.mxu1 }
 0x878   : > { %v16652_v62 = vpop.f32.mrf.mxu0 }
 0x879   : > { %v8227_v6 = vadd.f32 %v16684_v20, %v16652_v62  ;;  %v16693_v54 = vpop.f32.mrf.mxu1 }
 0x87a   : > { %v7979_v3 = vpop.f32.mrf.mxu0 }
 0x87b   : > { %v8221_v12 = vadd.f32 %v8220_v46, %v7979_v3  ;;  %v8256_v0 = vpop.f32.mrf.mxu1 }
 0x87c   : > { %v16655_v22 = vpop.f32.mrf.mxu0 }
 0x87d   : > { %v8239_v10 = vadd.f32 %v16687_v2, %v16655_v22  ;;  %v16696_v31 = vpop.f32.mrf.mxu1 }
 0x87e   : > { %v7999_v55 = vpop.f32.mrf.mxu0 }
 0x87f   : > { %v8233_v35 = vadd.f32 %v8232_v36, %v7999_v55  ;;  %v8268_v30 = vpop.f32.mrf.mxu1 }
 0x881   : > { %v16658_v21 = vpop.f32.mrf.mxu0  ;;  %v16699_v41 = vpop.f32.mrf.mxu1 }
 0x882   : > { %v8251_v11 = vadd.f32 %v16690_v52, %v16658_v21 }
 0x883   : > { %v8019_v25 = vpop.f32.mrf.mxu0  ;;  %v8280_v53 = vpop.f32.mrf.mxu1 }
 0x884   : > { %v8245_v7 = vadd.f32 %v8244_v32, %v8019_v25 }
 0x885   : > { %v16661_v4 = vpop.f32.mrf.mxu0  ;;  %v16702_v13 = vpop.f32.mrf.mxu1 }
 0x886   : > { %v21372_v18 = vadd.f32 %v16693_v54, %v16661_v4 }
 0x887   : > { %v8039_v44 = vpop.f32.mrf.mxu0  ;;  %v8292_v37 = vpop.f32.mrf.mxu1 }
 0x888   : > { %v21374_v33 = vadd.f32 %v8256_v0, %v8039_v44 }
 0x889   : > { %v16664_v39 = vpop.f32.mrf.mxu0  ;;  %v21376_v27 = vpop.f32.mrf.mxu1 }
 0x88a   : > { %v21378_v16 = vadd.f32 %v16696_v31, %v16664_v39 }
 0x88b   : > { %v8059_v42 = vpop.f32.mrf.mxu0  ;;  %v21380_v49 = vpop.f32.mrf.mxu1 }
 0x88c   : > { %v21382_v50 = vadd.f32 %v8268_v30, %v8059_v42 }
 0x88d   : > { %v16667_v47 = vpop.f32.mrf.mxu0  ;;  %v16748_v58 = vpop.f32.mrf.mxu1 }
 0x88e   : > { %v21384_v5 = vadd.f32 %v16699_v41, %v16667_v47 }
 0x88f   : > { %v8079_v63 = vpop.f32.mrf.mxu0  ;;  %v8572_v34 = vpop.f32.mrf.mxu1 }
 0x890   : > { %v21386_v60 = vadd.f32 %v8280_v53, %v8079_v63 }
 0x891   : > { %v16670_v61 = vpop.f32.mrf.mxu0  ;;  %v16751_v29 = vpop.f32.mrf.mxu1 }
 0x892   : > { %v21388_v45 = vadd.f32 %v16702_v13, %v16670_v61 }
 0x893   : > { %v8099_v40 = vpop.f32.mrf.mxu0  ;;  %v8588_v24 = vpop.f32.mrf.mxu1 }
 0x894   : > { %v21390_v26 = vadd.f32 %v8292_v37, %v8099_v40 }
 0x895   : > { %v21392_v57 = vpop.f32.mrf.mxu0  ;;  %v16754_v56 = vpop.f32.mrf.mxu1 }
 0x897   : > { %v21394_v17 = vpop.f32.mrf.mxu0  ;;  %v8604_v51 = vpop.f32.mrf.mxu1 }
 0x899   : > { %v16716_v48 = vpop.f32.mrf.mxu0  ;;  %v21396_v23 = vpop.f32.mrf.mxu1 }
 0x89a   : > { %v8398_v15 = vadd.f32 %v16716_v48, %v8227_v6 }
 0x89b   : > { %v8390_v28 = vpop.f32.mrf.mxu0  ;;  %v21398_v8 = vpop.f32.mrf.mxu1 }
 0x89c   : > { %v8391_v38 = vadd.f32 %v8390_v28, %v8221_v12  ;;  %v21400_v20 = vadd.f32 %v16748_v58, %v8398_v15 }
 0x89d   : > { %v16719_v46 = vpop.f32.mrf.mxu0  ;;  %v21402_v2 = vpop.f32.mrf.mxu1 }
 0x89e   : > { %23297 = vst [vmem:[#allocation41_spill] sm:$0xff] %v21400_v20  ;;  %v8412_v36 = vadd.f32 %v16719_v46, %v8239_v10  ;;  %v21404_v19 = vadd.f32 %v8572_v34, %v8391_v38 }
 0x89f   : > { %v8404_v52 = vpop.f32.mrf.mxu0  ;;  %v21406_v32 = vpop.f32.mrf.mxu1 }
 0x8a0   : > { %23298 = vst [vmem:[#allocation44_spill] sm:$0xff] %v21404_v19  ;;  %v8405_v62 = vadd.f32 %v8404_v52, %v8233_v35  ;;  %v21408_v54 = vadd.f32 %v16751_v29, %v8412_v36 }
 0x8a1   : > { %v16722_v3 = vpop.f32.mrf.mxu0  ;;  %v16763_v6 = vpop.f32.mrf.mxu1 }
 0x8a2   : > { %v8426_v43 = vadd.f32 %v16722_v3, %v8251_v11  ;;  %v21410_v0 = vadd.f32 %v8588_v24, %v8405_v62 }
 0x8a3   : > { %v8418_v12 = vpop.f32.mrf.mxu0  ;;  %v8652_v22 = vpop.f32.mrf.mxu1 }
 0x8a4   : > { %v8419_v14 = vadd.f32 %v8418_v12, %v8245_v7  ;;  %v21412_v31 = vadd.f32 %v16754_v56, %v8426_v43 }
 0x8a5   : > { %v16725_v55 = vpop.f32.mrf.mxu0  ;;  %v16766_v10 = vpop.f32.mrf.mxu1 }
 0x8a6   : > { %v21414_v30 = vadd.f32 %v8604_v51, %v8419_v14 }
 0x8a7   : > { %v8432_v21 = vpop.f32.mrf.mxu0  ;;  %v8668_v41 = vpop.f32.mrf.mxu1 }
 0x8a9   : > { %v16728_v25 = vpop.f32.mrf.mxu0  ;;  %v16769_v35 = vpop.f32.mrf.mxu1 }
 0x8aa   : > { %v8454_v19 = vadd.f32 %v16728_v25, %v21378_v16 }
 0x8ab   : > { %v8446_v53 = vpop.f32.mrf.mxu0  ;;  %v8684_v4 = vpop.f32.mrf.mxu1 }
 0x8ad   : > { %v16731_v13 = vpop.f32.mrf.mxu0  ;;  %v21416_v44 = vpop.f32.mrf.mxu1 }
 0x8ae   : > { %23299 = vst [vmem:[#allocation47_spill] sm:$0xff] %v21416_v44  ;;  %v8468_v14 = vadd.f32 %v16731_v13, %v21384_v5 }
 0x8af   : > { %v8460_v11 = vpop.f32.mrf.mxu0  ;;  %v21418_v37 = vpop.f32.mrf.mxu1 }
 0x8b0   : > { %23300 = vst [vmem:[#allocation50_spill] sm:$0xff] %v21418_v37  ;;  %v8311_v37 = vadd.f32 %v21376_v27, %v21392_v57  ;;  %v8461_v44 = vadd.f32 %v8460_v11, %v21386_v60  ;;  %v8661_v20 = vadd.f32 %v16763_v6, %v8468_v14  ;;  %v8645_v11 = vadd.f32 %v21402_v2, %v8454_v19 }
 0x8b1   : > { %v16734_v39 = vpop.f32.mrf.mxu0  ;;  %v21420_v7 = vpop.f32.mrf.mxu1 }
 0x8b2   : > { %23301 = vst [vmem:[#allocation24_spill] sm:$0xff] %v21420_v7  ;;  %v8482_v9 = vadd.f32 %v16734_v39, %v21388_v45  ;;  %v8447_v45 = vadd.f32 %v8446_v53, %v21382_v50  ;;  %v8653_v27 = vadd.f32 %v8652_v22, %v8461_v44 }
 0x8b3   : > { %v8474_v42 = vpop.f32.mrf.mxu0  ;;  %v21422_v47 = vpop.f32.mrf.mxu1 }
 0x8b4   : > { %23302 = vst [vmem:[#allocation55_spill] sm:$0xff] %v21422_v47  ;;  %v8475_v47 = vadd.f32 %v8474_v42, %v21390_v26  ;;  %v8677_v5 = vadd.f32 %v16766_v10, %v8482_v9  ;;  %v8440_v26 = vadd.f32 %v16725_v55, %v21372_v18  ;;  %v8433_v9 = vadd.f32 %v8432_v21, %v21374_v33 }
 0x8b5   : > { %v16737_v58 = vpop.f32.mrf.mxu0  ;;  %v21424_v63 = vpop.f32.mrf.mxu1  ;;  %v8637_v50 = vadd.f32 %v21406_v32, %v8447_v45 }
 0x8b6   : > { %v8669_v60 = vadd.f32 %v8668_v41, %v8475_v47  ;;  %v8629_v2 = vadd.f32 %v21396_v23, %v8440_v26  ;;  %v8621_v32 = vadd.f32 %v21398_v8, %v8433_v9 }
 0x8b7   : > { %v8488_v34 = vpop.f32.mrf.mxu0  ;;  %v21426_v61 = vpop.f32.mrf.mxu1 }
 0x8b8   : > { %23303 = vst [vmem:[#allocation21_spill] sm:$0xff] %v21426_v61 }
 0x8b9   : > { %v21428_v29 = vpop.f32.mrf.mxu0  ;;  %v21430_v40 = vpop.f32.mrf.mxu1 }
 0x8ba   : > { %23304 = vst [vmem:[#allocation58_spill] sm:$0xff] %v21428_v29  ;;  %v8496_v29 = vadd.f32 %v16737_v58, %v8311_v37 }
 0x8bb   : > { %v21432_v24 = vpop.f32.mrf.mxu0  ;;  %v21434_v56 = vpop.f32.mrf.mxu1 }
 0x8bc   : > { %23305 = vst [vmem:[#allocation9_spill] sm:$0xff] %v21432_v24  ;;  %v8305_v24 = vadd.f32 %v21380_v49, %v21394_v17  ;;  %v8693_v37 = vadd.f32 %v16769_v35, %v8496_v29 }
 0x8bd   : > { %v21436_v51 = vpop.f32.mrf.mxu0  ;;  %v16824_v48 = vpop.f32.mrf.mxu1 }
 0x8be   : > { %v8489_v13 = vadd.f32 %v8488_v34, %v8305_v24 }
 0x8bf   : > { %v21438_v15 = vpop.f32.mrf.mxu0  ;;  %v8988_v38 = vpop.f32.mrf.mxu1 }
 0x8c0   : > { %23306 = vst [vmem:[#allocation63_spill] sm:$0xff] %v21438_v15 }
 0x8c1   : > { %v21440_v28 = vpop.f32.mrf.mxu0  ;;  %v16827_v52 = vpop.f32.mrf.mxu1 }
 0x8c3   : > { %v21442_v46 = vpop.f32.mrf.mxu0  ;;  %v9000_v3 = vpop.f32.mrf.mxu1 }
 0x8c5   : > { %v16789_v36 = vpop.f32.mrf.mxu0  ;;  %v16830_v1 = vpop.f32.mrf.mxu1 }
 0x8c6   : > { %v8818_v21 = vadd.f32 %v16789_v36, %v8629_v2  ;;  %v23312_v2 = vld [vmem:[#allocation44_spill] sm:$0xff] }
 0x8c7   : > { %v8811_v62 = vpop.f32.mrf.mxu0  ;;  %v9012_v39 = vpop.f32.mrf.mxu1 }
 0x8c8   : > { %v8812_v34 = vadd.f32 %v8811_v62, %v8621_v32  ;;  %v8983_v36 = vadd.f32 %v21430_v40, %v8818_v21 }
 0x8c9   : > { %v16792_v43 = vpop.f32.mrf.mxu0  ;;  %v16833_v10 = vpop.f32.mrf.mxu1 }
 0x8ca   : > { %v8830_v6 = vadd.f32 %v16792_v43, %v8645_v11  ;;  %v8977_v40 = vadd.f32 %v21434_v56, %v8812_v34 }
 0x8cb   : > { %v8823_v12 = vpop.f32.mrf.mxu0  ;;  %v9024_v42 = vpop.f32.mrf.mxu1 }
 0x8cc   : > { %v8824_v19 = vadd.f32 %v8823_v12, %v8637_v50  ;;  %v21539_v11 = vand.u32 4294901760, %v8977_v40 }
 0x8cd   : > { %v16795_v59 = vpop.f32.mrf.mxu0 }
 0x8ce   : > { %v8842_v15 = vadd.f32 %v16795_v59, %v8661_v20  ;;  %v8685_v59 = vadd.f32 %v8684_v4, %v8489_v13  ;;  %v21574_v21 = vsub.f32 %v8977_v40, %v21539_v11 }
 0x8cf   : > { %v8835_v7 = vpop.f32.mrf.mxu0 }
 0x8d0   : > { %v8836_v17 = vadd.f32 %v8835_v7, %v8653_v27  ;;  %v9007_v20 = vadd.f32 %v16827_v52, %v8842_v15  ;;  %v8995_v7 = vadd.f32 %v16824_v48, %v8830_v6  ;;  %v8806_v48 = vadd.f32 %v21440_v28, %v21412_v31  ;;  %v23311_v6 = vld [vmem:[#allocation24_spill] sm:$0xff] }
 0x8d1   : > { %v16798_v61 = vpop.f32.mrf.mxu0  ;;  %v8800_v31 = vadd.f32 %v21442_v46, %v21414_v30  ;;  %v8794_v30 = vadd.f32 %v21436_v51, %v21408_v54  ;;  %v21522_v46 = vand.u32 4294901760, %v8983_v36 }
 0x8d2   : > { %v8854_v57 = vadd.f32 %v16798_v61, %v8677_v5  ;;  %v21464_v4 = vand.u32 4294901760, %v9007_v20  ;;  %v8989_v61 = vadd.f32 %v8988_v38, %v8824_v19  ;;  %v21485_v52 = vand.u32 4294901760, %v8995_v7  ;;  %v23313_v19 = vld [vmem:[#allocation9_spill] sm:$0xff] }
 0x8d3   : > { %v8847_v49 = vpop.f32.mrf.mxu0  ;;  %v8971_v56 = vadd.f32 %v21424_v63, %v8806_v48  ;;  %v23307_v63 = vld [vmem:[#allocation63_spill] sm:$0xff]  ;;  %v8959_v50 = vadd.f32 %v23311_v6, %v8794_v30  ;;  %v23316_v30 = vld [vmem:[#allocation50_spill] sm:$0xff] }
 0x8d4   : > { %v9019_v16 = vadd.f32 %v16830_v1, %v8854_v57  ;;  %v8848_v25 = vadd.f32 %v8847_v49, %v8669_v60  ;;  %v9001_v1 = vadd.f32 %v9000_v3, %v8836_v17  ;;  %v21489_v38 = vsub.f32 %v9007_v20, %v21464_v4  ;;  %v23308_v60 = vld [vmem:[#allocation21_spill] sm:$0xff] }
 0x8d5   : > { %v16801_v53 = vpop.f32.mrf.mxu0  ;;  %v21504_v28 = vand.u32 4294901760, %v8989_v61  ;;  %v21525_v13 = vsub.f32 %v8995_v7, %v21485_v52  ;;  %v8788_v51 = vadd.f32 %v23307_v63, %v21410_v0  ;;  %v8965_v26 = vadd.f32 %v23308_v60, %v8800_v31  ;;  %v23309_v0 = vld [vmem:[#allocation41_spill] sm:$0xff] }
 0x8d6   : > { %v21458_v22 = vand.u32 4294901760, %v9019_v16  ;;  %v9013_v41 = vadd.f32 %v9012_v39, %v8848_v25  ;;  %v8866_v18 = vadd.f32 %v16801_v53, %v8693_v37  ;;  %v21471_v29 = vand.u32 4294901760, %v9001_v1  ;;  %v23310_v37 = vld [vmem:[#allocation58_spill] sm:$0xff] }
 0x8d7   : > { %v8859_v55 = vpop.f32.mrf.mxu0  ;;  %v21534_v54 = vand.u32 4294901760, %v21489_v38  ;;  %v21543_v49 = vsub.f32 %v8989_v61, %v21504_v28  ;;  %v8782_v9 = vadd.f32 %v23310_v37, %v23309_v0  ;;  %v21558_v53 = vsub.f32 %v8983_v36, %v21522_v46 }
 0x8d8   : > { %v21461_v44 = vand.u32 4294901760, %v9013_v41  ;;  %v9031_v35 = vadd.f32 %v16833_v10, %v8866_v18  ;;  %v8860_v33 = vadd.f32 %v8859_v55, %v8685_v59  ;;  %v21467_v47 = vsub.f32 %v9019_v16, %v21458_v22  ;;  %v9035_v18 = vld [vmem:[%s21359_s15 + $0x8] sm:$0xff] }
 0x8d9   : > { %v21508_v12 = vsub.f32 %v9001_v1, %v21471_v29  ;;  %v21554_v10 = vand.u32 4294901760, %v8971_v56  ;;  %v9174_v20 = vsub.f32 %v21489_v38, %v21534_v54  ;;  %v8776_v55 = vadd.f32 %v23313_v19, %v23312_v2  ;;  %v23314_v1 = vld [vmem:[#allocation55_spill] sm:$0xff] }
 0x8da   : > { %v21469_v58 = vand.u32 4294901760, %v9031_v35  ;;  %v9025_v23 = vadd.f32 %v9024_v42, %v8860_v33  ;;  %v21474_v24 = vsub.f32 %v9013_v41, %v21461_v44  ;;  %v21499_v43 = vand.u32 4294901760, %v21467_v47 }
 0x8db   : > { %v21549_v25 = vand.u32 4294901760, %v21508_v12  ;;  %v21564_v41 = vand.u32 4294901760, %v21525_v13  ;;  %v21570_v33 = vand.u32 4294901760, %v8965_v26  ;;  %v21580_v42 = vand.u32 4294901760, %v21543_v49 }
 0x8dc   : > { %v21477_v15 = vsub.f32 %v9031_v35, %v21469_v58  ;;  %v21479_v8 = vand.u32 4294901760, %v9025_v23  ;;  %16834 = vmatprep.subr.mxu0 %v21469_v58  ;;  %v21517_v45 = vand.u32 4294901760, %v21474_v24  ;;  %v9160_v57 = vsub.f32 %v21467_v47, %v21499_v43 }
 0x8dd   : > { %16835 = vmatpush3.msra.mxu0 %v21469_v58  ;;  %v8953_v35 = vadd.f32 %v23314_v1, %v8788_v51  ;;  %v9181_v7 = vsub.f32 %v21508_v12, %v21549_v25  ;;  %v21583_v61 = vand.u32 4294901760, %v8959_v50  ;;  %v21586_v48 = vand.u32 4294901760, %v9035_v18 }
 0x8de   : > { %v21492_v62 = vsub.f32 %v9025_v23, %v21479_v8  ;;  %16836 = vmatprep.subr.mxu0 %v21479_v8  ;;  %v21496_v3 = vand.u32 4294901760, %v21477_v15  ;;  %v9167_v16 = vsub.f32 %v21474_v24, %v21517_v45  ;;  %v9161_v59 = vand.u32 4294901760, %v9160_v57  ;;  %v23315_v23 = vld [vmem:[#allocation47_spill] sm:$0xff] }
 0x8df   : > { %16837 = vmatpush3.msra.mxu0 %v21479_v8  ;;  %v8947_v34 = vadd.f32 %v23315_v23, %v8782_v9  ;;  %v21589_v36 = vsub.f32 %v8971_v56, %v21554_v10  ;;  %v9175_v31 = vand.u32 4294901760, %v9174_v20  ;;  %v9188_v40 = vsub.f32 %v21525_v13, %v21564_v41 }
 0x8e0   : > { %16838 = vmatprep.subr.mxu0 %v21458_v22  ;;  %v9146_v14 = vsub.f32 %v21477_v15, %v21496_v3  ;;  %v21514_v5 = vand.u32 4294901760, %v21492_v62  ;;  %v9168_v32 = vand.u32 4294901760, %v9167_v16  ;;  %v21602_v56 = vsub.f32 %v8965_v26, %v21570_v33 }
 0x8e1   : > { %16839 = vmatpush3.msra.mxu0 %v21458_v22  ;;  %v9182_v57 = vand.u32 4294901760, %v9181_v7  ;;  %v9195_v63 = vsub.f32 %v21543_v49, %v21580_v42  ;;  %v21608_v51 = vand.u32 4294901760, %v21574_v21  ;;  %v21610_v60 = vand.u32 4294901760, %v8947_v34 }
 0x8e2   : > { %16840 = vmatprep.subr.mxu0 %v21461_v44  ;;  %v9147_v39 = vand.u32 4294901760, %v9146_v14  ;;  %v9153_v27 = vsub.f32 %v21492_v62, %v21514_v5  ;;  %v21595_v14 = vand.u32 4294901760, %v21558_v53  ;;  %v21617_v26 = vsub.f32 %v8959_v50, %v21583_v61 }
 0x8e3   : > { %16841 = vmatpush3.msra.mxu0 %v21461_v44  ;;  %v9189_v16 = vand.u32 4294901760, %v9188_v40  ;;  %v21623_v37 = vand.u32 4294901760, %v21589_v36  ;;  %v9196_v50 = vand.u32 4294901760, %v9195_v63  ;;  %v21635_v20 = vand.u32 4294901760, %v21602_v56 }
 0x8e4   : > { %16842 = vmatprep.subr.mxu0 %v21464_v4  ;;  %16869 = vmatprep.subr.mxu1 %v9147_v39  ;;  %v9154_v17 = vand.u32 4294901760, %v9153_v27  ;;  %v21598_v27 = vand.u32 4294901760, %v8953_v35  ;;  %v9202_v0 = vsub.f32 %v21558_v53, %v21595_v14  ;;  %v21640_v2 = vsub.f32 %v8947_v34, %v21610_v60 }
 0x8e5   : > { %16843 = vmatpush3.msra.mxu0 %v21464_v4  ;;  %16870 = vmatpush3.msra.mxu1 %v9147_v39  ;;  %v8941_v39 = vadd.f32 %v23316_v30, %v8776_v55  ;;  %v9216_v55 = vsub.f32 %v21589_v36, %v21623_v37  ;;  %v21646_v1 = vand.u32 4294901760, %v21617_v26  ;;  %v9223_v7 = vsub.f32 %v21602_v56, %v21635_v20 }
 0x8e6   : > { %16844 = vmatprep.subr.mxu0 %v21471_v29  ;;  %16871 = vmatprep.subr.mxu1 %v9154_v17  ;;  %v21629_v6 = vsub.f32 %v8953_v35, %v21598_v27  ;;  %v9203_v19 = vand.u32 4294901760, %v9202_v0  ;;  %v21666_v30 = vand.u32 4294901760, %v21640_v2 }
 0x8e7   : > { %16845 = vmatpush3.msra.mxu0 %v21471_v29  ;;  %16872 = vmatpush3.msra.mxu1 %v9154_v17  ;;  %v21614_v17 = vsub.f32 %v9035_v18, %v21586_v48  ;;  %v21625_v9 = vand.u32 4294901760, %v8941_v39  ;;  %v9230_v40 = vsub.f32 %v21617_v26, %v21646_v1 }
 0x8e8   : > { %16846 = vmatprep.subr.mxu0 %v21485_v52  ;;  %16873 = vmatprep.subr.mxu1 %v9161_v59  ;;  %v21656_v23 = vand.u32 4294901760, %v21629_v6 }
 0x8e9   : > { %16847 = vmatpush3.msra.mxu0 %v21485_v52  ;;  %16874 = vmatpush3.msra.mxu1 %v9161_v59  ;;  %v9209_v59 = vsub.f32 %v21574_v21, %v21608_v51  ;;  %v9134_v18 = vand.u32 4294901760, %v21614_v17  ;;  %v21650_v35 = vsub.f32 %v8941_v39, %v21625_v9  ;;  %v9224_v39 = vand.u32 4294901760, %v9223_v7 }
 0x8ea   : > { %16848 = vmatprep.subr.mxu0 %v21504_v28  ;;  %16875 = vmatprep.subr.mxu1 %v9168_v32  ;;  %v9231_v0 = vand.u32 4294901760, %v9230_v40 }
 0x8eb   : > { %16849 = vmatpush3.msra.mxu0 %v21504_v28  ;;  %16876 = vmatpush3.msra.mxu1 %v9168_v32  ;;  %v9210_v32 = vand.u32 4294901760, %v9209_v59  ;;  %v9135_v34 = vsub.f32 %v21614_v17, %v9134_v18  ;;  %v21673_v63 = vand.u32 4294901760, %v21650_v35 }
 0x8ec   : > { %16850 = vmatprep.subr.mxu0 %v21522_v46  ;;  %16877 = vmatprep.subr.mxu1 %v9175_v31 }
 0x8ed   : > { %16851 = vmatpush3.msra.mxu0 %v21522_v46  ;;  %16878 = vmatpush3.msra.mxu1 %v9175_v31  ;;  %v9217_v31 = vand.u32 4294901760, %v9216_v55 }
 0x8ee   : > { %16852 = vmatprep.subr.mxu0 %v21539_v11  ;;  %16879 = vmatprep.subr.mxu1 %v9182_v57 }
 0x8ef   : > { %16853 = vmatpush3.msra.mxu0 %v21539_v11  ;;  %16880 = vmatpush3.msra.mxu1 %v9182_v57  ;;  %v9237_v57 = vsub.f32 %v21629_v6, %v21656_v23 }
 0x8f0   : > { %16854 = vmatprep.subr.mxu0 %v21554_v10  ;;  %16881 = vmatprep.subr.mxu1 %v9189_v16 }
 0x8f1   : > { %16855 = vmatpush3.msra.mxu0 %v21554_v10  ;;  %16882 = vmatpush3.msra.mxu1 %v9189_v16  ;;  %v9136_v16 = vand.u32 4294901760, %v9135_v34  ;;  %v9238_v59 = vand.u32 4294901760, %v9237_v57 }
 0x8f2   : > { %16856 = vmatprep.subr.mxu0 %v21570_v33  ;;  %16883 = vmatprep.subr.mxu1 %v9196_v50 }
 0x8f3   : > { %16857 = vmatpush3.msra.mxu0 %v21570_v33  ;;  %16884 = vmatpush3.msra.mxu1 %v9196_v50  ;;  %v9244_v50 = vsub.f32 %v21640_v2, %v21666_v30 }
 0x8f4   : > { %16858 = vmatprep.subr.mxu0 %v21583_v61  ;;  %16885 = vmatprep.subr.mxu1 %v9203_v19 }
 0x8f5   : > { %16859 = vmatpush3.msra.mxu0 %v21583_v61  ;;  %16886 = vmatpush3.msra.mxu1 %v9203_v19  ;;  %v9251_v19 = vsub.f32 %v21650_v35, %v21673_v63  ;;  %v9245_v55 = vand.u32 4294901760, %v9244_v50 }
 0x8f6   : > { %16860 = vmatprep.subr.mxu0 %v21598_v27  ;;  %16887 = vmatprep.subr.mxu1 %v9210_v32 }
 0x8f7   : > { %16861 = vmatpush3.msra.mxu0 %v21598_v27  ;;  %16888 = vmatpush3.msra.mxu1 %v9210_v32  ;;  %v9252_v32 = vand.u32 4294901760, %v9251_v19 }
 0x8f8   : > { %16862 = vmatprep.subr.mxu0 %v21610_v60  ;;  %16889 = vmatprep.subr.mxu1 %v9217_v31 }
 0x8f9   : > { %16863 = vmatpush3.msra.mxu0 %v21610_v60  ;;  %16890 = vmatpush3.msra.mxu1 %v9217_v31 }
 0x8fa   : > { %16864 = vmatprep.subr.mxu0 %v21625_v9  ;;  %16891 = vmatprep.subr.mxu1 %v9224_v39 }
 0x8fb   : > { %16865 = vmatpush3.msra.mxu0 %v21625_v9  ;;  %16892 = vmatpush3.msra.mxu1 %v9224_v39 }
 0x8fc   : > { %16893 = vmatprep.subr.mxu1 %v9231_v0  ;;  %16904 = vmatprep.subr.mxu0 %v21477_v15 }
 0x8fd   : > { %16867 = vmatmul.mubr.f32.vlgmr.msra.gmra.mxu0 %v9136_v16  ;;  %16894 = vmatpush3.msra.mxu1 %v9231_v0 }
 0x8fe   : > { %16905 = vmatpush3.msra.mxu0 %v21477_v15  ;;  %16895 = vmatprep.subr.mxu1 %v9238_v59 }
 0x8ff   : > { %16906 = vmatprep.subr.mxu0 %v21492_v62  ;;  %16896 = vmatpush3.msra.mxu1 %v9238_v59 }
 0x900   : > { %16907 = vmatpush3.msra.mxu0 %v21492_v62  ;;  %16897 = vmatprep.subr.mxu1 %v9245_v55 }
 0x901   : > { %16908 = vmatprep.subr.mxu0 %v21467_v47  ;;  %16898 = vmatpush3.msra.mxu1 %v9245_v55 }
 0x902   : > { %16909 = vmatpush3.msra.mxu0 %v21467_v47  ;;  %16899 = vmatprep.subr.mxu1 %v9252_v32  ;;  %v23317_v47 = vld [vmem:[#allocation34_spill] sm:$0xff] }
 0x903   : > { %16910 = vmatprep.subr.mxu0 %v21474_v24  ;;  %16900 = vmatpush3.msra.mxu1 %v9252_v32 }
 0x904   : > { %16911 = vmatpush3.msra.mxu0 %v21474_v24  ;;  %16902 = vmatmul.mubr.f32.vlgmr.msra.gmra.mxu1 %v21586_v48  ;;  %v23318_v24 = vand.u32 4294901760, %v23317_v47 }
 0x905   : > { %16912 = vmatprep.subr.mxu0 %v21489_v38  ;;  %16939 = vmatprep.subr.mxu1 %v21469_v58 }
 0x906   : > { %16913 = vmatpush3.msra.mxu0 %v21489_v38  ;;  %16940 = vmatpush3.msra.mxu1 %v21469_v58 }
 0x907   : > { %16914 = vmatprep.subr.mxu0 %v21508_v12  ;;  %16941 = vmatprep.subr.mxu1 %v21479_v8 }
 0x908   : > { %16915 = vmatpush3.msra.mxu0 %v21508_v12  ;;  %16942 = vmatpush3.msra.mxu1 %v21479_v8 }
 0x909   : > { %16916 = vmatprep.subr.mxu0 %v21525_v13  ;;  %16943 = vmatprep.subr.mxu1 %v21458_v22 }
 0x90a   : > { %16917 = vmatpush3.msra.mxu0 %v21525_v13  ;;  %16944 = vmatpush3.msra.mxu1 %v21458_v22 }
 0x90b   : > { %16918 = vmatprep.subr.mxu0 %v21543_v49  ;;  %16945 = vmatprep.subr.mxu1 %v21461_v44 }
 0x90c   : > { %16919 = vmatpush3.msra.mxu0 %v21543_v49  ;;  %16946 = vmatpush3.msra.mxu1 %v21461_v44 }
 0x90d   : > { %16920 = vmatprep.subr.mxu0 %v21558_v53  ;;  %16947 = vmatprep.subr.mxu1 %v21464_v4 }
 0x90e   : > { %16921 = vmatpush3.msra.mxu0 %v21558_v53  ;;  %16948 = vmatpush3.msra.mxu1 %v21464_v4 }
 0x90f   : > { %16922 = vmatprep.subr.mxu0 %v21574_v21  ;;  %16949 = vmatprep.subr.mxu1 %v21471_v29 }
 0x910   : > { %16923 = vmatpush3.msra.mxu0 %v21574_v21  ;;  %16950 = vmatpush3.msra.mxu1 %v21471_v29  ;;  %v13685_v21 = vld [vmem:[%s22527_s4 + $0x160] ss:$0 sm:$0xff] }
 0x911   : > { %16924 = vmatprep.subr.mxu0 %v21589_v36  ;;  %16951 = vmatprep.subr.mxu1 %v21485_v52 }
 0x912   : > { %16925 = vmatpush3.msra.mxu0 %v21589_v36  ;;  %16952 = vmatpush3.msra.mxu1 %v21485_v52 }
 0x913   : > { %16926 = vmatprep.subr.mxu0 %v21602_v56  ;;  %16953 = vmatprep.subr.mxu1 %v21504_v28 }
 0x914   : > { %16927 = vmatpush3.msra.mxu0 %v21602_v56  ;;  %16954 = vmatpush3.msra.mxu1 %v21504_v28 }
 0x915   : > { %16928 = vmatprep.subr.mxu0 %v21617_v26  ;;  %16955 = vmatprep.subr.mxu1 %v21522_v46 }
 0x916   : > { %16929 = vmatpush3.msra.mxu0 %v21617_v26  ;;  %16956 = vmatpush3.msra.mxu1 %v21522_v46 }
 0x917   : > { %16930 = vmatprep.subr.mxu0 %v21629_v6  ;;  %16957 = vmatprep.subr.mxu1 %v21539_v11 }
 0x918   : > { %16931 = vmatpush3.msra.mxu0 %v21629_v6  ;;  %16958 = vmatpush3.msra.mxu1 %v21539_v11 }
 0x919   : > { %16932 = vmatprep.subr.mxu0 %v21640_v2  ;;  %16959 = vmatprep.subr.mxu1 %v21554_v10 }
 0x91a   : > { %16933 = vmatpush3.msra.mxu0 %v21640_v2  ;;  %16960 = vmatpush3.msra.mxu1 %v21554_v10 }
 0x91b   : > { %16934 = vmatprep.subr.mxu0 %v21650_v35  ;;  %16961 = vmatprep.subr.mxu1 %v21570_v33 }
 0x91c   : > { %16935 = vmatpush3.msra.mxu0 %v21650_v35  ;;  %16936 = vmatprep.mubr.f32.mxu0 %v23317_v47 }
 0x91d   : > { %16962 = vmatpush3.msra.mxu1 %v21570_v33  ;;  %16937 = vmatmul.mubr.f32.vlgmr.msra.gmra.mxu0 %v21614_v17 }
 0x91e   : > { %16963 = vmatprep.subr.mxu1 %v21583_v61  ;;  %16974 = vmatprep.subr.mxu0 %v21496_v3 }
 0x91f   : > { %16964 = vmatpush3.msra.mxu1 %v21583_v61  ;;  %16975 = vmatpush3.msra.mxu0 %v21496_v3  ;;  %v9727_v3 = vld [vmem:[%s22527_s4 + $0x68] sm:$0xff] }
 0x920   : > { %16965 = vmatprep.subr.mxu1 %v21598_v27  ;;  %16976 = vmatprep.subr.mxu0 %v21514_v5 }
 0x921   : > { %16966 = vmatpush3.msra.mxu1 %v21598_v27  ;;  %16977 = vmatpush3.msra.mxu0 %v21514_v5  ;;  %v21860_v5 = vand.u32 4294901760, %v9727_v3 }
 0x922   : > { %16967 = vmatprep.subr.mxu1 %v21610_v60  ;;  %16978 = vmatprep.subr.mxu0 %v21499_v43 }
 0x923   : > { %16968 = vmatpush3.msra.mxu1 %v21610_v60  ;;  %16979 = vmatpush3.msra.mxu0 %v21499_v43 }
 0x924   : > { %16969 = vmatprep.subr.mxu1 %v21625_v9  ;;  %16980 = vmatprep.subr.mxu0 %v21517_v45 }
 0x925   : > { %16970 = vmatpush3.msra.mxu1 %v21625_v9  ;;  %16971 = vmatprep.mubr.f32.mxu1 %v23318_v24 }
 0x926   : > { %16981 = vmatpush3.msra.mxu0 %v21517_v45  ;;  %16972 = vmatmul.mubr.f32.vlgmr.msra.gmra.mxu1 %v9134_v18 }
 0x927   : > { %16982 = vmatprep.subr.mxu0 %v21534_v54  ;;  %17009 = vmatprep.subr.mxu1 %v21469_v58 }
 0x928   : > { %16983 = vmatpush3.msra.mxu0 %v21534_v54  ;;  %17010 = vmatpush3.msra.mxu1 %v21469_v58  ;;  %v9729_v58 = vld [vmem:[%s22527_s4 + $0x78] sm:$0xff]  ;;  %v21870_v54 = vsub.f32 %v9727_v3, %v21860_v5 }
 0x929   : > { %16984 = vmatprep.subr.mxu0 %v21549_v25  ;;  %17011 = vmatprep.subr.mxu1 %v21479_v8  ;;  %v21832_v15 = vand.u32 4294901760, %v9729_v58 }
 0x92a   : > { %16985 = vmatpush3.msra.mxu0 %v21549_v25  ;;  %17012 = vmatpush3.msra.mxu1 %v21479_v8  ;;  %v9728_v8 = vld [vmem:[%s22527_s4 + $0x70] sm:$0xff]  ;;  %v21877_v25 = vand.u32 4294901760, %v21870_v54 }
 0x92b   : > { %16986 = vmatprep.subr.mxu0 %v21564_v41  ;;  %17013 = vmatprep.subr.mxu1 %v21458_v22  ;;  %v21843_v38 = vsub.f32 %v9729_v58, %v21832_v15  ;;  %v21845_v62 = vand.u32 4294901760, %v9728_v8 }
 0x92c   : > { %16987 = vmatpush3.msra.mxu0 %v21564_v41  ;;  %17014 = vmatpush3.msra.mxu1 %v21458_v22  ;;  %v23319_v22 = vld [vmem:[#allocation89_spill] sm:$0xff]  ;;  %v9880_v53 = vsub.f32 %v21870_v54, %v21877_v25 }
 0x92d   : > { %16988 = vmatprep.subr.mxu0 %v21580_v42  ;;  %17015 = vmatprep.subr.mxu1 %v21461_v44  ;;  %v21858_v12 = vsub.f32 %v9728_v8, %v21845_v62 }
 0x92e   : > { %16989 = vmatpush3.msra.mxu0 %v21580_v42  ;;  %17016 = vmatpush3.msra.mxu1 %v21461_v44  ;;  %v9730_v44 = vld [vmem:[%s22527_s4 + $0x80] sm:$0xff]  ;;  %v9881_v41 = vand.u32 4294901760, %v9880_v53 }
 0x92f   : > { %16990 = vmatprep.subr.mxu0 %v21595_v14  ;;  %17017 = vmatprep.subr.mxu1 %v21464_v4  ;;  %v21867_v13 = vand.u32 4294901760, %v21858_v12 }
 0x930   : > { %16991 = vmatpush3.msra.mxu0 %v21595_v14  ;;  %17018 = vmatpush3.msra.mxu1 %v21464_v4  ;;  %v21824_v4 = vand.u32 4294901760, %v9730_v44 }
 0x931   : > { %16992 = vmatprep.subr.mxu0 %v21608_v51  ;;  %17019 = vmatprep.subr.mxu1 %v21471_v29  ;;  %v9873_v49 = vsub.f32 %v21858_v12, %v21867_v13 }
 0x932   : > { %16993 = vmatpush3.msra.mxu0 %v21608_v51  ;;  %17020 = vmatpush3.msra.mxu1 %v21471_v29  ;;  %v21830_v29 = vsub.f32 %v9730_v44, %v21824_v4 }
 0x933   : > { %16994 = vmatprep.subr.mxu0 %v21623_v37  ;;  %17021 = vmatprep.subr.mxu1 %v21485_v52 }
 0x934   : > { %16995 = vmatpush3.msra.mxu0 %v21623_v37  ;;  %17022 = vmatpush3.msra.mxu1 %v21485_v52  ;;  %v21840_v52 = vand.u32 4294901760, %v21830_v29 }
 0x935   : > { %16996 = vmatprep.subr.mxu0 %v21635_v20  ;;  %17023 = vmatprep.subr.mxu1 %v21504_v28 }
 0x936   : > { %16997 = vmatpush3.msra.mxu0 %v21635_v20  ;;  %17024 = vmatpush3.msra.mxu1 %v21504_v28  ;;  %v9859_v43 = vsub.f32 %v21830_v29, %v21840_v52  ;;  %v21855_v28 = vand.u32 4294901760, %v21843_v38 }
 0x937   : > { %16998 = vmatprep.subr.mxu0 %v21646_v1  ;;  %17025 = vmatprep.subr.mxu1 %v21522_v46 }
 0x938   : > { %16999 = vmatpush3.msra.mxu0 %v21646_v1  ;;  %17026 = vmatpush3.msra.mxu1 %v21522_v46  ;;  %v9860_v45 = vand.u32 4294901760, %v9859_v43  ;;  %v9866_v46 = vsub.f32 %v21843_v38, %v21855_v28 }
 0x939   : > { %17000 = vmatprep.subr.mxu0 %v21656_v23  ;;  %17027 = vmatprep.subr.mxu1 %v21539_v11 }
 0x93a   : > { %17001 = vmatpush3.msra.mxu0 %v21656_v23  ;;  %17028 = vmatpush3.msra.mxu1 %v21539_v11  ;;  %v9867_v11 = vand.u32 4294901760, %v9866_v46 }
 0x93b   : > { %17002 = vmatprep.subr.mxu0 %v21666_v30  ;;  %17029 = vmatprep.subr.mxu1 %v21554_v10 }
 0x93c   : > { %17003 = vmatpush3.msra.mxu0 %v21666_v30  ;;  %17030 = vmatpush3.msra.mxu1 %v21554_v10  ;;  %v9874_v10 = vand.u32 4294901760, %v9873_v49 }
 0x93d   : > { %17004 = vmatprep.subr.mxu0 %v21673_v63  ;;  %17031 = vmatprep.subr.mxu1 %v21570_v33 }
 0x93e   : > { %17005 = vmatpush3.msra.mxu0 %v21673_v63  ;;  %17006 = vmatprep.mubr.f32.mxu0 %v23319_v22 }
 0x93f   : > { %17032 = vmatpush3.msra.mxu1 %v21570_v33  ;;  %17007 = vmatmul.mubr.f32.vlgmr.msra.gmra.mxu0 %v21586_v48 }
 0x940   : > { %17033 = vmatprep.subr.mxu1 %v21583_v61  ;;  %17041 = vmatprep.mubr.f32.mxu1 %v23319_v22  ;;  %v10275_v22 = vld [vmem:[%s22527_s4 + $0xa0] sm:$0xff] }
 0x941   : > { %17034 = vmatpush3.msra.mxu1 %v21583_v61  ;;  %17044 = vmatprep.subr.mxu0 %v21824_v4  ;;  %v21921_v44 = vand.u32 4294901760, %v10275_v22 }
 0x942   : > { %17035 = vmatprep.subr.mxu1 %v21598_v27  ;;  %17045 = vmatpush3.msra.mxu0 %v21824_v4 }
 0x943   : > { %17036 = vmatpush3.msra.mxu1 %v21598_v27  ;;  %17046 = vmatprep.subr.mxu0 %v21832_v15  ;;  %v21927_v58 = vsub.f32 %v10275_v22, %v21921_v44 }
 0x944   : > { %17037 = vmatprep.subr.mxu1 %v21610_v60  ;;  %17047 = vmatpush3.msra.mxu0 %v21832_v15 }
 0x945   : > { %17038 = vmatpush3.msra.mxu1 %v21610_v60  ;;  %17048 = vmatprep.subr.mxu0 %v21845_v62  ;;  %v21937_v8 = vand.u32 4294901760, %v21927_v58 }
 0x946   : > { %17039 = vmatprep.subr.mxu1 %v21625_v9  ;;  %17049 = vmatpush3.msra.mxu0 %v21845_v62 }
 0x947   : > { %17040 = vmatpush3.msra.mxu1 %v21625_v9  ;;  %17050 = vmatprep.subr.mxu0 %v21860_v5  ;;  %v10404_v3 = vsub.f32 %v21927_v58, %v21937_v8 }
 0x948   : > { %17042 = vmatmul.mubr.f32.vlgmr.msra.gmra.mxu1 %v21586_v48  ;;  %17051 = vmatpush3.msra.mxu0 %v21860_v5 }
 0x949   : > { %17055 = vmatprep.subr.mxu1 %v9860_v45  ;;  %17066 = vmatprep.subr.mxu0 %v21830_v29 }
 0x94a   : > { %17056 = vmatpush3.msra.mxu1 %v9860_v45 }
 0x94b   : > { %17057 = vmatprep.subr.mxu1 %v9867_v11 }
 0x94c   : > { %17058 = vmatpush3.msra.mxu1 %v9867_v11 }
 0x94d   : > { %17059 = vmatprep.subr.mxu1 %v9874_v10 }
 0x94e   : > { %17060 = vmatpush3.msra.mxu1 %v9874_v10 }
 0x94f   : > { %17061 = vmatprep.subr.mxu1 %v9881_v41 }
 0x950   : > { %17062 = vmatpush3.msra.mxu1 %v9881_v41 }
 0x951   : > { %17077 = vmatprep.subr.mxu1 %v21824_v4 }
 0x9bd   : > { %v16868_v33 = vpop.f32.mrf.mxu0 }
 0x9be   : > { %v9139_v36 = vadd.f32 %v16868_v33, %v13685_v21  ;;  %v13686_v33 = vld [vmem:[%s22527_s4 + $0x168] ss:$0 sm:$0xff] }
 0x9bf   : > { %v9128_v42 = vpop.f32.mrf.mxu0 }
 0x9c0   : > { %v9129_v27 = vadd.f32 %v13685_v21, %v9128_v42 }
 0x9c4   : > { %v16903_v61 = vpop.f32.mrf.mxu1 }
 0x9c5   : > { %v9296_v60 = vadd.f32 %v16903_v61, %v9139_v36 }
 0x9c6   : > { %v9289_v14 = vpop.f32.mrf.mxu1 }
 0x9c7   : > { %v9290_v26 = vadd.f32 %v9289_v14, %v9129_v27 }
 0x9dd   : > { %v16938_v48 = vpop.f32.mrf.mxu0 }
 0x9de   : > { %v9407_v37 = vadd.f32 %v16938_v48, %v9296_v60 }
 0x9df   : > { %v9399_v56 = vpop.f32.mrf.mxu0 }
 0x9e0   : > { %v9400_v6 = vadd.f32 %v9399_v56, %v9290_v26 }
 0x9e6   : > { %v16973_v51 = vpop.f32.mrf.mxu1 }
 0x9e7   : > { %v9504_v20 = vadd.f32 %v16973_v51, %v9407_v37 }
 0x9e8   : > { %v9495_v9 = vpop.f32.mrf.mxu1 }
 0x9e9   : > { %v9496_v2 = vadd.f32 %v9495_v9, %v9400_v6 }
 0x9ff   : > { %v17008_v17 = vpop.f32.mrf.mxu0 }
 0xa00   : > { %v9629_v1 = vadd.f32 %v17008_v17, %v9504_v20 }
 0xa01   : > { %v9622_v18 = vpop.f32.mrf.mxu0 }
 0xa02   : > { %v9623_v7 = vadd.f32 %v9622_v18, %v9496_v2 }
 0xa08   : > { %v17043_v35 = vpop.f32.mrf.mxu1 }
 0xa09   : > { %v9722_v23 = vadd.f32 %v17043_v35, %v9629_v1 }
 0xa0a   : > { %v9715_v34 = vpop.f32.mrf.mxu1 }
 0xa0b   : > { %v9726_v31 = vmax.f32 %v9722_v23, 0.0  ;;  %v9716_v40 = vadd.f32 %v9715_v34, %v9623_v7 }
 0xa0d   : > { %v9740_v30 = vsel %vm2877_vm1, %v9726_v31, 0  ;;  %v9725_v39 = vmax.f32 %v9716_v40, 0.0 }
 0xa0e   : > { %v9821_v57 = vand.u32 4294901760, %v9740_v30 }
 0xa0f   : > { %v9737_v63 = vsel %vm2877_vm1, %v9725_v39, 0 }
 0xa10   : > { %v9822_v16 = vsub.f32 %v9740_v30, %v9821_v57  ;;  %v9811_v0 = vand.u32 4294901760, %v9737_v63 }
 0xa12   : > { %v9823_v50 = vand.u32 4294901760, %v9822_v16  ;;  %v9812_v59 = vsub.f32 %v9737_v63, %v9811_v0  ;;  %17063 = vmatprep.mubr.f32.mxu1 %v9811_v0 }
 0xa13   : > { %17064 = vmatmul.mubr.f32.vlgmr.msra.gmra.mxu1 %v9821_v57 }
 0xa14   : > { %17078 = vmatpush3.msra.mxu1 %v21824_v4  ;;  %v9813_v19 = vand.u32 4294901760, %v9812_v59  ;;  %v9824_v55 = vsub.f32 %v9822_v16, %v9823_v50 }
 0xa15   : > { %17079 = vmatprep.subr.mxu1 %v21832_v15 }
 0xa16   : > { %17080 = vmatpush3.msra.mxu1 %v21832_v15  ;;  %17085 = vmatprep.mubr.f32.mxu1 %v9813_v19  ;;  %v9814_v32 = vsub.f32 %v9812_v59, %v9813_v19  ;;  %v9825_v24 = vand.u32 4294901760, %v9824_v55 }
 0xa17   : > { %17081 = vmatprep.subr.mxu1 %v21845_v62 }
 0xa18   : > { %17082 = vmatpush3.msra.mxu1 %v21845_v62  ;;  %v9815_v47 = vand.u32 4294901760, %v9814_v32 }
 0xa19   : > { %17083 = vmatprep.subr.mxu1 %v21860_v5 }
 0xa1a   : > { %17084 = vmatpush3.msra.mxu1 %v21860_v5  ;;  %17052 = vmatprep.mubr.f32.mxu0 %v9815_v47 }
 0xa1b   : > { %17086 = vmatmul.mubr.f32.vlgmr.msra.gmra.mxu1 %v9823_v50  ;;  %17099 = vmatprep.subr.mxu1 %v21824_v4 }
 0xa1c   : > { %17053 = vmatmul.mubr.f32.vlgmr.msra.gmra.mxu0 %v9825_v24  ;;  %17100 = vmatpush3.msra.mxu1 %v21824_v4  ;;  %v10274_v4 = vld [vmem:[%s22527_s4 + $0x98] sm:$0xff]  ;;  %v10820_v24 = vld [vmem:[%s22527_s4 + $0xc0] sm:$0xff] }
 0xa1d   : > { %17067 = vmatpush3.msra.mxu0 %v21830_v29  ;;  %17107 = vmatprep.mubr.f32.mxu1 %v9811_v0  ;;  %v21929_v29 = vand.u32 4294901760, %v10274_v4  ;;  %v22018_v22 = vand.u32 4294901760, %v10820_v24 }
 0xa1e   : > { %17068 = vmatprep.subr.mxu0 %v21843_v38  ;;  %17074 = vmatprep.mubr.f32.mxu0 %v9812_v59 }
 0xa1f   : > { %17101 = vmatprep.subr.mxu1 %v21832_v15  ;;  %17069 = vmatpush3.msra.mxu0 %v21843_v38 }
 0xa20   : > { %17102 = vmatpush3.msra.mxu1 %v21832_v15  ;;  %17070 = vmatprep.subr.mxu0 %v21858_v12  ;;  %v10273_v15 = vld [vmem:[%s22527_s4 + $0x90] sm:$0xff] }
 0xa21   : > { %17103 = vmatprep.subr.mxu1 %v21845_v62  ;;  %17071 = vmatpush3.msra.mxu0 %v21858_v12  ;;  %v21942_v38 = vand.u32 4294901760, %v10273_v15 }
 0xa22   : > { %17104 = vmatpush3.msra.mxu1 %v21845_v62  ;;  %17072 = vmatprep.subr.mxu0 %v21870_v54  ;;  %v10272_v62 = vld [vmem:[%s22527_s4 + $0x88] sm:$0xff] }
 0xa23   : > { %17105 = vmatprep.subr.mxu1 %v21860_v5  ;;  %17073 = vmatpush3.msra.mxu0 %v21870_v54  ;;  %v21957_v12 = vand.u32 4294901760, %v10272_v62 }
 0xa24   : > { %17106 = vmatpush3.msra.mxu1 %v21860_v5  ;;  %17075 = vmatmul.mubr.f32.vlgmr.msra.gmra.mxu0 %v9822_v16  ;;  %v10405_v5 = vand.u32 4294901760, %v10404_v3 }
 0xa25   : > { %17088 = vmatprep.subr.mxu0 %v21840_v52  ;;  %17108 = vmatmul.mubr.f32.vlgmr.msra.gmra.mxu1 %v9821_v57 }
 0xa26   : > { %17089 = vmatpush3.msra.mxu0 %v21840_v52  ;;  %17096 = vmatprep.mubr.f32.mxu0 %v9811_v0  ;;  %v21940_v52 = vsub.f32 %v10274_v4, %v21929_v29  ;;  %v22024_v4 = vsub.f32 %v10820_v24, %v22018_v22 }
 0xa27   : > { %17090 = vmatprep.subr.mxu0 %v21855_v28  ;;  %17121 = vmatprep.subr.mxu1 %v10405_v5 }
 0xa28   : > { %17091 = vmatpush3.msra.mxu0 %v21855_v28  ;;  %v21952_v43 = vand.u32 4294901760, %v21940_v52  ;;  %v21955_v28 = vsub.f32 %v10273_v15, %v21942_v38  ;;  %17122 = vmatpush3.msra.mxu1 %v10405_v5  ;;  %v22034_v15 = vand.u32 4294901760, %v22024_v4 }
 0xa29   : > { %17092 = vmatprep.subr.mxu0 %v21867_v13 }
 0xa2a   : > { %17093 = vmatpush3.msra.mxu0 %v21867_v13  ;;  %v10411_v45 = vsub.f32 %v21940_v52, %v21952_v43  ;;  %v21964_v46 = vand.u32 4294901760, %v21955_v28  ;;  %v21967_v13 = vsub.f32 %v10272_v62, %v21957_v12  ;;  %v10946_v62 = vsub.f32 %v22024_v4, %v22034_v15 }
 0xa2b   : > { %17094 = vmatprep.subr.mxu0 %v21877_v25 }
 0xa2c   : > { %17095 = vmatpush3.msra.mxu0 %v21877_v25  ;;  %v10412_v54 = vand.u32 4294901760, %v10411_v45  ;;  %v10418_v11 = vsub.f32 %v21955_v28, %v21964_v46  ;;  %v21974_v49 = vand.u32 4294901760, %v21967_v13 }
 0xa2d   : > { %17097 = vmatmul.mubr.f32.vlgmr.msra.gmra.mxu0 %v9821_v57  ;;  %17110 = vmatprep.subr.mxu0 %v21921_v44 }
 0xa2e   : > { %17111 = vmatpush3.msra.mxu0 %v21921_v44  ;;  %17123 = vmatprep.subr.mxu1 %v10412_v54  ;;  %v10419_v25 = vand.u32 4294901760, %v10418_v11  ;;  %v10425_v10 = vsub.f32 %v21967_v13, %v21974_v49 }
 0xa2f   : > { %17112 = vmatprep.subr.mxu0 %v21929_v29  ;;  %17124 = vmatpush3.msra.mxu1 %v10412_v54 }
 0xa30   : > { %17113 = vmatpush3.msra.mxu0 %v21929_v29  ;;  %17125 = vmatprep.subr.mxu1 %v10419_v25  ;;  %v10426_v53 = vand.u32 4294901760, %v10425_v10 }
 0xa31   : > { %17114 = vmatprep.subr.mxu0 %v21942_v38  ;;  %17126 = vmatpush3.msra.mxu1 %v10419_v25 }
 0xa32   : > { %17115 = vmatpush3.msra.mxu0 %v21942_v38  ;;  %17127 = vmatprep.subr.mxu1 %v10426_v53 }
 0xa33   : > { %17116 = vmatprep.subr.mxu0 %v21957_v12  ;;  %17128 = vmatpush3.msra.mxu1 %v10426_v53 }
 0xa34   : > { %17117 = vmatpush3.msra.mxu0 %v21957_v12  ;;  %17143 = vmatprep.subr.mxu1 %v21921_v44 }
 0xa35   : > { %17132 = vmatprep.subr.mxu0 %v21927_v58 }
 0xad3   : > { %v17065_v21 = vpop.f32.mrf.mxu1 }
 0xad5   : > { %v9918_v14 = vpop.f32.mrf.mxu1 }
 0xadb   : > { %v17087_v56 = vpop.f32.mrf.mxu1 }
 0xadc   : > { %v17054_v41 = vpop.f32.mrf.mxu0 }
 0xadd   : > { %v9828_v61 = vadd.f32 %v17054_v41, %v13686_v33  ;;  %v10088_v37 = vpop.f32.mrf.mxu1  ;;  %v13687_v41 = vld [vmem:[%s22527_s4 + $0x170] ss:$0 sm:$0xff] }
 0xade   : > { %v9817_v42 = vpop.f32.mrf.mxu0 }
 0xadf   : > { %v9818_v48 = vadd.f32 %v13686_v33, %v9817_v42  ;;  %v9925_v27 = vadd.f32 %v17065_v21, %v9828_v61 }
 0xae1   : > { %v9919_v17 = vadd.f32 %v9918_v14, %v9818_v48 }
 0xae4   : > { %v17076_v36 = vpop.f32.mrf.mxu0 }
 0xae5   : > { %v10012_v60 = vadd.f32 %v17076_v36, %v9925_v27  ;;  %v17109_v6 = vpop.f32.mrf.mxu1 }
 0xae6   : > { %v10004_v51 = vpop.f32.mrf.mxu0 }
 0xae7   : > { %v10005_v26 = vadd.f32 %v10004_v51, %v9919_v17  ;;  %v10097_v9 = vadd.f32 %v17087_v56, %v10012_v60  ;;  %v10260_v23 = vpop.f32.mrf.mxu1 }
 0xae9   : > { %v10089_v2 = vadd.f32 %v10088_v37, %v10005_v26 }
 0xaed   : > { %v17098_v20 = vpop.f32.mrf.mxu0 }
 0xaee   : > { %v10186_v18 = vadd.f32 %v17098_v20, %v10097_v9 }
 0xaef   : > { %v10179_v1 = vpop.f32.mrf.mxu0 }
 0xaf0   : > { %v10267_v35 = vadd.f32 %v17109_v6, %v10186_v18  ;;  %v10180_v7 = vadd.f32 %v10179_v1, %v10089_v2 }
 0xaf2   : > { %v10271_v34 = vmax.f32 %v10267_v35, 0.0  ;;  %v10261_v31 = vadd.f32 %v10260_v23, %v10180_v7 }
 0xaf4   : > { %v10285_v40 = vsel %vm2877_vm1, %v10271_v34, 0  ;;  %v10270_v30 = vmax.f32 %v10261_v31, 0.0 }
 0xaf5   : > { %v10366_v39 = vand.u32 4294901760, %v10285_v40 }
 0xaf6   : > { %v10282_v57 = vsel %vm2877_vm1, %v10270_v30, 0 }
 0xaf7   : > { %v10367_v63 = vsub.f32 %v10285_v40, %v10366_v39  ;;  %v10356_v16 = vand.u32 4294901760, %v10282_v57 }
 0xaf9   : > { %v10368_v0 = vand.u32 4294901760, %v10367_v63  ;;  %v10357_v50 = vsub.f32 %v10282_v57, %v10356_v16  ;;  %17129 = vmatprep.mubr.f32.mxu1 %v10356_v16 }
 0xafa   : > { %17130 = vmatmul.mubr.f32.vlgmr.msra.gmra.mxu1 %v10366_v39 }
 0xafb   : > { %17144 = vmatpush3.msra.mxu1 %v21921_v44  ;;  %v10358_v59 = vand.u32 4294901760, %v10357_v50  ;;  %v10369_v19 = vsub.f32 %v10367_v63, %v10368_v0 }
 0xafc   : > { %17145 = vmatprep.subr.mxu1 %v21929_v29 }
 0xafd   : > { %17146 = vmatpush3.msra.mxu1 %v21929_v29  ;;  %17151 = vmatprep.mubr.f32.mxu1 %v10358_v59  ;;  %v10359_v55 = vsub.f32 %v10357_v50, %v10358_v59  ;;  %v10370_v47 = vand.u32 4294901760, %v10369_v19 }
 0xafe   : > { %17147 = vmatprep.subr.mxu1 %v21942_v38 }
 0xaff   : > { %17148 = vmatpush3.msra.mxu1 %v21942_v38  ;;  %v10360_v32 = vand.u32 4294901760, %v10359_v55 }
 0xb00   : > { %17149 = vmatprep.subr.mxu1 %v21957_v12 }
 0xb01   : > { %17150 = vmatpush3.msra.mxu1 %v21957_v12  ;;  %17118 = vmatprep.mubr.f32.mxu0 %v10360_v32 }
 0xb02   : > { %17152 = vmatmul.mubr.f32.vlgmr.msra.gmra.mxu1 %v10368_v0  ;;  %17165 = vmatprep.subr.mxu1 %v21921_v44 }
 0xb03   : > { %17119 = vmatmul.mubr.f32.vlgmr.msra.gmra.mxu0 %v10370_v47  ;;  %17166 = vmatpush3.msra.mxu1 %v21921_v44  ;;  %v10819_v44 = vld [vmem:[%s22527_s4 + $0xb8] sm:$0xff]  ;;  %v11369_v47 = vld [vmem:[%s22527_s4 + $0xe0] sm:$0xff] }
 0xb04   : > { %17133 = vmatpush3.msra.mxu0 %v21927_v58  ;;  %17173 = vmatprep.mubr.f32.mxu1 %v10356_v16  ;;  %v22026_v58 = vand.u32 4294901760, %v10819_v44  ;;  %v22115_v24 = vand.u32 4294901760, %v11369_v47 }
 0xb05   : > { %17134 = vmatprep.subr.mxu0 %v21940_v52  ;;  %17140 = vmatprep.mubr.f32.mxu0 %v10357_v50 }
 0xb06   : > { %17167 = vmatprep.subr.mxu1 %v21929_v29  ;;  %17135 = vmatpush3.msra.mxu0 %v21940_v52 }
 0xb07   : > { %17168 = vmatpush3.msra.mxu1 %v21929_v29  ;;  %17136 = vmatprep.subr.mxu0 %v21955_v28  ;;  %v10818_v29 = vld [vmem:[%s22527_s4 + $0xb0] sm:$0xff] }
 0xb08   : > { %17169 = vmatprep.subr.mxu1 %v21942_v38  ;;  %17137 = vmatpush3.msra.mxu0 %v21955_v28  ;;  %v22039_v52 = vand.u32 4294901760, %v10818_v29 }
 0xb09   : > { %17170 = vmatpush3.msra.mxu1 %v21942_v38  ;;  %17138 = vmatprep.subr.mxu0 %v21967_v13  ;;  %v10817_v38 = vld [vmem:[%s22527_s4 + $0xa8] sm:$0xff] }
 0xb0a   : > { %17171 = vmatprep.subr.mxu1 %v21957_v12  ;;  %17139 = vmatpush3.msra.mxu0 %v21967_v13  ;;  %v22054_v28 = vand.u32 4294901760, %v10817_v38 }
 0xb0b   : > { %17172 = vmatpush3.msra.mxu1 %v21957_v12  ;;  %17141 = vmatmul.mubr.f32.vlgmr.msra.gmra.mxu0 %v10367_v63  ;;  %v10947_v12 = vand.u32 4294901760, %v10946_v62 }
 0xb0c   : > { %17154 = vmatprep.subr.mxu0 %v21937_v8  ;;  %17174 = vmatmul.mubr.f32.vlgmr.msra.gmra.mxu1 %v10366_v39 }
 0xb0d   : > { %17155 = vmatpush3.msra.mxu0 %v21937_v8  ;;  %17162 = vmatprep.mubr.f32.mxu0 %v10356_v16  ;;  %v22037_v8 = vsub.f32 %v10819_v44, %v22026_v58  ;;  %v22121_v44 = vsub.f32 %v11369_v47, %v22115_v24 }
 0xb0e   : > { %17156 = vmatprep.subr.mxu0 %v21952_v43  ;;  %17187 = vmatprep.subr.mxu1 %v10947_v12 }
 0xb0f   : > { %17157 = vmatpush3.msra.mxu0 %v21952_v43  ;;  %v22049_v3 = vand.u32 4294901760, %v22037_v8  ;;  %v22052_v43 = vsub.f32 %v10818_v29, %v22039_v52  ;;  %17188 = vmatpush3.msra.mxu1 %v10947_v12  ;;  %v22131_v29 = vand.u32 4294901760, %v22121_v44 }
 0xb10   : > { %17158 = vmatprep.subr.mxu0 %v21964_v46 }
 0xb11   : > { %17159 = vmatpush3.msra.mxu0 %v21964_v46  ;;  %v10953_v5 = vsub.f32 %v22037_v8, %v22049_v3  ;;  %v22061_v45 = vand.u32 4294901760, %v22052_v43  ;;  %v22064_v46 = vsub.f32 %v10817_v38, %v22054_v28  ;;  %v11498_v38 = vsub.f32 %v22121_v44, %v22131_v29 }
 0xb12   : > { %17160 = vmatprep.subr.mxu0 %v21974_v49 }
 0xb13   : > { %17161 = vmatpush3.msra.mxu0 %v21974_v49  ;;  %v10954_v13 = vand.u32 4294901760, %v10953_v5  ;;  %v10960_v54 = vsub.f32 %v22052_v43, %v22061_v45  ;;  %v22071_v11 = vand.u32 4294901760, %v22064_v46 }
 0xb14   : > { %17163 = vmatmul.mubr.f32.vlgmr.msra.gmra.mxu0 %v10366_v39  ;;  %17176 = vmatprep.subr.mxu0 %v22018_v22 }
 0xb15   : > { %17177 = vmatpush3.msra.mxu0 %v22018_v22  ;;  %17189 = vmatprep.subr.mxu1 %v10954_v13  ;;  %v10961_v49 = vand.u32 4294901760, %v10960_v54  ;;  %v10967_v25 = vsub.f32 %v22064_v46, %v22071_v11 }
 0xb16   : > { %17178 = vmatprep.subr.mxu0 %v22026_v58  ;;  %17190 = vmatpush3.msra.mxu1 %v10954_v13 }
 0xb17   : > { %17179 = vmatpush3.msra.mxu0 %v22026_v58  ;;  %17191 = vmatprep.subr.mxu1 %v10961_v49  ;;  %v10968_v10 = vand.u32 4294901760, %v10967_v25 }
 0xb18   : > { %17180 = vmatprep.subr.mxu0 %v22039_v52  ;;  %17192 = vmatpush3.msra.mxu1 %v10961_v49 }
 0xb19   : > { %17181 = vmatpush3.msra.mxu0 %v22039_v52  ;;  %17193 = vmatprep.subr.mxu1 %v10968_v10 }
 0xb1a   : > { %17182 = vmatprep.subr.mxu0 %v22054_v28  ;;  %17194 = vmatpush3.msra.mxu1 %v10968_v10 }
 0xb1b   : > { %17183 = vmatpush3.msra.mxu0 %v22054_v28  ;;  %17209 = vmatprep.subr.mxu1 %v22018_v22 }
 0xb1c   : > { %17198 = vmatprep.subr.mxu0 %v22024_v4 }
 0xbba   : > { %v17131_v33 = vpop.f32.mrf.mxu1 }
 0xbbc   : > { %v10463_v36 = vpop.f32.mrf.mxu1 }
 0xbc2   : > { %v17153_v27 = vpop.f32.mrf.mxu1 }
 0xbc3   : > { %v17120_v53 = vpop.f32.mrf.mxu0 }
 0xbc4   : > { %v10373_v42 = vadd.f32 %v17120_v53, %v13687_v41  ;;  %v10633_v26 = vpop.f32.mrf.mxu1  ;;  %v10822_v53 = vld [vmem:[%s385_s14 + $0x8] sm:$0xff] }
 0xbc5   : > { %v10362_v21 = vpop.f32.mrf.mxu0 }
 0xbc6   : > { %v10363_v61 = vadd.f32 %v13687_v41, %v10362_v21  ;;  %v10470_v14 = vadd.f32 %v17131_v33, %v10373_v42  ;;  %v10821_v21 = vld [vmem:[%s385_s14] sm:$0xff] }
 0xbc8   : > { %v10464_v60 = vadd.f32 %v10463_v36, %v10363_v61 }
 0xbcb   : > { %v17142_v48 = vpop.f32.mrf.mxu0 }
 0xbcc   : > { %v10557_v51 = vadd.f32 %v17142_v48, %v10470_v14  ;;  %v17175_v9 = vpop.f32.mrf.mxu1 }
 0xbcd   : > { %v10549_v56 = vpop.f32.mrf.mxu0 }
 0xbce   : > { %v10550_v17 = vadd.f32 %v10549_v56, %v10464_v60  ;;  %v10642_v37 = vadd.f32 %v17153_v27, %v10557_v51  ;;  %v10805_v7 = vpop.f32.mrf.mxu1 }
 0xbd0   : > { %v10634_v18 = vadd.f32 %v10633_v26, %v10550_v17 }
 0xbd4   : > { %v17164_v6 = vpop.f32.mrf.mxu0 }
 0xbd5   : > { %v10731_v20 = vadd.f32 %v17164_v6, %v10642_v37 }
 0xbd6   : > { %v10724_v2 = vpop.f32.mrf.mxu0 }
 0xbd7   : > { %v10812_v1 = vadd.f32 %v17175_v9, %v10731_v20  ;;  %v10725_v35 = vadd.f32 %v10724_v2, %v10634_v18  ;;  %v13688_v2 = vld [vmem:[%s22527_s4 + $0x178] ss:$0 sm:$0xff] }
 0xbd9   : > { %v10816_v23 = vmax.f32 %v10812_v1, 0.0  ;;  %v10806_v34 = vadd.f32 %v10805_v7, %v10725_v35 }
 0xbdb   : > { %v10827_v31 = vsel %vm2877_vm1, %v10816_v23, 0  ;;  %v10815_v40 = vmax.f32 %v10806_v34, 0.0 }
 0xbdc   : > { %v10908_v30 = vand.u32 4294901760, %v10827_v31 }
 0xbdd   : > { %v10824_v39 = vsel %vm2877_vm1, %v10815_v40, 0 }
 0xbde   : > { %v10909_v57 = vsub.f32 %v10827_v31, %v10908_v30  ;;  %v10898_v63 = vand.u32 4294901760, %v10824_v39 }
 0xbe0   : > { %v10910_v16 = vand.u32 4294901760, %v10909_v57  ;;  %v10899_v0 = vsub.f32 %v10824_v39, %v10898_v63  ;;  %17195 = vmatprep.mubr.f32.mxu1 %v10898_v63 }
 0xbe1   : > { %17196 = vmatmul.mubr.f32.vlgmr.msra.gmra.mxu1 %v10908_v30 }
 0xbe2   : > { %17210 = vmatpush3.msra.mxu1 %v22018_v22  ;;  %v10900_v50 = vand.u32 4294901760, %v10899_v0  ;;  %v10911_v59 = vsub.f32 %v10909_v57, %v10910_v16 }
 0xbe3   : > { %17211 = vmatprep.subr.mxu1 %v22026_v58 }
 0xbe4   : > { %17212 = vmatpush3.msra.mxu1 %v22026_v58  ;;  %17217 = vmatprep.mubr.f32.mxu1 %v10900_v50  ;;  %v10901_v19 = vsub.f32 %v10899_v0, %v10900_v50  ;;  %v10912_v32 = vand.u32 4294901760, %v10911_v59 }
 0xbe5   : > { %17213 = vmatprep.subr.mxu1 %v22039_v52 }
 0xbe6   : > { %17214 = vmatpush3.msra.mxu1 %v22039_v52  ;;  %v10902_v55 = vand.u32 4294901760, %v10901_v19 }
 0xbe7   : > { %17215 = vmatprep.subr.mxu1 %v22054_v28 }
 0xbe8   : > { %17216 = vmatpush3.msra.mxu1 %v22054_v28  ;;  %17184 = vmatprep.mubr.f32.mxu0 %v10902_v55 }
 0xbe9   : > { %17218 = vmatmul.mubr.f32.vlgmr.msra.gmra.mxu1 %v10910_v16  ;;  %17231 = vmatprep.subr.mxu1 %v22018_v22 }
 0xbea   : > { %17185 = vmatmul.mubr.f32.vlgmr.msra.gmra.mxu0 %v10912_v32  ;;  %17232 = vmatpush3.msra.mxu1 %v22018_v22  ;;  %v11368_v22 = vld [vmem:[%s22527_s4 + $0xd8] sm:$0xff] }
 0xbeb   : > { %17199 = vmatpush3.msra.mxu0 %v22024_v4  ;;  %17239 = vmatprep.mubr.f32.mxu1 %v10898_v63  ;;  %v22123_v4 = vand.u32 4294901760, %v11368_v22 }
 0xbec   : > { %17200 = vmatprep.subr.mxu0 %v22037_v8  ;;  %17206 = vmatprep.mubr.f32.mxu0 %v10899_v0 }
 0xbed   : > { %17233 = vmatprep.subr.mxu1 %v22026_v58  ;;  %17201 = vmatpush3.msra.mxu0 %v22037_v8 }
 0xbee   : > { %17234 = vmatpush3.msra.mxu1 %v22026_v58  ;;  %17202 = vmatprep.subr.mxu0 %v22052_v43  ;;  %v11367_v58 = vld [vmem:[%s22527_s4 + $0xd0] sm:$0xff] }
 0xbef   : > { %17235 = vmatprep.subr.mxu1 %v22039_v52  ;;  %17203 = vmatpush3.msra.mxu0 %v22052_v43  ;;  %v22136_v8 = vand.u32 4294901760, %v11367_v58 }
 0xbf0   : > { %17236 = vmatpush3.msra.mxu1 %v22039_v52  ;;  %17204 = vmatprep.subr.mxu0 %v22064_v46  ;;  %v11366_v52 = vld [vmem:[%s22527_s4 + $0xc8] sm:$0xff] }
 0xbf1   : > { %17237 = vmatprep.subr.mxu1 %v22054_v28  ;;  %17205 = vmatpush3.msra.mxu0 %v22064_v46  ;;  %v22151_v43 = vand.u32 4294901760, %v11366_v52 }
 0xbf2   : > { %17238 = vmatpush3.msra.mxu1 %v22054_v28  ;;  %17207 = vmatmul.mubr.f32.vlgmr.msra.gmra.mxu0 %v10909_v57  ;;  %v11499_v28 = vand.u32 4294901760, %v11498_v38 }
 0xbf3   : > { %17220 = vmatprep.subr.mxu0 %v22034_v15  ;;  %17240 = vmatmul.mubr.f32.vlgmr.msra.gmra.mxu1 %v10908_v30 }
 0xbf4   : > { %17221 = vmatpush3.msra.mxu0 %v22034_v15  ;;  %17228 = vmatprep.mubr.f32.mxu0 %v10898_v63  ;;  %v22134_v15 = vsub.f32 %v11368_v22, %v22123_v4 }
 0xbf5   : > { %17222 = vmatprep.subr.mxu0 %v22049_v3  ;;  %17253 = vmatprep.subr.mxu1 %v11499_v28 }
 0xbf6   : > { %17223 = vmatpush3.msra.mxu0 %v22049_v3  ;;  %v22146_v62 = vand.u32 4294901760, %v22134_v15  ;;  %v22149_v3 = vsub.f32 %v11367_v58, %v22136_v8  ;;  %17254 = vmatpush3.msra.mxu1 %v11499_v28 }
 0xbf7   : > { %17224 = vmatprep.subr.mxu0 %v22061_v45 }
 0xbf8   : > { %17225 = vmatpush3.msra.mxu0 %v22061_v45  ;;  %v11505_v12 = vsub.f32 %v22134_v15, %v22146_v62  ;;  %v22158_v5 = vand.u32 4294901760, %v22149_v3  ;;  %v22161_v45 = vsub.f32 %v11366_v52, %v22151_v43 }
 0xbf9   : > { %17226 = vmatprep.subr.mxu0 %v22071_v11 }
 0xbfa   : > { %17227 = vmatpush3.msra.mxu0 %v22071_v11  ;;  %v11506_v46 = vand.u32 4294901760, %v11505_v12  ;;  %v11512_v13 = vsub.f32 %v22149_v3, %v22158_v5  ;;  %v22168_v54 = vand.u32 4294901760, %v22161_v45 }
 0xbfb   : > { %17229 = vmatmul.mubr.f32.vlgmr.msra.gmra.mxu0 %v10908_v30  ;;  %17242 = vmatprep.subr.mxu0 %v22115_v24 }
 0xbfc   : > { %17243 = vmatpush3.msra.mxu0 %v22115_v24  ;;  %17255 = vmatprep.subr.mxu1 %v11506_v46  ;;  %v11513_v11 = vand.u32 4294901760, %v11512_v13  ;;  %v11519_v49 = vsub.f32 %v22161_v45, %v22168_v54 }
 0xbfd   : > { %17244 = vmatprep.subr.mxu0 %v22123_v4  ;;  %17256 = vmatpush3.msra.mxu1 %v11506_v46 }
 0xbfe   : > { %17245 = vmatpush3.msra.mxu0 %v22123_v4  ;;  %17257 = vmatprep.subr.mxu1 %v11513_v11  ;;  %v11520_v25 = vand.u32 4294901760, %v11519_v49 }
 0xbff   : > { %17246 = vmatprep.subr.mxu0 %v22136_v8  ;;  %17258 = vmatpush3.msra.mxu1 %v11513_v11 }
 0xc00   : > { %17247 = vmatpush3.msra.mxu0 %v22136_v8  ;;  %17259 = vmatprep.subr.mxu1 %v11520_v25 }
 0xc01   : > { %17248 = vmatprep.subr.mxu0 %v22151_v43  ;;  %17260 = vmatpush3.msra.mxu1 %v11520_v25 }
 0xc02   : > { %17249 = vmatpush3.msra.mxu0 %v22151_v43  ;;  %17275 = vmatprep.subr.mxu1 %v22115_v24 }
 0xc03   : > { %17264 = vmatprep.subr.mxu0 %v22121_v44 }
 0xca1   : > { %v17197_v41 = vpop.f32.mrf.mxu1 }
 0xca3   : > { %v11005_v36 = vpop.f32.mrf.mxu1 }
 0xca9   : > { %v17219_v27 = vpop.f32.mrf.mxu1 }
 0xcaa   : > { %v17186_v10 = vpop.f32.mrf.mxu0 }
 0xcab   : > { %v10915_v42 = vadd.f32 %v17186_v10, %v10822_v53  ;;  %v11175_v26 = vpop.f32.mrf.mxu1 }
 0xcac   : > { %v10904_v33 = vpop.f32.mrf.mxu0 }
 0xcad   : > { %v10905_v61 = vadd.f32 %v10904_v33, %v10821_v21  ;;  %v11012_v14 = vadd.f32 %v17197_v41, %v10915_v42  ;;  %v13689_v21 = vld [vmem:[%s22527_s4 + $0x180] ss:$0 sm:$0xff] }
 0xcaf   : > { %v11006_v60 = vadd.f32 %v11005_v36, %v10905_v61 }
 0xcb2   : > { %v17208_v48 = vpop.f32.mrf.mxu0 }
 0xcb3   : > { %v11099_v51 = vadd.f32 %v17208_v48, %v11012_v14  ;;  %v17241_v9 = vpop.f32.mrf.mxu1 }
 0xcb4   : > { %v11091_v56 = vpop.f32.mrf.mxu0 }
 0xcb5   : > { %v11092_v17 = vadd.f32 %v11091_v56, %v11006_v60  ;;  %v11184_v37 = vadd.f32 %v17219_v27, %v11099_v51  ;;  %v11347_v23 = vpop.f32.mrf.mxu1 }
 0xcb7   : > { %v11176_v18 = vadd.f32 %v11175_v26, %v11092_v17 }
 0xcbb   : > { %v17230_v6 = vpop.f32.mrf.mxu0 }
 0xcbc   : > { %v11273_v20 = vadd.f32 %v17230_v6, %v11184_v37 }
 0xcbd   : > { %v11266_v1 = vpop.f32.mrf.mxu0 }
 0xcbe   : > { %v11354_v35 = vadd.f32 %v17241_v9, %v11273_v20  ;;  %v11267_v7 = vadd.f32 %v11266_v1, %v11176_v18 }
 0xcc0   : > { %v11363_v34 = vadd.f32 %v13688_v2, %v11354_v35  ;;  %v11348_v31 = vadd.f32 %v11347_v23, %v11267_v7 }
 0xcc2   : > { %v11365_v40 = vmax.f32 %v11363_v34, 0.0  ;;  %v11362_v30 = vadd.f32 %v13688_v2, %v11348_v31 }
 0xcc4   : > { %v11379_v39 = vsel %vm2877_vm1, %v11365_v40, 0  ;;  %v11364_v57 = vmax.f32 %v11362_v30, 0.0 }
 0xcc5   : > { %v11460_v63 = vand.u32 4294901760, %v11379_v39 }
 0xcc6   : > { %v11376_v16 = vsel %vm2877_vm1, %v11364_v57, 0 }
 0xcc7   : > { %v11461_v0 = vsub.f32 %v11379_v39, %v11460_v63  ;;  %v11450_v50 = vand.u32 4294901760, %v11376_v16 }
 0xcc9   : > { %17261 = vmatprep.mubr.f32.mxu1 %v11450_v50  ;;  %v11451_v59 = vsub.f32 %v11376_v16, %v11450_v50  ;;  %v11462_v19 = vand.u32 4294901760, %v11461_v0 }
 0xcca   : > { %17262 = vmatmul.mubr.f32.vlgmr.msra.gmra.mxu1 %v11460_v63 }
 0xccb   : > { %17276 = vmatpush3.msra.mxu1 %v22115_v24  ;;  %v11452_v55 = vand.u32 4294901760, %v11451_v59  ;;  %v11463_v47 = vsub.f32 %v11461_v0, %v11462_v19 }
 0xccc   : > { %17277 = vmatprep.subr.mxu1 %v22123_v4 }
 0xccd   : > { %17278 = vmatpush3.msra.mxu1 %v22123_v4  ;;  %17283 = vmatprep.mubr.f32.mxu1 %v11452_v55  ;;  %v11453_v32 = vsub.f32 %v11451_v59, %v11452_v55  ;;  %v11464_v58 = vand.u32 4294901760, %v11463_v47 }
 0xcce   : > { %17279 = vmatprep.subr.mxu1 %v22136_v8 }
 0xccf   : > { %17280 = vmatpush3.msra.mxu1 %v22136_v8  ;;  %v11454_v22 = vand.u32 4294901760, %v11453_v32 }
 0xcd0   : > { %17281 = vmatprep.subr.mxu1 %v22151_v43 }
 0xcd1   : > { %17282 = vmatpush3.msra.mxu1 %v22151_v43  ;;  %17250 = vmatprep.mubr.f32.mxu0 %v11454_v22 }
 0xcd2   : > { %17284 = vmatmul.mubr.f32.vlgmr.msra.gmra.mxu1 %v11462_v19  ;;  %17297 = vmatprep.subr.mxu1 %v22115_v24 }
 0xcd3   : > { %17251 = vmatmul.mubr.f32.vlgmr.msra.gmra.mxu0 %v11464_v58  ;;  %17298 = vmatpush3.msra.mxu1 %v22115_v24  ;;  %v11914_v24 = vld [vmem:[%s22527_s4 + $0x100] sm:$0xff] }
 0xcd4   : > { %17265 = vmatpush3.msra.mxu0 %v22121_v44  ;;  %17305 = vmatprep.mubr.f32.mxu1 %v11450_v50  ;;  %v22216_v44 = vand.u32 4294901760, %v11914_v24  ;;  %v12459_v58 = vld [vmem:[%s22527_s4 + $0x120] sm:$0xff] }
 0xcd5   : > { %17266 = vmatprep.subr.mxu0 %v22134_v15  ;;  %17272 = vmatprep.mubr.f32.mxu0 %v11451_v59 }
 0xcd6   : > { %17299 = vmatprep.subr.mxu1 %v22123_v4  ;;  %17267 = vmatpush3.msra.mxu0 %v22134_v15 }
 0xcd7   : > { %17300 = vmatpush3.msra.mxu1 %v22123_v4  ;;  %17268 = vmatprep.subr.mxu0 %v22149_v3  ;;  %v11913_v4 = vld [vmem:[%s22527_s4 + $0xf8] sm:$0xff] }
 0xcd8   : > { %17301 = vmatprep.subr.mxu1 %v22136_v8  ;;  %17269 = vmatpush3.msra.mxu0 %v22149_v3  ;;  %v22224_v15 = vand.u32 4294901760, %v11913_v4  ;;  %v11911_v3 = vld [vmem:[%s22527_s4 + $0xe8] sm:$0xff] }
 0xcd9   : > { %17302 = vmatpush3.msra.mxu1 %v22136_v8  ;;  %17270 = vmatprep.subr.mxu0 %v22161_v45  ;;  %v11912_v8 = vld [vmem:[%s22527_s4 + $0xf0] sm:$0xff] }
 0xcda   : > { %17303 = vmatprep.subr.mxu1 %v22151_v43  ;;  %17271 = vmatpush3.msra.mxu0 %v22161_v45  ;;  %v22235_v38 = vsub.f32 %v11913_v4, %v22224_v15 }
 0xcdb   : > { %17304 = vmatpush3.msra.mxu1 %v22151_v43  ;;  %17273 = vmatmul.mubr.f32.vlgmr.msra.gmra.mxu0 %v11461_v0 }
 0xcdc   : > { %17286 = vmatprep.subr.mxu0 %v22131_v29  ;;  %17306 = vmatmul.mubr.f32.vlgmr.msra.gmra.mxu1 %v11460_v63  ;;  %v22247_v28 = vand.u32 4294901760, %v22235_v38 }
 0xcdd   : > { %17287 = vmatpush3.msra.mxu0 %v22131_v29  ;;  %17294 = vmatprep.mubr.f32.mxu0 %v11450_v50  ;;  %v22222_v29 = vsub.f32 %v11914_v24, %v22216_v44  ;;  %v22313_v24 = vand.u32 4294901760, %v12459_v58 }
 0xcde   : > { %17288 = vmatprep.subr.mxu0 %v22146_v62  ;;  %v12050_v46 = vsub.f32 %v22235_v38, %v22247_v28 }
 0xcdf   : > { %17289 = vmatpush3.msra.mxu0 %v22146_v62  ;;  %v22232_v52 = vand.u32 4294901760, %v22222_v29  ;;  %v22237_v62 = vand.u32 4294901760, %v11912_v8  ;;  %v22319_v4 = vsub.f32 %v12459_v58, %v22313_v24 }
 0xce0   : > { %17290 = vmatprep.subr.mxu0 %v22158_v5  ;;  %v12051_v11 = vand.u32 4294901760, %v12050_v46 }
 0xce1   : > { %17291 = vmatpush3.msra.mxu0 %v22158_v5  ;;  %v12043_v43 = vsub.f32 %v22222_v29, %v22232_v52  ;;  %v22250_v12 = vsub.f32 %v11912_v8, %v22237_v62  ;;  %v22252_v5 = vand.u32 4294901760, %v11911_v3  ;;  %v22329_v8 = vand.u32 4294901760, %v22319_v4 }
 0xce2   : > { %17292 = vmatprep.subr.mxu0 %v22168_v54 }
 0xce3   : > { %17293 = vmatpush3.msra.mxu0 %v22168_v54  ;;  %v12044_v45 = vand.u32 4294901760, %v12043_v43  ;;  %v22259_v13 = vand.u32 4294901760, %v22250_v12  ;;  %v22262_v54 = vsub.f32 %v11911_v3, %v22252_v5  ;;  %v12588_v3 = vsub.f32 %v22319_v4, %v22329_v8 }
 0xce4   : > { %17295 = vmatmul.mubr.f32.vlgmr.msra.gmra.mxu0 %v11460_v63  ;;  %17308 = vmatprep.subr.mxu0 %v22216_v44 }
 0xce5   : > { %17309 = vmatpush3.msra.mxu0 %v22216_v44  ;;  %17319 = vmatprep.subr.mxu1 %v12044_v45  ;;  %v12057_v49 = vsub.f32 %v22250_v12, %v22259_v13  ;;  %v22269_v25 = vand.u32 4294901760, %v22262_v54 }
 0xce6   : > { %17310 = vmatprep.subr.mxu0 %v22224_v15  ;;  %17320 = vmatpush3.msra.mxu1 %v12044_v45 }
 0xce7   : > { %17311 = vmatpush3.msra.mxu0 %v22224_v15  ;;  %17321 = vmatprep.subr.mxu1 %v12051_v11  ;;  %v12058_v10 = vand.u32 4294901760, %v12057_v49  ;;  %v12064_v53 = vsub.f32 %v22262_v54, %v22269_v25 }
 0xce8   : > { %17312 = vmatprep.subr.mxu0 %v22237_v62  ;;  %17322 = vmatpush3.msra.mxu1 %v12051_v11 }
 0xce9   : > { %17313 = vmatpush3.msra.mxu0 %v22237_v62  ;;  %17323 = vmatprep.subr.mxu1 %v12058_v10  ;;  %v12065_v41 = vand.u32 4294901760, %v12064_v53 }
 0xcea   : > { %17314 = vmatprep.subr.mxu0 %v22252_v5  ;;  %17324 = vmatpush3.msra.mxu1 %v12058_v10 }
 0xceb   : > { %17315 = vmatpush3.msra.mxu0 %v22252_v5  ;;  %17325 = vmatprep.subr.mxu1 %v12065_v41 }
 0xcec   : > { %17330 = vmatprep.subr.mxu0 %v22222_v29  ;;  %17326 = vmatpush3.msra.mxu1 %v12065_v41 }
 0xced   : > { %17341 = vmatprep.subr.mxu1 %v22216_v44 }
 0xd8a   : > { %v17263_v42 = vpop.f32.mrf.mxu1 }
 0xd8c   : > { %v11557_v27 = vpop.f32.mrf.mxu1 }
 0xd92   : > { %v17285_v51 = vpop.f32.mrf.mxu1 }
 0xd93   : > { %v17252_v33 = vpop.f32.mrf.mxu0 }
 0xd94   : > { %v11467_v48 = vadd.f32 %v17252_v33, %v13689_v21  ;;  %v11727_v9 = vpop.f32.mrf.mxu1  ;;  %v13690_v33 = vld [vmem:[%s22527_s4 + $0x188] ss:$0 sm:$0xff] }
 0xd95   : > { %v11456_v61 = vpop.f32.mrf.mxu0 }
 0xd96   : > { %v11457_v36 = vadd.f32 %v13689_v21, %v11456_v61  ;;  %v11564_v56 = vadd.f32 %v17263_v42, %v11467_v48 }
 0xd98   : > { %v11558_v26 = vadd.f32 %v11557_v27, %v11457_v36 }
 0xd9b   : > { %v17274_v14 = vpop.f32.mrf.mxu0 }
 0xd9c   : > { %v11651_v17 = vadd.f32 %v17274_v14, %v11564_v56  ;;  %v17307_v20 = vpop.f32.mrf.mxu1 }
 0xd9d   : > { %v11643_v60 = vpop.f32.mrf.mxu0 }
 0xd9e   : > { %v11644_v37 = vadd.f32 %v11643_v60, %v11558_v26  ;;  %v11736_v6 = vadd.f32 %v17285_v51, %v11651_v17  ;;  %v11899_v34 = vpop.f32.mrf.mxu1 }
 0xda0   : > { %v11728_v1 = vadd.f32 %v11727_v9, %v11644_v37 }
 0xda4   : > { %v17296_v18 = vpop.f32.mrf.mxu0 }
 0xda5   : > { %v11825_v2 = vadd.f32 %v17296_v18, %v11736_v6 }
 0xda6   : > { %v11818_v35 = vpop.f32.mrf.mxu0 }
 0xda7   : > { %v11906_v7 = vadd.f32 %v17307_v20, %v11825_v2  ;;  %v11819_v23 = vadd.f32 %v11818_v35, %v11728_v1 }
 0xda9   : > { %v11910_v31 = vmax.f32 %v11906_v7, 0.0  ;;  %v11900_v40 = vadd.f32 %v11899_v34, %v11819_v23 }
 0xdab   : > { %v11924_v30 = vsel %vm2877_vm1, %v11910_v31, 0  ;;  %v11909_v39 = vmax.f32 %v11900_v40, 0.0 }
 0xdac   : > { %v12005_v57 = vand.u32 4294901760, %v11924_v30 }
 0xdad   : > { %v11921_v63 = vsel %vm2877_vm1, %v11909_v39, 0 }
 0xdae   : > { %v12006_v16 = vsub.f32 %v11924_v30, %v12005_v57  ;;  %v11995_v0 = vand.u32 4294901760, %v11921_v63 }
 0xdb0   : > { %v12007_v50 = vand.u32 4294901760, %v12006_v16  ;;  %v11996_v59 = vsub.f32 %v11921_v63, %v11995_v0  ;;  %17327 = vmatprep.mubr.f32.mxu1 %v11995_v0 }
 0xdb1   : > { %17328 = vmatmul.mubr.f32.vlgmr.msra.gmra.mxu1 %v12005_v57 }
 0xdb2   : > { %17342 = vmatpush3.msra.mxu1 %v22216_v44  ;;  %v11997_v19 = vand.u32 4294901760, %v11996_v59  ;;  %v12008_v55 = vsub.f32 %v12006_v16, %v12007_v50 }
 0xdb3   : > { %17343 = vmatprep.subr.mxu1 %v22224_v15 }
 0xdb4   : > { %17344 = vmatpush3.msra.mxu1 %v22224_v15  ;;  %17349 = vmatprep.mubr.f32.mxu1 %v11997_v19  ;;  %v11998_v32 = vsub.f32 %v11996_v59, %v11997_v19  ;;  %v12009_v22 = vand.u32 4294901760, %v12008_v55 }
 0xdb5   : > { %17345 = vmatprep.subr.mxu1 %v22237_v62 }
 0xdb6   : > { %17346 = vmatpush3.msra.mxu1 %v22237_v62  ;;  %v11999_v47 = vand.u32 4294901760, %v11998_v32 }
 0xdb7   : > { %17347 = vmatprep.subr.mxu1 %v22252_v5 }
 0xdb8   : > { %17348 = vmatpush3.msra.mxu1 %v22252_v5  ;;  %17316 = vmatprep.mubr.f32.mxu0 %v11999_v47 }
 0xdb9   : > { %17350 = vmatmul.mubr.f32.vlgmr.msra.gmra.mxu1 %v12007_v50  ;;  %17363 = vmatprep.subr.mxu1 %v22216_v44 }
 0xdba   : > { %17317 = vmatmul.mubr.f32.vlgmr.msra.gmra.mxu0 %v12009_v22  ;;  %17364 = vmatpush3.msra.mxu1 %v22216_v44  ;;  %v12458_v44 = vld [vmem:[%s22527_s4 + $0x118] sm:$0xff]  ;;  %v13004_v22 = vld [vmem:[%s22527_s4 + $0x140] sm:$0xff] }
 0xdbb   : > { %17331 = vmatpush3.msra.mxu0 %v22222_v29  ;;  %17371 = vmatprep.mubr.f32.mxu1 %v11995_v0  ;;  %v22321_v29 = vand.u32 4294901760, %v12458_v44  ;;  %v22410_v58 = vand.u32 4294901760, %v13004_v22 }
 0xdbc   : > { %17332 = vmatprep.subr.mxu0 %v22235_v38  ;;  %17338 = vmatprep.mubr.f32.mxu0 %v11996_v59 }
 0xdbd   : > { %17365 = vmatprep.subr.mxu1 %v22224_v15  ;;  %17333 = vmatpush3.msra.mxu0 %v22235_v38 }
 0xdbe   : > { %17366 = vmatpush3.msra.mxu1 %v22224_v15  ;;  %17334 = vmatprep.subr.mxu0 %v22250_v12  ;;  %v12457_v15 = vld [vmem:[%s22527_s4 + $0x110] sm:$0xff] }
 0xdbf   : > { %17367 = vmatprep.subr.mxu1 %v22237_v62  ;;  %17335 = vmatpush3.msra.mxu0 %v22250_v12  ;;  %v22334_v38 = vand.u32 4294901760, %v12457_v15 }
 0xdc0   : > { %17368 = vmatpush3.msra.mxu1 %v22237_v62  ;;  %17336 = vmatprep.subr.mxu0 %v22262_v54  ;;  %v12456_v62 = vld [vmem:[%s22527_s4 + $0x108] sm:$0xff] }
 0xdc1   : > { %17369 = vmatprep.subr.mxu1 %v22252_v5  ;;  %17337 = vmatpush3.msra.mxu0 %v22262_v54  ;;  %v22349_v12 = vand.u32 4294901760, %v12456_v62 }
 0xdc2   : > { %17370 = vmatpush3.msra.mxu1 %v22252_v5  ;;  %17339 = vmatmul.mubr.f32.vlgmr.msra.gmra.mxu0 %v12006_v16  ;;  %v12589_v5 = vand.u32 4294901760, %v12588_v3 }
 0xdc3   : > { %17352 = vmatprep.subr.mxu0 %v22232_v52  ;;  %17372 = vmatmul.mubr.f32.vlgmr.msra.gmra.mxu1 %v12005_v57 }
 0xdc4   : > { %17353 = vmatpush3.msra.mxu0 %v22232_v52  ;;  %17360 = vmatprep.mubr.f32.mxu0 %v11995_v0  ;;  %v22332_v52 = vsub.f32 %v12458_v44, %v22321_v29  ;;  %v22416_v44 = vsub.f32 %v13004_v22, %v22410_v58  ;;  %v13692_v22 = vld [vmem:[%s22527_s4 + $0x198] ss:$0 sm:$0xff] }
 0xdc5   : > { %17354 = vmatprep.subr.mxu0 %v22247_v28  ;;  %17385 = vmatprep.subr.mxu1 %v12589_v5 }
 0xdc6   : > { %17355 = vmatpush3.msra.mxu0 %v22247_v28  ;;  %v22344_v43 = vand.u32 4294901760, %v22332_v52  ;;  %v22347_v28 = vsub.f32 %v12457_v15, %v22334_v38  ;;  %17386 = vmatpush3.msra.mxu1 %v12589_v5  ;;  %v22426_v15 = vand.u32 4294901760, %v22416_v44 }
 0xdc7   : > { %17356 = vmatprep.subr.mxu0 %v22259_v13 }
 0xdc8   : > { %17357 = vmatpush3.msra.mxu0 %v22259_v13  ;;  %v12595_v45 = vsub.f32 %v22332_v52, %v22344_v43  ;;  %v22356_v46 = vand.u32 4294901760, %v22347_v28  ;;  %v22359_v13 = vsub.f32 %v12456_v62, %v22349_v12  ;;  %v13133_v62 = vsub.f32 %v22416_v44, %v22426_v15 }
 0xdc9   : > { %17358 = vmatprep.subr.mxu0 %v22269_v25 }
 0xdca   : > { %17359 = vmatpush3.msra.mxu0 %v22269_v25  ;;  %v12596_v54 = vand.u32 4294901760, %v12595_v45  ;;  %v12602_v11 = vsub.f32 %v22347_v28, %v22356_v46  ;;  %v22366_v49 = vand.u32 4294901760, %v22359_v13 }
 0xdcb   : > { %17361 = vmatmul.mubr.f32.vlgmr.msra.gmra.mxu0 %v12005_v57  ;;  %17374 = vmatprep.subr.mxu0 %v22313_v24 }
 0xdcc   : > { %17375 = vmatpush3.msra.mxu0 %v22313_v24  ;;  %17387 = vmatprep.subr.mxu1 %v12596_v54  ;;  %v12603_v25 = vand.u32 4294901760, %v12602_v11  ;;  %v12609_v10 = vsub.f32 %v22359_v13, %v22366_v49 }
 0xdcd   : > { %17376 = vmatprep.subr.mxu0 %v22321_v29  ;;  %17388 = vmatpush3.msra.mxu1 %v12596_v54 }
 0xdce   : > { %17377 = vmatpush3.msra.mxu0 %v22321_v29  ;;  %17389 = vmatprep.subr.mxu1 %v12603_v25  ;;  %v12610_v53 = vand.u32 4294901760, %v12609_v10 }
 0xdcf   : > { %17378 = vmatprep.subr.mxu0 %v22334_v38  ;;  %17390 = vmatpush3.msra.mxu1 %v12603_v25 }
 0xdd0   : > { %17379 = vmatpush3.msra.mxu0 %v22334_v38  ;;  %17391 = vmatprep.subr.mxu1 %v12610_v53 }
 0xdd1   : > { %17380 = vmatprep.subr.mxu0 %v22349_v12  ;;  %17392 = vmatpush3.msra.mxu1 %v12610_v53 }
 0xdd2   : > { %17381 = vmatpush3.msra.mxu0 %v22349_v12  ;;  %17407 = vmatprep.subr.mxu1 %v22313_v24 }
 0xdd3   : > { %17396 = vmatprep.subr.mxu0 %v22319_v4 }
 0xe71   : > { %v17329_v21 = vpop.f32.mrf.mxu1 }
 0xe73   : > { %v12102_v14 = vpop.f32.mrf.mxu1 }
 0xe79   : > { %v17351_v56 = vpop.f32.mrf.mxu1 }
 0xe7a   : > { %v17318_v41 = vpop.f32.mrf.mxu0 }
 0xe7b   : > { %v12012_v61 = vadd.f32 %v17318_v41, %v13690_v33  ;;  %v12272_v37 = vpop.f32.mrf.mxu1  ;;  %v13691_v41 = vld [vmem:[%s22527_s4 + $0x190] ss:$0 sm:$0xff] }
 0xe7c   : > { %v12001_v42 = vpop.f32.mrf.mxu0 }
 0xe7d   : > { %v12002_v48 = vadd.f32 %v13690_v33, %v12001_v42  ;;  %v12109_v27 = vadd.f32 %v17329_v21, %v12012_v61 }
 0xe7f   : > { %v12103_v17 = vadd.f32 %v12102_v14, %v12002_v48 }
 0xe82   : > { %v17340_v36 = vpop.f32.mrf.mxu0 }
 0xe83   : > { %v12196_v60 = vadd.f32 %v17340_v36, %v12109_v27  ;;  %v17373_v6 = vpop.f32.mrf.mxu1 }
 0xe84   : > { %v12188_v51 = vpop.f32.mrf.mxu0 }
 0xe85   : > { %v12189_v26 = vadd.f32 %v12188_v51, %v12103_v17  ;;  %v12281_v9 = vadd.f32 %v17351_v56, %v12196_v60  ;;  %v12444_v23 = vpop.f32.mrf.mxu1 }
 0xe87   : > { %v12273_v2 = vadd.f32 %v12272_v37, %v12189_v26 }
 0xe8b   : > { %v17362_v20 = vpop.f32.mrf.mxu0 }
 0xe8c   : > { %v12370_v18 = vadd.f32 %v17362_v20, %v12281_v9 }
 0xe8d   : > { %v12363_v1 = vpop.f32.mrf.mxu0 }
 0xe8e   : > { %v12451_v35 = vadd.f32 %v17373_v6, %v12370_v18  ;;  %v12364_v7 = vadd.f32 %v12363_v1, %v12273_v2 }
 0xe90   : > { %v12455_v34 = vmax.f32 %v12451_v35, 0.0  ;;  %v12445_v31 = vadd.f32 %v12444_v23, %v12364_v7 }
 0xe92   : > { %v12469_v40 = vsel %vm2877_vm1, %v12455_v34, 0  ;;  %v12454_v30 = vmax.f32 %v12445_v31, 0.0 }
 0xe93   : > { %v12550_v39 = vand.u32 4294901760, %v12469_v40 }
 0xe94   : > { %v12466_v57 = vsel %vm2877_vm1, %v12454_v30, 0 }
 0xe95   : > { %v12551_v63 = vsub.f32 %v12469_v40, %v12550_v39  ;;  %v12540_v16 = vand.u32 4294901760, %v12466_v57 }
 0xe97   : > { %v12552_v0 = vand.u32 4294901760, %v12551_v63  ;;  %v12541_v50 = vsub.f32 %v12466_v57, %v12540_v16  ;;  %17393 = vmatprep.mubr.f32.mxu1 %v12540_v16 }
 0xe98   : > { %17394 = vmatmul.mubr.f32.vlgmr.msra.gmra.mxu1 %v12550_v39 }
 0xe99   : > { %17408 = vmatpush3.msra.mxu1 %v22313_v24  ;;  %v12542_v59 = vand.u32 4294901760, %v12541_v50  ;;  %v12553_v19 = vsub.f32 %v12551_v63, %v12552_v0 }
 0xe9a   : > { %17409 = vmatprep.subr.mxu1 %v22321_v29 }
 0xe9b   : > { %17410 = vmatpush3.msra.mxu1 %v22321_v29  ;;  %17415 = vmatprep.mubr.f32.mxu1 %v12542_v59  ;;  %v12543_v55 = vsub.f32 %v12541_v50, %v12542_v59  ;;  %v12554_v47 = vand.u32 4294901760, %v12553_v19 }
 0xe9c   : > { %17411 = vmatprep.subr.mxu1 %v22334_v38 }
 0xe9d   : > { %17412 = vmatpush3.msra.mxu1 %v22334_v38  ;;  %v12544_v32 = vand.u32 4294901760, %v12543_v55 }
 0xe9e   : > { %17413 = vmatprep.subr.mxu1 %v22349_v12 }
 0xe9f   : > { %17414 = vmatpush3.msra.mxu1 %v22349_v12  ;;  %17382 = vmatprep.mubr.f32.mxu0 %v12544_v32 }
 0xea0   : > { %17416 = vmatmul.mubr.f32.vlgmr.msra.gmra.mxu1 %v12552_v0  ;;  %17429 = vmatprep.subr.mxu1 %v22313_v24 }
 0xea1   : > { %17383 = vmatmul.mubr.f32.vlgmr.msra.gmra.mxu0 %v12554_v47  ;;  %17430 = vmatpush3.msra.mxu1 %v22313_v24  ;;  %v13003_v24 = vld [vmem:[%s22527_s4 + $0x138] sm:$0xff] }
 0xea2   : > { %17397 = vmatpush3.msra.mxu0 %v22319_v4  ;;  %17437 = vmatprep.mubr.f32.mxu1 %v12540_v16  ;;  %v22418_v4 = vand.u32 4294901760, %v13003_v24 }
 0xea3   : > { %17398 = vmatprep.subr.mxu0 %v22332_v52  ;;  %17404 = vmatprep.mubr.f32.mxu0 %v12541_v50 }
 0xea4   : > { %17431 = vmatprep.subr.mxu1 %v22321_v29  ;;  %17399 = vmatpush3.msra.mxu0 %v22332_v52 }
 0xea5   : > { %17432 = vmatpush3.msra.mxu1 %v22321_v29  ;;  %17400 = vmatprep.subr.mxu0 %v22347_v28  ;;  %v13002_v29 = vld [vmem:[%s22527_s4 + $0x130] sm:$0xff] }
 0xea6   : > { %17433 = vmatprep.subr.mxu1 %v22334_v38  ;;  %17401 = vmatpush3.msra.mxu0 %v22347_v28  ;;  %v22431_v52 = vand.u32 4294901760, %v13002_v29 }
 0xea7   : > { %17434 = vmatpush3.msra.mxu1 %v22334_v38  ;;  %17402 = vmatprep.subr.mxu0 %v22359_v13  ;;  %v13001_v38 = vld [vmem:[%s22527_s4 + $0x128] sm:$0xff] }
 0xea8   : > { %17435 = vmatprep.subr.mxu1 %v22349_v12  ;;  %17403 = vmatpush3.msra.mxu0 %v22359_v13  ;;  %v22446_v28 = vand.u32 4294901760, %v13001_v38 }
 0xea9   : > { %17436 = vmatpush3.msra.mxu1 %v22349_v12  ;;  %17405 = vmatmul.mubr.f32.vlgmr.msra.gmra.mxu0 %v12551_v63  ;;  %v13134_v12 = vand.u32 4294901760, %v13133_v62 }
 0xeaa   : > { %17418 = vmatprep.subr.mxu0 %v22329_v8  ;;  %17438 = vmatmul.mubr.f32.vlgmr.msra.gmra.mxu1 %v12550_v39 }
 0xeab   : > { %17419 = vmatpush3.msra.mxu0 %v22329_v8  ;;  %17426 = vmatprep.mubr.f32.mxu0 %v12540_v16  ;;  %v22429_v8 = vsub.f32 %v13003_v24, %v22418_v4 }
 0xeac   : > { %17420 = vmatprep.subr.mxu0 %v22344_v43  ;;  %17451 = vmatprep.subr.mxu1 %v13134_v12 }
 0xead   : > { %17421 = vmatpush3.msra.mxu0 %v22344_v43  ;;  %v22441_v3 = vand.u32 4294901760, %v22429_v8  ;;  %v22444_v43 = vsub.f32 %v13002_v29, %v22431_v52  ;;  %17452 = vmatpush3.msra.mxu1 %v13134_v12 }
 0xeae   : > { %17422 = vmatprep.subr.mxu0 %v22356_v46 }
 0xeaf   : > { %17423 = vmatpush3.msra.mxu0 %v22356_v46  ;;  %v13140_v5 = vsub.f32 %v22429_v8, %v22441_v3  ;;  %v22453_v45 = vand.u32 4294901760, %v22444_v43  ;;  %v22456_v46 = vsub.f32 %v13001_v38, %v22446_v28 }
 0xeb0   : > { %17424 = vmatprep.subr.mxu0 %v22366_v49 }
 0xeb1   : > { %17425 = vmatpush3.msra.mxu0 %v22366_v49  ;;  %v13141_v13 = vand.u32 4294901760, %v13140_v5  ;;  %v13147_v54 = vsub.f32 %v22444_v43, %v22453_v45  ;;  %v22463_v11 = vand.u32 4294901760, %v22456_v46 }
 0xeb2   : > { %17427 = vmatmul.mubr.f32.vlgmr.msra.gmra.mxu0 %v12550_v39  ;;  %17440 = vmatprep.subr.mxu0 %v22410_v58 }
 0xeb3   : > { %17441 = vmatpush3.msra.mxu0 %v22410_v58  ;;  %17453 = vmatprep.subr.mxu1 %v13141_v13  ;;  %v13148_v49 = vand.u32 4294901760, %v13147_v54  ;;  %v13154_v25 = vsub.f32 %v22456_v46, %v22463_v11 }
 0xeb4   : > { %17442 = vmatprep.subr.mxu0 %v22418_v4  ;;  %17454 = vmatpush3.msra.mxu1 %v13141_v13 }
 0xeb5   : > { %17443 = vmatpush3.msra.mxu0 %v22418_v4  ;;  %17455 = vmatprep.subr.mxu1 %v13148_v49  ;;  %v13155_v10 = vand.u32 4294901760, %v13154_v25 }
 0xeb6   : > { %17444 = vmatprep.subr.mxu0 %v22431_v52  ;;  %17456 = vmatpush3.msra.mxu1 %v13148_v49 }
 0xeb7   : > { %17445 = vmatpush3.msra.mxu0 %v22431_v52  ;;  %17457 = vmatprep.subr.mxu1 %v13155_v10 }
 0xeb8   : > { %17446 = vmatprep.subr.mxu0 %v22446_v28  ;;  %17458 = vmatpush3.msra.mxu1 %v13155_v10 }
 0xeb9   : > { %17447 = vmatpush3.msra.mxu0 %v22446_v28  ;;  %17473 = vmatprep.subr.mxu1 %v22410_v58 }
 0xeba   : > { %17462 = vmatprep.subr.mxu0 %v22416_v44 }
 0xf58   : > { %v17395_v33 = vpop.f32.mrf.mxu1 }
 0xf5a   : > { %v12647_v36 = vpop.f32.mrf.mxu1 }
 0xf60   : > { %v17417_v27 = vpop.f32.mrf.mxu1 }
 0xf61   : > { %v17384_v53 = vpop.f32.mrf.mxu0 }
 0xf62   : > { %v12557_v42 = vadd.f32 %v17384_v53, %v13691_v41  ;;  %v12817_v26 = vpop.f32.mrf.mxu1 }
 0xf63   : > { %v12546_v21 = vpop.f32.mrf.mxu0 }
 0xf64   : > { %v12547_v61 = vadd.f32 %v13691_v41, %v12546_v21  ;;  %v12654_v14 = vadd.f32 %v17395_v33, %v12557_v42 }
 0xf66   : > { %v12648_v60 = vadd.f32 %v12647_v36, %v12547_v61 }
 0xf69   : > { %v17406_v48 = vpop.f32.mrf.mxu0 }
 0xf6a   : > { %v12741_v51 = vadd.f32 %v17406_v48, %v12654_v14  ;;  %v17439_v9 = vpop.f32.mrf.mxu1 }
 0xf6b   : > { %v12733_v56 = vpop.f32.mrf.mxu0 }
 0xf6c   : > { %v12734_v17 = vadd.f32 %v12733_v56, %v12648_v60  ;;  %v12826_v37 = vadd.f32 %v17417_v27, %v12741_v51  ;;  %v12989_v7 = vpop.f32.mrf.mxu1 }
 0xf6e   : > { %v12818_v18 = vadd.f32 %v12817_v26, %v12734_v17 }
 0xf72   : > { %v17428_v6 = vpop.f32.mrf.mxu0 }
 0xf73   : > { %v12915_v20 = vadd.f32 %v17428_v6, %v12826_v37 }
 0xf74   : > { %v12908_v2 = vpop.f32.mrf.mxu0 }
 0xf75   : > { %v12996_v1 = vadd.f32 %v17439_v9, %v12915_v20  ;;  %v12909_v35 = vadd.f32 %v12908_v2, %v12818_v18 }
 0xf77   : > { %v13000_v23 = vmax.f32 %v12996_v1, 0.0  ;;  %v12990_v34 = vadd.f32 %v12989_v7, %v12909_v35 }
 0xf79   : > { %v13014_v31 = vsel %vm2877_vm1, %v13000_v23, 0  ;;  %v12999_v40 = vmax.f32 %v12990_v34, 0.0 }
 0xf7a   : > { %v13095_v30 = vand.u32 4294901760, %v13014_v31 }
 0xf7b   : > { %v13011_v39 = vsel %vm2877_vm1, %v12999_v40, 0 }
 0xf7c   : > { %v13096_v57 = vsub.f32 %v13014_v31, %v13095_v30  ;;  %v13085_v63 = vand.u32 4294901760, %v13011_v39 }
 0xf7e   : > { %v13097_v16 = vand.u32 4294901760, %v13096_v57  ;;  %v13086_v0 = vsub.f32 %v13011_v39, %v13085_v63  ;;  %17459 = vmatprep.mubr.f32.mxu1 %v13085_v63 }
 0xf7f   : > { %17460 = vmatmul.mubr.f32.vlgmr.msra.gmra.mxu1 %v13095_v30 }
 0xf80   : > { %17474 = vmatpush3.msra.mxu1 %v22410_v58  ;;  %v13087_v50 = vand.u32 4294901760, %v13086_v0  ;;  %v13098_v59 = vsub.f32 %v13096_v57, %v13097_v16 }
 0xf81   : > { %17475 = vmatprep.subr.mxu1 %v22418_v4 }
 0xf82   : > { %17476 = vmatpush3.msra.mxu1 %v22418_v4  ;;  %17481 = vmatprep.mubr.f32.mxu1 %v13087_v50  ;;  %v13088_v19 = vsub.f32 %v13086_v0, %v13087_v50  ;;  %v13099_v32 = vand.u32 4294901760, %v13098_v59 }
 0xf83   : > { %17477 = vmatprep.subr.mxu1 %v22431_v52 }
 0xf84   : > { %17478 = vmatpush3.msra.mxu1 %v22431_v52  ;;  %v13089_v55 = vand.u32 4294901760, %v13088_v19 }
 0xf85   : > { %17479 = vmatprep.subr.mxu1 %v22446_v28 }
 0xf86   : > { %17480 = vmatpush3.msra.mxu1 %v22446_v28  ;;  %17448 = vmatprep.mubr.f32.mxu0 %v13089_v55 }
 0xf87   : > { %17482 = vmatmul.mubr.f32.vlgmr.msra.gmra.mxu1 %v13097_v16  ;;  %17495 = vmatprep.subr.mxu1 %v22410_v58 }
 0xf88   : > { %17449 = vmatmul.mubr.f32.vlgmr.msra.gmra.mxu0 %v13099_v32  ;;  %17496 = vmatpush3.msra.mxu1 %v22410_v58 }
 0xf89   : > { %17463 = vmatpush3.msra.mxu0 %v22416_v44  ;;  %17503 = vmatprep.mubr.f32.mxu1 %v13085_v63 }
 0xf8a   : > { %17464 = vmatprep.subr.mxu0 %v22429_v8  ;;  %17470 = vmatprep.mubr.f32.mxu0 %v13086_v0 }
 0xf8b   : > { %17497 = vmatprep.subr.mxu1 %v22418_v4  ;;  %17465 = vmatpush3.msra.mxu0 %v22429_v8 }
 0xf8c   : > { %17498 = vmatpush3.msra.mxu1 %v22418_v4  ;;  %17466 = vmatprep.subr.mxu0 %v22444_v43 }
 0xf8d   : > { %17499 = vmatprep.subr.mxu1 %v22431_v52  ;;  %17467 = vmatpush3.msra.mxu0 %v22444_v43 }
 0xf8e   : > { %17500 = vmatpush3.msra.mxu1 %v22431_v52  ;;  %17468 = vmatprep.subr.mxu0 %v22456_v46 }
 0xf8f   : > { %17501 = vmatprep.subr.mxu1 %v22446_v28  ;;  %17469 = vmatpush3.msra.mxu0 %v22456_v46 }
 0xf90   : > { %17502 = vmatpush3.msra.mxu1 %v22446_v28  ;;  %17471 = vmatmul.mubr.f32.vlgmr.msra.gmra.mxu0 %v13096_v57 }
 0xf91   : > { %17484 = vmatprep.subr.mxu0 %v22426_v15  ;;  %17504 = vmatmul.mubr.f32.vlgmr.msra.gmra.mxu1 %v13095_v30 }
 0xf92   : > { %17485 = vmatpush3.msra.mxu0 %v22426_v15  ;;  %17492 = vmatprep.mubr.f32.mxu0 %v13085_v63 }
 0xf93   : > { %17486 = vmatprep.subr.mxu0 %v22441_v3 }
 0xf94   : > { %17487 = vmatpush3.msra.mxu0 %v22441_v3 }
 0xf95   : > { %17488 = vmatprep.subr.mxu0 %v22453_v45 }
 0xf96   : > { %17489 = vmatpush3.msra.mxu0 %v22453_v45 }
 0xf97   : > { %17490 = vmatprep.subr.mxu0 %v22463_v11 }
 0xf98   : > { %17491 = vmatpush3.msra.mxu0 %v22463_v11 }
 0xf99   : > { %17493 = vmatmul.mubr.f32.vlgmr.msra.gmra.mxu0 %v13095_v30 }
0x103f   : > { %v17461_v58 = vpop.f32.mrf.mxu1 }
0x1041   : > { %v13192_v15 = vpop.f32.mrf.mxu1 }
0x1047   : > { %v17483_v52 = vpop.f32.mrf.mxu1 }
0x1048   : > { %v17450_v47 = vpop.f32.mrf.mxu0 }
0x1049   : > { %v13102_v44 = vadd.f32 %v17450_v47, %v13692_v22  ;;  %v13362_v28 = vpop.f32.mrf.mxu1 }
0x104a   : > { %v13091_v24 = vpop.f32.mrf.mxu0 }
0x104b   : > { %v13092_v4 = vadd.f32 %v13692_v22, %v13091_v24  ;;  %v13199_v8 = vadd.f32 %v17461_v58, %v13102_v44 }
0x104d   : > { %v13193_v3 = vadd.f32 %v13192_v15, %v13092_v4 }
0x1050   : > { %v17472_v29 = vpop.f32.mrf.mxu0 }
0x1051   : > { %v13286_v62 = vadd.f32 %v17472_v29, %v13199_v8  ;;  %v17505_v5 = vpop.f32.mrf.mxu1 }
0x1052   : > { %v13278_v38 = vpop.f32.mrf.mxu0 }
0x1053   : > { %v13279_v43 = vadd.f32 %v13278_v38, %v13193_v3  ;;  %v13371_v12 = vadd.f32 %v17483_v52, %v13286_v62  ;;  %v13534_v25 = vpop.f32.mrf.mxu1 }
0x1055   : > { %v13363_v13 = vadd.f32 %v13362_v28, %v13279_v43 }
0x1059   : > { %v17494_v45 = vpop.f32.mrf.mxu0 }
0x105a   : > { %v13460_v46 = vadd.f32 %v17494_v45, %v13371_v12 }
0x105b   : > { %v13453_v54 = vpop.f32.mrf.mxu0 }
0x105c   : > { %v13541_v11 = vadd.f32 %v17505_v5, %v13460_v46  ;;  %v13454_v49 = vadd.f32 %v13453_v54, %v13363_v13 }
0x105e   : > { %v13545_v10 = vand.u32 2147483647, %v13541_v11  ;;  %v13535_v53 = vadd.f32 %v13534_v25, %v13454_v49  ;;  %vm13557_vm3 = vcmp.ge.f32.partialorder %v13541_v11, 0.0 }
0x1060   : > { %v13547_v41 = vsub.f32 0.0, %v13545_v10  ;;  %v13544_v33 = vand.u32 2147483647, %v13535_v53  ;;  %vm13556_vm2 = vcmp.ge.f32.partialorder %v13535_v53, 0.0 }
0x1062   : > { %v13550_v21 = vmul.f32 1.442695, %v13547_v41  ;;  %v13546_v42 = vsub.f32 0.0, %v13544_v33 }
0x1064   : > { %17530 = vpow2.f32 %v13550_v21  ;;  %v13548_v61 = vmul.f32 1.442695, %v13546_v42 }
0x1066   : > { %17532 = vpow2.f32 %v13548_v61 }
0x1071   : > { %v17531_v48 = vpop.eup %17530 }
0x1072   : > { %v13553_v36 = vadd.f32 1.0, %v17531_v48 }
0x1073   : > { %v17533_v14 = vpop.eup %17532 }
0x1074   : > { %17534 = vrcp.f32 %v13553_v36  ;;  %v13552_v27 = vadd.f32 1.0, %v17533_v14 }
0x1076   : > { %17536 = vrcp.f32 %v13552_v27 }
0x1081   : > { %v17535_v56 = vpop.eup %17534 }
0x1082   : > { %v13559_v60 = vsub.f32 1.0, %v17535_v56 }
0x1083   : > { %v17537_v51 = vpop.eup %17536 }
0x1084   : > { %v13558_v17 = vsub.f32 1.0, %v17537_v51  ;;  %v13561_v37 = vsel %vm13557_vm3, %v17535_v56, %v13559_v60 }
0x1085   : > { %13563 = vst.msk [vmem:[%s391_s8 + $0x8] sm:$0xff] %vm2877_vm1, %v13561_v37 }
0x1086   : > { %v13560_v26 = vsel %vm13556_vm2, %v17537_v51, %v13558_v17 }
0x1087   : > { %13562 = vst.msk [vmem:[%s391_s8] sm:$0xff] %vm2877_vm1, %v13560_v26 }
0x1088 PF: > { %p12_p10 = scmp.ge.s32.totalorder %s17609_s22, 4   ;;  %s23320_s18 = smov %s17556_s19 }
0x1089   : > { %s23321_s19 = smov %s17618_s26  ;;  %s23322_s20 = smov %s17609_s22 }
0x108a   :  { %14 = sbr.rel (!%p12_p10) target bundleno = 2 (0x2), region = 122 }

</bundles_post_ra>
